<compile_context>
chip_gen: v7x
topology: tpu7x:2x2x1
jax: 0.10.0
libtpu: 0.0.40
codegen_flags: <defaults>
</compile_context>

<pallas_src>
import jax
import jax.numpy as jnp
from jax import lax
from jax.experimental import pallas as pl
from jax.experimental.pallas import tpu as pltpu

# ----------------------------- config (small, synthetic) -----------------------------
BATCH_SIZE = 2
NUM_STEPS = 8
VOCAB_SIZE = 32
EMB_SIZE = 16        # args.hidden_size
F_SIZE = 32          # args.cell_size   (fast cell hidden size)
S_SIZE = 16          # args.hyper_size  (slow cell hidden size)
FAST_LAYERS = 2      # args.fast_layers
ZONEOUT_H = 0.9      # args.zoneout_h  (keep probability for h)
ZONEOUT_C = 0.5      # args.zoneout_c  (keep probability for c)
KEEP_PROB = 1.0      # args.keep_prob  (inference: dropout is identity)
F_BIAS = 1.0         # folded into the forget-gate LN bias at init time
LN_EPS = 1e-3

B_PAD = 8            # pad batch to fill all 8 sublanes of a vreg
V_PAD = 128          # pad vocab so logits stores are lane-dense

_VMEM = pl.BlockSpec(memory_space=pltpu.MemorySpace.VMEM)


# ----------------------------- fused Pallas kernel -----------------------------
def fsrnn_kernel(emb_ref,
                 f0_w_ref, f0_gp_ref, f0_cp_ref,
                 sl_w_ref, sl_gp_ref, sl_cp_ref,
                 f1_w_ref, f1_gp_ref, f1_cp_ref,
                 pf_ref, ps_ref,
                 sw_ref, sb_ref,
                 logits_ref, fh_ref, fc_ref, sh_ref, sc_ref):
    T, Bp, _ = emb_ref.shape

    # ---- load weights / constants once; hoisted out of the time loop ----
    f0_w = f0_w_ref[...]                       # [(E+F), 4F]
    sl_w = sl_w_ref[...]                       # [(F+S), 4S]
    f1_w = f1_w_ref[...]                       # [(S+F), 4F]
    pf = pf_ref[...]                           # [4F, 4F] block-averaging projection
    ps = ps_ref[...]                           # [4S, 4S]
    sw = sw_ref[...]                           # [F, V_PAD]
    sb = jnp.broadcast_to(sb_ref[...], (Bp, sw.shape[1]))

    def load_cell(gp_ref, cp_ref):
        # gp rows: [pre-LN bias b, LN gain gg, LN bias gb (F_BIAS folded)]
        four_h = gp_ref.shape[1]
        h = cp_ref.shape[1]
        b = jnp.broadcast_to(gp_ref[0:1, :], (Bp, four_h))
        gg = jnp.broadcast_to(gp_ref[1:2, :], (Bp, four_h))
        gb = jnp.broadcast_to(gp_ref[2:3, :], (Bp, four_h))
        cg = jnp.broadcast_to(cp_ref[0:1, :], (Bp, h))
        cb = jnp.broadcast_to(cp_ref[1:2, :], (Bp, h))
        return b, gg, gb, cg, cb

    f0_p = load_cell(f0_gp_ref, f0_cp_ref)
    sl_p = load_cell(sl_gp_ref, sl_cp_ref)
    f1_p = load_cell(f1_gp_ref, f1_cp_ref)

    def ln_lstm(x, h, c, w, cell_p, proj):
        b, gg, gb, cg, cb = cell_p
        H = h.shape[1]
        # one MXU push: [x | h] @ [[Wx]; [Wh]] + b
        xh = jnp.concatenate([x, h], axis=1)
        z = jnp.dot(xh, w, preferred_element_type=jnp.float32) + b          # [Bp, 4H]
        # per-gate layer-norm stats via block-averaging matmuls (idle MXU),
        # instead of four lane-slices + four XLU reductions.
        mean_b = jnp.dot(z, proj, preferred_element_type=jnp.float32)
        zc = z - mean_b
        var_b = jnp.dot(zc * zc, proj, preferred_element_type=jnp.float32)
        zn = zc * lax.rsqrt(var_b + LN_EPS) * gg + gb
        sg = jax.nn.sigmoid(zn)                                              # EUP, full width
        i = sg[:, 0 * H:1 * H]
        j = jnp.tanh(zn[:, 1 * H:2 * H])
        f = sg[:, 2 * H:3 * H]         # forget-gate bias already folded into gb
        o = sg[:, 3 * H:4 * H]
        new_c = c * f + i * j
        # cell-state layer-norm
        m = jnp.mean(new_c, axis=-1, keepdims=True)
        v = jnp.mean(jnp.square(new_c - m), axis=-1, keepdims=True)
        c_ln = (new_c - m) * lax.rsqrt(v + LN_EPS) * cg + cb
        new_h = jnp.tanh(c_ln) * o
        # zoneout (inference mode; zoneout_* are keep probabilities)
        nh = ZONEOUT_H * new_h + (1.0 - ZONEOUT_H) * h
        nc = ZONEOUT_C * new_c + (1.0 - ZONEOUT_C) * c
        return nh, nc

    def step(t, carry):
        F_h, F_c, S_h, S_c = carry
        x_t = emb_ref[t]                                   # [Bp, E]
        # FSRNNCell: fast0(input) -> slow(fast out) -> fast1(slow out)
        # (keep_prob == 1.0 at inference, dropout is identity)
        F_h, F_c = ln_lstm(x_t, F_h, F_c, f0_w, f0_p, pf)
        S_h, S_c = ln_lstm(F_h, S_h, S_c, sl_w, sl_p, ps)
        F_h, F_c = ln_lstm(S_h, F_h, F_c, f1_w, f1_p, pf)
        # fused logits projection; V padded to 128 lanes -> unmasked store
        logits_ref[t] = jnp.dot(F_h, sw, preferred_element_type=jnp.float32) + sb
        return F_h, F_c, S_h, S_c

    init = (jnp.zeros((Bp, F_SIZE), jnp.float32),
            jnp.zeros((Bp, F_SIZE), jnp.float32),
            jnp.zeros((Bp, S_SIZE), jnp.float32),
            jnp.zeros((Bp, S_SIZE), jnp.float32))
    F_h, F_c, S_h, S_c = lax.fori_loop(0, T, step, init, unroll=True)

    fh_ref[...] = F_h
    fc_ref[...] = F_c
    sh_ref[...] = S_h
    sc_ref[...] = S_c


# ----------------------------- parameter init -----------------------------
def orthogonal(key, shape):
    a = jax.random.normal(key, shape, jnp.float32)
    if len(shape) < 2:
        return 0.1 * a
    transpose = shape[0] < shape[1]
    m = a.T if transpose else a
    q, r = jnp.linalg.qr(m)
    q = q * jnp.sign(jnp.diagonal(r))
    q = q.T if transpose else q
    return q[: shape[0], : shape[1]].astype(jnp.float32)


def make_cell_params(key, x_size, h_size):
    k1, k2 = jax.random.split(key)
    wx = orthogonal(k1, (x_size, 4 * h_size))
    wh = orthogonal(k2, (h_size, 4 * h_size))
    b = jnp.zeros((4 * h_size,), jnp.float32)
    gg = jnp.ones((4 * h_size,), jnp.float32)
    # Gates are ordered [i, j, f, o]; fold F_BIAS into the post-LN bias of the
    # forget block (sigmoid(LN(z_f)*gg + gb + F_BIAS) == sigmoid(f + F_BIAS)).
    gb = jnp.zeros((4 * h_size,), jnp.float32).at[2 * h_size:3 * h_size].add(F_BIAS)
    return {
        "w": jnp.concatenate([wx, wh], axis=0),                      # [(X+H), 4H]
        "gp": jnp.stack([b, gg, gb], axis=0),                        # [3, 4H]
        "cp": jnp.stack([jnp.ones((h_size,), jnp.float32),
                         jnp.zeros((h_size,), jnp.float32)], axis=0),  # [2, H]
    }


def block_avg_projection(h_size, n_blocks=4):
    """P[k,l] = 1/H if k and l are in the same gate block else 0 (so z @ P gives
    the per-gate mean broadcast back to every lane of that gate)."""
    n = n_blocks * h_size
    r = jnp.arange(n)[:, None] // h_size
    c = jnp.arange(n)[None, :] // h_size
    return jnp.where(r == c, 1.0 / h_size, 0.0).astype(jnp.float32)


def make_params(key):
    keys = jax.random.split(key, 6)
    sw = orthogonal(keys[4], (F_SIZE, VOCAB_SIZE))
    sb = orthogonal(keys[5], (1, VOCAB_SIZE))
    return {
        "embedding": jax.random.normal(keys[0], (VOCAB_SIZE, EMB_SIZE), jnp.float32),
        # fast cell 0: input = embedding; fast cell 1: input = slow-cell output
        "fast0": make_cell_params(keys[1], EMB_SIZE, F_SIZE),
        "fast1": make_cell_params(keys[2], S_SIZE, F_SIZE),
        "slow": make_cell_params(keys[3], F_SIZE, S_SIZE),
        "proj_fast": block_avg_projection(F_SIZE),                   # [4F, 4F]
        "proj_slow": block_avg_projection(S_SIZE),                   # [4S, 4S]
        "softmax_w_pad": jnp.zeros((F_SIZE, V_PAD), jnp.float32).at[:, :VOCAB_SIZE].set(sw),
        "softmax_b_pad": jnp.zeros((1, V_PAD), jnp.float32).at[:, :VOCAB_SIZE].set(sb),
    }


# ----------------------------- FS-RNN forward -----------------------------
def ptb_model_forward(params, token_ids):
    """token_ids: [batch, num_steps] int32 -> (logits [T, B, V], ((F_h,F_c),(S_h,S_c)))."""
    B, T = token_ids.shape
    emb = jnp.take(params["embedding"], token_ids, axis=0)   # [B, T, E]  (JAX glue)
    emb_t = jnp.transpose(emb, (1, 0, 2))                    # [T, B, E]
    emb_p = jnp.zeros((T, B_PAD, EMB_SIZE), jnp.float32).at[:, :B, :].set(emb_t)

    out_shape = (
        jax.ShapeDtypeStruct((T, B_PAD, V_PAD), jnp.float32),   # per-step logits (padded)
        jax.ShapeDtypeStruct((B_PAD, F_SIZE), jnp.float32),     # final F_h
        jax.ShapeDtypeStruct((B_PAD, F_SIZE), jnp.float32),     # final F_c
        jax.ShapeDtypeStruct((B_PAD, S_SIZE), jnp.float32),     # final S_h
        jax.ShapeDtypeStruct((B_PAD, S_SIZE), jnp.float32),     # final S_c
    )
    logits_pad, F_h, F_c, S_h, S_c = pl.pallas_call(
        fsrnn_kernel,
        out_shape=out_shape,
        in_specs=[_VMEM] * 14,
        out_specs=(_VMEM,) * 5,
    )(emb_p,
      params["fast0"]["w"], params["fast0"]["gp"], params["fast0"]["cp"],
      params["slow"]["w"], params["slow"]["gp"], params["slow"]["cp"],
      params["fast1"]["w"], params["fast1"]["gp"], params["fast1"]["cp"],
      params["proj_fast"], params["proj_slow"],
      params["softmax_w_pad"], params["softmax_b_pad"])

    # drop batch / vocab padding
    logits_tb = logits_pad[:, :B, :VOCAB_SIZE]               # [T, B, V], natural (t, b)
    # Faithfully reproduce the PyTorch reference:
    #   torch.cat(outputs, dim=1).view([-1, F])  -> rows ordered (b*T + t)
    #   logits.view([T, B, V])                   -> rows reinterpreted as (t*B + b)
    flat = jnp.transpose(logits_tb, (1, 0, 2)).reshape(B * T, VOCAB_SIZE)
    logits = flat.reshape(T, B, VOCAB_SIZE)
    F_state = (F_h[:B], F_c[:B])
    S_state = (S_h[:B], S_c[:B])
    return logits, (F_state, S_state)


# ----------------------------- main -----------------------------
if __name__ == "__main__":
    key = jax.random.PRNGKey(0)
    pkey, dkey = jax.random.split(key)
    params = make_params(pkey)

    token_ids = jax.random.randint(dkey, (BATCH_SIZE, NUM_STEPS), 0, VOCAB_SIZE,
                                   dtype=jnp.int32)

    fwd = jax.jit(ptb_model_forward)
    logits, (F_state, S_state) = fwd(params, token_ids)
    logits = jax.block_until_ready(logits)
    jax.block_until_ready(F_state)
    jax.block_until_ready(S_state)

    assert logits.shape == (NUM_STEPS, BATCH_SIZE, VOCAB_SIZE)
    assert logits.dtype == jnp.float32
    assert F_state[0].shape == (BATCH_SIZE, F_SIZE)
    assert S_state[0].shape == (BATCH_SIZE, S_SIZE)
    assert bool(jnp.all(jnp.isfinite(logits)))
    print("KERNEL_OK")
</pallas_src>

<mosaic_0001>
module attributes {stable_mosaic.version = 11 : i64} {
  func.func @fsrnn_kernel(%arg0: memref<8x8x16xf32, #tpu.memory_space<vmem>>, %arg1: memref<48x128xf32, #tpu.memory_space<vmem>>, %arg2: memref<3x128xf32, #tpu.memory_space<vmem>>, %arg3: memref<2x32xf32, #tpu.memory_space<vmem>>, %arg4: memref<48x64xf32, #tpu.memory_space<vmem>>, %arg5: memref<3x64xf32, #tpu.memory_space<vmem>>, %arg6: memref<2x16xf32, #tpu.memory_space<vmem>>, %arg7: memref<48x128xf32, #tpu.memory_space<vmem>>, %arg8: memref<3x128xf32, #tpu.memory_space<vmem>>, %arg9: memref<2x32xf32, #tpu.memory_space<vmem>>, %arg10: memref<128x128xf32, #tpu.memory_space<vmem>>, %arg11: memref<64x64xf32, #tpu.memory_space<vmem>>, %arg12: memref<32x128xf32, #tpu.memory_space<vmem>>, %arg13: memref<1x128xf32, #tpu.memory_space<vmem>>, %arg14: memref<8x8x128xf32, #tpu.memory_space<vmem>>, %arg15: memref<8x32xf32, #tpu.memory_space<vmem>>, %arg16: memref<8x32xf32, #tpu.memory_space<vmem>>, %arg17: memref<8x16xf32, #tpu.memory_space<vmem>>, %arg18: memref<8x16xf32, #tpu.memory_space<vmem>>) attributes {dimension_semantics = [], scalar_prefetch = 0 : i64, scratch_operands = 0 : i64, tpu.core_type = #tpu.core_type<tc>} {
    %c0 = arith.constant 0 : index
    %c0_0 = arith.constant 0 : index
    %0 = vector.load %arg1[%c0, %c0_0] : memref<48x128xf32, #tpu.memory_space<vmem>>, vector<48x128xf32>
    %c0_1 = arith.constant 0 : index
    %c0_2 = arith.constant 0 : index
    %1 = vector.load %arg4[%c0_1, %c0_2] : memref<48x64xf32, #tpu.memory_space<vmem>>, vector<48x64xf32>
    %c0_3 = arith.constant 0 : index
    %c0_4 = arith.constant 0 : index
    %2 = vector.load %arg7[%c0_3, %c0_4] : memref<48x128xf32, #tpu.memory_space<vmem>>, vector<48x128xf32>
    %c0_5 = arith.constant 0 : index
    %c0_6 = arith.constant 0 : index
    %3 = vector.load %arg10[%c0_5, %c0_6] : memref<128x128xf32, #tpu.memory_space<vmem>>, vector<128x128xf32>
    %c0_7 = arith.constant 0 : index
    %c0_8 = arith.constant 0 : index
    %4 = vector.load %arg11[%c0_7, %c0_8] : memref<64x64xf32, #tpu.memory_space<vmem>>, vector<64x64xf32>
    %c0_9 = arith.constant 0 : index
    %c0_10 = arith.constant 0 : index
    %5 = vector.load %arg12[%c0_9, %c0_10] : memref<32x128xf32, #tpu.memory_space<vmem>>, vector<32x128xf32>
    %c0_11 = arith.constant 0 : index
    %c0_12 = arith.constant 0 : index
    %6 = vector.load %arg13[%c0_11, %c0_12] : memref<1x128xf32, #tpu.memory_space<vmem>>, vector<1x128xf32>
    %7 = vector.shape_cast %6 : vector<1x128xf32> to vector<1x128xf32>
    %8 = vector.broadcast %7 : vector<1x128xf32> to vector<8x128xf32>
    %c0_13 = arith.constant 0 : index
    %c0_14 = arith.constant 0 : index
    %9 = vector.load %arg2[%c0_13, %c0_14] : memref<3x128xf32, #tpu.memory_space<vmem>>, vector<1x128xf32>
    %10 = vector.shape_cast %9 : vector<1x128xf32> to vector<1x128xf32>
    %11 = vector.broadcast %10 : vector<1x128xf32> to vector<8x128xf32>
    %c1 = arith.constant 1 : index
    %c0_15 = arith.constant 0 : index
    %12 = vector.load %arg2[%c1, %c0_15] : memref<3x128xf32, #tpu.memory_space<vmem>>, vector<1x128xf32>
    %13 = vector.shape_cast %12 : vector<1x128xf32> to vector<1x128xf32>
    %14 = vector.broadcast %13 : vector<1x128xf32> to vector<8x128xf32>
    %c2 = arith.constant 2 : index
    %c0_16 = arith.constant 0 : index
    %15 = vector.load %arg2[%c2, %c0_16] : memref<3x128xf32, #tpu.memory_space<vmem>>, vector<1x128xf32>
    %16 = vector.shape_cast %15 : vector<1x128xf32> to vector<1x128xf32>
    %17 = vector.broadcast %16 : vector<1x128xf32> to vector<8x128xf32>
    %c0_17 = arith.constant 0 : index
    %c0_18 = arith.constant 0 : index
    %18 = vector.load %arg3[%c0_17, %c0_18] : memref<2x32xf32, #tpu.memory_space<vmem>>, vector<1x32xf32>
    %19 = vector.shape_cast %18 : vector<1x32xf32> to vector<1x32xf32>
    %20 = vector.broadcast %19 : vector<1x32xf32> to vector<8x32xf32>
    %c1_19 = arith.constant 1 : index
    %c0_20 = arith.constant 0 : index
    %21 = vector.load %arg3[%c1_19, %c0_20] : memref<2x32xf32, #tpu.memory_space<vmem>>, vector<1x32xf32>
    %22 = vector.shape_cast %21 : vector<1x32xf32> to vector<1x32xf32>
    %23 = vector.broadcast %22 : vector<1x32xf32> to vector<8x32xf32>
    %c0_21 = arith.constant 0 : index
    %c0_22 = arith.constant 0 : index
    %24 = vector.load %arg5[%c0_21, %c0_22] : memref<3x64xf32, #tpu.memory_space<vmem>>, vector<1x64xf32>
    %25 = vector.shape_cast %24 : vector<1x64xf32> to vector<1x64xf32>
    %26 = vector.broadcast %25 : vector<1x64xf32> to vector<8x64xf32>
    %c1_23 = arith.constant 1 : index
    %c0_24 = arith.constant 0 : index
    %27 = vector.load %arg5[%c1_23, %c0_24] : memref<3x64xf32, #tpu.memory_space<vmem>>, vector<1x64xf32>
    %28 = vector.shape_cast %27 : vector<1x64xf32> to vector<1x64xf32>
    %29 = vector.broadcast %28 : vector<1x64xf32> to vector<8x64xf32>
    %c2_25 = arith.constant 2 : index
    %c0_26 = arith.constant 0 : index
    %30 = vector.load %arg5[%c2_25, %c0_26] : memref<3x64xf32, #tpu.memory_space<vmem>>, vector<1x64xf32>
    %31 = vector.shape_cast %30 : vector<1x64xf32> to vector<1x64xf32>
    %32 = vector.broadcast %31 : vector<1x64xf32> to vector<8x64xf32>
    %c0_27 = arith.constant 0 : index
    %c0_28 = arith.constant 0 : index
    %33 = vector.load %arg6[%c0_27, %c0_28] : memref<2x16xf32, #tpu.memory_space<vmem>>, vector<1x16xf32>
    %34 = vector.shape_cast %33 : vector<1x16xf32> to vector<1x16xf32>
    %35 = vector.broadcast %34 : vector<1x16xf32> to vector<8x16xf32>
    %c1_29 = arith.constant 1 : index
    %c0_30 = arith.constant 0 : index
    %36 = vector.load %arg6[%c1_29, %c0_30] : memref<2x16xf32, #tpu.memory_space<vmem>>, vector<1x16xf32>
    %37 = vector.shape_cast %36 : vector<1x16xf32> to vector<1x16xf32>
    %38 = vector.broadcast %37 : vector<1x16xf32> to vector<8x16xf32>
    %c0_31 = arith.constant 0 : index
    %c0_32 = arith.constant 0 : index
    %39 = vector.load %arg8[%c0_31, %c0_32] : memref<3x128xf32, #tpu.memory_space<vmem>>, vector<1x128xf32>
    %40 = vector.shape_cast %39 : vector<1x128xf32> to vector<1x128xf32>
    %41 = vector.broadcast %40 : vector<1x128xf32> to vector<8x128xf32>
    %c1_33 = arith.constant 1 : index
    %c0_34 = arith.constant 0 : index
    %42 = vector.load %arg8[%c1_33, %c0_34] : memref<3x128xf32, #tpu.memory_space<vmem>>, vector<1x128xf32>
    %43 = vector.shape_cast %42 : vector<1x128xf32> to vector<1x128xf32>
    %44 = vector.broadcast %43 : vector<1x128xf32> to vector<8x128xf32>
    %c2_35 = arith.constant 2 : index
    %c0_36 = arith.constant 0 : index
    %45 = vector.load %arg8[%c2_35, %c0_36] : memref<3x128xf32, #tpu.memory_space<vmem>>, vector<1x128xf32>
    %46 = vector.shape_cast %45 : vector<1x128xf32> to vector<1x128xf32>
    %47 = vector.broadcast %46 : vector<1x128xf32> to vector<8x128xf32>
    %c0_37 = arith.constant 0 : index
    %c0_38 = arith.constant 0 : index
    %48 = vector.load %arg9[%c0_37, %c0_38] : memref<2x32xf32, #tpu.memory_space<vmem>>, vector<1x32xf32>
    %49 = vector.shape_cast %48 : vector<1x32xf32> to vector<1x32xf32>
    %50 = vector.broadcast %49 : vector<1x32xf32> to vector<8x32xf32>
    %c1_39 = arith.constant 1 : index
    %c0_40 = arith.constant 0 : index
    %51 = vector.load %arg9[%c1_39, %c0_40] : memref<2x32xf32, #tpu.memory_space<vmem>>, vector<1x32xf32>
    %52 = vector.shape_cast %51 : vector<1x32xf32> to vector<1x32xf32>
    %53 = vector.broadcast %52 : vector<1x32xf32> to vector<8x32xf32>
    %cst = arith.constant 0.000000e+00 : f32
    %54 = vector.broadcast %cst : f32 to vector<8x32xf32>
    %cst_41 = arith.constant 0.000000e+00 : f32
    %55 = vector.broadcast %cst_41 : f32 to vector<8x32xf32>
    %cst_42 = arith.constant 0.000000e+00 : f32
    %56 = vector.broadcast %cst_42 : f32 to vector<8x16xf32>
    %cst_43 = arith.constant 0.000000e+00 : f32
    %57 = vector.broadcast %cst_43 : f32 to vector<8x16xf32>
    %c0_i32 = arith.constant 0 : i32
    %58 = arith.index_cast %c0_i32 : i32 to index
    %c0_44 = arith.constant 0 : index
    %c0_45 = arith.constant 0 : index
    %59 = vector.load %arg0[%58, %c0_44, %c0_45] : memref<8x8x16xf32, #tpu.memory_space<vmem>>, vector<1x8x16xf32>
    %60 = vector.shape_cast %59 : vector<1x8x16xf32> to vector<8x16xf32>
    %61 = tpu.concatenate %60, %54 in 1 : vector<8x16xf32>, vector<8x32xf32> -> vector<8x48xf32>
    %cst_46 = arith.constant dense<0.000000e+00> : vector<8x128xf32>
    %62 = tpu.matmul %61, %0, %cst_46 {dimension_numbers = #tpu.dot_dimension_numbers<[1], [0], [0], [1], [0, 0, 1, 1], [], []>} : vector<8x48xf32>, vector<48x128xf32>, vector<8x128xf32> -> vector<8x128xf32>
    %63 = arith.addf %62, %11 : vector<8x128xf32>
    %cst_47 = arith.constant dense<0.000000e+00> : vector<8x128xf32>
    %64 = tpu.matmul %63, %3, %cst_47 {dimension_numbers = #tpu.dot_dimension_numbers<[1], [0], [0], [1], [0, 0, 1, 1], [], []>} : vector<8x128xf32>, vector<128x128xf32>, vector<8x128xf32> -> vector<8x128xf32>
    %65 = arith.subf %63, %64 : vector<8x128xf32>
    %66 = arith.mulf %65, %65 : vector<8x128xf32>
    %cst_48 = arith.constant dense<0.000000e+00> : vector<8x128xf32>
    %67 = tpu.matmul %66, %3, %cst_48 {dimension_numbers = #tpu.dot_dimension_numbers<[1], [0], [0], [1], [0, 0, 1, 1], [], []>} : vector<8x128xf32>, vector<128x128xf32>, vector<8x128xf32> -> vector<8x128xf32>
    %cst_49 = arith.constant 1.000000e-03 : f32
    %68 = vector.broadcast %cst_49 : f32 to vector<8x128xf32>
    %69 = arith.addf %67, %68 : vector<8x128xf32>
    %70 = math.rsqrt %69 : vector<8x128xf32>
    %71 = arith.mulf %65, %70 : vector<8x128xf32>
    %72 = arith.mulf %71, %14 : vector<8x128xf32>
    %73 = arith.addf %72, %17 : vector<8x128xf32>
    %74 = arith.negf %73 : vector<8x128xf32>
    %75 = math.exp %74 : vector<8x128xf32>
    %cst_50 = arith.constant 1.000000e+00 : f32
    %76 = vector.broadcast %cst_50 : f32 to vector<8x128xf32>
    %77 = arith.addf %76, %75 : vector<8x128xf32>
    %78 = arith.divf %76, %77 : vector<8x128xf32>
    %79 = vector.extract_strided_slice %78 {offsets = [0, 0], sizes = [8, 32], strides = [1, 1]} : vector<8x128xf32> to vector<8x32xf32>
    %80 = vector.extract_strided_slice %73 {offsets = [0, 32], sizes = [8, 32], strides = [1, 1]} : vector<8x128xf32> to vector<8x32xf32>
    %81 = math.tanh %80 : vector<8x32xf32>
    %82 = vector.extract_strided_slice %78 {offsets = [0, 64], sizes = [8, 32], strides = [1, 1]} : vector<8x128xf32> to vector<8x32xf32>
    %83 = vector.extract_strided_slice %78 {offsets = [0, 96], sizes = [8, 32], strides = [1, 1]} : vector<8x128xf32> to vector<8x32xf32>
    %84 = arith.mulf %55, %82 : vector<8x32xf32>
    %85 = arith.mulf %79, %81 : vector<8x32xf32>
    %86 = arith.addf %84, %85 : vector<8x32xf32>
    %cst_51 = arith.constant dense<0.000000e+00> : vector<8xf32>
    %87 = vector.multi_reduction <add>, %86, %cst_51 [1] : vector<8x32xf32> to vector<8xf32>
    %88 = vector.shape_cast %87 : vector<8xf32> to vector<8x1xf32>
    %cst_52 = arith.constant 3.200000e+01 : f32
    %89 = vector.broadcast %cst_52 : f32 to vector<8x1xf32>
    %90 = arith.divf %88, %89 : vector<8x1xf32>
    %91 = vector.broadcast %90 : vector<8x1xf32> to vector<8x32xf32>
    %92 = arith.subf %86, %91 : vector<8x32xf32>
    %93 = arith.mulf %92, %92 : vector<8x32xf32>
    %cst_53 = arith.constant dense<0.000000e+00> : vector<8xf32>
    %94 = vector.multi_reduction <add>, %93, %cst_53 [1] : vector<8x32xf32> to vector<8xf32>
    %95 = vector.shape_cast %94 : vector<8xf32> to vector<8x1xf32>
    %cst_54 = arith.constant 3.200000e+01 : f32
    %96 = vector.broadcast %cst_54 : f32 to vector<8x1xf32>
    %97 = arith.divf %95, %96 : vector<8x1xf32>
    %98 = vector.broadcast %90 : vector<8x1xf32> to vector<8x32xf32>
    %99 = arith.subf %86, %98 : vector<8x32xf32>
    %cst_55 = arith.constant 1.000000e-03 : f32
    %100 = vector.broadcast %cst_55 : f32 to vector<8x1xf32>
    %101 = arith.addf %97, %100 : vector<8x1xf32>
    %102 = math.rsqrt %101 : vector<8x1xf32>
    %103 = vector.broadcast %102 : vector<8x1xf32> to vector<8x32xf32>
    %104 = arith.mulf %99, %103 : vector<8x32xf32>
    %105 = arith.mulf %104, %20 : vector<8x32xf32>
    %106 = arith.addf %105, %23 : vector<8x32xf32>
    %107 = math.tanh %106 : vector<8x32xf32>
    %108 = arith.mulf %107, %83 : vector<8x32xf32>
    %cst_56 = arith.constant 0.899999976 : f32
    %109 = vector.broadcast %cst_56 : f32 to vector<8x32xf32>
    %110 = arith.mulf %109, %108 : vector<8x32xf32>
    %cst_57 = arith.constant 1.000000e-01 : f32
    %111 = vector.broadcast %cst_57 : f32 to vector<8x32xf32>
    %112 = arith.mulf %111, %54 : vector<8x32xf32>
    %113 = arith.addf %110, %112 : vector<8x32xf32>
    %cst_58 = arith.constant 5.000000e-01 : f32
    %114 = vector.broadcast %cst_58 : f32 to vector<8x32xf32>
    %115 = arith.mulf %114, %86 : vector<8x32xf32>
    %cst_59 = arith.constant 5.000000e-01 : f32
    %116 = vector.broadcast %cst_59 : f32 to vector<8x32xf32>
    %117 = arith.mulf %116, %55 : vector<8x32xf32>
    %118 = arith.addf %115, %117 : vector<8x32xf32>
    %119 = tpu.concatenate %113, %56 in 1 : vector<8x32xf32>, vector<8x16xf32> -> vector<8x48xf32>
    %cst_60 = arith.constant dense<0.000000e+00> : vector<8x64xf32>
    %120 = tpu.matmul %119, %1, %cst_60 {dimension_numbers = #tpu.dot_dimension_numbers<[1], [0], [0], [1], [0, 0, 1, 1], [], []>} : vector<8x48xf32>, vector<48x64xf32>, vector<8x64xf32> -> vector<8x64xf32>
    %121 = arith.addf %120, %26 : vector<8x64xf32>
    %cst_61 = arith.constant dense<0.000000e+00> : vector<8x64xf32>
    %122 = tpu.matmul %121, %4, %cst_61 {dimension_numbers = #tpu.dot_dimension_numbers<[1], [0], [0], [1], [0, 0, 1, 1], [], []>} : vector<8x64xf32>, vector<64x64xf32>, vector<8x64xf32> -> vector<8x64xf32>
    %123 = arith.subf %121, %122 : vector<8x64xf32>
    %124 = arith.mulf %123, %123 : vector<8x64xf32>
    %cst_62 = arith.constant dense<0.000000e+00> : vector<8x64xf32>
    %125 = tpu.matmul %124, %4, %cst_62 {dimension_numbers = #tpu.dot_dimension_numbers<[1], [0], [0], [1], [0, 0, 1, 1], [], []>} : vector<8x64xf32>, vector<64x64xf32>, vector<8x64xf32> -> vector<8x64xf32>
    %cst_63 = arith.constant 1.000000e-03 : f32
    %126 = vector.broadcast %cst_63 : f32 to vector<8x64xf32>
    %127 = arith.addf %125, %126 : vector<8x64xf32>
    %128 = math.rsqrt %127 : vector<8x64xf32>
    %129 = arith.mulf %123, %128 : vector<8x64xf32>
    %130 = arith.mulf %129, %29 : vector<8x64xf32>
    %131 = arith.addf %130, %32 : vector<8x64xf32>
    %132 = arith.negf %131 : vector<8x64xf32>
    %133 = math.exp %132 : vector<8x64xf32>
    %cst_64 = arith.constant 1.000000e+00 : f32
    %134 = vector.broadcast %cst_64 : f32 to vector<8x64xf32>
    %135 = arith.addf %134, %133 : vector<8x64xf32>
    %136 = arith.divf %134, %135 : vector<8x64xf32>
    %137 = vector.extract_strided_slice %136 {offsets = [0, 0], sizes = [8, 16], strides = [1, 1]} : vector<8x64xf32> to vector<8x16xf32>
    %138 = vector.extract_strided_slice %131 {offsets = [0, 16], sizes = [8, 16], strides = [1, 1]} : vector<8x64xf32> to vector<8x16xf32>
    %139 = math.tanh %138 : vector<8x16xf32>
    %140 = vector.extract_strided_slice %136 {offsets = [0, 32], sizes = [8, 16], strides = [1, 1]} : vector<8x64xf32> to vector<8x16xf32>
    %141 = vector.extract_strided_slice %136 {offsets = [0, 48], sizes = [8, 16], strides = [1, 1]} : vector<8x64xf32> to vector<8x16xf32>
    %142 = arith.mulf %57, %140 : vector<8x16xf32>
    %143 = arith.mulf %137, %139 : vector<8x16xf32>
    %144 = arith.addf %142, %143 : vector<8x16xf32>
    %cst_65 = arith.constant dense<0.000000e+00> : vector<8xf32>
    %145 = vector.multi_reduction <add>, %144, %cst_65 [1] : vector<8x16xf32> to vector<8xf32>
    %146 = vector.shape_cast %145 : vector<8xf32> to vector<8x1xf32>
    %cst_66 = arith.constant 1.600000e+01 : f32
    %147 = vector.broadcast %cst_66 : f32 to vector<8x1xf32>
    %148 = arith.divf %146, %147 : vector<8x1xf32>
    %149 = vector.broadcast %148 : vector<8x1xf32> to vector<8x16xf32>
    %150 = arith.subf %144, %149 : vector<8x16xf32>
    %151 = arith.mulf %150, %150 : vector<8x16xf32>
    %cst_67 = arith.constant dense<0.000000e+00> : vector<8xf32>
    %152 = vector.multi_reduction <add>, %151, %cst_67 [1] : vector<8x16xf32> to vector<8xf32>
    %153 = vector.shape_cast %152 : vector<8xf32> to vector<8x1xf32>
    %cst_68 = arith.constant 1.600000e+01 : f32
    %154 = vector.broadcast %cst_68 : f32 to vector<8x1xf32>
    %155 = arith.divf %153, %154 : vector<8x1xf32>
    %156 = vector.broadcast %148 : vector<8x1xf32> to vector<8x16xf32>
    %157 = arith.subf %144, %156 : vector<8x16xf32>
    %cst_69 = arith.constant 1.000000e-03 : f32
    %158 = vector.broadcast %cst_69 : f32 to vector<8x1xf32>
    %159 = arith.addf %155, %158 : vector<8x1xf32>
    %160 = math.rsqrt %159 : vector<8x1xf32>
    %161 = vector.broadcast %160 : vector<8x1xf32> to vector<8x16xf32>
    %162 = arith.mulf %157, %161 : vector<8x16xf32>
    %163 = arith.mulf %162, %35 : vector<8x16xf32>
    %164 = arith.addf %163, %38 : vector<8x16xf32>
    %165 = math.tanh %164 : vector<8x16xf32>
    %166 = arith.mulf %165, %141 : vector<8x16xf32>
    %cst_70 = arith.constant 0.899999976 : f32
    %167 = vector.broadcast %cst_70 : f32 to vector<8x16xf32>
    %168 = arith.mulf %167, %166 : vector<8x16xf32>
    %cst_71 = arith.constant 1.000000e-01 : f32
    %169 = vector.broadcast %cst_71 : f32 to vector<8x16xf32>
    %170 = arith.mulf %169, %56 : vector<8x16xf32>
    %171 = arith.addf %168, %170 : vector<8x16xf32>
    %cst_72 = arith.constant 5.000000e-01 : f32
    %172 = vector.broadcast %cst_72 : f32 to vector<8x16xf32>
    %173 = arith.mulf %172, %144 : vector<8x16xf32>
    %cst_73 = arith.constant 5.000000e-01 : f32
    %174 = vector.broadcast %cst_73 : f32 to vector<8x16xf32>
    %175 = arith.mulf %174, %57 : vector<8x16xf32>
    %176 = arith.addf %173, %175 : vector<8x16xf32>
    %177 = tpu.concatenate %171, %113 in 1 : vector<8x16xf32>, vector<8x32xf32> -> vector<8x48xf32>
    %cst_74 = arith.constant dense<0.000000e+00> : vector<8x128xf32>
    %178 = tpu.matmul %177, %2, %cst_74 {dimension_numbers = #tpu.dot_dimension_numbers<[1], [0], [0], [1], [0, 0, 1, 1], [], []>} : vector<8x48xf32>, vector<48x128xf32>, vector<8x128xf32> -> vector<8x128xf32>
    %179 = arith.addf %178, %41 : vector<8x128xf32>
    %cst_75 = arith.constant dense<0.000000e+00> : vector<8x128xf32>
    %180 = tpu.matmul %179, %3, %cst_75 {dimension_numbers = #tpu.dot_dimension_numbers<[1], [0], [0], [1], [0, 0, 1, 1], [], []>} : vector<8x128xf32>, vector<128x128xf32>, vector<8x128xf32> -> vector<8x128xf32>
    %181 = arith.subf %179, %180 : vector<8x128xf32>
    %182 = arith.mulf %181, %181 : vector<8x128xf32>
    %cst_76 = arith.constant dense<0.000000e+00> : vector<8x128xf32>
    %183 = tpu.matmul %182, %3, %cst_76 {dimension_numbers = #tpu.dot_dimension_numbers<[1], [0], [0], [1], [0, 0, 1, 1], [], []>} : vector<8x128xf32>, vector<128x128xf32>, vector<8x128xf32> -> vector<8x128xf32>
    %cst_77 = arith.constant 1.000000e-03 : f32
    %184 = vector.broadcast %cst_77 : f32 to vector<8x128xf32>
    %185 = arith.addf %183, %184 : vector<8x128xf32>
    %186 = math.rsqrt %185 : vector<8x128xf32>
    %187 = arith.mulf %181, %186 : vector<8x128xf32>
    %188 = arith.mulf %187, %44 : vector<8x128xf32>
    %189 = arith.addf %188, %47 : vector<8x128xf32>
    %190 = arith.negf %189 : vector<8x128xf32>
    %191 = math.exp %190 : vector<8x128xf32>
    %cst_78 = arith.constant 1.000000e+00 : f32
    %192 = vector.broadcast %cst_78 : f32 to vector<8x128xf32>
    %193 = arith.addf %192, %191 : vector<8x128xf32>
    %194 = arith.divf %192, %193 : vector<8x128xf32>
    %195 = vector.extract_strided_slice %194 {offsets = [0, 0], sizes = [8, 32], strides = [1, 1]} : vector<8x128xf32> to vector<8x32xf32>
    %196 = vector.extract_strided_slice %189 {offsets = [0, 32], sizes = [8, 32], strides = [1, 1]} : vector<8x128xf32> to vector<8x32xf32>
    %197 = math.tanh %196 : vector<8x32xf32>
    %198 = vector.extract_strided_slice %194 {offsets = [0, 64], sizes = [8, 32], strides = [1, 1]} : vector<8x128xf32> to vector<8x32xf32>
    %199 = vector.extract_strided_slice %194 {offsets = [0, 96], sizes = [8, 32], strides = [1, 1]} : vector<8x128xf32> to vector<8x32xf32>
    %200 = arith.mulf %118, %198 : vector<8x32xf32>
    %201 = arith.mulf %195, %197 : vector<8x32xf32>
    %202 = arith.addf %200, %201 : vector<8x32xf32>
    %cst_79 = arith.constant dense<0.000000e+00> : vector<8xf32>
    %203 = vector.multi_reduction <add>, %202, %cst_79 [1] : vector<8x32xf32> to vector<8xf32>
    %204 = vector.shape_cast %203 : vector<8xf32> to vector<8x1xf32>
    %cst_80 = arith.constant 3.200000e+01 : f32
    %205 = vector.broadcast %cst_80 : f32 to vector<8x1xf32>
    %206 = arith.divf %204, %205 : vector<8x1xf32>
    %207 = vector.broadcast %206 : vector<8x1xf32> to vector<8x32xf32>
    %208 = arith.subf %202, %207 : vector<8x32xf32>
    %209 = arith.mulf %208, %208 : vector<8x32xf32>
    %cst_81 = arith.constant dense<0.000000e+00> : vector<8xf32>
    %210 = vector.multi_reduction <add>, %209, %cst_81 [1] : vector<8x32xf32> to vector<8xf32>
    %211 = vector.shape_cast %210 : vector<8xf32> to vector<8x1xf32>
    %cst_82 = arith.constant 3.200000e+01 : f32
    %212 = vector.broadcast %cst_82 : f32 to vector<8x1xf32>
    %213 = arith.divf %211, %212 : vector<8x1xf32>
    %214 = vector.broadcast %206 : vector<8x1xf32> to vector<8x32xf32>
    %215 = arith.subf %202, %214 : vector<8x32xf32>
    %cst_83 = arith.constant 1.000000e-03 : f32
    %216 = vector.broadcast %cst_83 : f32 to vector<8x1xf32>
    %217 = arith.addf %213, %216 : vector<8x1xf32>
    %218 = math.rsqrt %217 : vector<8x1xf32>
    %219 = vector.broadcast %218 : vector<8x1xf32> to vector<8x32xf32>
    %220 = arith.mulf %215, %219 : vector<8x32xf32>
    %221 = arith.mulf %220, %50 : vector<8x32xf32>
    %222 = arith.addf %221, %53 : vector<8x32xf32>
    %223 = math.tanh %222 : vector<8x32xf32>
    %224 = arith.mulf %223, %199 : vector<8x32xf32>
    %cst_84 = arith.constant 0.899999976 : f32
    %225 = vector.broadcast %cst_84 : f32 to vector<8x32xf32>
    %226 = arith.mulf %225, %224 : vector<8x32xf32>
    %cst_85 = arith.constant 1.000000e-01 : f32
    %227 = vector.broadcast %cst_85 : f32 to vector<8x32xf32>
    %228 = arith.mulf %227, %113 : vector<8x32xf32>
    %229 = arith.addf %226, %228 : vector<8x32xf32>
    %cst_86 = arith.constant 5.000000e-01 : f32
    %230 = vector.broadcast %cst_86 : f32 to vector<8x32xf32>
    %231 = arith.mulf %230, %202 : vector<8x32xf32>
    %cst_87 = arith.constant 5.000000e-01 : f32
    %232 = vector.broadcast %cst_87 : f32 to vector<8x32xf32>
    %233 = arith.mulf %232, %118 : vector<8x32xf32>
    %234 = arith.addf %231, %233 : vector<8x32xf32>
    %cst_88 = arith.constant dense<0.000000e+00> : vector<8x128xf32>
    %235 = tpu.matmul %229, %5, %cst_88 {dimension_numbers = #tpu.dot_dimension_numbers<[1], [0], [0], [1], [0, 0, 1, 1], [], []>} : vector<8x32xf32>, vector<32x128xf32>, vector<8x128xf32> -> vector<8x128xf32>
    %236 = arith.addf %235, %8 : vector<8x128xf32>
    %237 = arith.index_cast %c0_i32 : i32 to index
    %c0_89 = arith.constant 0 : index
    %c0_90 = arith.constant 0 : index
    %238 = vector.load %arg14[%237, %c0_89, %c0_90] : memref<8x8x128xf32, #tpu.memory_space<vmem>>, vector<1x8x128xf32>
    %239 = vector.shape_cast %238 : vector<1x8x128xf32> to vector<8x128xf32>
    %240 = vector.shape_cast %236 : vector<8x128xf32> to vector<1x8x128xf32>
    tpu.vector_store %arg14[%237, %c0_89, %c0_90], %240 {strides = array<i32>} : memref<8x8x128xf32, #tpu.memory_space<vmem>>, vector<1x8x128xf32>,
    %c1_i32 = arith.constant 1 : i32
    %241 = arith.index_cast %c1_i32 : i32 to index
    %c0_91 = arith.constant 0 : index
    %c0_92 = arith.constant 0 : index
    %242 = vector.load %arg0[%241, %c0_91, %c0_92] : memref<8x8x16xf32, #tpu.memory_space<vmem>>, vector<1x8x16xf32>
    %243 = vector.shape_cast %242 : vector<1x8x16xf32> to vector<8x16xf32>
    %244 = tpu.concatenate %243, %229 in 1 : vector<8x16xf32>, vector<8x32xf32> -> vector<8x48xf32>
    %cst_93 = arith.constant dense<0.000000e+00> : vector<8x128xf32>
    %245 = tpu.matmul %244, %0, %cst_93 {dimension_numbers = #tpu.dot_dimension_numbers<[1], [0], [0], [1], [0, 0, 1, 1], [], []>} : vector<8x48xf32>, vector<48x128xf32>, vector<8x128xf32> -> vector<8x128xf32>
    %246 = arith.addf %245, %11 : vector<8x128xf32>
    %cst_94 = arith.constant dense<0.000000e+00> : vector<8x128xf32>
    %247 = tpu.matmul %246, %3, %cst_94 {dimension_numbers = #tpu.dot_dimension_numbers<[1], [0], [0], [1], [0, 0, 1, 1], [], []>} : vector<8x128xf32>, vector<128x128xf32>, vector<8x128xf32> -> vector<8x128xf32>
    %248 = arith.subf %246, %247 : vector<8x128xf32>
    %249 = arith.mulf %248, %248 : vector<8x128xf32>
    %cst_95 = arith.constant dense<0.000000e+00> : vector<8x128xf32>
    %250 = tpu.matmul %249, %3, %cst_95 {dimension_numbers = #tpu.dot_dimension_numbers<[1], [0], [0], [1], [0, 0, 1, 1], [], []>} : vector<8x128xf32>, vector<128x128xf32>, vector<8x128xf32> -> vector<8x128xf32>
    %cst_96 = arith.constant 1.000000e-03 : f32
    %251 = vector.broadcast %cst_96 : f32 to vector<8x128xf32>
    %252 = arith.addf %250, %251 : vector<8x128xf32>
    %253 = math.rsqrt %252 : vector<8x128xf32>
    %254 = arith.mulf %248, %253 : vector<8x128xf32>
    %255 = arith.mulf %254, %14 : vector<8x128xf32>
    %256 = arith.addf %255, %17 : vector<8x128xf32>
    %257 = arith.negf %256 : vector<8x128xf32>
    %258 = math.exp %257 : vector<8x128xf32>
    %cst_97 = arith.constant 1.000000e+00 : f32
    %259 = vector.broadcast %cst_97 : f32 to vector<8x128xf32>
    %260 = arith.addf %259, %258 : vector<8x128xf32>
    %261 = arith.divf %259, %260 : vector<8x128xf32>
    %262 = vector.extract_strided_slice %261 {offsets = [0, 0], sizes = [8, 32], strides = [1, 1]} : vector<8x128xf32> to vector<8x32xf32>
    %263 = vector.extract_strided_slice %256 {offsets = [0, 32], sizes = [8, 32], strides = [1, 1]} : vector<8x128xf32> to vector<8x32xf32>
    %264 = math.tanh %263 : vector<8x32xf32>
    %265 = vector.extract_strided_slice %261 {offsets = [0, 64], sizes = [8, 32], strides = [1, 1]} : vector<8x128xf32> to vector<8x32xf32>
    %266 = vector.extract_strided_slice %261 {offsets = [0, 96], sizes = [8, 32], strides = [1, 1]} : vector<8x128xf32> to vector<8x32xf32>
    %267 = arith.mulf %234, %265 : vector<8x32xf32>
    %268 = arith.mulf %262, %264 : vector<8x32xf32>
    %269 = arith.addf %267, %268 : vector<8x32xf32>
    %cst_98 = arith.constant dense<0.000000e+00> : vector<8xf32>
    %270 = vector.multi_reduction <add>, %269, %cst_98 [1] : vector<8x32xf32> to vector<8xf32>
    %271 = vector.shape_cast %270 : vector<8xf32> to vector<8x1xf32>
    %cst_99 = arith.constant 3.200000e+01 : f32
    %272 = vector.broadcast %cst_99 : f32 to vector<8x1xf32>
    %273 = arith.divf %271, %272 : vector<8x1xf32>
    %274 = vector.broadcast %273 : vector<8x1xf32> to vector<8x32xf32>
    %275 = arith.subf %269, %274 : vector<8x32xf32>
    %276 = arith.mulf %275, %275 : vector<8x32xf32>
    %cst_100 = arith.constant dense<0.000000e+00> : vector<8xf32>
    %277 = vector.multi_reduction <add>, %276, %cst_100 [1] : vector<8x32xf32> to vector<8xf32>
    %278 = vector.shape_cast %277 : vector<8xf32> to vector<8x1xf32>
    %cst_101 = arith.constant 3.200000e+01 : f32
    %279 = vector.broadcast %cst_101 : f32 to vector<8x1xf32>
    %280 = arith.divf %278, %279 : vector<8x1xf32>
    %281 = vector.broadcast %273 : vector<8x1xf32> to vector<8x32xf32>
    %282 = arith.subf %269, %281 : vector<8x32xf32>
    %cst_102 = arith.constant 1.000000e-03 : f32
    %283 = vector.broadcast %cst_102 : f32 to vector<8x1xf32>
    %284 = arith.addf %280, %283 : vector<8x1xf32>
    %285 = math.rsqrt %284 : vector<8x1xf32>
    %286 = vector.broadcast %285 : vector<8x1xf32> to vector<8x32xf32>
    %287 = arith.mulf %282, %286 : vector<8x32xf32>
    %288 = arith.mulf %287, %20 : vector<8x32xf32>
    %289 = arith.addf %288, %23 : vector<8x32xf32>
    %290 = math.tanh %289 : vector<8x32xf32>
    %291 = arith.mulf %290, %266 : vector<8x32xf32>
    %cst_103 = arith.constant 0.899999976 : f32
    %292 = vector.broadcast %cst_103 : f32 to vector<8x32xf32>
    %293 = arith.mulf %292, %291 : vector<8x32xf32>
    %cst_104 = arith.constant 1.000000e-01 : f32
    %294 = vector.broadcast %cst_104 : f32 to vector<8x32xf32>
    %295 = arith.mulf %294, %229 : vector<8x32xf32>
    %296 = arith.addf %293, %295 : vector<8x32xf32>
    %cst_105 = arith.constant 5.000000e-01 : f32
    %297 = vector.broadcast %cst_105 : f32 to vector<8x32xf32>
    %298 = arith.mulf %297, %269 : vector<8x32xf32>
    %cst_106 = arith.constant 5.000000e-01 : f32
    %299 = vector.broadcast %cst_106 : f32 to vector<8x32xf32>
    %300 = arith.mulf %299, %234 : vector<8x32xf32>
    %301 = arith.addf %298, %300 : vector<8x32xf32>
    %302 = tpu.concatenate %296, %171 in 1 : vector<8x32xf32>, vector<8x16xf32> -> vector<8x48xf32>
    %cst_107 = arith.constant dense<0.000000e+00> : vector<8x64xf32>
    %303 = tpu.matmul %302, %1, %cst_107 {dimension_numbers = #tpu.dot_dimension_numbers<[1], [0], [0], [1], [0, 0, 1, 1], [], []>} : vector<8x48xf32>, vector<48x64xf32>, vector<8x64xf32> -> vector<8x64xf32>
    %304 = arith.addf %303, %26 : vector<8x64xf32>
    %cst_108 = arith.constant dense<0.000000e+00> : vector<8x64xf32>
    %305 = tpu.matmul %304, %4, %cst_108 {dimension_numbers = #tpu.dot_dimension_numbers<[1], [0], [0], [1], [0, 0, 1, 1], [], []>} : vector<8x64xf32>, vector<64x64xf32>, vector<8x64xf32> -> vector<8x64xf32>
    %306 = arith.subf %304, %305 : vector<8x64xf32>
    %307 = arith.mulf %306, %306 : vector<8x64xf32>
    %cst_109 = arith.constant dense<0.000000e+00> : vector<8x64xf32>
    %308 = tpu.matmul %307, %4, %cst_109 {dimension_numbers = #tpu.dot_dimension_numbers<[1], [0], [0], [1], [0, 0, 1, 1], [], []>} : vector<8x64xf32>, vector<64x64xf32>, vector<8x64xf32> -> vector<8x64xf32>
    %cst_110 = arith.constant 1.000000e-03 : f32
    %309 = vector.broadcast %cst_110 : f32 to vector<8x64xf32>
    %310 = arith.addf %308, %309 : vector<8x64xf32>
    %311 = math.rsqrt %310 : vector<8x64xf32>
    %312 = arith.mulf %306, %311 : vector<8x64xf32>
    %313 = arith.mulf %312, %29 : vector<8x64xf32>
    %314 = arith.addf %313, %32 : vector<8x64xf32>
    %315 = arith.negf %314 : vector<8x64xf32>
    %316 = math.exp %315 : vector<8x64xf32>
    %cst_111 = arith.constant 1.000000e+00 : f32
    %317 = vector.broadcast %cst_111 : f32 to vector<8x64xf32>
    %318 = arith.addf %317, %316 : vector<8x64xf32>
    %319 = arith.divf %317, %318 : vector<8x64xf32>
    %320 = vector.extract_strided_slice %319 {offsets = [0, 0], sizes = [8, 16], strides = [1, 1]} : vector<8x64xf32> to vector<8x16xf32>
    %321 = vector.extract_strided_slice %314 {offsets = [0, 16], sizes = [8, 16], strides = [1, 1]} : vector<8x64xf32> to vector<8x16xf32>
    %322 = math.tanh %321 : vector<8x16xf32>
    %323 = vector.extract_strided_slice %319 {offsets = [0, 32], sizes = [8, 16], strides = [1, 1]} : vector<8x64xf32> to vector<8x16xf32>
    %324 = vector.extract_strided_slice %319 {offsets = [0, 48], sizes = [8, 16], strides = [1, 1]} : vector<8x64xf32> to vector<8x16xf32>
    %325 = arith.mulf %176, %323 : vector<8x16xf32>
    %326 = arith.mulf %320, %322 : vector<8x16xf32>
    %327 = arith.addf %325, %326 : vector<8x16xf32>
    %cst_112 = arith.constant dense<0.000000e+00> : vector<8xf32>
    %328 = vector.multi_reduction <add>, %327, %cst_112 [1] : vector<8x16xf32> to vector<8xf32>
    %329 = vector.shape_cast %328 : vector<8xf32> to vector<8x1xf32>
    %cst_113 = arith.constant 1.600000e+01 : f32
    %330 = vector.broadcast %cst_113 : f32 to vector<8x1xf32>
    %331 = arith.divf %329, %330 : vector<8x1xf32>
    %332 = vector.broadcast %331 : vector<8x1xf32> to vector<8x16xf32>
    %333 = arith.subf %327, %332 : vector<8x16xf32>
    %334 = arith.mulf %333, %333 : vector<8x16xf32>
    %cst_114 = arith.constant dense<0.000000e+00> : vector<8xf32>
    %335 = vector.multi_reduction <add>, %334, %cst_114 [1] : vector<8x16xf32> to vector<8xf32>
    %336 = vector.shape_cast %335 : vector<8xf32> to vector<8x1xf32>
    %cst_115 = arith.constant 1.600000e+01 : f32
    %337 = vector.broadcast %cst_115 : f32 to vector<8x1xf32>
    %338 = arith.divf %336, %337 : vector<8x1xf32>
    %339 = vector.broadcast %331 : vector<8x1xf32> to vector<8x16xf32>
    %340 = arith.subf %327, %339 : vector<8x16xf32>
    %cst_116 = arith.constant 1.000000e-03 : f32
    %341 = vector.broadcast %cst_116 : f32 to vector<8x1xf32>
    %342 = arith.addf %338, %341 : vector<8x1xf32>
    %343 = math.rsqrt %342 : vector<8x1xf32>
    %344 = vector.broadcast %343 : vector<8x1xf32> to vector<8x16xf32>
    %345 = arith.mulf %340, %344 : vector<8x16xf32>
    %346 = arith.mulf %345, %35 : vector<8x16xf32>
    %347 = arith.addf %346, %38 : vector<8x16xf32>
    %348 = math.tanh %347 : vector<8x16xf32>
    %349 = arith.mulf %348, %324 : vector<8x16xf32>
    %cst_117 = arith.constant 0.899999976 : f32
    %350 = vector.broadcast %cst_117 : f32 to vector<8x16xf32>
    %351 = arith.mulf %350, %349 : vector<8x16xf32>
    %cst_118 = arith.constant 1.000000e-01 : f32
    %352 = vector.broadcast %cst_118 : f32 to vector<8x16xf32>
    %353 = arith.mulf %352, %171 : vector<8x16xf32>
    %354 = arith.addf %351, %353 : vector<8x16xf32>
    %cst_119 = arith.constant 5.000000e-01 : f32
    %355 = vector.broadcast %cst_119 : f32 to vector<8x16xf32>
    %356 = arith.mulf %355, %327 : vector<8x16xf32>
    %cst_120 = arith.constant 5.000000e-01 : f32
    %357 = vector.broadcast %cst_120 : f32 to vector<8x16xf32>
    %358 = arith.mulf %357, %176 : vector<8x16xf32>
    %359 = arith.addf %356, %358 : vector<8x16xf32>
    %360 = tpu.concatenate %354, %296 in 1 : vector<8x16xf32>, vector<8x32xf32> -> vector<8x48xf32>
    %cst_121 = arith.constant dense<0.000000e+00> : vector<8x128xf32>
    %361 = tpu.matmul %360, %2, %cst_121 {dimension_numbers = #tpu.dot_dimension_numbers<[1], [0], [0], [1], [0, 0, 1, 1], [], []>} : vector<8x48xf32>, vector<48x128xf32>, vector<8x128xf32> -> vector<8x128xf32>
    %362 = arith.addf %361, %41 : vector<8x128xf32>
    %cst_122 = arith.constant dense<0.000000e+00> : vector<8x128xf32>
    %363 = tpu.matmul %362, %3, %cst_122 {dimension_numbers = #tpu.dot_dimension_numbers<[1], [0], [0], [1], [0, 0, 1, 1], [], []>} : vector<8x128xf32>, vector<128x128xf32>, vector<8x128xf32> -> vector<8x128xf32>
    %364 = arith.subf %362, %363 : vector<8x128xf32>
    %365 = arith.mulf %364, %364 : vector<8x128xf32>
    %cst_123 = arith.constant dense<0.000000e+00> : vector<8x128xf32>
    %366 = tpu.matmul %365, %3, %cst_123 {dimension_numbers = #tpu.dot_dimension_numbers<[1], [0], [0], [1], [0, 0, 1, 1], [], []>} : vector<8x128xf32>, vector<128x128xf32>, vector<8x128xf32> -> vector<8x128xf32>
    %cst_124 = arith.constant 1.000000e-03 : f32
    %367 = vector.broadcast %cst_124 : f32 to vector<8x128xf32>
    %368 = arith.addf %366, %367 : vector<8x128xf32>
    %369 = math.rsqrt %368 : vector<8x128xf32>
    %370 = arith.mulf %364, %369 : vector<8x128xf32>
    %371 = arith.mulf %370, %44 : vector<8x128xf32>
    %372 = arith.addf %371, %47 : vector<8x128xf32>
    %373 = arith.negf %372 : vector<8x128xf32>
    %374 = math.exp %373 : vector<8x128xf32>
    %cst_125 = arith.constant 1.000000e+00 : f32
    %375 = vector.broadcast %cst_125 : f32 to vector<8x128xf32>
    %376 = arith.addf %375, %374 : vector<8x128xf32>
    %377 = arith.divf %375, %376 : vector<8x128xf32>
    %378 = vector.extract_strided_slice %377 {offsets = [0, 0], sizes = [8, 32], strides = [1, 1]} : vector<8x128xf32> to vector<8x32xf32>
    %379 = vector.extract_strided_slice %372 {offsets = [0, 32], sizes = [8, 32], strides = [1, 1]} : vector<8x128xf32> to vector<8x32xf32>
    %380 = math.tanh %379 : vector<8x32xf32>
    %381 = vector.extract_strided_slice %377 {offsets = [0, 64], sizes = [8, 32], strides = [1, 1]} : vector<8x128xf32> to vector<8x32xf32>
    %382 = vector.extract_strided_slice %377 {offsets = [0, 96], sizes = [8, 32], strides = [1, 1]} : vector<8x128xf32> to vector<8x32xf32>
    %383 = arith.mulf %301, %381 : vector<8x32xf32>
    %384 = arith.mulf %378, %380 : vector<8x32xf32>
    %385 = arith.addf %383, %384 : vector<8x32xf32>
    %cst_126 = arith.constant dense<0.000000e+00> : vector<8xf32>
    %386 = vector.multi_reduction <add>, %385, %cst_126 [1] : vector<8x32xf32> to vector<8xf32>
    %387 = vector.shape_cast %386 : vector<8xf32> to vector<8x1xf32>
    %cst_127 = arith.constant 3.200000e+01 : f32
    %388 = vector.broadcast %cst_127 : f32 to vector<8x1xf32>
    %389 = arith.divf %387, %388 : vector<8x1xf32>
    %390 = vector.broadcast %389 : vector<8x1xf32> to vector<8x32xf32>
    %391 = arith.subf %385, %390 : vector<8x32xf32>
    %392 = arith.mulf %391, %391 : vector<8x32xf32>
    %cst_128 = arith.constant dense<0.000000e+00> : vector<8xf32>
    %393 = vector.multi_reduction <add>, %392, %cst_128 [1] : vector<8x32xf32> to vector<8xf32>
    %394 = vector.shape_cast %393 : vector<8xf32> to vector<8x1xf32>
    %cst_129 = arith.constant 3.200000e+01 : f32
    %395 = vector.broadcast %cst_129 : f32 to vector<8x1xf32>
    %396 = arith.divf %394, %395 : vector<8x1xf32>
    %397 = vector.broadcast %389 : vector<8x1xf32> to vector<8x32xf32>
    %398 = arith.subf %385, %397 : vector<8x32xf32>
    %cst_130 = arith.constant 1.000000e-03 : f32
    %399 = vector.broadcast %cst_130 : f32 to vector<8x1xf32>
    %400 = arith.addf %396, %399 : vector<8x1xf32>
    %401 = math.rsqrt %400 : vector<8x1xf32>
    %402 = vector.broadcast %401 : vector<8x1xf32> to vector<8x32xf32>
    %403 = arith.mulf %398, %402 : vector<8x32xf32>
    %404 = arith.mulf %403, %50 : vector<8x32xf32>
    %405 = arith.addf %404, %53 : vector<8x32xf32>
    %406 = math.tanh %405 : vector<8x32xf32>
    %407 = arith.mulf %406, %382 : vector<8x32xf32>
    %cst_131 = arith.constant 0.899999976 : f32
    %408 = vector.broadcast %cst_131 : f32 to vector<8x32xf32>
    %409 = arith.mulf %408, %407 : vector<8x32xf32>
    %cst_132 = arith.constant 1.000000e-01 : f32
    %410 = vector.broadcast %cst_132 : f32 to vector<8x32xf32>
    %411 = arith.mulf %410, %296 : vector<8x32xf32>
    %412 = arith.addf %409, %411 : vector<8x32xf32>
    %cst_133 = arith.constant 5.000000e-01 : f32
    %413 = vector.broadcast %cst_133 : f32 to vector<8x32xf32>
    %414 = arith.mulf %413, %385 : vector<8x32xf32>
    %cst_134 = arith.constant 5.000000e-01 : f32
    %415 = vector.broadcast %cst_134 : f32 to vector<8x32xf32>
    %416 = arith.mulf %415, %301 : vector<8x32xf32>
    %417 = arith.addf %414, %416 : vector<8x32xf32>
    %cst_135 = arith.constant dense<0.000000e+00> : vector<8x128xf32>
    %418 = tpu.matmul %412, %5, %cst_135 {dimension_numbers = #tpu.dot_dimension_numbers<[1], [0], [0], [1], [0, 0, 1, 1], [], []>} : vector<8x32xf32>, vector<32x128xf32>, vector<8x128xf32> -> vector<8x128xf32>
    %419 = arith.addf %418, %8 : vector<8x128xf32>
    %420 = arith.index_cast %c1_i32 : i32 to index
    %c0_136 = arith.constant 0 : index
    %c0_137 = arith.constant 0 : index
    %421 = vector.load %arg14[%420, %c0_136, %c0_137] : memref<8x8x128xf32, #tpu.memory_space<vmem>>, vector<1x8x128xf32>
    %422 = vector.shape_cast %421 : vector<1x8x128xf32> to vector<8x128xf32>
    %423 = vector.shape_cast %419 : vector<8x128xf32> to vector<1x8x128xf32>
    tpu.vector_store %arg14[%420, %c0_136, %c0_137], %423 {strides = array<i32>} : memref<8x8x128xf32, #tpu.memory_space<vmem>>, vector<1x8x128xf32>,
    %c2_i32 = arith.constant 2 : i32
    %424 = arith.index_cast %c2_i32 : i32 to index
    %c0_138 = arith.constant 0 : index
    %c0_139 = arith.constant 0 : index
    %425 = vector.load %arg0[%424, %c0_138, %c0_139] : memref<8x8x16xf32, #tpu.memory_space<vmem>>, vector<1x8x16xf32>
    %426 = vector.shape_cast %425 : vector<1x8x16xf32> to vector<8x16xf32>
    %427 = tpu.concatenate %426, %412 in 1 : vector<8x16xf32>, vector<8x32xf32> -> vector<8x48xf32>
    %cst_140 = arith.constant dense<0.000000e+00> : vector<8x128xf32>
    %428 = tpu.matmul %427, %0, %cst_140 {dimension_numbers = #tpu.dot_dimension_numbers<[1], [0], [0], [1], [0, 0, 1, 1], [], []>} : vector<8x48xf32>, vector<48x128xf32>, vector<8x128xf32> -> vector<8x128xf32>
    %429 = arith.addf %428, %11 : vector<8x128xf32>
    %cst_141 = arith.constant dense<0.000000e+00> : vector<8x128xf32>
    %430 = tpu.matmul %429, %3, %cst_141 {dimension_numbers = #tpu.dot_dimension_numbers<[1], [0], [0], [1], [0, 0, 1, 1], [], []>} : vector<8x128xf32>, vector<128x128xf32>, vector<8x128xf32> -> vector<8x128xf32>
    %431 = arith.subf %429, %430 : vector<8x128xf32>
    %432 = arith.mulf %431, %431 : vector<8x128xf32>
    %cst_142 = arith.constant dense<0.000000e+00> : vector<8x128xf32>
    %433 = tpu.matmul %432, %3, %cst_142 {dimension_numbers = #tpu.dot_dimension_numbers<[1], [0], [0], [1], [0, 0, 1, 1], [], []>} : vector<8x128xf32>, vector<128x128xf32>, vector<8x128xf32> -> vector<8x128xf32>
    %cst_143 = arith.constant 1.000000e-03 : f32
    %434 = vector.broadcast %cst_143 : f32 to vector<8x128xf32>
    %435 = arith.addf %433, %434 : vector<8x128xf32>
    %436 = math.rsqrt %435 : vector<8x128xf32>
    %437 = arith.mulf %431, %436 : vector<8x128xf32>
    %438 = arith.mulf %437, %14 : vector<8x128xf32>
    %439 = arith.addf %438, %17 : vector<8x128xf32>
    %440 = arith.negf %439 : vector<8x128xf32>
    %441 = math.exp %440 : vector<8x128xf32>
    %cst_144 = arith.constant 1.000000e+00 : f32
    %442 = vector.broadcast %cst_144 : f32 to vector<8x128xf32>
    %443 = arith.addf %442, %441 : vector<8x128xf32>
    %444 = arith.divf %442, %443 : vector<8x128xf32>
    %445 = vector.extract_strided_slice %444 {offsets = [0, 0], sizes = [8, 32], strides = [1, 1]} : vector<8x128xf32> to vector<8x32xf32>
    %446 = vector.extract_strided_slice %439 {offsets = [0, 32], sizes = [8, 32], strides = [1, 1]} : vector<8x128xf32> to vector<8x32xf32>
    %447 = math.tanh %446 : vector<8x32xf32>
    %448 = vector.extract_strided_slice %444 {offsets = [0, 64], sizes = [8, 32], strides = [1, 1]} : vector<8x128xf32> to vector<8x32xf32>
    %449 = vector.extract_strided_slice %444 {offsets = [0, 96], sizes = [8, 32], strides = [1, 1]} : vector<8x128xf32> to vector<8x32xf32>
    %450 = arith.mulf %417, %448 : vector<8x32xf32>
    %451 = arith.mulf %445, %447 : vector<8x32xf32>
    %452 = arith.addf %450, %451 : vector<8x32xf32>
    %cst_145 = arith.constant dense<0.000000e+00> : vector<8xf32>
    %453 = vector.multi_reduction <add>, %452, %cst_145 [1] : vector<8x32xf32> to vector<8xf32>
    %454 = vector.shape_cast %453 : vector<8xf32> to vector<8x1xf32>
    %cst_146 = arith.constant 3.200000e+01 : f32
    %455 = vector.broadcast %cst_146 : f32 to vector<8x1xf32>
    %456 = arith.divf %454, %455 : vector<8x1xf32>
    %457 = vector.broadcast %456 : vector<8x1xf32> to vector<8x32xf32>
    %458 = arith.subf %452, %457 : vector<8x32xf32>
    %459 = arith.mulf %458, %458 : vector<8x32xf32>
    %cst_147 = arith.constant dense<0.000000e+00> : vector<8xf32>
    %460 = vector.multi_reduction <add>, %459, %cst_147 [1] : vector<8x32xf32> to vector<8xf32>
    %461 = vector.shape_cast %460 : vector<8xf32> to vector<8x1xf32>
    %cst_148 = arith.constant 3.200000e+01 : f32
    %462 = vector.broadcast %cst_148 : f32 to vector<8x1xf32>
    %463 = arith.divf %461, %462 : vector<8x1xf32>
    %464 = vector.broadcast %456 : vector<8x1xf32> to vector<8x32xf32>
    %465 = arith.subf %452, %464 : vector<8x32xf32>
    %cst_149 = arith.constant 1.000000e-03 : f32
    %466 = vector.broadcast %cst_149 : f32 to vector<8x1xf32>
    %467 = arith.addf %463, %466 : vector<8x1xf32>
    %468 = math.rsqrt %467 : vector<8x1xf32>
    %469 = vector.broadcast %468 : vector<8x1xf32> to vector<8x32xf32>
    %470 = arith.mulf %465, %469 : vector<8x32xf32>
    %471 = arith.mulf %470, %20 : vector<8x32xf32>
    %472 = arith.addf %471, %23 : vector<8x32xf32>
    %473 = math.tanh %472 : vector<8x32xf32>
    %474 = arith.mulf %473, %449 : vector<8x32xf32>
    %cst_150 = arith.constant 0.899999976 : f32
    %475 = vector.broadcast %cst_150 : f32 to vector<8x32xf32>
    %476 = arith.mulf %475, %474 : vector<8x32xf32>
    %cst_151 = arith.constant 1.000000e-01 : f32
    %477 = vector.broadcast %cst_151 : f32 to vector<8x32xf32>
    %478 = arith.mulf %477, %412 : vector<8x32xf32>
    %479 = arith.addf %476, %478 : vector<8x32xf32>
    %cst_152 = arith.constant 5.000000e-01 : f32
    %480 = vector.broadcast %cst_152 : f32 to vector<8x32xf32>
    %481 = arith.mulf %480, %452 : vector<8x32xf32>
    %cst_153 = arith.constant 5.000000e-01 : f32
    %482 = vector.broadcast %cst_153 : f32 to vector<8x32xf32>
    %483 = arith.mulf %482, %417 : vector<8x32xf32>
    %484 = arith.addf %481, %483 : vector<8x32xf32>
    %485 = tpu.concatenate %479, %354 in 1 : vector<8x32xf32>, vector<8x16xf32> -> vector<8x48xf32>
    %cst_154 = arith.constant dense<0.000000e+00> : vector<8x64xf32>
    %486 = tpu.matmul %485, %1, %cst_154 {dimension_numbers = #tpu.dot_dimension_numbers<[1], [0], [0], [1], [0, 0, 1, 1], [], []>} : vector<8x48xf32>, vector<48x64xf32>, vector<8x64xf32> -> vector<8x64xf32>
    %487 = arith.addf %486, %26 : vector<8x64xf32>
    %cst_155 = arith.constant dense<0.000000e+00> : vector<8x64xf32>
    %488 = tpu.matmul %487, %4, %cst_155 {dimension_numbers = #tpu.dot_dimension_numbers<[1], [0], [0], [1], [0, 0, 1, 1], [], []>} : vector<8x64xf32>, vector<64x64xf32>, vector<8x64xf32> -> vector<8x64xf32>
    %489 = arith.subf %487, %488 : vector<8x64xf32>
    %490 = arith.mulf %489, %489 : vector<8x64xf32>
    %cst_156 = arith.constant dense<0.000000e+00> : vector<8x64xf32>
    %491 = tpu.matmul %490, %4, %cst_156 {dimension_numbers = #tpu.dot_dimension_numbers<[1], [0], [0], [1], [0, 0, 1, 1], [], []>} : vector<8x64xf32>, vector<64x64xf32>, vector<8x64xf32> -> vector<8x64xf32>
    %cst_157 = arith.constant 1.000000e-03 : f32
    %492 = vector.broadcast %cst_157 : f32 to vector<8x64xf32>
    %493 = arith.addf %491, %492 : vector<8x64xf32>
    %494 = math.rsqrt %493 : vector<8x64xf32>
    %495 = arith.mulf %489, %494 : vector<8x64xf32>
    %496 = arith.mulf %495, %29 : vector<8x64xf32>
    %497 = arith.addf %496, %32 : vector<8x64xf32>
    %498 = arith.negf %497 : vector<8x64xf32>
    %499 = math.exp %498 : vector<8x64xf32>
    %cst_158 = arith.constant 1.000000e+00 : f32
    %500 = vector.broadcast %cst_158 : f32 to vector<8x64xf32>
    %501 = arith.addf %500, %499 : vector<8x64xf32>
    %502 = arith.divf %500, %501 : vector<8x64xf32>
    %503 = vector.extract_strided_slice %502 {offsets = [0, 0], sizes = [8, 16], strides = [1, 1]} : vector<8x64xf32> to vector<8x16xf32>
    %504 = vector.extract_strided_slice %497 {offsets = [0, 16], sizes = [8, 16], strides = [1, 1]} : vector<8x64xf32> to vector<8x16xf32>
    %505 = math.tanh %504 : vector<8x16xf32>
    %506 = vector.extract_strided_slice %502 {offsets = [0, 32], sizes = [8, 16], strides = [1, 1]} : vector<8x64xf32> to vector<8x16xf32>
    %507 = vector.extract_strided_slice %502 {offsets = [0, 48], sizes = [8, 16], strides = [1, 1]} : vector<8x64xf32> to vector<8x16xf32>
    %508 = arith.mulf %359, %506 : vector<8x16xf32>
    %509 = arith.mulf %503, %505 : vector<8x16xf32>
    %510 = arith.addf %508, %509 : vector<8x16xf32>
    %cst_159 = arith.constant dense<0.000000e+00> : vector<8xf32>
    %511 = vector.multi_reduction <add>, %510, %cst_159 [1] : vector<8x16xf32> to vector<8xf32>
    %512 = vector.shape_cast %511 : vector<8xf32> to vector<8x1xf32>
    %cst_160 = arith.constant 1.600000e+01 : f32
    %513 = vector.broadcast %cst_160 : f32 to vector<8x1xf32>
    %514 = arith.divf %512, %513 : vector<8x1xf32>
    %515 = vector.broadcast %514 : vector<8x1xf32> to vector<8x16xf32>
    %516 = arith.subf %510, %515 : vector<8x16xf32>
    %517 = arith.mulf %516, %516 : vector<8x16xf32>
    %cst_161 = arith.constant dense<0.000000e+00> : vector<8xf32>
    %518 = vector.multi_reduction <add>, %517, %cst_161 [1] : vector<8x16xf32> to vector<8xf32>
    %519 = vector.shape_cast %518 : vector<8xf32> to vector<8x1xf32>
    %cst_162 = arith.constant 1.600000e+01 : f32
    %520 = vector.broadcast %cst_162 : f32 to vector<8x1xf32>
    %521 = arith.divf %519, %520 : vector<8x1xf32>
    %522 = vector.broadcast %514 : vector<8x1xf32> to vector<8x16xf32>
    %523 = arith.subf %510, %522 : vector<8x16xf32>
    %cst_163 = arith.constant 1.000000e-03 : f32
    %524 = vector.broadcast %cst_163 : f32 to vector<8x1xf32>
    %525 = arith.addf %521, %524 : vector<8x1xf32>
    %526 = math.rsqrt %525 : vector<8x1xf32>
    %527 = vector.broadcast %526 : vector<8x1xf32> to vector<8x16xf32>
    %528 = arith.mulf %523, %527 : vector<8x16xf32>
    %529 = arith.mulf %528, %35 : vector<8x16xf32>
    %530 = arith.addf %529, %38 : vector<8x16xf32>
    %531 = math.tanh %530 : vector<8x16xf32>
    %532 = arith.mulf %531, %507 : vector<8x16xf32>
    %cst_164 = arith.constant 0.899999976 : f32
    %533 = vector.broadcast %cst_164 : f32 to vector<8x16xf32>
    %534 = arith.mulf %533, %532 : vector<8x16xf32>
    %cst_165 = arith.constant 1.000000e-01 : f32
    %535 = vector.broadcast %cst_165 : f32 to vector<8x16xf32>
    %536 = arith.mulf %535, %354 : vector<8x16xf32>
    %537 = arith.addf %534, %536 : vector<8x16xf32>
    %cst_166 = arith.constant 5.000000e-01 : f32
    %538 = vector.broadcast %cst_166 : f32 to vector<8x16xf32>
    %539 = arith.mulf %538, %510 : vector<8x16xf32>
    %cst_167 = arith.constant 5.000000e-01 : f32
    %540 = vector.broadcast %cst_167 : f32 to vector<8x16xf32>
    %541 = arith.mulf %540, %359 : vector<8x16xf32>
    %542 = arith.addf %539, %541 : vector<8x16xf32>
    %543 = tpu.concatenate %537, %479 in 1 : vector<8x16xf32>, vector<8x32xf32> -> vector<8x48xf32>
    %cst_168 = arith.constant dense<0.000000e+00> : vector<8x128xf32>
    %544 = tpu.matmul %543, %2, %cst_168 {dimension_numbers = #tpu.dot_dimension_numbers<[1], [0], [0], [1], [0, 0, 1, 1], [], []>} : vector<8x48xf32>, vector<48x128xf32>, vector<8x128xf32> -> vector<8x128xf32>
    %545 = arith.addf %544, %41 : vector<8x128xf32>
    %cst_169 = arith.constant dense<0.000000e+00> : vector<8x128xf32>
    %546 = tpu.matmul %545, %3, %cst_169 {dimension_numbers = #tpu.dot_dimension_numbers<[1], [0], [0], [1], [0, 0, 1, 1], [], []>} : vector<8x128xf32>, vector<128x128xf32>, vector<8x128xf32> -> vector<8x128xf32>
    %547 = arith.subf %545, %546 : vector<8x128xf32>
    %548 = arith.mulf %547, %547 : vector<8x128xf32>
    %cst_170 = arith.constant dense<0.000000e+00> : vector<8x128xf32>
    %549 = tpu.matmul %548, %3, %cst_170 {dimension_numbers = #tpu.dot_dimension_numbers<[1], [0], [0], [1], [0, 0, 1, 1], [], []>} : vector<8x128xf32>, vector<128x128xf32>, vector<8x128xf32> -> vector<8x128xf32>
    %cst_171 = arith.constant 1.000000e-03 : f32
    %550 = vector.broadcast %cst_171 : f32 to vector<8x128xf32>
    %551 = arith.addf %549, %550 : vector<8x128xf32>
    %552 = math.rsqrt %551 : vector<8x128xf32>
    %553 = arith.mulf %547, %552 : vector<8x128xf32>
    %554 = arith.mulf %553, %44 : vector<8x128xf32>
    %555 = arith.addf %554, %47 : vector<8x128xf32>
    %556 = arith.negf %555 : vector<8x128xf32>
    %557 = math.exp %556 : vector<8x128xf32>
    %cst_172 = arith.constant 1.000000e+00 : f32
    %558 = vector.broadcast %cst_172 : f32 to vector<8x128xf32>
    %559 = arith.addf %558, %557 : vector<8x128xf32>
    %560 = arith.divf %558, %559 : vector<8x128xf32>
    %561 = vector.extract_strided_slice %560 {offsets = [0, 0], sizes = [8, 32], strides = [1, 1]} : vector<8x128xf32> to vector<8x32xf32>
    %562 = vector.extract_strided_slice %555 {offsets = [0, 32], sizes = [8, 32], strides = [1, 1]} : vector<8x128xf32> to vector<8x32xf32>
    %563 = math.tanh %562 : vector<8x32xf32>
    %564 = vector.extract_strided_slice %560 {offsets = [0, 64], sizes = [8, 32], strides = [1, 1]} : vector<8x128xf32> to vector<8x32xf32>
    %565 = vector.extract_strided_slice %560 {offsets = [0, 96], sizes = [8, 32], strides = [1, 1]} : vector<8x128xf32> to vector<8x32xf32>
    %566 = arith.mulf %484, %564 : vector<8x32xf32>
    %567 = arith.mulf %561, %563 : vector<8x32xf32>
    %568 = arith.addf %566, %567 : vector<8x32xf32>
    %cst_173 = arith.constant dense<0.000000e+00> : vector<8xf32>
    %569 = vector.multi_reduction <add>, %568, %cst_173 [1] : vector<8x32xf32> to vector<8xf32>
    %570 = vector.shape_cast %569 : vector<8xf32> to vector<8x1xf32>
    %cst_174 = arith.constant 3.200000e+01 : f32
    %571 = vector.broadcast %cst_174 : f32 to vector<8x1xf32>
    %572 = arith.divf %570, %571 : vector<8x1xf32>
    %573 = vector.broadcast %572 : vector<8x1xf32> to vector<8x32xf32>
    %574 = arith.subf %568, %573 : vector<8x32xf32>
    %575 = arith.mulf %574, %574 : vector<8x32xf32>
    %cst_175 = arith.constant dense<0.000000e+00> : vector<8xf32>
    %576 = vector.multi_reduction <add>, %575, %cst_175 [1] : vector<8x32xf32> to vector<8xf32>
    %577 = vector.shape_cast %576 : vector<8xf32> to vector<8x1xf32>
    %cst_176 = arith.constant 3.200000e+01 : f32
    %578 = vector.broadcast %cst_176 : f32 to vector<8x1xf32>
    %579 = arith.divf %577, %578 : vector<8x1xf32>
    %580 = vector.broadcast %572 : vector<8x1xf32> to vector<8x32xf32>
    %581 = arith.subf %568, %580 : vector<8x32xf32>
    %cst_177 = arith.constant 1.000000e-03 : f32
    %582 = vector.broadcast %cst_177 : f32 to vector<8x1xf32>
    %583 = arith.addf %579, %582 : vector<8x1xf32>
    %584 = math.rsqrt %583 : vector<8x1xf32>
    %585 = vector.broadcast %584 : vector<8x1xf32> to vector<8x32xf32>
    %586 = arith.mulf %581, %585 : vector<8x32xf32>
    %587 = arith.mulf %586, %50 : vector<8x32xf32>
    %588 = arith.addf %587, %53 : vector<8x32xf32>
    %589 = math.tanh %588 : vector<8x32xf32>
    %590 = arith.mulf %589, %565 : vector<8x32xf32>
    %cst_178 = arith.constant 0.899999976 : f32
    %591 = vector.broadcast %cst_178 : f32 to vector<8x32xf32>
    %592 = arith.mulf %591, %590 : vector<8x32xf32>
    %cst_179 = arith.constant 1.000000e-01 : f32
    %593 = vector.broadcast %cst_179 : f32 to vector<8x32xf32>
    %594 = arith.mulf %593, %479 : vector<8x32xf32>
    %595 = arith.addf %592, %594 : vector<8x32xf32>
    %cst_180 = arith.constant 5.000000e-01 : f32
    %596 = vector.broadcast %cst_180 : f32 to vector<8x32xf32>
    %597 = arith.mulf %596, %568 : vector<8x32xf32>
    %cst_181 = arith.constant 5.000000e-01 : f32
    %598 = vector.broadcast %cst_181 : f32 to vector<8x32xf32>
    %599 = arith.mulf %598, %484 : vector<8x32xf32>
    %600 = arith.addf %597, %599 : vector<8x32xf32>
    %cst_182 = arith.constant dense<0.000000e+00> : vector<8x128xf32>
    %601 = tpu.matmul %595, %5, %cst_182 {dimension_numbers = #tpu.dot_dimension_numbers<[1], [0], [0], [1], [0, 0, 1, 1], [], []>} : vector<8x32xf32>, vector<32x128xf32>, vector<8x128xf32> -> vector<8x128xf32>
    %602 = arith.addf %601, %8 : vector<8x128xf32>
    %603 = arith.index_cast %c2_i32 : i32 to index
    %c0_183 = arith.constant 0 : index
    %c0_184 = arith.constant 0 : index
    %604 = vector.load %arg14[%603, %c0_183, %c0_184] : memref<8x8x128xf32, #tpu.memory_space<vmem>>, vector<1x8x128xf32>
    %605 = vector.shape_cast %604 : vector<1x8x128xf32> to vector<8x128xf32>
    %606 = vector.shape_cast %602 : vector<8x128xf32> to vector<1x8x128xf32>
    tpu.vector_store %arg14[%603, %c0_183, %c0_184], %606 {strides = array<i32>} : memref<8x8x128xf32, #tpu.memory_space<vmem>>, vector<1x8x128xf32>,
    %c3_i32 = arith.constant 3 : i32
    %607 = arith.index_cast %c3_i32 : i32 to index
    %c0_185 = arith.constant 0 : index
    %c0_186 = arith.constant 0 : index
    %608 = vector.load %arg0[%607, %c0_185, %c0_186] : memref<8x8x16xf32, #tpu.memory_space<vmem>>, vector<1x8x16xf32>
    %609 = vector.shape_cast %608 : vector<1x8x16xf32> to vector<8x16xf32>
    %610 = tpu.concatenate %609, %595 in 1 : vector<8x16xf32>, vector<8x32xf32> -> vector<8x48xf32>
    %cst_187 = arith.constant dense<0.000000e+00> : vector<8x128xf32>
    %611 = tpu.matmul %610, %0, %cst_187 {dimension_numbers = #tpu.dot_dimension_numbers<[1], [0], [0], [1], [0, 0, 1, 1], [], []>} : vector<8x48xf32>, vector<48x128xf32>, vector<8x128xf32> -> vector<8x128xf32>
    %612 = arith.addf %611, %11 : vector<8x128xf32>
    %cst_188 = arith.constant dense<0.000000e+00> : vector<8x128xf32>
    %613 = tpu.matmul %612, %3, %cst_188 {dimension_numbers = #tpu.dot_dimension_numbers<[1], [0], [0], [1], [0, 0, 1, 1], [], []>} : vector<8x128xf32>, vector<128x128xf32>, vector<8x128xf32> -> vector<8x128xf32>
    %614 = arith.subf %612, %613 : vector<8x128xf32>
    %615 = arith.mulf %614, %614 : vector<8x128xf32>
    %cst_189 = arith.constant dense<0.000000e+00> : vector<8x128xf32>
    %616 = tpu.matmul %615, %3, %cst_189 {dimension_numbers = #tpu.dot_dimension_numbers<[1], [0], [0], [1], [0, 0, 1, 1], [], []>} : vector<8x128xf32>, vector<128x128xf32>, vector<8x128xf32> -> vector<8x128xf32>
    %cst_190 = arith.constant 1.000000e-03 : f32
    %617 = vector.broadcast %cst_190 : f32 to vector<8x128xf32>
    %618 = arith.addf %616, %617 : vector<8x128xf32>
    %619 = math.rsqrt %618 : vector<8x128xf32>
    %620 = arith.mulf %614, %619 : vector<8x128xf32>
    %621 = arith.mulf %620, %14 : vector<8x128xf32>
    %622 = arith.addf %621, %17 : vector<8x128xf32>
    %623 = arith.negf %622 : vector<8x128xf32>
    %624 = math.exp %623 : vector<8x128xf32>
    %cst_191 = arith.constant 1.000000e+00 : f32
    %625 = vector.broadcast %cst_191 : f32 to vector<8x128xf32>
    %626 = arith.addf %625, %624 : vector<8x128xf32>
    %627 = arith.divf %625, %626 : vector<8x128xf32>
    %628 = vector.extract_strided_slice %627 {offsets = [0, 0], sizes = [8, 32], strides = [1, 1]} : vector<8x128xf32> to vector<8x32xf32>
    %629 = vector.extract_strided_slice %622 {offsets = [0, 32], sizes = [8, 32], strides = [1, 1]} : vector<8x128xf32> to vector<8x32xf32>
    %630 = math.tanh %629 : vector<8x32xf32>
    %631 = vector.extract_strided_slice %627 {offsets = [0, 64], sizes = [8, 32], strides = [1, 1]} : vector<8x128xf32> to vector<8x32xf32>
    %632 = vector.extract_strided_slice %627 {offsets = [0, 96], sizes = [8, 32], strides = [1, 1]} : vector<8x128xf32> to vector<8x32xf32>
    %633 = arith.mulf %600, %631 : vector<8x32xf32>
    %634 = arith.mulf %628, %630 : vector<8x32xf32>
    %635 = arith.addf %633, %634 : vector<8x32xf32>
    %cst_192 = arith.constant dense<0.000000e+00> : vector<8xf32>
    %636 = vector.multi_reduction <add>, %635, %cst_192 [1] : vector<8x32xf32> to vector<8xf32>
    %637 = vector.shape_cast %636 : vector<8xf32> to vector<8x1xf32>
    %cst_193 = arith.constant 3.200000e+01 : f32
    %638 = vector.broadcast %cst_193 : f32 to vector<8x1xf32>
    %639 = arith.divf %637, %638 : vector<8x1xf32>
    %640 = vector.broadcast %639 : vector<8x1xf32> to vector<8x32xf32>
    %641 = arith.subf %635, %640 : vector<8x32xf32>
    %642 = arith.mulf %641, %641 : vector<8x32xf32>
    %cst_194 = arith.constant dense<0.000000e+00> : vector<8xf32>
    %643 = vector.multi_reduction <add>, %642, %cst_194 [1] : vector<8x32xf32> to vector<8xf32>
    %644 = vector.shape_cast %643 : vector<8xf32> to vector<8x1xf32>
    %cst_195 = arith.constant 3.200000e+01 : f32
    %645 = vector.broadcast %cst_195 : f32 to vector<8x1xf32>
    %646 = arith.divf %644, %645 : vector<8x1xf32>
    %647 = vector.broadcast %639 : vector<8x1xf32> to vector<8x32xf32>
    %648 = arith.subf %635, %647 : vector<8x32xf32>
    %cst_196 = arith.constant 1.000000e-03 : f32
    %649 = vector.broadcast %cst_196 : f32 to vector<8x1xf32>
    %650 = arith.addf %646, %649 : vector<8x1xf32>
    %651 = math.rsqrt %650 : vector<8x1xf32>
    %652 = vector.broadcast %651 : vector<8x1xf32> to vector<8x32xf32>
    %653 = arith.mulf %648, %652 : vector<8x32xf32>
    %654 = arith.mulf %653, %20 : vector<8x32xf32>
    %655 = arith.addf %654, %23 : vector<8x32xf32>
    %656 = math.tanh %655 : vector<8x32xf32>
    %657 = arith.mulf %656, %632 : vector<8x32xf32>
    %cst_197 = arith.constant 0.899999976 : f32
    %658 = vector.broadcast %cst_197 : f32 to vector<8x32xf32>
    %659 = arith.mulf %658, %657 : vector<8x32xf32>
    %cst_198 = arith.constant 1.000000e-01 : f32
    %660 = vector.broadcast %cst_198 : f32 to vector<8x32xf32>
    %661 = arith.mulf %660, %595 : vector<8x32xf32>
    %662 = arith.addf %659, %661 : vector<8x32xf32>
    %cst_199 = arith.constant 5.000000e-01 : f32
    %663 = vector.broadcast %cst_199 : f32 to vector<8x32xf32>
    %664 = arith.mulf %663, %635 : vector<8x32xf32>
    %cst_200 = arith.constant 5.000000e-01 : f32
    %665 = vector.broadcast %cst_200 : f32 to vector<8x32xf32>
    %666 = arith.mulf %665, %600 : vector<8x32xf32>
    %667 = arith.addf %664, %666 : vector<8x32xf32>
    %668 = tpu.concatenate %662, %537 in 1 : vector<8x32xf32>, vector<8x16xf32> -> vector<8x48xf32>
    %cst_201 = arith.constant dense<0.000000e+00> : vector<8x64xf32>
    %669 = tpu.matmul %668, %1, %cst_201 {dimension_numbers = #tpu.dot_dimension_numbers<[1], [0], [0], [1], [0, 0, 1, 1], [], []>} : vector<8x48xf32>, vector<48x64xf32>, vector<8x64xf32> -> vector<8x64xf32>
    %670 = arith.addf %669, %26 : vector<8x64xf32>
    %cst_202 = arith.constant dense<0.000000e+00> : vector<8x64xf32>
    %671 = tpu.matmul %670, %4, %cst_202 {dimension_numbers = #tpu.dot_dimension_numbers<[1], [0], [0], [1], [0, 0, 1, 1], [], []>} : vector<8x64xf32>, vector<64x64xf32>, vector<8x64xf32> -> vector<8x64xf32>
    %672 = arith.subf %670, %671 : vector<8x64xf32>
    %673 = arith.mulf %672, %672 : vector<8x64xf32>
    %cst_203 = arith.constant dense<0.000000e+00> : vector<8x64xf32>
    %674 = tpu.matmul %673, %4, %cst_203 {dimension_numbers = #tpu.dot_dimension_numbers<[1], [0], [0], [1], [0, 0, 1, 1], [], []>} : vector<8x64xf32>, vector<64x64xf32>, vector<8x64xf32> -> vector<8x64xf32>
    %cst_204 = arith.constant 1.000000e-03 : f32
    %675 = vector.broadcast %cst_204 : f32 to vector<8x64xf32>
    %676 = arith.addf %674, %675 : vector<8x64xf32>
    %677 = math.rsqrt %676 : vector<8x64xf32>
    %678 = arith.mulf %672, %677 : vector<8x64xf32>
    %679 = arith.mulf %678, %29 : vector<8x64xf32>
    %680 = arith.addf %679, %32 : vector<8x64xf32>
    %681 = arith.negf %680 : vector<8x64xf32>
    %682 = math.exp %681 : vector<8x64xf32>
    %cst_205 = arith.constant 1.000000e+00 : f32
    %683 = vector.broadcast %cst_205 : f32 to vector<8x64xf32>
    %684 = arith.addf %683, %682 : vector<8x64xf32>
    %685 = arith.divf %683, %684 : vector<8x64xf32>
    %686 = vector.extract_strided_slice %685 {offsets = [0, 0], sizes = [8, 16], strides = [1, 1]} : vector<8x64xf32> to vector<8x16xf32>
    %687 = vector.extract_strided_slice %680 {offsets = [0, 16], sizes = [8, 16], strides = [1, 1]} : vector<8x64xf32> to vector<8x16xf32>
    %688 = math.tanh %687 : vector<8x16xf32>
    %689 = vector.extract_strided_slice %685 {offsets = [0, 32], sizes = [8, 16], strides = [1, 1]} : vector<8x64xf32> to vector<8x16xf32>
    %690 = vector.extract_strided_slice %685 {offsets = [0, 48], sizes = [8, 16], strides = [1, 1]} : vector<8x64xf32> to vector<8x16xf32>
    %691 = arith.mulf %542, %689 : vector<8x16xf32>
    %692 = arith.mulf %686, %688 : vector<8x16xf32>
    %693 = arith.addf %691, %692 : vector<8x16xf32>
    %cst_206 = arith.constant dense<0.000000e+00> : vector<8xf32>
    %694 = vector.multi_reduction <add>, %693, %cst_206 [1] : vector<8x16xf32> to vector<8xf32>
    %695 = vector.shape_cast %694 : vector<8xf32> to vector<8x1xf32>
    %cst_207 = arith.constant 1.600000e+01 : f32
    %696 = vector.broadcast %cst_207 : f32 to vector<8x1xf32>
    %697 = arith.divf %695, %696 : vector<8x1xf32>
    %698 = vector.broadcast %697 : vector<8x1xf32> to vector<8x16xf32>
    %699 = arith.subf %693, %698 : vector<8x16xf32>
    %700 = arith.mulf %699, %699 : vector<8x16xf32>
    %cst_208 = arith.constant dense<0.000000e+00> : vector<8xf32>
    %701 = vector.multi_reduction <add>, %700, %cst_208 [1] : vector<8x16xf32> to vector<8xf32>
    %702 = vector.shape_cast %701 : vector<8xf32> to vector<8x1xf32>
    %cst_209 = arith.constant 1.600000e+01 : f32
    %703 = vector.broadcast %cst_209 : f32 to vector<8x1xf32>
    %704 = arith.divf %702, %703 : vector<8x1xf32>
    %705 = vector.broadcast %697 : vector<8x1xf32> to vector<8x16xf32>
    %706 = arith.subf %693, %705 : vector<8x16xf32>
    %cst_210 = arith.constant 1.000000e-03 : f32
    %707 = vector.broadcast %cst_210 : f32 to vector<8x1xf32>
    %708 = arith.addf %704, %707 : vector<8x1xf32>
    %709 = math.rsqrt %708 : vector<8x1xf32>
    %710 = vector.broadcast %709 : vector<8x1xf32> to vector<8x16xf32>
    %711 = arith.mulf %706, %710 : vector<8x16xf32>
    %712 = arith.mulf %711, %35 : vector<8x16xf32>
    %713 = arith.addf %712, %38 : vector<8x16xf32>
    %714 = math.tanh %713 : vector<8x16xf32>
    %715 = arith.mulf %714, %690 : vector<8x16xf32>
    %cst_211 = arith.constant 0.899999976 : f32
    %716 = vector.broadcast %cst_211 : f32 to vector<8x16xf32>
    %717 = arith.mulf %716, %715 : vector<8x16xf32>
    %cst_212 = arith.constant 1.000000e-01 : f32
    %718 = vector.broadcast %cst_212 : f32 to vector<8x16xf32>
    %719 = arith.mulf %718, %537 : vector<8x16xf32>
    %720 = arith.addf %717, %719 : vector<8x16xf32>
    %cst_213 = arith.constant 5.000000e-01 : f32
    %721 = vector.broadcast %cst_213 : f32 to vector<8x16xf32>
    %722 = arith.mulf %721, %693 : vector<8x16xf32>
    %cst_214 = arith.constant 5.000000e-01 : f32
    %723 = vector.broadcast %cst_214 : f32 to vector<8x16xf32>
    %724 = arith.mulf %723, %542 : vector<8x16xf32>
    %725 = arith.addf %722, %724 : vector<8x16xf32>
    %726 = tpu.concatenate %720, %662 in 1 : vector<8x16xf32>, vector<8x32xf32> -> vector<8x48xf32>
    %cst_215 = arith.constant dense<0.000000e+00> : vector<8x128xf32>
    %727 = tpu.matmul %726, %2, %cst_215 {dimension_numbers = #tpu.dot_dimension_numbers<[1], [0], [0], [1], [0, 0, 1, 1], [], []>} : vector<8x48xf32>, vector<48x128xf32>, vector<8x128xf32> -> vector<8x128xf32>
    %728 = arith.addf %727, %41 : vector<8x128xf32>
    %cst_216 = arith.constant dense<0.000000e+00> : vector<8x128xf32>
    %729 = tpu.matmul %728, %3, %cst_216 {dimension_numbers = #tpu.dot_dimension_numbers<[1], [0], [0], [1], [0, 0, 1, 1], [], []>} : vector<8x128xf32>, vector<128x128xf32>, vector<8x128xf32> -> vector<8x128xf32>
    %730 = arith.subf %728, %729 : vector<8x128xf32>
    %731 = arith.mulf %730, %730 : vector<8x128xf32>
    %cst_217 = arith.constant dense<0.000000e+00> : vector<8x128xf32>
    %732 = tpu.matmul %731, %3, %cst_217 {dimension_numbers = #tpu.dot_dimension_numbers<[1], [0], [0], [1], [0, 0, 1, 1], [], []>} : vector<8x128xf32>, vector<128x128xf32>, vector<8x128xf32> -> vector<8x128xf32>
    %cst_218 = arith.constant 1.000000e-03 : f32
    %733 = vector.broadcast %cst_218 : f32 to vector<8x128xf32>
    %734 = arith.addf %732, %733 : vector<8x128xf32>
    %735 = math.rsqrt %734 : vector<8x128xf32>
    %736 = arith.mulf %730, %735 : vector<8x128xf32>
    %737 = arith.mulf %736, %44 : vector<8x128xf32>
    %738 = arith.addf %737, %47 : vector<8x128xf32>
    %739 = arith.negf %738 : vector<8x128xf32>
    %740 = math.exp %739 : vector<8x128xf32>
    %cst_219 = arith.constant 1.000000e+00 : f32
    %741 = vector.broadcast %cst_219 : f32 to vector<8x128xf32>
    %742 = arith.addf %741, %740 : vector<8x128xf32>
    %743 = arith.divf %741, %742 : vector<8x128xf32>
    %744 = vector.extract_strided_slice %743 {offsets = [0, 0], sizes = [8, 32], strides = [1, 1]} : vector<8x128xf32> to vector<8x32xf32>
    %745 = vector.extract_strided_slice %738 {offsets = [0, 32], sizes = [8, 32], strides = [1, 1]} : vector<8x128xf32> to vector<8x32xf32>
    %746 = math.tanh %745 : vector<8x32xf32>
    %747 = vector.extract_strided_slice %743 {offsets = [0, 64], sizes = [8, 32], strides = [1, 1]} : vector<8x128xf32> to vector<8x32xf32>
    %748 = vector.extract_strided_slice %743 {offsets = [0, 96], sizes = [8, 32], strides = [1, 1]} : vector<8x128xf32> to vector<8x32xf32>
    %749 = arith.mulf %667, %747 : vector<8x32xf32>
    %750 = arith.mulf %744, %746 : vector<8x32xf32>
    %751 = arith.addf %749, %750 : vector<8x32xf32>
    %cst_220 = arith.constant dense<0.000000e+00> : vector<8xf32>
    %752 = vector.multi_reduction <add>, %751, %cst_220 [1] : vector<8x32xf32> to vector<8xf32>
    %753 = vector.shape_cast %752 : vector<8xf32> to vector<8x1xf32>
    %cst_221 = arith.constant 3.200000e+01 : f32
    %754 = vector.broadcast %cst_221 : f32 to vector<8x1xf32>
    %755 = arith.divf %753, %754 : vector<8x1xf32>
    %756 = vector.broadcast %755 : vector<8x1xf32> to vector<8x32xf32>
    %757 = arith.subf %751, %756 : vector<8x32xf32>
    %758 = arith.mulf %757, %757 : vector<8x32xf32>
    %cst_222 = arith.constant dense<0.000000e+00> : vector<8xf32>
    %759 = vector.multi_reduction <add>, %758, %cst_222 [1] : vector<8x32xf32> to vector<8xf32>
    %760 = vector.shape_cast %759 : vector<8xf32> to vector<8x1xf32>
    %cst_223 = arith.constant 3.200000e+01 : f32
    %761 = vector.broadcast %cst_223 : f32 to vector<8x1xf32>
    %762 = arith.divf %760, %761 : vector<8x1xf32>
    %763 = vector.broadcast %755 : vector<8x1xf32> to vector<8x32xf32>
    %764 = arith.subf %751, %763 : vector<8x32xf32>
    %cst_224 = arith.constant 1.000000e-03 : f32
    %765 = vector.broadcast %cst_224 : f32 to vector<8x1xf32>
    %766 = arith.addf %762, %765 : vector<8x1xf32>
    %767 = math.rsqrt %766 : vector<8x1xf32>
    %768 = vector.broadcast %767 : vector<8x1xf32> to vector<8x32xf32>
    %769 = arith.mulf %764, %768 : vector<8x32xf32>
    %770 = arith.mulf %769, %50 : vector<8x32xf32>
    %771 = arith.addf %770, %53 : vector<8x32xf32>
    %772 = math.tanh %771 : vector<8x32xf32>
    %773 = arith.mulf %772, %748 : vector<8x32xf32>
    %cst_225 = arith.constant 0.899999976 : f32
    %774 = vector.broadcast %cst_225 : f32 to vector<8x32xf32>
    %775 = arith.mulf %774, %773 : vector<8x32xf32>
    %cst_226 = arith.constant 1.000000e-01 : f32
    %776 = vector.broadcast %cst_226 : f32 to vector<8x32xf32>
    %777 = arith.mulf %776, %662 : vector<8x32xf32>
    %778 = arith.addf %775, %777 : vector<8x32xf32>
    %cst_227 = arith.constant 5.000000e-01 : f32
    %779 = vector.broadcast %cst_227 : f32 to vector<8x32xf32>
    %780 = arith.mulf %779, %751 : vector<8x32xf32>
    %cst_228 = arith.constant 5.000000e-01 : f32
    %781 = vector.broadcast %cst_228 : f32 to vector<8x32xf32>
    %782 = arith.mulf %781, %667 : vector<8x32xf32>
    %783 = arith.addf %780, %782 : vector<8x32xf32>
    %cst_229 = arith.constant dense<0.000000e+00> : vector<8x128xf32>
    %784 = tpu.matmul %778, %5, %cst_229 {dimension_numbers = #tpu.dot_dimension_numbers<[1], [0], [0], [1], [0, 0, 1, 1], [], []>} : vector<8x32xf32>, vector<32x128xf32>, vector<8x128xf32> -> vector<8x128xf32>
    %785 = arith.addf %784, %8 : vector<8x128xf32>
    %786 = arith.index_cast %c3_i32 : i32 to index
    %c0_230 = arith.constant 0 : index
    %c0_231 = arith.constant 0 : index
    %787 = vector.load %arg14[%786, %c0_230, %c0_231] : memref<8x8x128xf32, #tpu.memory_space<vmem>>, vector<1x8x128xf32>
    %788 = vector.shape_cast %787 : vector<1x8x128xf32> to vector<8x128xf32>
    %789 = vector.shape_cast %785 : vector<8x128xf32> to vector<1x8x128xf32>
    tpu.vector_store %arg14[%786, %c0_230, %c0_231], %789 {strides = array<i32>} : memref<8x8x128xf32, #tpu.memory_space<vmem>>, vector<1x8x128xf32>,
    %c4_i32 = arith.constant 4 : i32
    %790 = arith.index_cast %c4_i32 : i32 to index
    %c0_232 = arith.constant 0 : index
    %c0_233 = arith.constant 0 : index
    %791 = vector.load %arg0[%790, %c0_232, %c0_233] : memref<8x8x16xf32, #tpu.memory_space<vmem>>, vector<1x8x16xf32>
    %792 = vector.shape_cast %791 : vector<1x8x16xf32> to vector<8x16xf32>
    %793 = tpu.concatenate %792, %778 in 1 : vector<8x16xf32>, vector<8x32xf32> -> vector<8x48xf32>
    %cst_234 = arith.constant dense<0.000000e+00> : vector<8x128xf32>
    %794 = tpu.matmul %793, %0, %cst_234 {dimension_numbers = #tpu.dot_dimension_numbers<[1], [0], [0], [1], [0, 0, 1, 1], [], []>} : vector<8x48xf32>, vector<48x128xf32>, vector<8x128xf32> -> vector<8x128xf32>
    %795 = arith.addf %794, %11 : vector<8x128xf32>
    %cst_235 = arith.constant dense<0.000000e+00> : vector<8x128xf32>
    %796 = tpu.matmul %795, %3, %cst_235 {dimension_numbers = #tpu.dot_dimension_numbers<[1], [0], [0], [1], [0, 0, 1, 1], [], []>} : vector<8x128xf32>, vector<128x128xf32>, vector<8x128xf32> -> vector<8x128xf32>
    %797 = arith.subf %795, %796 : vector<8x128xf32>
    %798 = arith.mulf %797, %797 : vector<8x128xf32>
    %cst_236 = arith.constant dense<0.000000e+00> : vector<8x128xf32>
    %799 = tpu.matmul %798, %3, %cst_236 {dimension_numbers = #tpu.dot_dimension_numbers<[1], [0], [0], [1], [0, 0, 1, 1], [], []>} : vector<8x128xf32>, vector<128x128xf32>, vector<8x128xf32> -> vector<8x128xf32>
    %cst_237 = arith.constant 1.000000e-03 : f32
    %800 = vector.broadcast %cst_237 : f32 to vector<8x128xf32>
    %801 = arith.addf %799, %800 : vector<8x128xf32>
    %802 = math.rsqrt %801 : vector<8x128xf32>
    %803 = arith.mulf %797, %802 : vector<8x128xf32>
    %804 = arith.mulf %803, %14 : vector<8x128xf32>
    %805 = arith.addf %804, %17 : vector<8x128xf32>
    %806 = arith.negf %805 : vector<8x128xf32>
    %807 = math.exp %806 : vector<8x128xf32>
    %cst_238 = arith.constant 1.000000e+00 : f32
    %808 = vector.broadcast %cst_238 : f32 to vector<8x128xf32>
    %809 = arith.addf %808, %807 : vector<8x128xf32>
    %810 = arith.divf %808, %809 : vector<8x128xf32>
    %811 = vector.extract_strided_slice %810 {offsets = [0, 0], sizes = [8, 32], strides = [1, 1]} : vector<8x128xf32> to vector<8x32xf32>
    %812 = vector.extract_strided_slice %805 {offsets = [0, 32], sizes = [8, 32], strides = [1, 1]} : vector<8x128xf32> to vector<8x32xf32>
    %813 = math.tanh %812 : vector<8x32xf32>
    %814 = vector.extract_strided_slice %810 {offsets = [0, 64], sizes = [8, 32], strides = [1, 1]} : vector<8x128xf32> to vector<8x32xf32>
    %815 = vector.extract_strided_slice %810 {offsets = [0, 96], sizes = [8, 32], strides = [1, 1]} : vector<8x128xf32> to vector<8x32xf32>
    %816 = arith.mulf %783, %814 : vector<8x32xf32>
    %817 = arith.mulf %811, %813 : vector<8x32xf32>
    %818 = arith.addf %816, %817 : vector<8x32xf32>
    %cst_239 = arith.constant dense<0.000000e+00> : vector<8xf32>
    %819 = vector.multi_reduction <add>, %818, %cst_239 [1] : vector<8x32xf32> to vector<8xf32>
    %820 = vector.shape_cast %819 : vector<8xf32> to vector<8x1xf32>
    %cst_240 = arith.constant 3.200000e+01 : f32
    %821 = vector.broadcast %cst_240 : f32 to vector<8x1xf32>
    %822 = arith.divf %820, %821 : vector<8x1xf32>
    %823 = vector.broadcast %822 : vector<8x1xf32> to vector<8x32xf32>
    %824 = arith.subf %818, %823 : vector<8x32xf32>
    %825 = arith.mulf %824, %824 : vector<8x32xf32>
    %cst_241 = arith.constant dense<0.000000e+00> : vector<8xf32>
    %826 = vector.multi_reduction <add>, %825, %cst_241 [1] : vector<8x32xf32> to vector<8xf32>
    %827 = vector.shape_cast %826 : vector<8xf32> to vector<8x1xf32>
    %cst_242 = arith.constant 3.200000e+01 : f32
    %828 = vector.broadcast %cst_242 : f32 to vector<8x1xf32>
    %829 = arith.divf %827, %828 : vector<8x1xf32>
    %830 = vector.broadcast %822 : vector<8x1xf32> to vector<8x32xf32>
    %831 = arith.subf %818, %830 : vector<8x32xf32>
    %cst_243 = arith.constant 1.000000e-03 : f32
    %832 = vector.broadcast %cst_243 : f32 to vector<8x1xf32>
    %833 = arith.addf %829, %832 : vector<8x1xf32>
    %834 = math.rsqrt %833 : vector<8x1xf32>
    %835 = vector.broadcast %834 : vector<8x1xf32> to vector<8x32xf32>
    %836 = arith.mulf %831, %835 : vector<8x32xf32>
    %837 = arith.mulf %836, %20 : vector<8x32xf32>
    %838 = arith.addf %837, %23 : vector<8x32xf32>
    %839 = math.tanh %838 : vector<8x32xf32>
    %840 = arith.mulf %839, %815 : vector<8x32xf32>
    %cst_244 = arith.constant 0.899999976 : f32
    %841 = vector.broadcast %cst_244 : f32 to vector<8x32xf32>
    %842 = arith.mulf %841, %840 : vector<8x32xf32>
    %cst_245 = arith.constant 1.000000e-01 : f32
    %843 = vector.broadcast %cst_245 : f32 to vector<8x32xf32>
    %844 = arith.mulf %843, %778 : vector<8x32xf32>
    %845 = arith.addf %842, %844 : vector<8x32xf32>
    %cst_246 = arith.constant 5.000000e-01 : f32
    %846 = vector.broadcast %cst_246 : f32 to vector<8x32xf32>
    %847 = arith.mulf %846, %818 : vector<8x32xf32>
    %cst_247 = arith.constant 5.000000e-01 : f32
    %848 = vector.broadcast %cst_247 : f32 to vector<8x32xf32>
    %849 = arith.mulf %848, %783 : vector<8x32xf32>
    %850 = arith.addf %847, %849 : vector<8x32xf32>
    %851 = tpu.concatenate %845, %720 in 1 : vector<8x32xf32>, vector<8x16xf32> -> vector<8x48xf32>
    %cst_248 = arith.constant dense<0.000000e+00> : vector<8x64xf32>
    %852 = tpu.matmul %851, %1, %cst_248 {dimension_numbers = #tpu.dot_dimension_numbers<[1], [0], [0], [1], [0, 0, 1, 1], [], []>} : vector<8x48xf32>, vector<48x64xf32>, vector<8x64xf32> -> vector<8x64xf32>
    %853 = arith.addf %852, %26 : vector<8x64xf32>
    %cst_249 = arith.constant dense<0.000000e+00> : vector<8x64xf32>
    %854 = tpu.matmul %853, %4, %cst_249 {dimension_numbers = #tpu.dot_dimension_numbers<[1], [0], [0], [1], [0, 0, 1, 1], [], []>} : vector<8x64xf32>, vector<64x64xf32>, vector<8x64xf32> -> vector<8x64xf32>
    %855 = arith.subf %853, %854 : vector<8x64xf32>
    %856 = arith.mulf %855, %855 : vector<8x64xf32>
    %cst_250 = arith.constant dense<0.000000e+00> : vector<8x64xf32>
    %857 = tpu.matmul %856, %4, %cst_250 {dimension_numbers = #tpu.dot_dimension_numbers<[1], [0], [0], [1], [0, 0, 1, 1], [], []>} : vector<8x64xf32>, vector<64x64xf32>, vector<8x64xf32> -> vector<8x64xf32>
    %cst_251 = arith.constant 1.000000e-03 : f32
    %858 = vector.broadcast %cst_251 : f32 to vector<8x64xf32>
    %859 = arith.addf %857, %858 : vector<8x64xf32>
    %860 = math.rsqrt %859 : vector<8x64xf32>
    %861 = arith.mulf %855, %860 : vector<8x64xf32>
    %862 = arith.mulf %861, %29 : vector<8x64xf32>
    %863 = arith.addf %862, %32 : vector<8x64xf32>
    %864 = arith.negf %863 : vector<8x64xf32>
    %865 = math.exp %864 : vector<8x64xf32>
    %cst_252 = arith.constant 1.000000e+00 : f32
    %866 = vector.broadcast %cst_252 : f32 to vector<8x64xf32>
    %867 = arith.addf %866, %865 : vector<8x64xf32>
    %868 = arith.divf %866, %867 : vector<8x64xf32>
    %869 = vector.extract_strided_slice %868 {offsets = [0, 0], sizes = [8, 16], strides = [1, 1]} : vector<8x64xf32> to vector<8x16xf32>
    %870 = vector.extract_strided_slice %863 {offsets = [0, 16], sizes = [8, 16], strides = [1, 1]} : vector<8x64xf32> to vector<8x16xf32>
    %871 = math.tanh %870 : vector<8x16xf32>
    %872 = vector.extract_strided_slice %868 {offsets = [0, 32], sizes = [8, 16], strides = [1, 1]} : vector<8x64xf32> to vector<8x16xf32>
    %873 = vector.extract_strided_slice %868 {offsets = [0, 48], sizes = [8, 16], strides = [1, 1]} : vector<8x64xf32> to vector<8x16xf32>
    %874 = arith.mulf %725, %872 : vector<8x16xf32>
    %875 = arith.mulf %869, %871 : vector<8x16xf32>
    %876 = arith.addf %874, %875 : vector<8x16xf32>
    %cst_253 = arith.constant dense<0.000000e+00> : vector<8xf32>
    %877 = vector.multi_reduction <add>, %876, %cst_253 [1] : vector<8x16xf32> to vector<8xf32>
    %878 = vector.shape_cast %877 : vector<8xf32> to vector<8x1xf32>
    %cst_254 = arith.constant 1.600000e+01 : f32
    %879 = vector.broadcast %cst_254 : f32 to vector<8x1xf32>
    %880 = arith.divf %878, %879 : vector<8x1xf32>
    %881 = vector.broadcast %880 : vector<8x1xf32> to vector<8x16xf32>
    %882 = arith.subf %876, %881 : vector<8x16xf32>
    %883 = arith.mulf %882, %882 : vector<8x16xf32>
    %cst_255 = arith.constant dense<0.000000e+00> : vector<8xf32>
    %884 = vector.multi_reduction <add>, %883, %cst_255 [1] : vector<8x16xf32> to vector<8xf32>
    %885 = vector.shape_cast %884 : vector<8xf32> to vector<8x1xf32>
    %cst_256 = arith.constant 1.600000e+01 : f32
    %886 = vector.broadcast %cst_256 : f32 to vector<8x1xf32>
    %887 = arith.divf %885, %886 : vector<8x1xf32>
    %888 = vector.broadcast %880 : vector<8x1xf32> to vector<8x16xf32>
    %889 = arith.subf %876, %888 : vector<8x16xf32>
    %cst_257 = arith.constant 1.000000e-03 : f32
    %890 = vector.broadcast %cst_257 : f32 to vector<8x1xf32>
    %891 = arith.addf %887, %890 : vector<8x1xf32>
    %892 = math.rsqrt %891 : vector<8x1xf32>
    %893 = vector.broadcast %892 : vector<8x1xf32> to vector<8x16xf32>
    %894 = arith.mulf %889, %893 : vector<8x16xf32>
    %895 = arith.mulf %894, %35 : vector<8x16xf32>
    %896 = arith.addf %895, %38 : vector<8x16xf32>
    %897 = math.tanh %896 : vector<8x16xf32>
    %898 = arith.mulf %897, %873 : vector<8x16xf32>
    %cst_258 = arith.constant 0.899999976 : f32
    %899 = vector.broadcast %cst_258 : f32 to vector<8x16xf32>
    %900 = arith.mulf %899, %898 : vector<8x16xf32>
    %cst_259 = arith.constant 1.000000e-01 : f32
    %901 = vector.broadcast %cst_259 : f32 to vector<8x16xf32>
    %902 = arith.mulf %901, %720 : vector<8x16xf32>
    %903 = arith.addf %900, %902 : vector<8x16xf32>
    %cst_260 = arith.constant 5.000000e-01 : f32
    %904 = vector.broadcast %cst_260 : f32 to vector<8x16xf32>
    %905 = arith.mulf %904, %876 : vector<8x16xf32>
    %cst_261 = arith.constant 5.000000e-01 : f32
    %906 = vector.broadcast %cst_261 : f32 to vector<8x16xf32>
    %907 = arith.mulf %906, %725 : vector<8x16xf32>
    %908 = arith.addf %905, %907 : vector<8x16xf32>
    %909 = tpu.concatenate %903, %845 in 1 : vector<8x16xf32>, vector<8x32xf32> -> vector<8x48xf32>
    %cst_262 = arith.constant dense<0.000000e+00> : vector<8x128xf32>
    %910 = tpu.matmul %909, %2, %cst_262 {dimension_numbers = #tpu.dot_dimension_numbers<[1], [0], [0], [1], [0, 0, 1, 1], [], []>} : vector<8x48xf32>, vector<48x128xf32>, vector<8x128xf32> -> vector<8x128xf32>
    %911 = arith.addf %910, %41 : vector<8x128xf32>
    %cst_263 = arith.constant dense<0.000000e+00> : vector<8x128xf32>
    %912 = tpu.matmul %911, %3, %cst_263 {dimension_numbers = #tpu.dot_dimension_numbers<[1], [0], [0], [1], [0, 0, 1, 1], [], []>} : vector<8x128xf32>, vector<128x128xf32>, vector<8x128xf32> -> vector<8x128xf32>
    %913 = arith.subf %911, %912 : vector<8x128xf32>
    %914 = arith.mulf %913, %913 : vector<8x128xf32>
    %cst_264 = arith.constant dense<0.000000e+00> : vector<8x128xf32>
    %915 = tpu.matmul %914, %3, %cst_264 {dimension_numbers = #tpu.dot_dimension_numbers<[1], [0], [0], [1], [0, 0, 1, 1], [], []>} : vector<8x128xf32>, vector<128x128xf32>, vector<8x128xf32> -> vector<8x128xf32>
    %cst_265 = arith.constant 1.000000e-03 : f32
    %916 = vector.broadcast %cst_265 : f32 to vector<8x128xf32>
    %917 = arith.addf %915, %916 : vector<8x128xf32>
    %918 = math.rsqrt %917 : vector<8x128xf32>
    %919 = arith.mulf %913, %918 : vector<8x128xf32>
    %920 = arith.mulf %919, %44 : vector<8x128xf32>
    %921 = arith.addf %920, %47 : vector<8x128xf32>
    %922 = arith.negf %921 : vector<8x128xf32>
    %923 = math.exp %922 : vector<8x128xf32>
    %cst_266 = arith.constant 1.000000e+00 : f32
    %924 = vector.broadcast %cst_266 : f32 to vector<8x128xf32>
    %925 = arith.addf %924, %923 : vector<8x128xf32>
    %926 = arith.divf %924, %925 : vector<8x128xf32>
    %927 = vector.extract_strided_slice %926 {offsets = [0, 0], sizes = [8, 32], strides = [1, 1]} : vector<8x128xf32> to vector<8x32xf32>
    %928 = vector.extract_strided_slice %921 {offsets = [0, 32], sizes = [8, 32], strides = [1, 1]} : vector<8x128xf32> to vector<8x32xf32>
    %929 = math.tanh %928 : vector<8x32xf32>
    %930 = vector.extract_strided_slice %926 {offsets = [0, 64], sizes = [8, 32], strides = [1, 1]} : vector<8x128xf32> to vector<8x32xf32>
    %931 = vector.extract_strided_slice %926 {offsets = [0, 96], sizes = [8, 32], strides = [1, 1]} : vector<8x128xf32> to vector<8x32xf32>
    %932 = arith.mulf %850, %930 : vector<8x32xf32>
    %933 = arith.mulf %927, %929 : vector<8x32xf32>
    %934 = arith.addf %932, %933 : vector<8x32xf32>
    %cst_267 = arith.constant dense<0.000000e+00> : vector<8xf32>
    %935 = vector.multi_reduction <add>, %934, %cst_267 [1] : vector<8x32xf32> to vector<8xf32>
    %936 = vector.shape_cast %935 : vector<8xf32> to vector<8x1xf32>
    %cst_268 = arith.constant 3.200000e+01 : f32
    %937 = vector.broadcast %cst_268 : f32 to vector<8x1xf32>
    %938 = arith.divf %936, %937 : vector<8x1xf32>
    %939 = vector.broadcast %938 : vector<8x1xf32> to vector<8x32xf32>
    %940 = arith.subf %934, %939 : vector<8x32xf32>
    %941 = arith.mulf %940, %940 : vector<8x32xf32>
    %cst_269 = arith.constant dense<0.000000e+00> : vector<8xf32>
    %942 = vector.multi_reduction <add>, %941, %cst_269 [1] : vector<8x32xf32> to vector<8xf32>
    %943 = vector.shape_cast %942 : vector<8xf32> to vector<8x1xf32>
    %cst_270 = arith.constant 3.200000e+01 : f32
    %944 = vector.broadcast %cst_270 : f32 to vector<8x1xf32>
    %945 = arith.divf %943, %944 : vector<8x1xf32>
    %946 = vector.broadcast %938 : vector<8x1xf32> to vector<8x32xf32>
    %947 = arith.subf %934, %946 : vector<8x32xf32>
    %cst_271 = arith.constant 1.000000e-03 : f32
    %948 = vector.broadcast %cst_271 : f32 to vector<8x1xf32>
    %949 = arith.addf %945, %948 : vector<8x1xf32>
    %950 = math.rsqrt %949 : vector<8x1xf32>
    %951 = vector.broadcast %950 : vector<8x1xf32> to vector<8x32xf32>
    %952 = arith.mulf %947, %951 : vector<8x32xf32>
    %953 = arith.mulf %952, %50 : vector<8x32xf32>
    %954 = arith.addf %953, %53 : vector<8x32xf32>
    %955 = math.tanh %954 : vector<8x32xf32>
    %956 = arith.mulf %955, %931 : vector<8x32xf32>
    %cst_272 = arith.constant 0.899999976 : f32
    %957 = vector.broadcast %cst_272 : f32 to vector<8x32xf32>
    %958 = arith.mulf %957, %956 : vector<8x32xf32>
    %cst_273 = arith.constant 1.000000e-01 : f32
    %959 = vector.broadcast %cst_273 : f32 to vector<8x32xf32>
    %960 = arith.mulf %959, %845 : vector<8x32xf32>
    %961 = arith.addf %958, %960 : vector<8x32xf32>
    %cst_274 = arith.constant 5.000000e-01 : f32
    %962 = vector.broadcast %cst_274 : f32 to vector<8x32xf32>
    %963 = arith.mulf %962, %934 : vector<8x32xf32>
    %cst_275 = arith.constant 5.000000e-01 : f32
    %964 = vector.broadcast %cst_275 : f32 to vector<8x32xf32>
    %965 = arith.mulf %964, %850 : vector<8x32xf32>
    %966 = arith.addf %963, %965 : vector<8x32xf32>
    %cst_276 = arith.constant dense<0.000000e+00> : vector<8x128xf32>
    %967 = tpu.matmul %961, %5, %cst_276 {dimension_numbers = #tpu.dot_dimension_numbers<[1], [0], [0], [1], [0, 0, 1, 1], [], []>} : vector<8x32xf32>, vector<32x128xf32>, vector<8x128xf32> -> vector<8x128xf32>
    %968 = arith.addf %967, %8 : vector<8x128xf32>
    %969 = arith.index_cast %c4_i32 : i32 to index
    %c0_277 = arith.constant 0 : index
    %c0_278 = arith.constant 0 : index
    %970 = vector.load %arg14[%969, %c0_277, %c0_278] : memref<8x8x128xf32, #tpu.memory_space<vmem>>, vector<1x8x128xf32>
    %971 = vector.shape_cast %970 : vector<1x8x128xf32> to vector<8x128xf32>
    %972 = vector.shape_cast %968 : vector<8x128xf32> to vector<1x8x128xf32>
    tpu.vector_store %arg14[%969, %c0_277, %c0_278], %972 {strides = array<i32>} : memref<8x8x128xf32, #tpu.memory_space<vmem>>, vector<1x8x128xf32>,
    %c5_i32 = arith.constant 5 : i32
    %973 = arith.index_cast %c5_i32 : i32 to index
    %c0_279 = arith.constant 0 : index
    %c0_280 = arith.constant 0 : index
    %974 = vector.load %arg0[%973, %c0_279, %c0_280] : memref<8x8x16xf32, #tpu.memory_space<vmem>>, vector<1x8x16xf32>
    %975 = vector.shape_cast %974 : vector<1x8x16xf32> to vector<8x16xf32>
    %976 = tpu.concatenate %975, %961 in 1 : vector<8x16xf32>, vector<8x32xf32> -> vector<8x48xf32>
    %cst_281 = arith.constant dense<0.000000e+00> : vector<8x128xf32>
    %977 = tpu.matmul %976, %0, %cst_281 {dimension_numbers = #tpu.dot_dimension_numbers<[1], [0], [0], [1], [0, 0, 1, 1], [], []>} : vector<8x48xf32>, vector<48x128xf32>, vector<8x128xf32> -> vector<8x128xf32>
    %978 = arith.addf %977, %11 : vector<8x128xf32>
    %cst_282 = arith.constant dense<0.000000e+00> : vector<8x128xf32>
    %979 = tpu.matmul %978, %3, %cst_282 {dimension_numbers = #tpu.dot_dimension_numbers<[1], [0], [0], [1], [0, 0, 1, 1], [], []>} : vector<8x128xf32>, vector<128x128xf32>, vector<8x128xf32> -> vector<8x128xf32>
    %980 = arith.subf %978, %979 : vector<8x128xf32>
    %981 = arith.mulf %980, %980 : vector<8x128xf32>
    %cst_283 = arith.constant dense<0.000000e+00> : vector<8x128xf32>
    %982 = tpu.matmul %981, %3, %cst_283 {dimension_numbers = #tpu.dot_dimension_numbers<[1], [0], [0], [1], [0, 0, 1, 1], [], []>} : vector<8x128xf32>, vector<128x128xf32>, vector<8x128xf32> -> vector<8x128xf32>
    %cst_284 = arith.constant 1.000000e-03 : f32
    %983 = vector.broadcast %cst_284 : f32 to vector<8x128xf32>
    %984 = arith.addf %982, %983 : vector<8x128xf32>
    %985 = math.rsqrt %984 : vector<8x128xf32>
    %986 = arith.mulf %980, %985 : vector<8x128xf32>
    %987 = arith.mulf %986, %14 : vector<8x128xf32>
    %988 = arith.addf %987, %17 : vector<8x128xf32>
    %989 = arith.negf %988 : vector<8x128xf32>
    %990 = math.exp %989 : vector<8x128xf32>
    %cst_285 = arith.constant 1.000000e+00 : f32
    %991 = vector.broadcast %cst_285 : f32 to vector<8x128xf32>
    %992 = arith.addf %991, %990 : vector<8x128xf32>
    %993 = arith.divf %991, %992 : vector<8x128xf32>
    %994 = vector.extract_strided_slice %993 {offsets = [0, 0], sizes = [8, 32], strides = [1, 1]} : vector<8x128xf32> to vector<8x32xf32>
    %995 = vector.extract_strided_slice %988 {offsets = [0, 32], sizes = [8, 32], strides = [1, 1]} : vector<8x128xf32> to vector<8x32xf32>
    %996 = math.tanh %995 : vector<8x32xf32>
    %997 = vector.extract_strided_slice %993 {offsets = [0, 64], sizes = [8, 32], strides = [1, 1]} : vector<8x128xf32> to vector<8x32xf32>
    %998 = vector.extract_strided_slice %993 {offsets = [0, 96], sizes = [8, 32], strides = [1, 1]} : vector<8x128xf32> to vector<8x32xf32>
    %999 = arith.mulf %966, %997 : vector<8x32xf32>
    %1000 = arith.mulf %994, %996 : vector<8x32xf32>
    %1001 = arith.addf %999, %1000 : vector<8x32xf32>
    %cst_286 = arith.constant dense<0.000000e+00> : vector<8xf32>
    %1002 = vector.multi_reduction <add>, %1001, %cst_286 [1] : vector<8x32xf32> to vector<8xf32>
    %1003 = vector.shape_cast %1002 : vector<8xf32> to vector<8x1xf32>
    %cst_287 = arith.constant 3.200000e+01 : f32
    %1004 = vector.broadcast %cst_287 : f32 to vector<8x1xf32>
    %1005 = arith.divf %1003, %1004 : vector<8x1xf32>
    %1006 = vector.broadcast %1005 : vector<8x1xf32> to vector<8x32xf32>
    %1007 = arith.subf %1001, %1006 : vector<8x32xf32>
    %1008 = arith.mulf %1007, %1007 : vector<8x32xf32>
    %cst_288 = arith.constant dense<0.000000e+00> : vector<8xf32>
    %1009 = vector.multi_reduction <add>, %1008, %cst_288 [1] : vector<8x32xf32> to vector<8xf32>
    %1010 = vector.shape_cast %1009 : vector<8xf32> to vector<8x1xf32>
    %cst_289 = arith.constant 3.200000e+01 : f32
    %1011 = vector.broadcast %cst_289 : f32 to vector<8x1xf32>
    %1012 = arith.divf %1010, %1011 : vector<8x1xf32>
    %1013 = vector.broadcast %1005 : vector<8x1xf32> to vector<8x32xf32>
    %1014 = arith.subf %1001, %1013 : vector<8x32xf32>
    %cst_290 = arith.constant 1.000000e-03 : f32
    %1015 = vector.broadcast %cst_290 : f32 to vector<8x1xf32>
    %1016 = arith.addf %1012, %1015 : vector<8x1xf32>
    %1017 = math.rsqrt %1016 : vector<8x1xf32>
    %1018 = vector.broadcast %1017 : vector<8x1xf32> to vector<8x32xf32>
    %1019 = arith.mulf %1014, %1018 : vector<8x32xf32>
    %1020 = arith.mulf %1019, %20 : vector<8x32xf32>
    %1021 = arith.addf %1020, %23 : vector<8x32xf32>
    %1022 = math.tanh %1021 : vector<8x32xf32>
    %1023 = arith.mulf %1022, %998 : vector<8x32xf32>
    %cst_291 = arith.constant 0.899999976 : f32
    %1024 = vector.broadcast %cst_291 : f32 to vector<8x32xf32>
    %1025 = arith.mulf %1024, %1023 : vector<8x32xf32>
    %cst_292 = arith.constant 1.000000e-01 : f32
    %1026 = vector.broadcast %cst_292 : f32 to vector<8x32xf32>
    %1027 = arith.mulf %1026, %961 : vector<8x32xf32>
    %1028 = arith.addf %1025, %1027 : vector<8x32xf32>
    %cst_293 = arith.constant 5.000000e-01 : f32
    %1029 = vector.broadcast %cst_293 : f32 to vector<8x32xf32>
    %1030 = arith.mulf %1029, %1001 : vector<8x32xf32>
    %cst_294 = arith.constant 5.000000e-01 : f32
    %1031 = vector.broadcast %cst_294 : f32 to vector<8x32xf32>
    %1032 = arith.mulf %1031, %966 : vector<8x32xf32>
    %1033 = arith.addf %1030, %1032 : vector<8x32xf32>
    %1034 = tpu.concatenate %1028, %903 in 1 : vector<8x32xf32>, vector<8x16xf32> -> vector<8x48xf32>
    %cst_295 = arith.constant dense<0.000000e+00> : vector<8x64xf32>
    %1035 = tpu.matmul %1034, %1, %cst_295 {dimension_numbers = #tpu.dot_dimension_numbers<[1], [0], [0], [1], [0, 0, 1, 1], [], []>} : vector<8x48xf32>, vector<48x64xf32>, vector<8x64xf32> -> vector<8x64xf32>
    %1036 = arith.addf %1035, %26 : vector<8x64xf32>
    %cst_296 = arith.constant dense<0.000000e+00> : vector<8x64xf32>
    %1037 = tpu.matmul %1036, %4, %cst_296 {dimension_numbers = #tpu.dot_dimension_numbers<[1], [0], [0], [1], [0, 0, 1, 1], [], []>} : vector<8x64xf32>, vector<64x64xf32>, vector<8x64xf32> -> vector<8x64xf32>
    %1038 = arith.subf %1036, %1037 : vector<8x64xf32>
    %1039 = arith.mulf %1038, %1038 : vector<8x64xf32>
    %cst_297 = arith.constant dense<0.000000e+00> : vector<8x64xf32>
    %1040 = tpu.matmul %1039, %4, %cst_297 {dimension_numbers = #tpu.dot_dimension_numbers<[1], [0], [0], [1], [0, 0, 1, 1], [], []>} : vector<8x64xf32>, vector<64x64xf32>, vector<8x64xf32> -> vector<8x64xf32>
    %cst_298 = arith.constant 1.000000e-03 : f32
    %1041 = vector.broadcast %cst_298 : f32 to vector<8x64xf32>
    %1042 = arith.addf %1040, %1041 : vector<8x64xf32>
    %1043 = math.rsqrt %1042 : vector<8x64xf32>
    %1044 = arith.mulf %1038, %1043 : vector<8x64xf32>
    %1045 = arith.mulf %1044, %29 : vector<8x64xf32>
    %1046 = arith.addf %1045, %32 : vector<8x64xf32>
    %1047 = arith.negf %1046 : vector<8x64xf32>
    %1048 = math.exp %1047 : vector<8x64xf32>
    %cst_299 = arith.constant 1.000000e+00 : f32
    %1049 = vector.broadcast %cst_299 : f32 to vector<8x64xf32>
    %1050 = arith.addf %1049, %1048 : vector<8x64xf32>
    %1051 = arith.divf %1049, %1050 : vector<8x64xf32>
    %1052 = vector.extract_strided_slice %1051 {offsets = [0, 0], sizes = [8, 16], strides = [1, 1]} : vector<8x64xf32> to vector<8x16xf32>
    %1053 = vector.extract_strided_slice %1046 {offsets = [0, 16], sizes = [8, 16], strides = [1, 1]} : vector<8x64xf32> to vector<8x16xf32>
    %1054 = math.tanh %1053 : vector<8x16xf32>
    %1055 = vector.extract_strided_slice %1051 {offsets = [0, 32], sizes = [8, 16], strides = [1, 1]} : vector<8x64xf32> to vector<8x16xf32>
    %1056 = vector.extract_strided_slice %1051 {offsets = [0, 48], sizes = [8, 16], strides = [1, 1]} : vector<8x64xf32> to vector<8x16xf32>
    %1057 = arith.mulf %908, %1055 : vector<8x16xf32>
    %1058 = arith.mulf %1052, %1054 : vector<8x16xf32>
    %1059 = arith.addf %1057, %1058 : vector<8x16xf32>
    %cst_300 = arith.constant dense<0.000000e+00> : vector<8xf32>
    %1060 = vector.multi_reduction <add>, %1059, %cst_300 [1] : vector<8x16xf32> to vector<8xf32>
    %1061 = vector.shape_cast %1060 : vector<8xf32> to vector<8x1xf32>
    %cst_301 = arith.constant 1.600000e+01 : f32
    %1062 = vector.broadcast %cst_301 : f32 to vector<8x1xf32>
    %1063 = arith.divf %1061, %1062 : vector<8x1xf32>
    %1064 = vector.broadcast %1063 : vector<8x1xf32> to vector<8x16xf32>
    %1065 = arith.subf %1059, %1064 : vector<8x16xf32>
    %1066 = arith.mulf %1065, %1065 : vector<8x16xf32>
    %cst_302 = arith.constant dense<0.000000e+00> : vector<8xf32>
    %1067 = vector.multi_reduction <add>, %1066, %cst_302 [1] : vector<8x16xf32> to vector<8xf32>
    %1068 = vector.shape_cast %1067 : vector<8xf32> to vector<8x1xf32>
    %cst_303 = arith.constant 1.600000e+01 : f32
    %1069 = vector.broadcast %cst_303 : f32 to vector<8x1xf32>
    %1070 = arith.divf %1068, %1069 : vector<8x1xf32>
    %1071 = vector.broadcast %1063 : vector<8x1xf32> to vector<8x16xf32>
    %1072 = arith.subf %1059, %1071 : vector<8x16xf32>
    %cst_304 = arith.constant 1.000000e-03 : f32
    %1073 = vector.broadcast %cst_304 : f32 to vector<8x1xf32>
    %1074 = arith.addf %1070, %1073 : vector<8x1xf32>
    %1075 = math.rsqrt %1074 : vector<8x1xf32>
    %1076 = vector.broadcast %1075 : vector<8x1xf32> to vector<8x16xf32>
    %1077 = arith.mulf %1072, %1076 : vector<8x16xf32>
    %1078 = arith.mulf %1077, %35 : vector<8x16xf32>
    %1079 = arith.addf %1078, %38 : vector<8x16xf32>
    %1080 = math.tanh %1079 : vector<8x16xf32>
    %1081 = arith.mulf %1080, %1056 : vector<8x16xf32>
    %cst_305 = arith.constant 0.899999976 : f32
    %1082 = vector.broadcast %cst_305 : f32 to vector<8x16xf32>
    %1083 = arith.mulf %1082, %1081 : vector<8x16xf32>
    %cst_306 = arith.constant 1.000000e-01 : f32
    %1084 = vector.broadcast %cst_306 : f32 to vector<8x16xf32>
    %1085 = arith.mulf %1084, %903 : vector<8x16xf32>
    %1086 = arith.addf %1083, %1085 : vector<8x16xf32>
    %cst_307 = arith.constant 5.000000e-01 : f32
    %1087 = vector.broadcast %cst_307 : f32 to vector<8x16xf32>
    %1088 = arith.mulf %1087, %1059 : vector<8x16xf32>
    %cst_308 = arith.constant 5.000000e-01 : f32
    %1089 = vector.broadcast %cst_308 : f32 to vector<8x16xf32>
    %1090 = arith.mulf %1089, %908 : vector<8x16xf32>
    %1091 = arith.addf %1088, %1090 : vector<8x16xf32>
    %1092 = tpu.concatenate %1086, %1028 in 1 : vector<8x16xf32>, vector<8x32xf32> -> vector<8x48xf32>
    %cst_309 = arith.constant dense<0.000000e+00> : vector<8x128xf32>
    %1093 = tpu.matmul %1092, %2, %cst_309 {dimension_numbers = #tpu.dot_dimension_numbers<[1], [0], [0], [1], [0, 0, 1, 1], [], []>} : vector<8x48xf32>, vector<48x128xf32>, vector<8x128xf32> -> vector<8x128xf32>
    %1094 = arith.addf %1093, %41 : vector<8x128xf32>
    %cst_310 = arith.constant dense<0.000000e+00> : vector<8x128xf32>
    %1095 = tpu.matmul %1094, %3, %cst_310 {dimension_numbers = #tpu.dot_dimension_numbers<[1], [0], [0], [1], [0, 0, 1, 1], [], []>} : vector<8x128xf32>, vector<128x128xf32>, vector<8x128xf32> -> vector<8x128xf32>
    %1096 = arith.subf %1094, %1095 : vector<8x128xf32>
    %1097 = arith.mulf %1096, %1096 : vector<8x128xf32>
    %cst_311 = arith.constant dense<0.000000e+00> : vector<8x128xf32>
    %1098 = tpu.matmul %1097, %3, %cst_311 {dimension_numbers = #tpu.dot_dimension_numbers<[1], [0], [0], [1], [0, 0, 1, 1], [], []>} : vector<8x128xf32>, vector<128x128xf32>, vector<8x128xf32> -> vector<8x128xf32>
    %cst_312 = arith.constant 1.000000e-03 : f32
    %1099 = vector.broadcast %cst_312 : f32 to vector<8x128xf32>
    %1100 = arith.addf %1098, %1099 : vector<8x128xf32>
    %1101 = math.rsqrt %1100 : vector<8x128xf32>
    %1102 = arith.mulf %1096, %1101 : vector<8x128xf32>
    %1103 = arith.mulf %1102, %44 : vector<8x128xf32>
    %1104 = arith.addf %1103, %47 : vector<8x128xf32>
    %1105 = arith.negf %1104 : vector<8x128xf32>
    %1106 = math.exp %1105 : vector<8x128xf32>
    %cst_313 = arith.constant 1.000000e+00 : f32
    %1107 = vector.broadcast %cst_313 : f32 to vector<8x128xf32>
    %1108 = arith.addf %1107, %1106 : vector<8x128xf32>
    %1109 = arith.divf %1107, %1108 : vector<8x128xf32>
    %1110 = vector.extract_strided_slice %1109 {offsets = [0, 0], sizes = [8, 32], strides = [1, 1]} : vector<8x128xf32> to vector<8x32xf32>
    %1111 = vector.extract_strided_slice %1104 {offsets = [0, 32], sizes = [8, 32], strides = [1, 1]} : vector<8x128xf32> to vector<8x32xf32>
    %1112 = math.tanh %1111 : vector<8x32xf32>
    %1113 = vector.extract_strided_slice %1109 {offsets = [0, 64], sizes = [8, 32], strides = [1, 1]} : vector<8x128xf32> to vector<8x32xf32>
    %1114 = vector.extract_strided_slice %1109 {offsets = [0, 96], sizes = [8, 32], strides = [1, 1]} : vector<8x128xf32> to vector<8x32xf32>
    %1115 = arith.mulf %1033, %1113 : vector<8x32xf32>
    %1116 = arith.mulf %1110, %1112 : vector<8x32xf32>
    %1117 = arith.addf %1115, %1116 : vector<8x32xf32>
    %cst_314 = arith.constant dense<0.000000e+00> : vector<8xf32>
    %1118 = vector.multi_reduction <add>, %1117, %cst_314 [1] : vector<8x32xf32> to vector<8xf32>
    %1119 = vector.shape_cast %1118 : vector<8xf32> to vector<8x1xf32>
    %cst_315 = arith.constant 3.200000e+01 : f32
    %1120 = vector.broadcast %cst_315 : f32 to vector<8x1xf32>
    %1121 = arith.divf %1119, %1120 : vector<8x1xf32>
    %1122 = vector.broadcast %1121 : vector<8x1xf32> to vector<8x32xf32>
    %1123 = arith.subf %1117, %1122 : vector<8x32xf32>
    %1124 = arith.mulf %1123, %1123 : vector<8x32xf32>
    %cst_316 = arith.constant dense<0.000000e+00> : vector<8xf32>
    %1125 = vector.multi_reduction <add>, %1124, %cst_316 [1] : vector<8x32xf32> to vector<8xf32>
    %1126 = vector.shape_cast %1125 : vector<8xf32> to vector<8x1xf32>
    %cst_317 = arith.constant 3.200000e+01 : f32
    %1127 = vector.broadcast %cst_317 : f32 to vector<8x1xf32>
    %1128 = arith.divf %1126, %1127 : vector<8x1xf32>
    %1129 = vector.broadcast %1121 : vector<8x1xf32> to vector<8x32xf32>
    %1130 = arith.subf %1117, %1129 : vector<8x32xf32>
    %cst_318 = arith.constant 1.000000e-03 : f32
    %1131 = vector.broadcast %cst_318 : f32 to vector<8x1xf32>
    %1132 = arith.addf %1128, %1131 : vector<8x1xf32>
    %1133 = math.rsqrt %1132 : vector<8x1xf32>
    %1134 = vector.broadcast %1133 : vector<8x1xf32> to vector<8x32xf32>
    %1135 = arith.mulf %1130, %1134 : vector<8x32xf32>
    %1136 = arith.mulf %1135, %50 : vector<8x32xf32>
    %1137 = arith.addf %1136, %53 : vector<8x32xf32>
    %1138 = math.tanh %1137 : vector<8x32xf32>
    %1139 = arith.mulf %1138, %1114 : vector<8x32xf32>
    %cst_319 = arith.constant 0.899999976 : f32
    %1140 = vector.broadcast %cst_319 : f32 to vector<8x32xf32>
    %1141 = arith.mulf %1140, %1139 : vector<8x32xf32>
    %cst_320 = arith.constant 1.000000e-01 : f32
    %1142 = vector.broadcast %cst_320 : f32 to vector<8x32xf32>
    %1143 = arith.mulf %1142, %1028 : vector<8x32xf32>
    %1144 = arith.addf %1141, %1143 : vector<8x32xf32>
    %cst_321 = arith.constant 5.000000e-01 : f32
    %1145 = vector.broadcast %cst_321 : f32 to vector<8x32xf32>
    %1146 = arith.mulf %1145, %1117 : vector<8x32xf32>
    %cst_322 = arith.constant 5.000000e-01 : f32
    %1147 = vector.broadcast %cst_322 : f32 to vector<8x32xf32>
    %1148 = arith.mulf %1147, %1033 : vector<8x32xf32>
    %1149 = arith.addf %1146, %1148 : vector<8x32xf32>
    %cst_323 = arith.constant dense<0.000000e+00> : vector<8x128xf32>
    %1150 = tpu.matmul %1144, %5, %cst_323 {dimension_numbers = #tpu.dot_dimension_numbers<[1], [0], [0], [1], [0, 0, 1, 1], [], []>} : vector<8x32xf32>, vector<32x128xf32>, vector<8x128xf32> -> vector<8x128xf32>
    %1151 = arith.addf %1150, %8 : vector<8x128xf32>
    %1152 = arith.index_cast %c5_i32 : i32 to index
    %c0_324 = arith.constant 0 : index
    %c0_325 = arith.constant 0 : index
    %1153 = vector.load %arg14[%1152, %c0_324, %c0_325] : memref<8x8x128xf32, #tpu.memory_space<vmem>>, vector<1x8x128xf32>
    %1154 = vector.shape_cast %1153 : vector<1x8x128xf32> to vector<8x128xf32>
    %1155 = vector.shape_cast %1151 : vector<8x128xf32> to vector<1x8x128xf32>
    tpu.vector_store %arg14[%1152, %c0_324, %c0_325], %1155 {strides = array<i32>} : memref<8x8x128xf32, #tpu.memory_space<vmem>>, vector<1x8x128xf32>,
    %c6_i32 = arith.constant 6 : i32
    %1156 = arith.index_cast %c6_i32 : i32 to index
    %c0_326 = arith.constant 0 : index
    %c0_327 = arith.constant 0 : index
    %1157 = vector.load %arg0[%1156, %c0_326, %c0_327] : memref<8x8x16xf32, #tpu.memory_space<vmem>>, vector<1x8x16xf32>
    %1158 = vector.shape_cast %1157 : vector<1x8x16xf32> to vector<8x16xf32>
    %1159 = tpu.concatenate %1158, %1144 in 1 : vector<8x16xf32>, vector<8x32xf32> -> vector<8x48xf32>
    %cst_328 = arith.constant dense<0.000000e+00> : vector<8x128xf32>
    %1160 = tpu.matmul %1159, %0, %cst_328 {dimension_numbers = #tpu.dot_dimension_numbers<[1], [0], [0], [1], [0, 0, 1, 1], [], []>} : vector<8x48xf32>, vector<48x128xf32>, vector<8x128xf32> -> vector<8x128xf32>
    %1161 = arith.addf %1160, %11 : vector<8x128xf32>
    %cst_329 = arith.constant dense<0.000000e+00> : vector<8x128xf32>
    %1162 = tpu.matmul %1161, %3, %cst_329 {dimension_numbers = #tpu.dot_dimension_numbers<[1], [0], [0], [1], [0, 0, 1, 1], [], []>} : vector<8x128xf32>, vector<128x128xf32>, vector<8x128xf32> -> vector<8x128xf32>
    %1163 = arith.subf %1161, %1162 : vector<8x128xf32>
    %1164 = arith.mulf %1163, %1163 : vector<8x128xf32>
    %cst_330 = arith.constant dense<0.000000e+00> : vector<8x128xf32>
    %1165 = tpu.matmul %1164, %3, %cst_330 {dimension_numbers = #tpu.dot_dimension_numbers<[1], [0], [0], [1], [0, 0, 1, 1], [], []>} : vector<8x128xf32>, vector<128x128xf32>, vector<8x128xf32> -> vector<8x128xf32>
    %cst_331 = arith.constant 1.000000e-03 : f32
    %1166 = vector.broadcast %cst_331 : f32 to vector<8x128xf32>
    %1167 = arith.addf %1165, %1166 : vector<8x128xf32>
    %1168 = math.rsqrt %1167 : vector<8x128xf32>
    %1169 = arith.mulf %1163, %1168 : vector<8x128xf32>
    %1170 = arith.mulf %1169, %14 : vector<8x128xf32>
    %1171 = arith.addf %1170, %17 : vector<8x128xf32>
    %1172 = arith.negf %1171 : vector<8x128xf32>
    %1173 = math.exp %1172 : vector<8x128xf32>
    %cst_332 = arith.constant 1.000000e+00 : f32
    %1174 = vector.broadcast %cst_332 : f32 to vector<8x128xf32>
    %1175 = arith.addf %1174, %1173 : vector<8x128xf32>
    %1176 = arith.divf %1174, %1175 : vector<8x128xf32>
    %1177 = vector.extract_strided_slice %1176 {offsets = [0, 0], sizes = [8, 32], strides = [1, 1]} : vector<8x128xf32> to vector<8x32xf32>
    %1178 = vector.extract_strided_slice %1171 {offsets = [0, 32], sizes = [8, 32], strides = [1, 1]} : vector<8x128xf32> to vector<8x32xf32>
    %1179 = math.tanh %1178 : vector<8x32xf32>
    %1180 = vector.extract_strided_slice %1176 {offsets = [0, 64], sizes = [8, 32], strides = [1, 1]} : vector<8x128xf32> to vector<8x32xf32>
    %1181 = vector.extract_strided_slice %1176 {offsets = [0, 96], sizes = [8, 32], strides = [1, 1]} : vector<8x128xf32> to vector<8x32xf32>
    %1182 = arith.mulf %1149, %1180 : vector<8x32xf32>
    %1183 = arith.mulf %1177, %1179 : vector<8x32xf32>
    %1184 = arith.addf %1182, %1183 : vector<8x32xf32>
    %cst_333 = arith.constant dense<0.000000e+00> : vector<8xf32>
    %1185 = vector.multi_reduction <add>, %1184, %cst_333 [1] : vector<8x32xf32> to vector<8xf32>
    %1186 = vector.shape_cast %1185 : vector<8xf32> to vector<8x1xf32>
    %cst_334 = arith.constant 3.200000e+01 : f32
    %1187 = vector.broadcast %cst_334 : f32 to vector<8x1xf32>
    %1188 = arith.divf %1186, %1187 : vector<8x1xf32>
    %1189 = vector.broadcast %1188 : vector<8x1xf32> to vector<8x32xf32>
    %1190 = arith.subf %1184, %1189 : vector<8x32xf32>
    %1191 = arith.mulf %1190, %1190 : vector<8x32xf32>
    %cst_335 = arith.constant dense<0.000000e+00> : vector<8xf32>
    %1192 = vector.multi_reduction <add>, %1191, %cst_335 [1] : vector<8x32xf32> to vector<8xf32>
    %1193 = vector.shape_cast %1192 : vector<8xf32> to vector<8x1xf32>
    %cst_336 = arith.constant 3.200000e+01 : f32
    %1194 = vector.broadcast %cst_336 : f32 to vector<8x1xf32>
    %1195 = arith.divf %1193, %1194 : vector<8x1xf32>
    %1196 = vector.broadcast %1188 : vector<8x1xf32> to vector<8x32xf32>
    %1197 = arith.subf %1184, %1196 : vector<8x32xf32>
    %cst_337 = arith.constant 1.000000e-03 : f32
    %1198 = vector.broadcast %cst_337 : f32 to vector<8x1xf32>
    %1199 = arith.addf %1195, %1198 : vector<8x1xf32>
    %1200 = math.rsqrt %1199 : vector<8x1xf32>
    %1201 = vector.broadcast %1200 : vector<8x1xf32> to vector<8x32xf32>
    %1202 = arith.mulf %1197, %1201 : vector<8x32xf32>
    %1203 = arith.mulf %1202, %20 : vector<8x32xf32>
    %1204 = arith.addf %1203, %23 : vector<8x32xf32>
    %1205 = math.tanh %1204 : vector<8x32xf32>
    %1206 = arith.mulf %1205, %1181 : vector<8x32xf32>
    %cst_338 = arith.constant 0.899999976 : f32
    %1207 = vector.broadcast %cst_338 : f32 to vector<8x32xf32>
    %1208 = arith.mulf %1207, %1206 : vector<8x32xf32>
    %cst_339 = arith.constant 1.000000e-01 : f32
    %1209 = vector.broadcast %cst_339 : f32 to vector<8x32xf32>
    %1210 = arith.mulf %1209, %1144 : vector<8x32xf32>
    %1211 = arith.addf %1208, %1210 : vector<8x32xf32>
    %cst_340 = arith.constant 5.000000e-01 : f32
    %1212 = vector.broadcast %cst_340 : f32 to vector<8x32xf32>
    %1213 = arith.mulf %1212, %1184 : vector<8x32xf32>
    %cst_341 = arith.constant 5.000000e-01 : f32
    %1214 = vector.broadcast %cst_341 : f32 to vector<8x32xf32>
    %1215 = arith.mulf %1214, %1149 : vector<8x32xf32>
    %1216 = arith.addf %1213, %1215 : vector<8x32xf32>
    %1217 = tpu.concatenate %1211, %1086 in 1 : vector<8x32xf32>, vector<8x16xf32> -> vector<8x48xf32>
    %cst_342 = arith.constant dense<0.000000e+00> : vector<8x64xf32>
    %1218 = tpu.matmul %1217, %1, %cst_342 {dimension_numbers = #tpu.dot_dimension_numbers<[1], [0], [0], [1], [0, 0, 1, 1], [], []>} : vector<8x48xf32>, vector<48x64xf32>, vector<8x64xf32> -> vector<8x64xf32>
    %1219 = arith.addf %1218, %26 : vector<8x64xf32>
    %cst_343 = arith.constant dense<0.000000e+00> : vector<8x64xf32>
    %1220 = tpu.matmul %1219, %4, %cst_343 {dimension_numbers = #tpu.dot_dimension_numbers<[1], [0], [0], [1], [0, 0, 1, 1], [], []>} : vector<8x64xf32>, vector<64x64xf32>, vector<8x64xf32> -> vector<8x64xf32>
    %1221 = arith.subf %1219, %1220 : vector<8x64xf32>
    %1222 = arith.mulf %1221, %1221 : vector<8x64xf32>
    %cst_344 = arith.constant dense<0.000000e+00> : vector<8x64xf32>
    %1223 = tpu.matmul %1222, %4, %cst_344 {dimension_numbers = #tpu.dot_dimension_numbers<[1], [0], [0], [1], [0, 0, 1, 1], [], []>} : vector<8x64xf32>, vector<64x64xf32>, vector<8x64xf32> -> vector<8x64xf32>
    %cst_345 = arith.constant 1.000000e-03 : f32
    %1224 = vector.broadcast %cst_345 : f32 to vector<8x64xf32>
    %1225 = arith.addf %1223, %1224 : vector<8x64xf32>
    %1226 = math.rsqrt %1225 : vector<8x64xf32>
    %1227 = arith.mulf %1221, %1226 : vector<8x64xf32>
    %1228 = arith.mulf %1227, %29 : vector<8x64xf32>
    %1229 = arith.addf %1228, %32 : vector<8x64xf32>
    %1230 = arith.negf %1229 : vector<8x64xf32>
    %1231 = math.exp %1230 : vector<8x64xf32>
    %cst_346 = arith.constant 1.000000e+00 : f32
    %1232 = vector.broadcast %cst_346 : f32 to vector<8x64xf32>
    %1233 = arith.addf %1232, %1231 : vector<8x64xf32>
    %1234 = arith.divf %1232, %1233 : vector<8x64xf32>
    %1235 = vector.extract_strided_slice %1234 {offsets = [0, 0], sizes = [8, 16], strides = [1, 1]} : vector<8x64xf32> to vector<8x16xf32>
    %1236 = vector.extract_strided_slice %1229 {offsets = [0, 16], sizes = [8, 16], strides = [1, 1]} : vector<8x64xf32> to vector<8x16xf32>
    %1237 = math.tanh %1236 : vector<8x16xf32>
    %1238 = vector.extract_strided_slice %1234 {offsets = [0, 32], sizes = [8, 16], strides = [1, 1]} : vector<8x64xf32> to vector<8x16xf32>
    %1239 = vector.extract_strided_slice %1234 {offsets = [0, 48], sizes = [8, 16], strides = [1, 1]} : vector<8x64xf32> to vector<8x16xf32>
    %1240 = arith.mulf %1091, %1238 : vector<8x16xf32>
    %1241 = arith.mulf %1235, %1237 : vector<8x16xf32>
    %1242 = arith.addf %1240, %1241 : vector<8x16xf32>
    %cst_347 = arith.constant dense<0.000000e+00> : vector<8xf32>
    %1243 = vector.multi_reduction <add>, %1242, %cst_347 [1] : vector<8x16xf32> to vector<8xf32>
    %1244 = vector.shape_cast %1243 : vector<8xf32> to vector<8x1xf32>
    %cst_348 = arith.constant 1.600000e+01 : f32
    %1245 = vector.broadcast %cst_348 : f32 to vector<8x1xf32>
    %1246 = arith.divf %1244, %1245 : vector<8x1xf32>
    %1247 = vector.broadcast %1246 : vector<8x1xf32> to vector<8x16xf32>
    %1248 = arith.subf %1242, %1247 : vector<8x16xf32>
    %1249 = arith.mulf %1248, %1248 : vector<8x16xf32>
    %cst_349 = arith.constant dense<0.000000e+00> : vector<8xf32>
    %1250 = vector.multi_reduction <add>, %1249, %cst_349 [1] : vector<8x16xf32> to vector<8xf32>
    %1251 = vector.shape_cast %1250 : vector<8xf32> to vector<8x1xf32>
    %cst_350 = arith.constant 1.600000e+01 : f32
    %1252 = vector.broadcast %cst_350 : f32 to vector<8x1xf32>
    %1253 = arith.divf %1251, %1252 : vector<8x1xf32>
    %1254 = vector.broadcast %1246 : vector<8x1xf32> to vector<8x16xf32>
    %1255 = arith.subf %1242, %1254 : vector<8x16xf32>
    %cst_351 = arith.constant 1.000000e-03 : f32
    %1256 = vector.broadcast %cst_351 : f32 to vector<8x1xf32>
    %1257 = arith.addf %1253, %1256 : vector<8x1xf32>
    %1258 = math.rsqrt %1257 : vector<8x1xf32>
    %1259 = vector.broadcast %1258 : vector<8x1xf32> to vector<8x16xf32>
    %1260 = arith.mulf %1255, %1259 : vector<8x16xf32>
    %1261 = arith.mulf %1260, %35 : vector<8x16xf32>
    %1262 = arith.addf %1261, %38 : vector<8x16xf32>
    %1263 = math.tanh %1262 : vector<8x16xf32>
    %1264 = arith.mulf %1263, %1239 : vector<8x16xf32>
    %cst_352 = arith.constant 0.899999976 : f32
    %1265 = vector.broadcast %cst_352 : f32 to vector<8x16xf32>
    %1266 = arith.mulf %1265, %1264 : vector<8x16xf32>
    %cst_353 = arith.constant 1.000000e-01 : f32
    %1267 = vector.broadcast %cst_353 : f32 to vector<8x16xf32>
    %1268 = arith.mulf %1267, %1086 : vector<8x16xf32>
    %1269 = arith.addf %1266, %1268 : vector<8x16xf32>
    %cst_354 = arith.constant 5.000000e-01 : f32
    %1270 = vector.broadcast %cst_354 : f32 to vector<8x16xf32>
    %1271 = arith.mulf %1270, %1242 : vector<8x16xf32>
    %cst_355 = arith.constant 5.000000e-01 : f32
    %1272 = vector.broadcast %cst_355 : f32 to vector<8x16xf32>
    %1273 = arith.mulf %1272, %1091 : vector<8x16xf32>
    %1274 = arith.addf %1271, %1273 : vector<8x16xf32>
    %1275 = tpu.concatenate %1269, %1211 in 1 : vector<8x16xf32>, vector<8x32xf32> -> vector<8x48xf32>
    %cst_356 = arith.constant dense<0.000000e+00> : vector<8x128xf32>
    %1276 = tpu.matmul %1275, %2, %cst_356 {dimension_numbers = #tpu.dot_dimension_numbers<[1], [0], [0], [1], [0, 0, 1, 1], [], []>} : vector<8x48xf32>, vector<48x128xf32>, vector<8x128xf32> -> vector<8x128xf32>
    %1277 = arith.addf %1276, %41 : vector<8x128xf32>
    %cst_357 = arith.constant dense<0.000000e+00> : vector<8x128xf32>
    %1278 = tpu.matmul %1277, %3, %cst_357 {dimension_numbers = #tpu.dot_dimension_numbers<[1], [0], [0], [1], [0, 0, 1, 1], [], []>} : vector<8x128xf32>, vector<128x128xf32>, vector<8x128xf32> -> vector<8x128xf32>
    %1279 = arith.subf %1277, %1278 : vector<8x128xf32>
    %1280 = arith.mulf %1279, %1279 : vector<8x128xf32>
    %cst_358 = arith.constant dense<0.000000e+00> : vector<8x128xf32>
    %1281 = tpu.matmul %1280, %3, %cst_358 {dimension_numbers = #tpu.dot_dimension_numbers<[1], [0], [0], [1], [0, 0, 1, 1], [], []>} : vector<8x128xf32>, vector<128x128xf32>, vector<8x128xf32> -> vector<8x128xf32>
    %cst_359 = arith.constant 1.000000e-03 : f32
    %1282 = vector.broadcast %cst_359 : f32 to vector<8x128xf32>
    %1283 = arith.addf %1281, %1282 : vector<8x128xf32>
    %1284 = math.rsqrt %1283 : vector<8x128xf32>
    %1285 = arith.mulf %1279, %1284 : vector<8x128xf32>
    %1286 = arith.mulf %1285, %44 : vector<8x128xf32>
    %1287 = arith.addf %1286, %47 : vector<8x128xf32>
    %1288 = arith.negf %1287 : vector<8x128xf32>
    %1289 = math.exp %1288 : vector<8x128xf32>
    %cst_360 = arith.constant 1.000000e+00 : f32
    %1290 = vector.broadcast %cst_360 : f32 to vector<8x128xf32>
    %1291 = arith.addf %1290, %1289 : vector<8x128xf32>
    %1292 = arith.divf %1290, %1291 : vector<8x128xf32>
    %1293 = vector.extract_strided_slice %1292 {offsets = [0, 0], sizes = [8, 32], strides = [1, 1]} : vector<8x128xf32> to vector<8x32xf32>
    %1294 = vector.extract_strided_slice %1287 {offsets = [0, 32], sizes = [8, 32], strides = [1, 1]} : vector<8x128xf32> to vector<8x32xf32>
    %1295 = math.tanh %1294 : vector<8x32xf32>
    %1296 = vector.extract_strided_slice %1292 {offsets = [0, 64], sizes = [8, 32], strides = [1, 1]} : vector<8x128xf32> to vector<8x32xf32>
    %1297 = vector.extract_strided_slice %1292 {offsets = [0, 96], sizes = [8, 32], strides = [1, 1]} : vector<8x128xf32> to vector<8x32xf32>
    %1298 = arith.mulf %1216, %1296 : vector<8x32xf32>
    %1299 = arith.mulf %1293, %1295 : vector<8x32xf32>
    %1300 = arith.addf %1298, %1299 : vector<8x32xf32>
    %cst_361 = arith.constant dense<0.000000e+00> : vector<8xf32>
    %1301 = vector.multi_reduction <add>, %1300, %cst_361 [1] : vector<8x32xf32> to vector<8xf32>
    %1302 = vector.shape_cast %1301 : vector<8xf32> to vector<8x1xf32>
    %cst_362 = arith.constant 3.200000e+01 : f32
    %1303 = vector.broadcast %cst_362 : f32 to vector<8x1xf32>
    %1304 = arith.divf %1302, %1303 : vector<8x1xf32>
    %1305 = vector.broadcast %1304 : vector<8x1xf32> to vector<8x32xf32>
    %1306 = arith.subf %1300, %1305 : vector<8x32xf32>
    %1307 = arith.mulf %1306, %1306 : vector<8x32xf32>
    %cst_363 = arith.constant dense<0.000000e+00> : vector<8xf32>
    %1308 = vector.multi_reduction <add>, %1307, %cst_363 [1] : vector<8x32xf32> to vector<8xf32>
    %1309 = vector.shape_cast %1308 : vector<8xf32> to vector<8x1xf32>
    %cst_364 = arith.constant 3.200000e+01 : f32
    %1310 = vector.broadcast %cst_364 : f32 to vector<8x1xf32>
    %1311 = arith.divf %1309, %1310 : vector<8x1xf32>
    %1312 = vector.broadcast %1304 : vector<8x1xf32> to vector<8x32xf32>
    %1313 = arith.subf %1300, %1312 : vector<8x32xf32>
    %cst_365 = arith.constant 1.000000e-03 : f32
    %1314 = vector.broadcast %cst_365 : f32 to vector<8x1xf32>
    %1315 = arith.addf %1311, %1314 : vector<8x1xf32>
    %1316 = math.rsqrt %1315 : vector<8x1xf32>
    %1317 = vector.broadcast %1316 : vector<8x1xf32> to vector<8x32xf32>
    %1318 = arith.mulf %1313, %1317 : vector<8x32xf32>
    %1319 = arith.mulf %1318, %50 : vector<8x32xf32>
    %1320 = arith.addf %1319, %53 : vector<8x32xf32>
    %1321 = math.tanh %1320 : vector<8x32xf32>
    %1322 = arith.mulf %1321, %1297 : vector<8x32xf32>
    %cst_366 = arith.constant 0.899999976 : f32
    %1323 = vector.broadcast %cst_366 : f32 to vector<8x32xf32>
    %1324 = arith.mulf %1323, %1322 : vector<8x32xf32>
    %cst_367 = arith.constant 1.000000e-01 : f32
    %1325 = vector.broadcast %cst_367 : f32 to vector<8x32xf32>
    %1326 = arith.mulf %1325, %1211 : vector<8x32xf32>
    %1327 = arith.addf %1324, %1326 : vector<8x32xf32>
    %cst_368 = arith.constant 5.000000e-01 : f32
    %1328 = vector.broadcast %cst_368 : f32 to vector<8x32xf32>
    %1329 = arith.mulf %1328, %1300 : vector<8x32xf32>
    %cst_369 = arith.constant 5.000000e-01 : f32
    %1330 = vector.broadcast %cst_369 : f32 to vector<8x32xf32>
    %1331 = arith.mulf %1330, %1216 : vector<8x32xf32>
    %1332 = arith.addf %1329, %1331 : vector<8x32xf32>
    %cst_370 = arith.constant dense<0.000000e+00> : vector<8x128xf32>
    %1333 = tpu.matmul %1327, %5, %cst_370 {dimension_numbers = #tpu.dot_dimension_numbers<[1], [0], [0], [1], [0, 0, 1, 1], [], []>} : vector<8x32xf32>, vector<32x128xf32>, vector<8x128xf32> -> vector<8x128xf32>
    %1334 = arith.addf %1333, %8 : vector<8x128xf32>
    %1335 = arith.index_cast %c6_i32 : i32 to index
    %c0_371 = arith.constant 0 : index
    %c0_372 = arith.constant 0 : index
    %1336 = vector.load %arg14[%1335, %c0_371, %c0_372] : memref<8x8x128xf32, #tpu.memory_space<vmem>>, vector<1x8x128xf32>
    %1337 = vector.shape_cast %1336 : vector<1x8x128xf32> to vector<8x128xf32>
    %1338 = vector.shape_cast %1334 : vector<8x128xf32> to vector<1x8x128xf32>
    tpu.vector_store %arg14[%1335, %c0_371, %c0_372], %1338 {strides = array<i32>} : memref<8x8x128xf32, #tpu.memory_space<vmem>>, vector<1x8x128xf32>,
    %c7_i32 = arith.constant 7 : i32
    %1339 = arith.index_cast %c7_i32 : i32 to index
    %c0_373 = arith.constant 0 : index
    %c0_374 = arith.constant 0 : index
    %1340 = vector.load %arg0[%1339, %c0_373, %c0_374] : memref<8x8x16xf32, #tpu.memory_space<vmem>>, vector<1x8x16xf32>
    %1341 = vector.shape_cast %1340 : vector<1x8x16xf32> to vector<8x16xf32>
    %1342 = tpu.concatenate %1341, %1327 in 1 : vector<8x16xf32>, vector<8x32xf32> -> vector<8x48xf32>
    %cst_375 = arith.constant dense<0.000000e+00> : vector<8x128xf32>
    %1343 = tpu.matmul %1342, %0, %cst_375 {dimension_numbers = #tpu.dot_dimension_numbers<[1], [0], [0], [1], [0, 0, 1, 1], [], []>} : vector<8x48xf32>, vector<48x128xf32>, vector<8x128xf32> -> vector<8x128xf32>
    %1344 = arith.addf %1343, %11 : vector<8x128xf32>
    %cst_376 = arith.constant dense<0.000000e+00> : vector<8x128xf32>
    %1345 = tpu.matmul %1344, %3, %cst_376 {dimension_numbers = #tpu.dot_dimension_numbers<[1], [0], [0], [1], [0, 0, 1, 1], [], []>} : vector<8x128xf32>, vector<128x128xf32>, vector<8x128xf32> -> vector<8x128xf32>
    %1346 = arith.subf %1344, %1345 : vector<8x128xf32>
    %1347 = arith.mulf %1346, %1346 : vector<8x128xf32>
    %cst_377 = arith.constant dense<0.000000e+00> : vector<8x128xf32>
    %1348 = tpu.matmul %1347, %3, %cst_377 {dimension_numbers = #tpu.dot_dimension_numbers<[1], [0], [0], [1], [0, 0, 1, 1], [], []>} : vector<8x128xf32>, vector<128x128xf32>, vector<8x128xf32> -> vector<8x128xf32>
    %cst_378 = arith.constant 1.000000e-03 : f32
    %1349 = vector.broadcast %cst_378 : f32 to vector<8x128xf32>
    %1350 = arith.addf %1348, %1349 : vector<8x128xf32>
    %1351 = math.rsqrt %1350 : vector<8x128xf32>
    %1352 = arith.mulf %1346, %1351 : vector<8x128xf32>
    %1353 = arith.mulf %1352, %14 : vector<8x128xf32>
    %1354 = arith.addf %1353, %17 : vector<8x128xf32>
    %1355 = arith.negf %1354 : vector<8x128xf32>
    %1356 = math.exp %1355 : vector<8x128xf32>
    %cst_379 = arith.constant 1.000000e+00 : f32
    %1357 = vector.broadcast %cst_379 : f32 to vector<8x128xf32>
    %1358 = arith.addf %1357, %1356 : vector<8x128xf32>
    %1359 = arith.divf %1357, %1358 : vector<8x128xf32>
    %1360 = vector.extract_strided_slice %1359 {offsets = [0, 0], sizes = [8, 32], strides = [1, 1]} : vector<8x128xf32> to vector<8x32xf32>
    %1361 = vector.extract_strided_slice %1354 {offsets = [0, 32], sizes = [8, 32], strides = [1, 1]} : vector<8x128xf32> to vector<8x32xf32>
    %1362 = math.tanh %1361 : vector<8x32xf32>
    %1363 = vector.extract_strided_slice %1359 {offsets = [0, 64], sizes = [8, 32], strides = [1, 1]} : vector<8x128xf32> to vector<8x32xf32>
    %1364 = vector.extract_strided_slice %1359 {offsets = [0, 96], sizes = [8, 32], strides = [1, 1]} : vector<8x128xf32> to vector<8x32xf32>
    %1365 = arith.mulf %1332, %1363 : vector<8x32xf32>
    %1366 = arith.mulf %1360, %1362 : vector<8x32xf32>
    %1367 = arith.addf %1365, %1366 : vector<8x32xf32>
    %cst_380 = arith.constant dense<0.000000e+00> : vector<8xf32>
    %1368 = vector.multi_reduction <add>, %1367, %cst_380 [1] : vector<8x32xf32> to vector<8xf32>
    %1369 = vector.shape_cast %1368 : vector<8xf32> to vector<8x1xf32>
    %cst_381 = arith.constant 3.200000e+01 : f32
    %1370 = vector.broadcast %cst_381 : f32 to vector<8x1xf32>
    %1371 = arith.divf %1369, %1370 : vector<8x1xf32>
    %1372 = vector.broadcast %1371 : vector<8x1xf32> to vector<8x32xf32>
    %1373 = arith.subf %1367, %1372 : vector<8x32xf32>
    %1374 = arith.mulf %1373, %1373 : vector<8x32xf32>
    %cst_382 = arith.constant dense<0.000000e+00> : vector<8xf32>
    %1375 = vector.multi_reduction <add>, %1374, %cst_382 [1] : vector<8x32xf32> to vector<8xf32>
    %1376 = vector.shape_cast %1375 : vector<8xf32> to vector<8x1xf32>
    %cst_383 = arith.constant 3.200000e+01 : f32
    %1377 = vector.broadcast %cst_383 : f32 to vector<8x1xf32>
    %1378 = arith.divf %1376, %1377 : vector<8x1xf32>
    %1379 = vector.broadcast %1371 : vector<8x1xf32> to vector<8x32xf32>
    %1380 = arith.subf %1367, %1379 : vector<8x32xf32>
    %cst_384 = arith.constant 1.000000e-03 : f32
    %1381 = vector.broadcast %cst_384 : f32 to vector<8x1xf32>
    %1382 = arith.addf %1378, %1381 : vector<8x1xf32>
    %1383 = math.rsqrt %1382 : vector<8x1xf32>
    %1384 = vector.broadcast %1383 : vector<8x1xf32> to vector<8x32xf32>
    %1385 = arith.mulf %1380, %1384 : vector<8x32xf32>
    %1386 = arith.mulf %1385, %20 : vector<8x32xf32>
    %1387 = arith.addf %1386, %23 : vector<8x32xf32>
    %1388 = math.tanh %1387 : vector<8x32xf32>
    %1389 = arith.mulf %1388, %1364 : vector<8x32xf32>
    %cst_385 = arith.constant 0.899999976 : f32
    %1390 = vector.broadcast %cst_385 : f32 to vector<8x32xf32>
    %1391 = arith.mulf %1390, %1389 : vector<8x32xf32>
    %cst_386 = arith.constant 1.000000e-01 : f32
    %1392 = vector.broadcast %cst_386 : f32 to vector<8x32xf32>
    %1393 = arith.mulf %1392, %1327 : vector<8x32xf32>
    %1394 = arith.addf %1391, %1393 : vector<8x32xf32>
    %cst_387 = arith.constant 5.000000e-01 : f32
    %1395 = vector.broadcast %cst_387 : f32 to vector<8x32xf32>
    %1396 = arith.mulf %1395, %1367 : vector<8x32xf32>
    %cst_388 = arith.constant 5.000000e-01 : f32
    %1397 = vector.broadcast %cst_388 : f32 to vector<8x32xf32>
    %1398 = arith.mulf %1397, %1332 : vector<8x32xf32>
    %1399 = arith.addf %1396, %1398 : vector<8x32xf32>
    %1400 = tpu.concatenate %1394, %1269 in 1 : vector<8x32xf32>, vector<8x16xf32> -> vector<8x48xf32>
    %cst_389 = arith.constant dense<0.000000e+00> : vector<8x64xf32>
    %1401 = tpu.matmul %1400, %1, %cst_389 {dimension_numbers = #tpu.dot_dimension_numbers<[1], [0], [0], [1], [0, 0, 1, 1], [], []>} : vector<8x48xf32>, vector<48x64xf32>, vector<8x64xf32> -> vector<8x64xf32>
    %1402 = arith.addf %1401, %26 : vector<8x64xf32>
    %cst_390 = arith.constant dense<0.000000e+00> : vector<8x64xf32>
    %1403 = tpu.matmul %1402, %4, %cst_390 {dimension_numbers = #tpu.dot_dimension_numbers<[1], [0], [0], [1], [0, 0, 1, 1], [], []>} : vector<8x64xf32>, vector<64x64xf32>, vector<8x64xf32> -> vector<8x64xf32>
    %1404 = arith.subf %1402, %1403 : vector<8x64xf32>
    %1405 = arith.mulf %1404, %1404 : vector<8x64xf32>
    %cst_391 = arith.constant dense<0.000000e+00> : vector<8x64xf32>
    %1406 = tpu.matmul %1405, %4, %cst_391 {dimension_numbers = #tpu.dot_dimension_numbers<[1], [0], [0], [1], [0, 0, 1, 1], [], []>} : vector<8x64xf32>, vector<64x64xf32>, vector<8x64xf32> -> vector<8x64xf32>
    %cst_392 = arith.constant 1.000000e-03 : f32
    %1407 = vector.broadcast %cst_392 : f32 to vector<8x64xf32>
    %1408 = arith.addf %1406, %1407 : vector<8x64xf32>
    %1409 = math.rsqrt %1408 : vector<8x64xf32>
    %1410 = arith.mulf %1404, %1409 : vector<8x64xf32>
    %1411 = arith.mulf %1410, %29 : vector<8x64xf32>
    %1412 = arith.addf %1411, %32 : vector<8x64xf32>
    %1413 = arith.negf %1412 : vector<8x64xf32>
    %1414 = math.exp %1413 : vector<8x64xf32>
    %cst_393 = arith.constant 1.000000e+00 : f32
    %1415 = vector.broadcast %cst_393 : f32 to vector<8x64xf32>
    %1416 = arith.addf %1415, %1414 : vector<8x64xf32>
    %1417 = arith.divf %1415, %1416 : vector<8x64xf32>
    %1418 = vector.extract_strided_slice %1417 {offsets = [0, 0], sizes = [8, 16], strides = [1, 1]} : vector<8x64xf32> to vector<8x16xf32>
    %1419 = vector.extract_strided_slice %1412 {offsets = [0, 16], sizes = [8, 16], strides = [1, 1]} : vector<8x64xf32> to vector<8x16xf32>
    %1420 = math.tanh %1419 : vector<8x16xf32>
    %1421 = vector.extract_strided_slice %1417 {offsets = [0, 32], sizes = [8, 16], strides = [1, 1]} : vector<8x64xf32> to vector<8x16xf32>
    %1422 = vector.extract_strided_slice %1417 {offsets = [0, 48], sizes = [8, 16], strides = [1, 1]} : vector<8x64xf32> to vector<8x16xf32>
    %1423 = arith.mulf %1274, %1421 : vector<8x16xf32>
    %1424 = arith.mulf %1418, %1420 : vector<8x16xf32>
    %1425 = arith.addf %1423, %1424 : vector<8x16xf32>
    %cst_394 = arith.constant dense<0.000000e+00> : vector<8xf32>
    %1426 = vector.multi_reduction <add>, %1425, %cst_394 [1] : vector<8x16xf32> to vector<8xf32>
    %1427 = vector.shape_cast %1426 : vector<8xf32> to vector<8x1xf32>
    %cst_395 = arith.constant 1.600000e+01 : f32
    %1428 = vector.broadcast %cst_395 : f32 to vector<8x1xf32>
    %1429 = arith.divf %1427, %1428 : vector<8x1xf32>
    %1430 = vector.broadcast %1429 : vector<8x1xf32> to vector<8x16xf32>
    %1431 = arith.subf %1425, %1430 : vector<8x16xf32>
    %1432 = arith.mulf %1431, %1431 : vector<8x16xf32>
    %cst_396 = arith.constant dense<0.000000e+00> : vector<8xf32>
    %1433 = vector.multi_reduction <add>, %1432, %cst_396 [1] : vector<8x16xf32> to vector<8xf32>
    %1434 = vector.shape_cast %1433 : vector<8xf32> to vector<8x1xf32>
    %cst_397 = arith.constant 1.600000e+01 : f32
    %1435 = vector.broadcast %cst_397 : f32 to vector<8x1xf32>
    %1436 = arith.divf %1434, %1435 : vector<8x1xf32>
    %1437 = vector.broadcast %1429 : vector<8x1xf32> to vector<8x16xf32>
    %1438 = arith.subf %1425, %1437 : vector<8x16xf32>
    %cst_398 = arith.constant 1.000000e-03 : f32
    %1439 = vector.broadcast %cst_398 : f32 to vector<8x1xf32>
    %1440 = arith.addf %1436, %1439 : vector<8x1xf32>
    %1441 = math.rsqrt %1440 : vector<8x1xf32>
    %1442 = vector.broadcast %1441 : vector<8x1xf32> to vector<8x16xf32>
    %1443 = arith.mulf %1438, %1442 : vector<8x16xf32>
    %1444 = arith.mulf %1443, %35 : vector<8x16xf32>
    %1445 = arith.addf %1444, %38 : vector<8x16xf32>
    %1446 = math.tanh %1445 : vector<8x16xf32>
    %1447 = arith.mulf %1446, %1422 : vector<8x16xf32>
    %cst_399 = arith.constant 0.899999976 : f32
    %1448 = vector.broadcast %cst_399 : f32 to vector<8x16xf32>
    %1449 = arith.mulf %1448, %1447 : vector<8x16xf32>
    %cst_400 = arith.constant 1.000000e-01 : f32
    %1450 = vector.broadcast %cst_400 : f32 to vector<8x16xf32>
    %1451 = arith.mulf %1450, %1269 : vector<8x16xf32>
    %1452 = arith.addf %1449, %1451 : vector<8x16xf32>
    %cst_401 = arith.constant 5.000000e-01 : f32
    %1453 = vector.broadcast %cst_401 : f32 to vector<8x16xf32>
    %1454 = arith.mulf %1453, %1425 : vector<8x16xf32>
    %cst_402 = arith.constant 5.000000e-01 : f32
    %1455 = vector.broadcast %cst_402 : f32 to vector<8x16xf32>
    %1456 = arith.mulf %1455, %1274 : vector<8x16xf32>
    %1457 = arith.addf %1454, %1456 : vector<8x16xf32>
    %1458 = tpu.concatenate %1452, %1394 in 1 : vector<8x16xf32>, vector<8x32xf32> -> vector<8x48xf32>
    %cst_403 = arith.constant dense<0.000000e+00> : vector<8x128xf32>
    %1459 = tpu.matmul %1458, %2, %cst_403 {dimension_numbers = #tpu.dot_dimension_numbers<[1], [0], [0], [1], [0, 0, 1, 1], [], []>} : vector<8x48xf32>, vector<48x128xf32>, vector<8x128xf32> -> vector<8x128xf32>
    %1460 = arith.addf %1459, %41 : vector<8x128xf32>
    %cst_404 = arith.constant dense<0.000000e+00> : vector<8x128xf32>
    %1461 = tpu.matmul %1460, %3, %cst_404 {dimension_numbers = #tpu.dot_dimension_numbers<[1], [0], [0], [1], [0, 0, 1, 1], [], []>} : vector<8x128xf32>, vector<128x128xf32>, vector<8x128xf32> -> vector<8x128xf32>
    %1462 = arith.subf %1460, %1461 : vector<8x128xf32>
    %1463 = arith.mulf %1462, %1462 : vector<8x128xf32>
    %cst_405 = arith.constant dense<0.000000e+00> : vector<8x128xf32>
    %1464 = tpu.matmul %1463, %3, %cst_405 {dimension_numbers = #tpu.dot_dimension_numbers<[1], [0], [0], [1], [0, 0, 1, 1], [], []>} : vector<8x128xf32>, vector<128x128xf32>, vector<8x128xf32> -> vector<8x128xf32>
    %cst_406 = arith.constant 1.000000e-03 : f32
    %1465 = vector.broadcast %cst_406 : f32 to vector<8x128xf32>
    %1466 = arith.addf %1464, %1465 : vector<8x128xf32>
    %1467 = math.rsqrt %1466 : vector<8x128xf32>
    %1468 = arith.mulf %1462, %1467 : vector<8x128xf32>
    %1469 = arith.mulf %1468, %44 : vector<8x128xf32>
    %1470 = arith.addf %1469, %47 : vector<8x128xf32>
    %1471 = arith.negf %1470 : vector<8x128xf32>
    %1472 = math.exp %1471 : vector<8x128xf32>
    %cst_407 = arith.constant 1.000000e+00 : f32
    %1473 = vector.broadcast %cst_407 : f32 to vector<8x128xf32>
    %1474 = arith.addf %1473, %1472 : vector<8x128xf32>
    %1475 = arith.divf %1473, %1474 : vector<8x128xf32>
    %1476 = vector.extract_strided_slice %1475 {offsets = [0, 0], sizes = [8, 32], strides = [1, 1]} : vector<8x128xf32> to vector<8x32xf32>
    %1477 = vector.extract_strided_slice %1470 {offsets = [0, 32], sizes = [8, 32], strides = [1, 1]} : vector<8x128xf32> to vector<8x32xf32>
    %1478 = math.tanh %1477 : vector<8x32xf32>
    %1479 = vector.extract_strided_slice %1475 {offsets = [0, 64], sizes = [8, 32], strides = [1, 1]} : vector<8x128xf32> to vector<8x32xf32>
    %1480 = vector.extract_strided_slice %1475 {offsets = [0, 96], sizes = [8, 32], strides = [1, 1]} : vector<8x128xf32> to vector<8x32xf32>
    %1481 = arith.mulf %1399, %1479 : vector<8x32xf32>
    %1482 = arith.mulf %1476, %1478 : vector<8x32xf32>
    %1483 = arith.addf %1481, %1482 : vector<8x32xf32>
    %cst_408 = arith.constant dense<0.000000e+00> : vector<8xf32>
    %1484 = vector.multi_reduction <add>, %1483, %cst_408 [1] : vector<8x32xf32> to vector<8xf32>
    %1485 = vector.shape_cast %1484 : vector<8xf32> to vector<8x1xf32>
    %cst_409 = arith.constant 3.200000e+01 : f32
    %1486 = vector.broadcast %cst_409 : f32 to vector<8x1xf32>
    %1487 = arith.divf %1485, %1486 : vector<8x1xf32>
    %1488 = vector.broadcast %1487 : vector<8x1xf32> to vector<8x32xf32>
    %1489 = arith.subf %1483, %1488 : vector<8x32xf32>
    %1490 = arith.mulf %1489, %1489 : vector<8x32xf32>
    %cst_410 = arith.constant dense<0.000000e+00> : vector<8xf32>
    %1491 = vector.multi_reduction <add>, %1490, %cst_410 [1] : vector<8x32xf32> to vector<8xf32>
    %1492 = vector.shape_cast %1491 : vector<8xf32> to vector<8x1xf32>
    %cst_411 = arith.constant 3.200000e+01 : f32
    %1493 = vector.broadcast %cst_411 : f32 to vector<8x1xf32>
    %1494 = arith.divf %1492, %1493 : vector<8x1xf32>
    %1495 = vector.broadcast %1487 : vector<8x1xf32> to vector<8x32xf32>
    %1496 = arith.subf %1483, %1495 : vector<8x32xf32>
    %cst_412 = arith.constant 1.000000e-03 : f32
    %1497 = vector.broadcast %cst_412 : f32 to vector<8x1xf32>
    %1498 = arith.addf %1494, %1497 : vector<8x1xf32>
    %1499 = math.rsqrt %1498 : vector<8x1xf32>
    %1500 = vector.broadcast %1499 : vector<8x1xf32> to vector<8x32xf32>
    %1501 = arith.mulf %1496, %1500 : vector<8x32xf32>
    %1502 = arith.mulf %1501, %50 : vector<8x32xf32>
    %1503 = arith.addf %1502, %53 : vector<8x32xf32>
    %1504 = math.tanh %1503 : vector<8x32xf32>
    %1505 = arith.mulf %1504, %1480 : vector<8x32xf32>
    %cst_413 = arith.constant 0.899999976 : f32
    %1506 = vector.broadcast %cst_413 : f32 to vector<8x32xf32>
    %1507 = arith.mulf %1506, %1505 : vector<8x32xf32>
    %cst_414 = arith.constant 1.000000e-01 : f32
    %1508 = vector.broadcast %cst_414 : f32 to vector<8x32xf32>
    %1509 = arith.mulf %1508, %1394 : vector<8x32xf32>
    %1510 = arith.addf %1507, %1509 : vector<8x32xf32>
    %cst_415 = arith.constant 5.000000e-01 : f32
    %1511 = vector.broadcast %cst_415 : f32 to vector<8x32xf32>
    %1512 = arith.mulf %1511, %1483 : vector<8x32xf32>
    %cst_416 = arith.constant 5.000000e-01 : f32
    %1513 = vector.broadcast %cst_416 : f32 to vector<8x32xf32>
    %1514 = arith.mulf %1513, %1399 : vector<8x32xf32>
    %1515 = arith.addf %1512, %1514 : vector<8x32xf32>
    %cst_417 = arith.constant dense<0.000000e+00> : vector<8x128xf32>
    %1516 = tpu.matmul %1510, %5, %cst_417 {dimension_numbers = #tpu.dot_dimension_numbers<[1], [0], [0], [1], [0, 0, 1, 1], [], []>} : vector<8x32xf32>, vector<32x128xf32>, vector<8x128xf32> -> vector<8x128xf32>
    %1517 = arith.addf %1516, %8 : vector<8x128xf32>
    %1518 = arith.index_cast %c7_i32 : i32 to index
    %c0_418 = arith.constant 0 : index
    %c0_419 = arith.constant 0 : index
    %1519 = vector.load %arg14[%1518, %c0_418, %c0_419] : memref<8x8x128xf32, #tpu.memory_space<vmem>>, vector<1x8x128xf32>
    %1520 = vector.shape_cast %1519 : vector<1x8x128xf32> to vector<8x128xf32>
    %1521 = vector.shape_cast %1517 : vector<8x128xf32> to vector<1x8x128xf32>
    tpu.vector_store %arg14[%1518, %c0_418, %c0_419], %1521 {strides = array<i32>} : memref<8x8x128xf32, #tpu.memory_space<vmem>>, vector<1x8x128xf32>,
    %c8_i32 = arith.constant 8 : i32
    %c0_420 = arith.constant 0 : index
    %c0_421 = arith.constant 0 : index
    %1522 = vector.load %arg15[%c0_420, %c0_421] : memref<8x32xf32, #tpu.memory_space<vmem>>, vector<8x32xf32>
    tpu.vector_store %arg15[%c0_420, %c0_421], %1510 {strides = array<i32>} : memref<8x32xf32, #tpu.memory_space<vmem>>, vector<8x32xf32>,
    %c0_422 = arith.constant 0 : index
    %c0_423 = arith.constant 0 : index
    %1523 = vector.load %arg16[%c0_422, %c0_423] : memref<8x32xf32, #tpu.memory_space<vmem>>, vector<8x32xf32>
    tpu.vector_store %arg16[%c0_422, %c0_423], %1515 {strides = array<i32>} : memref<8x32xf32, #tpu.memory_space<vmem>>, vector<8x32xf32>,
    %c0_424 = arith.constant 0 : index
    %c0_425 = arith.constant 0 : index
    %1524 = vector.load %arg17[%c0_424, %c0_425] : memref<8x16xf32, #tpu.memory_space<vmem>>, vector<8x16xf32>
    tpu.vector_store %arg17[%c0_424, %c0_425], %1452 {strides = array<i32>} : memref<8x16xf32, #tpu.memory_space<vmem>>, vector<8x16xf32>,
    %c0_426 = arith.constant 0 : index
    %c0_427 = arith.constant 0 : index
    %1525 = vector.load %arg18[%c0_426, %c0_427] : memref<8x16xf32, #tpu.memory_space<vmem>>, vector<8x16xf32>
    tpu.vector_store %arg18[%c0_426, %c0_427], %1457 {strides = array<i32>} : memref<8x16xf32, #tpu.memory_space<vmem>>, vector<8x16xf32>,
    return
  }
}

</mosaic_0001>

<bundles_post_ra>
// kernel: ptb_model_forward.1
= control target key start
LH: loop header
LB: loop body
LE: loop exit
PB: predicated region body
PF: predicated region fallthrough
CT: control target
= control target key end

     0   :  { %s14395_s0 = inlined_call_operand.vmem [shape: f32[8,8,16], index: 0, kind: input, shape index: {}]   ;;  %s14396_s1 = inlined_call_operand.vmem [shape: f32[48,128], index: 1, kind: input, shape index: {}]   ;;  %s14397_s2 = inlined_call_operand.vmem [shape: f32[3,128], index: 2, kind: input, shape index: {}]   ;;  %s14398_s3 = inlined_call_operand.hbm [shape: f32[2,32], index: 3, kind: input, shape index: {}]   ;;  %s14399_s4 = inlined_call_operand.vmem [shape: f32[48,64], index: 4, kind: input, shape index: {}]   ;;  %s14400_s5 = inlined_call_operand.hbm [shape: f32[3,64], index: 5, kind: input, shape index: {}]   ;;  %s14401_s6 = inlined_call_operand.vmem [shape: f32[2,16], index: 6, kind: input, shape index: {}]   ;;  %s14402_s7 = inlined_call_operand.vmem [shape: f32[48,128], index: 7, kind: input, shape index: {}]   ;;  %s14403_s8 = inlined_call_operand.hbm [shape: f32[3,128], index: 8, kind: input, shape index: {}]   ;;  %s14404_s9 = inlined_call_operand.hbm [shape: f32[2,32], index: 9, kind: input, shape index: {}]   ;;  %s14405_s10 = inlined_call_operand.vmem [shape: f32[128,128], index: 10, kind: input, shape index: {}]   ;;  %s14406_s11 = inlined_call_operand.vmem [shape: f32[64,64], index: 11, kind: input, shape index: {}]   ;;  %s14407_s12 = inlined_call_operand.vmem [shape: f32[32,128], index: 12, kind: input, shape index: {}]   ;;  %s14408_s13 = inlined_call_operand.vmem [shape: f32[1,128], index: 13, kind: input, shape index: {}]   ;;  %s14409_s14 = inlined_call_operand.vmem [shape: f32[8,8,128], index: 14, kind: output, shape index: {0}]   ;;  %s14410_s15 = inlined_call_operand.vmem [shape: f32[8,32], index: 15, kind: output, shape index: {1}]   ;;  %s14411_s16 = inlined_call_operand.vmem [shape: f32[8,32], index: 16, kind: output, shape index: {2}]   ;;  %s14412_s17 = inlined_call_operand.vmem [shape: f32[8,16], index: 17, kind: output, shape index: {3}]   ;;  %s14413_s18 = inlined_call_operand.vmem [shape: f32[8,16], index: 18, kind: output, shape index: {4}]  }
   0x1   :  { %14417 = sst [smem:[#allocation12_spill]] %s14395_s0 }
   0x2   :  { %14418 = sst [smem:[#allocation13_spill]] %s14396_s1 }
   0x3   :  { %14419 = sst [smem:[#allocation14_spill]] %s14397_s2 }
   0x4   :  { %24 = vsyncpa [#allocation3], 0 }
   0x5   :  { %25 = vsyncpa [#allocation5], 0 }
   0x6   :  { %26 = vsyncpa [#allocation8], 0  ;;  %s12146_s27 = smov [#allocation4]   ;;  %s12147_s29 = smov [#allocation2]  }
   0x7   :  { %s51_s28 = sshll.u32 %s12146_s27, 4  ;;  %s39_s30 = sshll.u32 %s12147_s29, 4  ;;  %s52_s28 = int_to_ptr.vmem [resolvable:$true] %s51_s28  ;;  %s40_s30 = int_to_ptr.vmem [resolvable:$true] %s39_s30 }
   0x8   :  { %s12052_s1 = scalar_lea.hbm %s14400_s5, 64 }
   0x9   :  { %p12053_p0 = scmp.ne.s32.totalorder %s14400_s5, %s12052_s1  ;;  %p12056_p1 = scmp.lt.u32.totalorder %s12052_s1, %s14400_s5 }
   0xb   :  { %p12058_p2 = pnand %p12056_p1, %p12053_p0 }
   0xd   :  { %12061 = shalt.err (!%p12058_p2)
}
   0xe   :  { %s12062_s23 = scalar_lea.vmem %s52_s28, 64  ;;  %p12067_p4 = scmp.lt.s32.totalorder %s52_s28, %s52_s28 }
   0xf   :  { %p12063_p3 = scmp.ne.s32.totalorder %s52_s28, %s12062_s23  ;;  %p12068_p5 = scmp.lt.s32.totalorder %s12062_s23, %s12062_s23 }
  0x11   :  { %p12069_p6 = por %p12068_p5, %p12067_p4 }
  0x13   :  { %p12070_p7 = pnand %p12069_p6, %p12063_p3 }
  0x15   :  { %12073 = shalt.err (!%p12070_p7)
}
  0x16   :  { %54 = dma.hbm_to_vmem [thread:$0]  %s14400_s5, 64, %s52_s28, [#allocation5]  }
  0x17   :  { %s12074_s29 = scalar_lea.hbm %s14398_s3, 32 }
  0x18   :  { %p12075_p8 = scmp.ne.s32.totalorder %s14398_s3, %s12074_s29  ;;  %p12078_p9 = scmp.lt.u32.totalorder %s12074_s29, %s14398_s3 }
  0x1a   :  { %p12080_p10 = pnand %p12078_p9, %p12075_p8 }
  0x1c   :  { %12083 = shalt.err (!%p12080_p10)
}
  0x1d   :  { %s12084_s21 = scalar_lea.vmem %s40_s30, 32  ;;  %p12089_p12 = scmp.lt.s32.totalorder %s40_s30, %s40_s30 }
  0x1e   :  { %p12085_p11 = scmp.ne.s32.totalorder %s40_s30, %s12084_s21  ;;  %p12090_p13 = scmp.lt.s32.totalorder %s12084_s21, %s12084_s21 }
  0x20   :  { %p12091_p0 = por %p12090_p13, %p12089_p12 }
  0x22   :  { %p12092_p1 = pnand %p12091_p0, %p12085_p11 }
  0x24   :  { %12095 = shalt.err (!%p12092_p1)
}
  0x25   :  { %42 = dma.hbm_to_vmem [thread:$0]  %s14398_s3, 32, %s40_s30, [#allocation3]  }
  0x26   :  { %s12148_s22 = smov [#allocation6]   ;;  %s12149_s23 = smov [#allocation7]  }
  0x27   :  { %s65_s2 = sshll.u32 %s12148_s22, 4  ;;  %s75_s24 = sshll.u32 %s12149_s23, 4  ;;  %s66_s2 = int_to_ptr.vmem [resolvable:$true] %s65_s2  ;;  %s76_s24 = int_to_ptr.vmem [resolvable:$true] %s75_s24 }
  0x28   :  { %s12096_s27 = scalar_lea.hbm %s14403_s8, 64 }
  0x29   :  { %p12097_p2 = scmp.ne.s32.totalorder %s14403_s8, %s12096_s27  ;;  %p12100_p3 = scmp.lt.u32.totalorder %s12096_s27, %s14403_s8 }
  0x2b   :  { %p12102_p4 = pnand %p12100_p3, %p12097_p2 }
  0x2d   :  { %12105 = shalt.err (!%p12102_p4)
}
  0x2e   :  { %s12106_s3 = scalar_lea.vmem %s66_s2, 64  ;;  %p12111_p6 = scmp.lt.s32.totalorder %s66_s2, %s66_s2 }
  0x2f   :  { %p12107_p5 = scmp.ne.s32.totalorder %s66_s2, %s12106_s3  ;;  %p12112_p7 = scmp.lt.s32.totalorder %s12106_s3, %s12106_s3 }
  0x31   :  { %p12113_p8 = por %p12112_p7, %p12111_p6 }
  0x33   :  { %p12114_p9 = pnand %p12113_p8, %p12107_p5 }
  0x35   :  { %12117 = shalt.err (!%p12114_p9)
}
  0x36   :  { %68 = dma.hbm_to_vmem [thread:$0]  %s14403_s8, 64, %s66_s2, [#allocation5]  }
  0x37   :  { %s12118_s28 = scalar_lea.hbm %s14404_s9, 32 }
  0x38   :  { %p12119_p10 = scmp.ne.s32.totalorder %s14404_s9, %s12118_s28  ;;  %p12122_p11 = scmp.lt.u32.totalorder %s12118_s28, %s14404_s9 }
  0x3a   :  { %p12124_p12 = pnand %p12122_p11, %p12119_p10 }
  0x3c   :  { %12127 = shalt.err (!%p12124_p12)
}
  0x3d   :  { %s12128_s27 = scalar_lea.vmem %s76_s24, 32  ;;  %p12133_p0 = scmp.lt.s32.totalorder %s76_s24, %s76_s24 }
  0x3e   :  { %p12129_p13 = scmp.ne.s32.totalorder %s76_s24, %s12128_s27  ;;  %p12134_p1 = scmp.lt.s32.totalorder %s12128_s27, %s12128_s27 }
  0x40   :  { %p12135_p2 = por %p12134_p1, %p12133_p0 }
  0x42   :  { %p12136_p3 = pnand %p12135_p2, %p12129_p13 }
  0x44   :  { %12139 = shalt.err (!%p12136_p3)
}
  0x45   :  { %78 = dma.hbm_to_vmem [thread:$0]  %s14404_s9, 32, %s76_s24, [#allocation8]  }
  0x46   :  { %12140 = dma.done.wait [#allocation3], 32  }
  0x47   :  { %12141 = vsyncadd [#allocation3], 4294967264 }
  0x48   :  { %12142 = dma.done.wait [#allocation5], 128  }
  0x49   :  { %12143 = vsyncadd [#allocation5], 4294967168 }
  0x4a   :  { %12144 = dma.done.wait [#allocation8], 32  }
  0x4b   :  { %12145 = vsyncadd [#allocation8], 4294967264  ;;  %v12150_v0 = vmov 0.0|0.0   ;;  %vm12151_vm0 = vmmov 0   ;;  %v12152_v1 = vmov 0.0   ;;  %s14420_s29 = sld [smem:[#allocation13_spill]] }
  0x4c   :  { %10498 = vmatprep.subr.bf16.mxu0 %v12150_v0  ;;  %8638 = vmatprep.mubr.msk.f32.mxu0 %vm12151_vm0, %v12152_v1  ;;  %v117_v7 = vld [vmem:[%s14405_s10] sm:$0xff]  ;;  %v118_v8 = vld [vmem:[%s14405_s10 + $0x8] sm:$0xff]  ;;  %v119_v11 = vld [vmem:[%s14405_s10 + $0x10] sm:$0xff]  ;;  %s14421_s20 = sld [smem:[#allocation12_spill]]  ;;  %vm228_vm1 = vcmask 130048   ;;  %vm230_vm2 = vcmask 392192  }
  0x4d   :  { %10507 = vmatprep.subr.bf16.mxu1 %v12150_v0  ;;  %8673 = vmatprep.mubr.msk.f32.mxu1 %vm12151_vm0, %v12152_v1  ;;  %v12330_v10 = vpack.c.bf16 %v118_v8, %v117_v7  ;;  %v120_v12 = vld [vmem:[%s14405_s10 + $0x18] sm:$0xff]  ;;  %v121_v16 = vld [vmem:[%s14405_s10 + $0x20] sm:$0xff]  ;;  %v122_v17 = vld [vmem:[%s14405_s10 + $0x28] sm:$0xff]  ;;  %s14422_s23 = sld [smem:[#allocation14_spill]]  ;;  %s12153_s8 = smov 96   ;;  %vm472_vm3 = vcmask 261120  }
  0x4e   :  { %v12346_v15 = vpack.c.bf16 %v120_v12, %v119_v11  ;;  %v12363_v20 = vpack.c.bf16 %v122_v17, %v121_v16  ;;  %v123_v21 = vld [vmem:[%s14405_s10 + $0x30] sm:$0xff]  ;;  %v124_v22 = vld [vmem:[%s14405_s10 + $0x38] sm:$0xff]  ;;  %v125_v25 = vld [vmem:[%s14405_s10 + $0x40] sm:$0xff]  ;;  %s12154_s2 = smov 64   ;;  %vm589_vm4 = vcmask 523264   ;;  %s12156_s22 = smov 32  }
  0x4f   :  { %10509 = vmatpush3.bf16.msra.mxu1 %v12330_v10  ;;  %v12376_v24 = vpack.c.bf16 %v124_v22, %v123_v21  ;;  %v126_v26 = vld [vmem:[%s14405_s10 + $0x48] sm:$0xff]  ;;  %v127_v28 = vld [vmem:[%s14405_s10 + $0x50] sm:$0xff]  ;;  %v128_v29 = vld [vmem:[%s14405_s10 + $0x58] sm:$0xff]  ;;  %s12157_s27 = smov 80  }
  0x50   :  { %10510 = vmatprep.subr.bf16.mxu1 %v12150_v0  ;;  %v12391_v27 = vpack.c.bf16 %v126_v26, %v125_v25  ;;  %v12403_v30 = vpack.c.bf16 %v128_v29, %v127_v28  ;;  %v129_v31 = vld [vmem:[%s14405_s10 + $0x60] sm:$0xff]  ;;  %v130_v32 = vld [vmem:[%s14405_s10 + $0x68] sm:$0xff]  ;;  %v131_v34 = vld [vmem:[%s14405_s10 + $0x70] sm:$0xff] }
  0x51   :  { %v99_v2 = vld [vmem:[%s14420_s29] sm:$0xff]  ;;  %v100_v3 = vld [vmem:[%s14420_s29 + $0x8] sm:$0xff]  ;;  %v101_v4 = vld [vmem:[%s14420_s29 + $0x10] sm:$0xff]  ;;  %v12415_v33 = vpack.c.bf16 %v130_v32, %v129_v31 }
  0x52   :  { %v12316_v5 = vpack.c.bf16 %v100_v3, %v99_v2  ;;  %v102_v6 = vld [vmem:[%s14420_s29 + $0x18] sm:$0xff]  ;;  %v103_v13 = vld [vmem:[%s14420_s29 + $0x20] sm:$0xff]  ;;  %v104_v14 = vld [vmem:[%s14420_s29 + $0x28] sm:$0xff] }
  0x53   :  { %v12328_v9 = vpack.c.bf16 %v102_v6, %v101_v4  ;;  %v12356_v18 = vpack.c.bf16 %v104_v14, %v103_v13  ;;  %v227_v19 = vld [vmem:[%s14421_s20] sm:$0xff]  ;;  %10512 = vmatpush3.bf16.msra.mxu1 %v12346_v15  ;;  %v132_v35 = vld [vmem:[%s14405_s10 + $0x78] sm:$0xff]  ;;  %v106_v17 = vld [vmem:[%s14399_s4 + $0x8] sm:$0xff] }
  0x54   :  { %10500 = vmatpush3.bf16.msra.mxu0 %v12316_v5  ;;  %10513 = vmatprep.subr.bf16.mxu1 %v12150_v0  ;;  %v229_v23 = vsel %vm228_vm1, %v227_v19, 0.0  ;;  %v12434_v36 = vpack.c.bf16 %v132_v35, %v131_v34  ;;  %v12443_v37 = vld [vmem:[%s14422_s23] ss:$0 sm:$0xff]  ;;  %v12453_v49 = vld [vmem:[%s14422_s23 + $0x1] ss:$0 sm:$0xff]  ;;  %v107_v19 = vld [vmem:[%s14399_s4 + $0x10] sm:$0xff] }
  0x55   :  { %10501 = vmatprep.subr.bf16.mxu0 %v12150_v0  ;;  %v12458_v51 = vld [vmem:[%s14422_s23 + $0x2] ss:$0 sm:$0xff]  ;;  %v7632_v4 = vld [vmem:[#allocation2] ss:$0 sm:$0xff]  ;;  %v7633_v14 = vld [vmem:[#allocation2 + $0x1] ss:$0 sm:$0xff] }
  0x56   :  { %v105_v16 = vld [vmem:[%s14399_s4] sm:$0xff]  ;;  %v108_v22 = vld [vmem:[%s14399_s4 + $0x18] sm:$0xff]  ;;  %v110_v26 = vld [vmem:[%s14399_s4 + $0x28] sm:$0xff] }
  0x57   :  { %10515 = vmatpush3.bf16.msra.mxu1 %v12363_v20  ;;  %v12484_v21 = vpack.c.bf16 %v106_v17, %v105_v16  ;;  %v109_v25 = vld [vmem:[%s14399_s4 + $0x20] sm:$0xff] }
  0x58   :  { %10503 = vmatpush3.bf16.msra.mxu0 %v12328_v9  ;;  %10516 = vmatprep.subr.bf16.mxu1 %v12150_v0  ;;  %v12500_v28 = vpack.c.bf16 %v110_v26, %v109_v25  ;;  %v12592_v17 = vld [vmem:[#allocation4 + $0x1] ss:$0 sm:$0xff] }
  0x59   :  { %10504 = vmatprep.subr.bf16.mxu0 %v12150_v0 }
  0x5b   :  { %10518 = vmatpush3.bf16.msra.mxu1 %v12376_v24 }
  0x5c   :  { %10506 = vmatpush3.bf16.msra.mxu0 %v12356_v18  ;;  %10519 = vmatprep.subr.bf16.mxu1 %v12150_v0 }
  0x5d   :  { %10531 = vmatprep.subr.bf16.mxu0 %v12150_v0 }
  0x5f   :  { %8639 = vmatmul.mubr.msk.f32.vlgmr.msra.gmra.mrb[0].mxu0 %vm230_vm2, %v229_v23  ;;  %10521 = vmatpush3.bf16.msra.mxu1 %v12391_v27  ;;  %v12490_v23 = vpack.c.bf16 %v108_v22, %v107_v19  ;;  %v12594_v22 = vld [vmem:[#allocation4 + $0x2] ss:$0 sm:$0xff] }
  0x60   :  { %10533 = vmatpush3.bf16.msra.mxu0 %v12330_v10  ;;  %8708 = vmatprep.mubr.msk.f32.mxu0 %vm12151_vm0, %v12152_v1 }
  0x61   :  { %10534 = vmatprep.subr.bf16.mxu0 %v12150_v0  ;;  %10522 = vmatprep.subr.bf16.mxu1 %v12150_v0 }
  0x63   :  { %10524 = vmatpush3.bf16.msra.mxu1 %v12403_v30 }
  0x64   :  { %10536 = vmatpush3.bf16.msra.mxu0 %v12346_v15  ;;  %10525 = vmatprep.subr.bf16.mxu1 %v12150_v0 }
  0x65   :  { %10537 = vmatprep.subr.bf16.mxu0 %v12150_v0 }
  0x67   :  { %10527 = vmatpush3.bf16.msra.mxu1 %v12415_v33 }
  0x68   :  { %10539 = vmatpush3.bf16.msra.mxu0 %v12363_v20  ;;  %10528 = vmatprep.subr.bf16.mxu1 %v12150_v0 }
  0x69   :  { %10540 = vmatprep.subr.bf16.mxu0 %v12150_v0 }
  0x6b   :  { %10530 = vmatpush3.bf16.msra.mxu1 %v12434_v36 }
  0x6c   :  { %10542 = vmatpush3.bf16.msra.mxu0 %v12376_v24  ;;  %10555 = vmatprep.subr.bf16.mxu1 %v12150_v0 }
  0x6d   :  { %10543 = vmatprep.subr.bf16.mxu0 %v12150_v0 }
  0x70   :  { %10545 = vmatpush3.bf16.msra.mxu0 %v12391_v27 }
  0x71   :  { %10546 = vmatprep.subr.bf16.mxu0 %v12150_v0 }
  0x74   :  { %10548 = vmatpush3.bf16.msra.mxu0 %v12403_v30 }
  0x75   :  { %10549 = vmatprep.subr.bf16.mxu0 %v12150_v0 }
  0x78   :  { %10551 = vmatpush3.bf16.msra.mxu0 %v12415_v33 }
  0x79   :  { %10552 = vmatprep.subr.bf16.mxu0 %v12150_v0 }
  0x7c   :  { %10554 = vmatpush3.bf16.msra.mxu0 %v12434_v36 }
  0x7d   :  { %10564 = vmatprep.subr.bf16.mxu0 %v12150_v0 }
 0x132   :  { %v300_v38 = vpop.f32.mrb[0].mxu0 }
 0x133   :  { %v301_v39 = vadd.f32 %v12443_v37, %v300_v38  ;;  %v8640_v40 = vpop.f32.mrb[1].mxu0 }
 0x135   :  { %8674 = vmatmul.mubr.f32.vlgmr.msra.gmra.mrb[0].mxu1 %v301_v39 }
 0x136   :  { %8723 = vmatprep.mubr.msk.f32.mxu1 %vm12151_vm0, %v12152_v1  ;;  %10557 = vmatpush3.bf16.msra.mxu1 %v12484_v21 }
 0x137   :  { %10558 = vmatprep.subr.bf16.mxu1 %v12150_v0 }
 0x13a   :  { %10560 = vmatpush3.bf16.msra.mxu1 %v12490_v23 }
 0x13b   :  { %10561 = vmatprep.subr.bf16.mxu1 %v12150_v0 }
 0x13e   :  { %10563 = vmatpush3.bf16.msra.mxu1 %v12500_v28 }
 0x13f   :  { %10576 = vmatprep.subr.bf16.mxu1 %v12150_v0 }
 0x208   :  { %v370_v41 = vpop.f32.mrb[0].mxu1 }
 0x209   :  { %v374_v42 = vsub.f32 %v301_v39, %v370_v41  ;;  %v8675_v43 = vpop.f32.mrb[1].mxu1 }
 0x20a   :  { %v134_v43 = vld [vmem:[%s14406_s11 + $0x8] sm:$0xff] }
 0x20b   :  { %v375_v44 = vmul.f32 %v374_v42, %v374_v42 }
 0x20d   :  { %8709 = vmatmul.mubr.f32.vlgmr.msra.gmra.mrb[2].mxu0 %v375_v44  ;;  %v135_v44 = vld [vmem:[%s14406_s11 + $0x10] sm:$0xff] }
 0x20e   :  { %8742 = vmatprep.mubr.msk.f32.mxu0 %vm12151_vm0, %v12152_v1 }
 0x2e0   :  { %v442_v45 = vpop.f32.mrb[2].mxu0 }
 0x2e1   :  { %v443_v46 = vadd.f32 0.001, %v442_v45  ;;  %v8710_v47 = vpop.f32.mrb[3].mxu0 }
 0x2e3   :  { %11734 = vrsqrt.f32 %v443_v46  ;;  %v136_v46 = vld [vmem:[%s14406_s11 + $0x18] sm:$0xff] }
 0x2e4   :  { %v12526_v47 = vpack.c.bf16 %v136_v46, %v135_v44 }
 0x2ed   :  { %v11735_v48 = vpop.eup %11734 }
 0x2ee   :  { %v447_v50 = vmul.f32 %v11735_v48, %v374_v42  ;;  %v133_v42 = vld [vmem:[%s14406_s11] sm:$0xff] }
 0x2ef   :  { %v12520_v45 = vpack.c.bf16 %v134_v43, %v133_v42  ;;  %v137_v48 = vld [vmem:[%s14406_s11 + $0x20] sm:$0xff] }
 0x2f0   :  { %v448_v52 = vmul.f32 %v12453_v49, %v447_v50  ;;  %v138_v50 = vld [vmem:[%s14406_s11 + $0x28] sm:$0xff] }
 0x2f1   :  { %10566 = vmatpush3.bf16.msra.mxu0 %v12520_v45 }
 0x2f2   :  { %v449_v53 = vadd.f32 %v12458_v51, %v448_v52  ;;  %10567 = vmatprep.subr.bf16.mxu0 %v12150_v0 }
 0x2f4   :  { %11736 = vtanh.f32 %v449_v53  ;;  %v7645_v55 = vmul.f32 -1.442695, %v449_v53 }
 0x2f5   :  { %10569 = vmatpush3.bf16.msra.mxu0 %v12526_v47 }
 0x2f6   :  { %11738 = vpow2.f32 %v7645_v55  ;;  %10570 = vmatprep.subr.bf16.mxu0 %v12150_v0 }
 0x2fe   :  { %v11737_v54 = vpop.eup %11736 }
 0x2ff   :  { %459 = vrot.lane.b32.xlu0 %v11737_v54, %s12153_s8  ;;  %v12536_v54 = vpack.c.bf16 %v138_v50, %v137_v48  ;;  %v7637_v50 = vld [vmem:[%s14401_s6] ss:$0 sm:$0xff] }
 0x300   :  { %v11739_v56 = vpop.eup %11738 }
 0x301   :  { %v453_v57 = vadd.f32 1.0, %v11739_v56  ;;  %10572 = vmatpush3.bf16.msra.mxu0 %v12536_v54 }
 0x302   :  { %10573 = vmatprep.subr.bf16.mxu0 %v12150_v0 }
 0x303   :  { %11740 = vrcp.f32 %v453_v57 }
 0x30d   :  { %v11741_v58 = vpop.eup %11740 }
 0x30e   :  { %v457_v61 = vmul.f32 0.0, %v11741_v58 }
 0x371   :  { %v460_v59 = vpop.permute.xlu0 %459 }
 0x372   :  { %v462_v60 = vmul.f32 %v11741_v58, %v460_v59  ;;  %v139_v59 = vld [vmem:[%s14406_s11 + $0x30] sm:$0xff] }
 0x374   :  { %464 = vrot.lane.b32.xlu0 %v462_v60, %s12154_s2  ;;  %v140_v60 = vld [vmem:[%s14406_s11 + $0x38] sm:$0xff]  ;;  %s12155_s11 = smov 112  }
 0x3e6   :  { %v465_v62 = vpop.permute.xlu0 %464 }
 0x3e7   :  { %v12464_v63 = vadd.f32 %v465_v62, %v457_v61  ;;  %v12561_v61 = vpack.c.bf16 %v140_v60, %v139_v59  ;;  %v12567_v62 = vld [vmem:[#allocation4] ss:$0 sm:$0xff]  ;;  %v7638_v60 = vld [vmem:[%s14401_s6 + $0x1] ss:$0 sm:$0xff] }
 0x3e9   :  { %469 = vrot.lane.b32.xlu1 %v12464_v63, %s12154_s2  ;;  %10575 = vmatpush3.bf16.msra.mxu0 %v12561_v61 }
 0x3ea   :  { %10588 = vmatprep.subr.bf16.mxu0 %v12150_v0 }
 0x45b   :  { %v470_v2 = vpop.permute.xlu1 %469 }
 0x45c   :  { %v473_v3 = vsel %vm472_vm3, %v470_v2, 0.0 }
 0x45d   :  { %474 = vadd.xlane.f32.xlu1 %v473_v3 }
 0x46e   :  { %492 = vrot.lane.b32.xlu1 %v7632_v4, %s12154_s2 }
 0x472   :  { %503 = vrot.lane.b32.xlu1 %v11741_v58, %s12153_s8 }
 0x4ea   :  { %v475_v6 = vpop.xlane.xlu1 %474 }
 0x4eb   :  { %v477_v7 = vmul.f32 0.03125, %v475_v6 }
 0x4ed   :  { %v478_v8 = vsub.f32 %v12464_v63, %v477_v7 }
 0x4ee   :  { %v12505_v38 = vpop.permute.xlu1 %492 }
 0x4ef   :  { %v479_v11 = vmul.f32 %v478_v8, %v478_v8 }
 0x4f1   :  { %481 = vrot.lane.b32.xlu0 %v479_v11, %s12154_s2 }
 0x4f2   :  { %v504_v53 = vpop.permute.xlu1 %503 }
 0x563   :  { %v482_v12 = vpop.permute.xlu0 %481 }
 0x564   :  { %v484_v13 = vsel %vm472_vm3, %v482_v12, 0.0 }
 0x565   :  { %485 = vadd.xlane.f32.xlu0 %v484_v13 }
 0x57b   :  { %497 = vrot.lane.b32.xlu0 %v7633_v14, %s12154_s2 }
 0x5f2   :  { %v486_v29 = vpop.xlane.xlu0 %485 }
 0x5f3   :  { %v487_v31 = vmul.f32 0.03125, %v486_v29 }
 0x5f5   :  { %v488_v32 = vadd.f32 0.001, %v487_v31 }
 0x5f6   :  { %v12507_v39 = vpop.permute.xlu0 %497 }
 0x5f7   :  { %11742 = vrsqrt.f32 %v488_v32 }
 0x601   :  { %v11743_v34 = vpop.eup %11742 }
 0x602   :  { %v490_v35 = vmul.f32 %v11743_v34, %v478_v8 }
 0x604   :  { %v495_v40 = vmul.f32 %v12505_v38, %v490_v35 }
 0x606   :  { %v500_v41 = vadd.f32 %v12507_v39, %v495_v40 }
 0x608   :  { %11744 = vtanh.f32 %v500_v41 }
 0x612   :  { %v11745_v52 = vpop.eup %11744 }
 0x613   :  { %v506_v55 = vmul.f32 %v11745_v52, %v504_v53 }
 0x615   :  { %v12539_v56 = vmul.f32 0.9, %v506_v55 }
 0x617   :  { %512 = vrot.lane.b32.xlu1 %v12539_v56, %s12154_s2 }
 0x689   :  { %v513_v57 = vpop.permute.xlu1 %512 }
 0x68a   :  { %v515_v58 = vsel %vm472_vm3, %v513_v57, 0.0 }
 0x68b   :  { %8724 = vmatmul.mubr.msk.f32.vlgmr.msra.gmra.mrb[2].mxu1 %vm230_vm2, %v515_v58 }
 0x68c   :  { %10578 = vmatpush3.bf16.msra.mxu1 %v12520_v45  ;;  %8761 = vmatprep.mubr.msk.f32.mxu1 %vm12151_vm0, %v12152_v1 }
 0x68d   :  { %10579 = vmatprep.subr.bf16.mxu1 %v12150_v0 }
 0x690   :  { %10581 = vmatpush3.bf16.msra.mxu1 %v12526_v47 }
 0x691   :  { %10582 = vmatprep.subr.bf16.mxu1 %v12150_v0 }
 0x694   :  { %10584 = vmatpush3.bf16.msra.mxu1 %v12536_v54 }
 0x695   :  { %10585 = vmatprep.subr.bf16.mxu1 %v12150_v0 }
 0x698   :  { %10587 = vmatpush3.bf16.msra.mxu1 %v12561_v61 }
 0x699   :  { %10597 = vmatprep.subr.bf16.mxu1 %v12150_v0 }
 0x75e   :  { %v585_v2 = vpop.f32.mrb[2].mxu1 }
 0x75f   :  { %v586_v3 = vadd.f32 %v12567_v62, %v585_v2  ;;  %v8725_v4 = vpop.f32.mrb[3].mxu1  ;;  %v111_v2 = vld [vmem:[%s14402_s7] sm:$0xff] }
 0x760   :  { %v113_v4 = vld [vmem:[%s14402_s7 + $0x10] sm:$0xff] }
 0x761   :  { %8743 = vmatmul.mubr.msk.f32.vlgmr.msra.gmra.mrb[4].mxu0 %vm589_vm4, %v586_v3 }
 0x762   :  { %8776 = vmatprep.mubr.msk.f32.mxu0 %vm12151_vm0, %v12152_v1 }
 0x834   :  { %v659_v6 = vpop.f32.mrb[4].mxu0 }
 0x835   :  { %v663_v7 = vsub.f32 %v586_v3, %v659_v6  ;;  %v8744_v8 = vpop.f32.mrb[5].mxu0  ;;  %v112_v3 = vld [vmem:[%s14402_s7 + $0x8] sm:$0xff] }
 0x836   :  { %v12628_v6 = vpack.c.bf16 %v112_v3, %v111_v2 }
 0x837   :  { %v664_v11 = vmul.f32 %v663_v7, %v663_v7 }
 0x838   :  { %10590 = vmatpush3.bf16.msra.mxu0 %v12628_v6 }
 0x839   :  { %8762 = vmatmul.mubr.msk.f32.vlgmr.msra.gmra.mrb[4].mxu1 %vm589_vm4, %v664_v11  ;;  %10591 = vmatprep.subr.bf16.mxu0 %v12150_v0  ;;  %v115_v11 = vld [vmem:[%s14402_s7 + $0x20] sm:$0xff] }
 0x83a   :  { %10599 = vmatpush3.bf16.msra.mxu1 %v12330_v10  ;;  %8811 = vmatprep.mubr.msk.f32.mxu1 %vm12151_vm0, %v12152_v1 }
 0x83b   :  { %10600 = vmatprep.subr.bf16.mxu1 %v12150_v0 }
 0x83e   :  { %10602 = vmatpush3.bf16.msra.mxu1 %v12346_v15 }
 0x83f   :  { %10603 = vmatprep.subr.bf16.mxu1 %v12150_v0 }
 0x842   :  { %10605 = vmatpush3.bf16.msra.mxu1 %v12363_v20 }
 0x843   :  { %10606 = vmatprep.subr.bf16.mxu1 %v12150_v0 }
 0x846   :  { %10608 = vmatpush3.bf16.msra.mxu1 %v12376_v24 }
 0x847   :  { %10609 = vmatprep.subr.bf16.mxu1 %v12150_v0 }
 0x84a   :  { %10611 = vmatpush3.bf16.msra.mxu1 %v12391_v27 }
 0x84b   :  { %10612 = vmatprep.subr.bf16.mxu1 %v12150_v0 }
 0x84e   :  { %10614 = vmatpush3.bf16.msra.mxu1 %v12403_v30 }
 0x84f   :  { %10615 = vmatprep.subr.bf16.mxu1 %v12150_v0 }
 0x852   :  { %10617 = vmatpush3.bf16.msra.mxu1 %v12415_v33 }
 0x853   :  { %10618 = vmatprep.subr.bf16.mxu1 %v12150_v0 }
 0x856   :  { %10620 = vmatpush3.bf16.msra.mxu1 %v12434_v36 }
 0x857   :  { %10645 = vmatprep.subr.bf16.mxu1 %v12150_v0 }
 0x90c   :  { %v734_v12 = vpop.f32.mrb[4].mxu1 }
 0x90d   :  { %v735_v13 = vadd.f32 0.001, %v734_v12  ;;  %v8763_v14 = vpop.f32.mrb[5].mxu1  ;;  %v116_v12 = vld [vmem:[%s14402_s7 + $0x28] sm:$0xff] }
 0x90f   :  { %11746 = vrsqrt.f32 %v735_v13  ;;  %v12644_v13 = vpack.c.bf16 %v116_v12, %v115_v11  ;;  %v12702_v11 = vld [vmem:[#allocation6 + $0x1] ss:$0 sm:$0xff] }
 0x919   :  { %v11747_v16 = vpop.eup %11746 }
 0x91a   :  { %v739_v19 = vmul.f32 %v11747_v16, %v663_v7  ;;  %v114_v7 = vld [vmem:[%s14402_s7 + $0x18] sm:$0xff] }
 0x91b   :  { %v12634_v8 = vpack.c.bf16 %v114_v7, %v113_v4 }
 0x91c   :  { %v740_v25 = vmul.f32 %v12592_v17, %v739_v19 }
 0x91d   :  { %10593 = vmatpush3.bf16.msra.mxu0 %v12634_v8 }
 0x91e   :  { %v741_v26 = vadd.f32 %v12594_v22, %v740_v25  ;;  %10594 = vmatprep.subr.bf16.mxu0 %v12150_v0 }
 0x920   :  { %11748 = vtanh.f32 %v741_v26  ;;  %v7649_v31 = vmul.f32 -1.442695, %v741_v26 }
 0x921   :  { %10596 = vmatpush3.bf16.msra.mxu0 %v12644_v13 }
 0x922   :  { %11750 = vpow2.f32 %v7649_v31  ;;  %10621 = vmatprep.subr.bf16.mxu0 %v12150_v0 }
 0x92a   :  { %v11749_v29 = vpop.eup %11748 }
 0x92b   :  { %751 = vrot.lane.b32.xlu0 %v11749_v29, %s12155_s11 }
 0x92c   :  { %v11751_v32 = vpop.eup %11750 }
 0x92d   :  { %v745_v34 = vadd.f32 1.0, %v11751_v32 }
 0x92f   :  { %11752 = vrcp.f32 %v745_v34 }
 0x939   :  { %v11753_v35 = vpop.eup %11752 }
 0x93a   :  { %v749_v42 = vmul.f32 0.0, %v11753_v35 }
 0x99d   :  { %v752_v40 = vpop.permute.xlu0 %751 }
 0x99e   :  { %v754_v41 = vmul.f32 %v11753_v35, %v752_v40 }
 0x9a0   :  { %756 = vrot.lane.b32.xlu1 %v754_v41, %s12156_s22 }
 0xa12   :  { %v757_v43 = vpop.permute.xlu1 %756 }
 0xa13   :  { %v12600_v44 = vadd.f32 %v757_v43, %v749_v42 }
 0xa15   :  { %761 = vrot.lane.b32.xlu0 %v12600_v44, %s12153_s8 }
 0xa87   :  { %v762_v46 = vpop.permute.xlu0 %761 }
 0xa88   :  { %v764_v48 = vsel %vm228_vm1, %v762_v46, 0.0 }
 0xa89   :  { %765 = vadd.xlane.f32.xlu1 %v764_v48 }
 0xa9a   :  { %783 = vrot.lane.b32.xlu1 %v7637_v50, %s12156_s22  ;;  %v12679_v50 = vld [vmem:[#allocation6] ss:$0 sm:$0xff] }
 0xa9e   :  { %794 = vrot.lane.b32.xlu1 %v11753_v35, %s12155_s11 }
 0xb16   :  { %v766_v52 = vpop.xlane.xlu1 %765 }
 0xb17   :  { %v768_v53 = vmul.f32 0.0625, %v766_v52 }
 0xb19   :  { %v769_v55 = vsub.f32 %v12600_v44, %v768_v53 }
 0xb1a   :  { %v12649_v29 = vpop.permute.xlu1 %783 }
 0xb1b   :  { %v770_v57 = vmul.f32 %v769_v55, %v769_v55 }
 0xb1d   :  { %772 = vrot.lane.b32.xlu0 %v770_v57, %s12153_s8 }
 0xb1e   :  { %v795_v40 = vpop.permute.xlu1 %794 }
 0xb8f   :  { %v773_v58 = vpop.permute.xlu0 %772 }
 0xb90   :  { %v775_v59 = vsel %vm228_vm1, %v773_v58, 0.0 }
 0xb91   :  { %776 = vadd.xlane.f32.xlu0 %v775_v59 }
 0xba7   :  { %788 = vrot.lane.b32.xlu0 %v7638_v60, %s12156_s22 }
 0xbab   :  { %806 = vrot.lane.b32.xlu0 %v12539_v56, %s12157_s27 }
 0xc1e   :  { %v777_v14 = vpop.xlane.xlu0 %776 }
 0xc1f   :  { %v778_v16 = vmul.f32 0.0625, %v777_v14  ;;  %v12704_v14 = vld [vmem:[#allocation6 + $0x2] ss:$0 sm:$0xff] }
 0xc21   :  { %v779_v19 = vadd.f32 0.001, %v778_v16 }
 0xc22   :  { %v12652_v32 = vpop.permute.xlu0 %788 }
 0xc23   :  { %11754 = vrsqrt.f32 %v779_v19 }
 0xc26   :  { %v807_v43 = vpop.permute.xlu0 %806 }
 0xc2d   :  { %v11755_v25 = vpop.eup %11754 }
 0xc2e   :  { %v781_v26 = vmul.f32 %v11755_v25, %v769_v55 }
 0xc30   :  { %v786_v31 = vmul.f32 %v12649_v29, %v781_v26 }
 0xc32   :  { %v791_v34 = vadd.f32 %v12652_v32, %v786_v31 }
 0xc34   :  { %11756 = vtanh.f32 %v791_v34 }
 0xc3e   :  { %v11757_v35 = vpop.eup %11756 }
 0xc3f   :  { %v797_v41 = vmul.f32 %v11757_v35, %v795_v40 }
 0xc41   :  { %v12655_v42 = vmul.f32 0.9, %v797_v41 }
 0xc43   :  { %803 = vrot.lane.b32.xlu1 %v12655_v42, %s12153_s8 }
 0xcb5   :  { %v804_v46 = vpop.permute.xlu1 %803 }
 0xcb6   :  { %v809_v48 = vsel %vm228_vm1, %v804_v46, %v807_v43  ;;  %v12711_v43 = vmul.f32 0.5, %v12464_v63 }
 0xcb7   :  { %8777 = vmatmul.mubr.msk.f32.vlgmr.msra.gmra.mrb[6].mxu0 %vm230_vm2, %v809_v48 }
 0xcb8   :  { %10623 = vmatpush3.bf16.msra.mxu0 %v12330_v10  ;;  %8846 = vmatprep.mubr.msk.f32.mxu0 %vm12151_vm0, %v12152_v1 }
 0xcb9   :  { %10624 = vmatprep.subr.bf16.mxu0 %v12150_v0 }
 0xcbc   :  { %10626 = vmatpush3.bf16.msra.mxu0 %v12346_v15 }
 0xcbd   :  { %10627 = vmatprep.subr.bf16.mxu0 %v12150_v0 }
 0xcc0   :  { %10629 = vmatpush3.bf16.msra.mxu0 %v12363_v20 }
 0xcc1   :  { %10630 = vmatprep.subr.bf16.mxu0 %v12150_v0 }
 0xcc4   :  { %10632 = vmatpush3.bf16.msra.mxu0 %v12376_v24 }
 0xcc5   :  { %10633 = vmatprep.subr.bf16.mxu0 %v12150_v0 }
 0xcc8   :  { %10635 = vmatpush3.bf16.msra.mxu0 %v12391_v27 }
 0xcc9   :  { %10636 = vmatprep.subr.bf16.mxu0 %v12150_v0 }
 0xccc   :  { %10638 = vmatpush3.bf16.msra.mxu0 %v12403_v30 }
 0xccd   :  { %10639 = vmatprep.subr.bf16.mxu0 %v12150_v0 }
 0xcd0   :  { %10641 = vmatpush3.bf16.msra.mxu0 %v12415_v33 }
 0xcd1   :  { %10642 = vmatprep.subr.bf16.mxu0 %v12150_v0 }
 0xcd4   :  { %10644 = vmatpush3.bf16.msra.mxu0 %v12434_v36 }
 0xcd5   :  { %10660 = vmatprep.subr.bf16.mxu0 %v12150_v0 }
 0xd8a   :  { %v879_v52 = vpop.f32.mrb[6].mxu0 }
 0xd8b   :  { %v880_v53 = vadd.f32 %v12679_v50, %v879_v52  ;;  %v8778_v55 = vpop.f32.mrb[7].mxu0 }
 0xd8d   :  { %8812 = vmatmul.mubr.f32.vlgmr.msra.gmra.mrb[6].mxu1 %v880_v53 }
 0xd8e   :  { %8857 = vmatprep.mubr.msk.f32.mxu1 %vm12151_vm0, %v12152_v1 }
 0xe60   :  { %v949_v57 = vpop.f32.mrb[6].mxu1 }
 0xe61   :  { %v953_v58 = vsub.f32 %v880_v53, %v949_v57  ;;  %v8813_v59 = vpop.f32.mrb[7].mxu1  ;;  %v7642_v57 = vld [vmem:[#allocation7] ss:$0 sm:$0xff] }
 0xe63   :  { %v954_v60 = vmul.f32 %v953_v58, %v953_v58 }
 0xe65   :  { %8847 = vmatmul.mubr.f32.vlgmr.msra.gmra.mrb[8].mxu0 %v954_v60 }
 0xe66   :  { %10662 = vmatpush3.bf16.msra.mxu0 %v12330_v10  ;;  %8907 = vmatprep.mubr.msk.f32.mxu0 %vm12151_vm0, %v12152_v1 }
 0xe67   :  { %10663 = vmatprep.subr.bf16.mxu0 %v12150_v0 }
 0xe6a   :  { %10665 = vmatpush3.bf16.msra.mxu0 %v12346_v15 }
 0xe6b   :  { %10666 = vmatprep.subr.bf16.mxu0 %v12150_v0 }
 0xe6e   :  { %10668 = vmatpush3.bf16.msra.mxu0 %v12363_v20 }
 0xe6f   :  { %10669 = vmatprep.subr.bf16.mxu0 %v12150_v0 }
 0xe72   :  { %10671 = vmatpush3.bf16.msra.mxu0 %v12376_v24 }
 0xe73   :  { %10672 = vmatprep.subr.bf16.mxu0 %v12150_v0 }
 0xe76   :  { %10674 = vmatpush3.bf16.msra.mxu0 %v12391_v27 }
 0xe77   :  { %10675 = vmatprep.subr.bf16.mxu0 %v12150_v0 }
 0xe7a   :  { %10677 = vmatpush3.bf16.msra.mxu0 %v12403_v30 }
 0xe7b   :  { %10678 = vmatprep.subr.bf16.mxu0 %v12150_v0 }
 0xe7e   :  { %10680 = vmatpush3.bf16.msra.mxu0 %v12415_v33 }
 0xe7f   :  { %10681 = vmatprep.subr.bf16.mxu0 %v12150_v0 }
 0xe82   :  { %10683 = vmatpush3.bf16.msra.mxu0 %v12434_v36 }
 0xe83   :  { %10708 = vmatprep.subr.bf16.mxu0 %v12150_v0 }
 0xf38   :  { %v1021_v2 = vpop.f32.mrb[8].mxu0 }
 0xf39   :  { %v1022_v3 = vadd.f32 0.001, %v1021_v2  ;;  %v8848_v4 = vpop.f32.mrb[9].mxu0 }
 0xf3a   :  { %v7643_v4 = vld [vmem:[#allocation7 + $0x1] ss:$0 sm:$0xff] }
 0xf3b   :  { %11758 = vrsqrt.f32 %v1022_v3 }
 0xf45   :  { %v11759_v7 = vpop.eup %11758 }
 0xf46   :  { %v1026_v12 = vmul.f32 %v11759_v7, %v953_v58  ;;  %v141_v7 = vld [vmem:[%s14407_s12] sm:$0xff] }
 0xf48   :  { %v1027_v16 = vmul.f32 %v12702_v11, %v1026_v12  ;;  %v142_v12 = vld [vmem:[%s14407_s12 + $0x8] sm:$0xff] }
 0xf4a   :  { %v1028_v19 = vadd.f32 %v12704_v14, %v1027_v16  ;;  %v143_v16 = vld [vmem:[%s14407_s12 + $0x10] sm:$0xff] }
 0xf4c   :  { %11760 = vtanh.f32 %v1028_v19  ;;  %v7651_v26 = vmul.f32 -1.442695, %v1028_v19  ;;  %v12734_v19 = vpack.c.bf16 %v142_v12, %v141_v7  ;;  %v12793_v12 = vld [vmem:[%s14408_s13] ss:$0 sm:$0xff] }
 0xf4e   :  { %11762 = vpow2.f32 %v7651_v26  ;;  %10647 = vmatpush3.bf16.msra.mxu1 %v12734_v19 }
 0xf4f   :  { %10648 = vmatprep.subr.bf16.mxu1 %v12150_v0 }
 0xf56   :  { %v11761_v25 = vpop.eup %11760 }
 0xf57   :  { %1038 = vrot.lane.b32.xlu1 %v11761_v25, %s12153_s8  ;;  %v144_v25 = vld [vmem:[%s14407_s12 + $0x18] sm:$0xff] }
 0xf58   :  { %v11763_v31 = vpop.eup %11762  ;;  %v12740_v26 = vpack.c.bf16 %v144_v25, %v143_v16 }
 0xf59   :  { %v1032_v34 = vadd.f32 1.0, %v11763_v31 }
 0xf5a   :  { %10650 = vmatpush3.bf16.msra.mxu1 %v12740_v26 }
 0xf5b   :  { %11764 = vrcp.f32 %v1032_v34  ;;  %10651 = vmatprep.subr.bf16.mxu1 %v12150_v0 }
 0xf65   :  { %v11765_v35 = vpop.eup %11764 }
 0xf66   :  { %v1036_v46 = vmul.f32 %v11765_v35, %v12711_v43 }
 0xfc9   :  { %v1039_v40 = vpop.permute.xlu1 %1038 }
 0xfca   :  { %v1041_v41 = vmul.f32 %v11765_v35, %v1039_v40 }
 0xfcc   :  { %1043 = vrot.lane.b32.xlu0 %v1041_v41, %s12154_s2 }
0x103e   :  { %v1044_v48 = vpop.permute.xlu0 %1043 }
0x103f   :  { %v12714_v52 = vadd.f32 %v1044_v48, %v1036_v46 }
0x1041   :  { %1048 = vrot.lane.b32.xlu1 %v12714_v52, %s12154_s2 }
0x10b3   :  { %v1049_v53 = vpop.permute.xlu1 %1048 }
0x10b4   :  { %v1051_v55 = vsel %vm472_vm3, %v1049_v53, 0.0 }
0x10b5   :  { %1052 = vadd.xlane.f32.xlu0 %v1051_v55 }
0x10cb   :  { %1069 = vrot.lane.b32.xlu0 %v7642_v57, %s12154_s2 }
0x10cf   :  { %1080 = vrot.lane.b32.xlu0 %v11765_v35, %s12153_s8 }
0x1142   :  { %v1053_v58 = vpop.xlane.xlu0 %1052 }
0x1143   :  { %v1054_v63 = vmul.f32 0.03125, %v1053_v58 }
0x1145   :  { %v1055_v59 = vsub.f32 %v12714_v52, %v1054_v63 }
0x1146   :  { %v12745_v46 = vpop.permute.xlu0 %1069 }
0x1147   :  { %v1056_v60 = vmul.f32 %v1055_v59, %v1055_v59 }
0x1149   :  { %1058 = vrot.lane.b32.xlu1 %v1056_v60, %s12154_s2 }
0x114a   :  { %v1081_v58 = vpop.permute.xlu0 %1080 }
0x11bb   :  { %v1059_v2 = vpop.permute.xlu1 %1058 }
0x11bc   :  { %v1061_v3 = vsel %vm472_vm3, %v1059_v2, 0.0  ;;  %v1085_v2 = vmul.f32 0.1, %v12539_v56  ;;  %v7653_v56 = vld [vmem:[%s14421_s20 + $0x8] sm:$0xff] }
0x11bd   :  { %1062 = vadd.xlane.f32.xlu1 %v1061_v3 }
0x11ce   :  { %1074 = vrot.lane.b32.xlu1 %v7643_v4, %s12154_s2 }
0x124a   :  { %v1063_v31 = vpop.xlane.xlu1 %1062 }
0x124b   :  { %v1064_v34 = vmul.f32 0.03125, %v1063_v31 }
0x124d   :  { %v1065_v35 = vadd.f32 0.001, %v1064_v34 }
0x124e   :  { %v12747_v48 = vpop.permute.xlu1 %1074 }
0x124f   :  { %11766 = vrsqrt.f32 %v1065_v35 }
0x1259   :  { %v11767_v40 = vpop.eup %11766 }
0x125a   :  { %v1067_v41 = vmul.f32 %v11767_v40, %v1055_v59 }
0x125c   :  { %v1072_v53 = vmul.f32 %v12745_v46, %v1067_v41 }
0x125e   :  { %v1077_v55 = vadd.f32 %v12747_v48, %v1072_v53 }
0x1260   :  { %11768 = vtanh.f32 %v1077_v55 }
0x126a   :  { %v11769_v57 = vpop.eup %11768 }
0x126b   :  { %v1083_v63 = vmul.f32 %v11769_v57, %v1081_v58 }
0x126d   :  { %v1084_v60 = vmul.f32 0.9, %v1083_v63 }
0x126f   :  { %v12752_v3 = vadd.f32 %v1085_v2, %v1084_v60 }
0x1271   :  { %1168 = vrot.lane.b32.xlu1 %v12752_v3, %s12157_s27  ;;  %1091 = vrot.lane.b32.xlu0 %v12752_v3, %s12154_s2 }
0x12e3   :  { %v1092_v59 = vpop.permute.xlu0 %1091  ;;  %v1169_v4 = vpop.permute.xlu1 %1168 }
0x12e4   :  { %8858 = vmatmul.mubr.msk.f32.vlgmr.msra.gmra.mrb[8].mxu1 %vm472_vm3, %v1092_v59  ;;  %v1171_v7 = vsel %vm228_vm1, %v7653_v56, %v1169_v4 }
0x12e5   :  { %10653 = vmatpush3.bf16.msra.mxu1 %v12316_v5  ;;  %8872 = vmatprep.mubr.msk.f32.mxu1 %vm12151_vm0, %v12152_v1 }
0x12e6   :  { %10654 = vmatprep.subr.bf16.mxu1 %v12150_v0 }
0x12e9   :  { %10656 = vmatpush3.bf16.msra.mxu1 %v12328_v9 }
0x12ea   :  { %10657 = vmatprep.subr.bf16.mxu1 %v12150_v0 }
0x12ed   :  { %10659 = vmatpush3.bf16.msra.mxu1 %v12356_v18 }
0x12ee   :  { %10684 = vmatprep.subr.bf16.mxu1 %v12150_v0 }
0x12f0   :  { %8873 = vmatmul.mubr.msk.f32.vlgmr.msra.gmra.mrb[10].mxu1 %vm230_vm2, %v1171_v7 }
0x12f1   :  { %10686 = vmatpush3.bf16.msra.mxu1 %v12330_v10  ;;  %8942 = vmatprep.mubr.msk.f32.mxu1 %vm12151_vm0, %v12152_v1 }
0x12f2   :  { %10687 = vmatprep.subr.bf16.mxu1 %v12150_v0 }
0x12f5   :  { %10689 = vmatpush3.bf16.msra.mxu1 %v12346_v15 }
0x12f6   :  { %10690 = vmatprep.subr.bf16.mxu1 %v12150_v0 }
0x12f9   :  { %10692 = vmatpush3.bf16.msra.mxu1 %v12363_v20 }
0x12fa   :  { %10693 = vmatprep.subr.bf16.mxu1 %v12150_v0 }
0x12fd   :  { %10695 = vmatpush3.bf16.msra.mxu1 %v12376_v24 }
0x12fe   :  { %10696 = vmatprep.subr.bf16.mxu1 %v12150_v0 }
0x1301   :  { %10698 = vmatpush3.bf16.msra.mxu1 %v12391_v27 }
0x1302   :  { %10699 = vmatprep.subr.bf16.mxu1 %v12150_v0 }
0x1305   :  { %10701 = vmatpush3.bf16.msra.mxu1 %v12403_v30 }
0x1306   :  { %10702 = vmatprep.subr.bf16.mxu1 %v12150_v0 }
0x1309   :  { %10704 = vmatpush3.bf16.msra.mxu1 %v12415_v33 }
0x130a   :  { %10705 = vmatprep.subr.bf16.mxu1 %v12150_v0 }
0x130d   :  { %10707 = vmatpush3.bf16.msra.mxu1 %v12434_v36 }
0x130e   :  { %10717 = vmatprep.subr.bf16.mxu1 %v12150_v0 }
0x13b7   :  { %v1161_v16 = vpop.f32.mrb[8].mxu1 }
0x13b8   :  { %v1162_v25 = vadd.f32 %v12793_v12, %v1161_v16  ;;  %v8859_v31 = vpop.f32.mrb[9].mxu1 }
0x13ba   :  { %1165 = vst [vmem:[%s14409_s14] sm:$0xff] %v1162_v25 }
0x13c3   :  { %v1241_v34 = vpop.f32.mrb[10].mxu1 }
0x13c4   :  { %v1242_v35 = vadd.f32 %v12443_v37, %v1241_v34  ;;  %v8874_v40 = vpop.f32.mrb[11].mxu1 }
0x13c5   :  { %v1087_v40 = vmul.f32 0.5, %v12714_v52 }
0x13c6   :  { %8908 = vmatmul.mubr.f32.vlgmr.msra.gmra.mrb[10].mxu0 %v1242_v35 }
0x13c7   :  { %10710 = vmatpush3.bf16.msra.mxu0 %v12484_v21  ;;  %8957 = vmatprep.mubr.msk.f32.mxu0 %vm12151_vm0, %v12152_v1 }
0x13c8   :  { %10711 = vmatprep.subr.bf16.mxu0 %v12150_v0 }
0x13cb   :  { %10713 = vmatpush3.bf16.msra.mxu0 %v12490_v23 }
0x13cc   :  { %10714 = vmatprep.subr.bf16.mxu0 %v12150_v0 }
0x13cf   :  { %10716 = vmatpush3.bf16.msra.mxu0 %v12500_v28 }
0x13d0   :  { %10729 = vmatprep.subr.bf16.mxu0 %v12150_v0 }
0x1499   :  { %v1311_v41 = vpop.f32.mrb[10].mxu0 }
0x149a   :  { %v1315_v53 = vsub.f32 %v1242_v35, %v1311_v41  ;;  %v8909_v37 = vpop.f32.mrb[11].mxu0 }
0x149c   :  { %v1316_v55 = vmul.f32 %v1315_v53, %v1315_v53 }
0x149e   :  { %8943 = vmatmul.mubr.f32.vlgmr.msra.gmra.mrb[12].mxu1 %v1316_v55 }
0x149f   :  { %10719 = vmatpush3.bf16.msra.mxu1 %v12520_v45  ;;  %8976 = vmatprep.mubr.msk.f32.mxu1 %vm12151_vm0, %v12152_v1 }
0x14a0   :  { %10720 = vmatprep.subr.bf16.mxu1 %v12150_v0 }
0x14a3   :  { %10722 = vmatpush3.bf16.msra.mxu1 %v12526_v47 }
0x14a4   :  { %10723 = vmatprep.subr.bf16.mxu1 %v12150_v0 }
0x14a7   :  { %10725 = vmatpush3.bf16.msra.mxu1 %v12536_v54 }
0x14a8   :  { %10726 = vmatprep.subr.bf16.mxu1 %v12150_v0 }
0x14ab   :  { %10728 = vmatpush3.bf16.msra.mxu1 %v12561_v61 }
0x14ac   :  { %10741 = vmatprep.subr.bf16.mxu1 %v12150_v0 }
0x1571   :  { %v1383_v57 = vpop.f32.mrb[12].mxu1 }
0x1572   :  { %v1384_v58 = vadd.f32 0.001, %v1383_v57  ;;  %v8944_v63 = vpop.f32.mrb[13].mxu1 }
0x1574   :  { %11770 = vrsqrt.f32 %v1384_v58 }
0x157e   :  { %v11771_v60 = vpop.eup %11770 }
0x157f   :  { %v1388_v2 = vmul.f32 %v11771_v60, %v1315_v53 }
0x1581   :  { %v1389_v59 = vmul.f32 %v12453_v49, %v1388_v2  ;;  %v1088_v49 = vmul.f32 0.5, %v12711_v43 }
0x1583   :  { %v1390_v56 = vadd.f32 %v12458_v51, %v1389_v59  ;;  %v12824_v41 = vadd.f32 %v1088_v49, %v1087_v40 }
0x1585   :  { %11772 = vtanh.f32 %v1390_v56  ;;  %v7655_v7 = vmul.f32 -1.442695, %v1390_v56 }
0x1587   :  { %11774 = vpow2.f32 %v7655_v7 }
0x158f   :  { %v11773_v4 = vpop.eup %11772 }
0x1590   :  { %1400 = vrot.lane.b32.xlu0 %v11773_v4, %s12153_s8 }
0x1591   :  { %v11775_v16 = vpop.eup %11774 }
0x1592   :  { %v1394_v25 = vadd.f32 1.0, %v11775_v16 }
0x1594   :  { %11776 = vrcp.f32 %v1394_v25 }
0x159e   :  { %v11777_v31 = vpop.eup %11776 }
0x159f   :  { %v1398_v51 = vmul.f32 %v11777_v31, %v12824_v41 }
0x1602   :  { %v1401_v34 = vpop.permute.xlu0 %1400 }
0x1603   :  { %v1403_v35 = vmul.f32 %v11777_v31, %v1401_v34 }
0x1605   :  { %1405 = vrot.lane.b32.xlu1 %v1403_v35, %s12154_s2 }
0x1677   :  { %v1406_v53 = vpop.permute.xlu1 %1405 }
0x1678   :  { %v12827_v37 = vadd.f32 %v1406_v53, %v1398_v51  ;;  %v1439_v51 = vmul.f32 0.1, %v12752_v3 }
0x167a   :  { %1410 = vrot.lane.b32.xlu0 %v12827_v37, %s12154_s2 }
0x16ec   :  { %v1411_v55 = vpop.permute.xlu0 %1410 }
0x16ed   :  { %v1413_v57 = vsel %vm472_vm3, %v1411_v55, 0.0 }
0x16ee   :  { %1414 = vadd.xlane.f32.xlu1 %v1413_v57 }
0x16ff   :  { %1434 = vrot.lane.b32.xlu1 %v11777_v31, %s12153_s8 }
0x177b   :  { %v1415_v58 = vpop.xlane.xlu1 %1414 }
0x177c   :  { %v1416_v52 = vmul.f32 0.03125, %v1415_v58 }
0x177e   :  { %v1417_v43 = vsub.f32 %v12827_v37, %v1416_v52 }
0x177f   :  { %v1435_v35 = vpop.permute.xlu1 %1434 }
0x1780   :  { %v1418_v63 = vmul.f32 %v1417_v43, %v1417_v43 }
0x1782   :  { %1420 = vrot.lane.b32.xlu0 %v1418_v63, %s12154_s2 }
0x17f4   :  { %v1421_v60 = vpop.permute.xlu0 %1420 }
0x17f5   :  { %v1423_v2 = vsel %vm472_vm3, %v1421_v60, 0.0 }
0x17f6   :  { %1424 = vadd.xlane.f32.xlu0 %v1423_v2 }
0x1883   :  { %v1425_v59 = vpop.xlane.xlu0 %1424 }
0x1884   :  { %v1426_v56 = vmul.f32 0.03125, %v1425_v59 }
0x1886   :  { %v1427_v4 = vadd.f32 0.001, %v1426_v56 }
0x1888   :  { %11778 = vrsqrt.f32 %v1427_v4 }
0x1892   :  { %v11779_v7 = vpop.eup %11778 }
0x1893   :  { %v1429_v16 = vmul.f32 %v11779_v7, %v1417_v43 }
0x1895   :  { %v1430_v25 = vmul.f32 %v1429_v16, %v12505_v38 }
0x1897   :  { %v1431_v31 = vadd.f32 %v1430_v25, %v12507_v39 }
0x1899   :  { %11780 = vtanh.f32 %v1431_v31 }
0x18a3   :  { %v11781_v34 = vpop.eup %11780 }
0x18a4   :  { %v1437_v40 = vmul.f32 %v11781_v34, %v1435_v35 }
0x18a6   :  { %v1438_v49 = vmul.f32 0.9, %v1437_v40 }
0x18a8   :  { %v12839_v53 = vadd.f32 %v1439_v51, %v1438_v49 }
0x18aa   :  { %1445 = vrot.lane.b32.xlu0 %v12839_v53, %s12154_s2 }
0x191c   :  { %v1446_v55 = vpop.permute.xlu0 %1445 }
0x191d   :  { %v1448_v57 = vsel %vm472_vm3, %v1446_v55, %v12655_v42 }
0x191e   :  { %8958 = vmatmul.mubr.msk.f32.vlgmr.msra.gmra.mrb[12].mxu0 %vm230_vm2, %v1448_v57  ;;  %v12890_v57 = vmul.f32 0.5, %v12600_v44 }
0x191f   :  { %10731 = vmatpush3.bf16.msra.mxu0 %v12520_v45  ;;  %8995 = vmatprep.mubr.msk.f32.mxu0 %vm12151_vm0, %v12152_v1 }
0x1920   :  { %10732 = vmatprep.subr.bf16.mxu0 %v12150_v0 }
0x1923   :  { %10734 = vmatpush3.bf16.msra.mxu0 %v12526_v47 }
0x1924   :  { %10735 = vmatprep.subr.bf16.mxu0 %v12150_v0 }
0x1927   :  { %10737 = vmatpush3.bf16.msra.mxu0 %v12536_v54 }
0x1928   :  { %10738 = vmatprep.subr.bf16.mxu0 %v12150_v0 }
0x192b   :  { %10740 = vmatpush3.bf16.msra.mxu0 %v12561_v61 }
0x192c   :  { %10750 = vmatprep.subr.bf16.mxu0 %v12150_v0 }
0x19f1   :  { %v1518_v3 = vpop.f32.mrb[12].mxu0 }
0x19f2   :  { %v1519_v58 = vadd.f32 %v12567_v62, %v1518_v3  ;;  %v8959_v52 = vpop.f32.mrb[13].mxu0 }
0x19f4   :  { %8977 = vmatmul.mubr.msk.f32.vlgmr.msra.gmra.mrb[14].mxu1 %vm589_vm4, %v1519_v58 }
0x19f5   :  { %10743 = vmatpush3.bf16.msra.mxu1 %v12628_v6  ;;  %9010 = vmatprep.mubr.msk.f32.mxu1 %vm12151_vm0, %v12152_v1 }
0x19f6   :  { %10744 = vmatprep.subr.bf16.mxu1 %v12150_v0 }
0x19f9   :  { %10746 = vmatpush3.bf16.msra.mxu1 %v12634_v8 }
0x19fa   :  { %10747 = vmatprep.subr.bf16.mxu1 %v12150_v0 }
0x19fd   :  { %10749 = vmatpush3.bf16.msra.mxu1 %v12644_v13 }
0x19fe   :  { %10774 = vmatprep.subr.bf16.mxu1 %v12150_v0 }
0x1ac7   :  { %v1591_v43 = vpop.f32.mrb[14].mxu1 }
0x1ac8   :  { %v1595_v62 = vsub.f32 %v1519_v58, %v1591_v43  ;;  %v8978_v63 = vpop.f32.mrb[15].mxu1 }
0x1aca   :  { %v1596_v60 = vmul.f32 %v1595_v62, %v1595_v62 }
0x1acc   :  { %8996 = vmatmul.mubr.msk.f32.vlgmr.msra.gmra.mrb[14].mxu0 %vm589_vm4, %v1596_v60 }
0x1acd   :  { %10752 = vmatpush3.bf16.msra.mxu0 %v12330_v10  ;;  %9045 = vmatprep.mubr.msk.f32.mxu0 %vm12151_vm0, %v12152_v1 }
0x1ace   :  { %10753 = vmatprep.subr.bf16.mxu0 %v12150_v0 }
0x1ad1   :  { %10755 = vmatpush3.bf16.msra.mxu0 %v12346_v15 }
0x1ad2   :  { %10756 = vmatprep.subr.bf16.mxu0 %v12150_v0 }
0x1ad5   :  { %10758 = vmatpush3.bf16.msra.mxu0 %v12363_v20 }
0x1ad6   :  { %10759 = vmatprep.subr.bf16.mxu0 %v12150_v0 }
0x1ad9   :  { %10761 = vmatpush3.bf16.msra.mxu0 %v12376_v24 }
0x1ada   :  { %10762 = vmatprep.subr.bf16.mxu0 %v12150_v0 }
0x1add   :  { %10764 = vmatpush3.bf16.msra.mxu0 %v12391_v27 }
0x1ade   :  { %10765 = vmatprep.subr.bf16.mxu0 %v12150_v0 }
0x1ae1   :  { %10767 = vmatpush3.bf16.msra.mxu0 %v12403_v30 }
0x1ae2   :  { %10768 = vmatprep.subr.bf16.mxu0 %v12150_v0 }
0x1ae5   :  { %10770 = vmatpush3.bf16.msra.mxu0 %v12415_v33 }
0x1ae6   :  { %10771 = vmatprep.subr.bf16.mxu0 %v12150_v0 }
0x1ae9   :  { %10773 = vmatpush3.bf16.msra.mxu0 %v12434_v36 }
0x1aea   :  { %10798 = vmatprep.subr.bf16.mxu0 %v12150_v0 }
0x1b9f   :  { %v1666_v2 = vpop.f32.mrb[14].mxu0 }
0x1ba0   :  { %v1667_v59 = vadd.f32 0.001, %v1666_v2  ;;  %v8997_v56 = vpop.f32.mrb[15].mxu0 }
0x1ba2   :  { %11782 = vrsqrt.f32 %v1667_v59 }
0x1bac   :  { %v11783_v4 = vpop.eup %11782 }
0x1bad   :  { %v1671_v7 = vmul.f32 %v11783_v4, %v1595_v62 }
0x1baf   :  { %v1672_v16 = vmul.f32 %v12592_v17, %v1671_v7 }
0x1bb1   :  { %v1673_v25 = vadd.f32 %v12594_v22, %v1672_v16 }
0x1bb3   :  { %11784 = vtanh.f32 %v1673_v25  ;;  %v7659_v34 = vmul.f32 -1.442695, %v1673_v25 }
0x1bb5   :  { %11786 = vpow2.f32 %v7659_v34 }
0x1bbd   :  { %v11785_v31 = vpop.eup %11784 }
0x1bbe   :  { %1683 = vrot.lane.b32.xlu1 %v11785_v31, %s12155_s11 }
0x1bbf   :  { %v11787_v35 = vpop.eup %11786 }
0x1bc0   :  { %v1677_v40 = vadd.f32 1.0, %v11787_v35 }
0x1bc2   :  { %11788 = vrcp.f32 %v1677_v40 }
0x1bcc   :  { %v11789_v49 = vpop.eup %11788 }
0x1bcd   :  { %v1681_v17 = vmul.f32 %v11789_v49, %v12890_v57 }
0x1c30   :  { %v1684_v51 = vpop.permute.xlu1 %1683 }
0x1c31   :  { %v1686_v55 = vmul.f32 %v11789_v49, %v1684_v51  ;;  %v1722_v51 = vmul.f32 0.1, %v12655_v42 }
0x1c33   :  { %1688 = vrot.lane.b32.xlu1 %v1686_v55, %s12156_s22 }
0x1ca5   :  { %v1689_v22 = vpop.permute.xlu1 %1688 }
0x1ca6   :  { %v12893_v3 = vadd.f32 %v1689_v22, %v1681_v17 }
0x1ca8   :  { %1693 = vrot.lane.b32.xlu0 %v12893_v3, %s12153_s8 }
0x1d1a   :  { %v1694_v58 = vpop.permute.xlu0 %1693 }
0x1d1b   :  { %v1696_v52 = vsel %vm228_vm1, %v1694_v58, 0.0 }
0x1d1c   :  { %1697 = vadd.xlane.f32.xlu1 %v1696_v52 }
0x1d2d   :  { %1717 = vrot.lane.b32.xlu1 %v11789_v49, %s12155_s11 }
0x1d31   :  { %1731 = vrot.lane.b32.xlu1 %v12839_v53, %s12157_s27 }
0x1da9   :  { %v1698_v43 = vpop.xlane.xlu1 %1697 }
0x1daa   :  { %v1699_v44 = vmul.f32 0.0625, %v1698_v43 }
0x1dac   :  { %v1700_v62 = vsub.f32 %v12893_v3, %v1699_v44 }
0x1dad   :  { %v1718_v35 = vpop.permute.xlu1 %1717 }
0x1dae   :  { %v1701_v63 = vmul.f32 %v1700_v62, %v1700_v62 }
0x1db0   :  { %1703 = vrot.lane.b32.xlu0 %v1701_v63, %s12153_s8 }
0x1db1   :  { %v1732_v17 = vpop.permute.xlu1 %1731 }
0x1e22   :  { %v1704_v60 = vpop.permute.xlu0 %1703 }
0x1e23   :  { %v1706_v2 = vsel %vm228_vm1, %v1704_v60, 0.0 }
0x1e24   :  { %1707 = vadd.xlane.f32.xlu0 %v1706_v2 }
0x1eb1   :  { %v1708_v59 = vpop.xlane.xlu0 %1707 }
0x1eb2   :  { %v1709_v56 = vmul.f32 0.0625, %v1708_v59 }
0x1eb4   :  { %v1710_v4 = vadd.f32 0.001, %v1709_v56 }
0x1eb6   :  { %11790 = vrsqrt.f32 %v1710_v4 }
0x1ec0   :  { %v11791_v7 = vpop.eup %11790 }
0x1ec1   :  { %v1712_v16 = vmul.f32 %v11791_v7, %v1700_v62 }
0x1ec3   :  { %v1713_v25 = vmul.f32 %v1712_v16, %v12649_v29 }
0x1ec5   :  { %v1714_v31 = vadd.f32 %v1713_v25, %v12652_v32 }
0x1ec7   :  { %11792 = vtanh.f32 %v1714_v31 }
0x1ed1   :  { %v11793_v34 = vpop.eup %11792 }
0x1ed2   :  { %v1720_v40 = vmul.f32 %v11793_v34, %v1718_v35 }
0x1ed4   :  { %v1721_v49 = vmul.f32 0.9, %v1720_v40 }
0x1ed6   :  { %v12907_v55 = vadd.f32 %v1722_v51, %v1721_v49 }
0x1ed8   :  { %1728 = vrot.lane.b32.xlu0 %v12907_v55, %s12153_s8 }
0x1f4a   :  { %v1729_v22 = vpop.permute.xlu0 %1728 }
0x1f4b   :  { %v1734_v58 = vsel %vm228_vm1, %v1729_v22, %v1732_v17  ;;  %v1441_v17 = vmul.f32 0.5, %v12827_v37 }
0x1f4c   :  { %9011 = vmatmul.mubr.msk.f32.vlgmr.msra.gmra.mrb[16].mxu1 %vm230_vm2, %v1734_v58 }
0x1f4d   :  { %10776 = vmatpush3.bf16.msra.mxu1 %v12330_v10  ;;  %9080 = vmatprep.mubr.msk.f32.mxu1 %vm12151_vm0, %v12152_v1 }
0x1f4e   :  { %10777 = vmatprep.subr.bf16.mxu1 %v12150_v0 }
0x1f51   :  { %10779 = vmatpush3.bf16.msra.mxu1 %v12346_v15 }
0x1f52   :  { %10780 = vmatprep.subr.bf16.mxu1 %v12150_v0 }
0x1f55   :  { %10782 = vmatpush3.bf16.msra.mxu1 %v12363_v20 }
0x1f56   :  { %10783 = vmatprep.subr.bf16.mxu1 %v12150_v0 }
0x1f59   :  { %10785 = vmatpush3.bf16.msra.mxu1 %v12376_v24 }
0x1f5a   :  { %10786 = vmatprep.subr.bf16.mxu1 %v12150_v0 }
0x1f5d   :  { %10788 = vmatpush3.bf16.msra.mxu1 %v12391_v27 }
0x1f5e   :  { %10789 = vmatprep.subr.bf16.mxu1 %v12150_v0 }
0x1f61   :  { %10791 = vmatpush3.bf16.msra.mxu1 %v12403_v30 }
0x1f62   :  { %10792 = vmatprep.subr.bf16.mxu1 %v12150_v0 }
0x1f65   :  { %10794 = vmatpush3.bf16.msra.mxu1 %v12415_v33 }
0x1f66   :  { %10795 = vmatprep.subr.bf16.mxu1 %v12150_v0 }
0x1f69   :  { %10797 = vmatpush3.bf16.msra.mxu1 %v12434_v36 }
0x1f6a   :  { %10813 = vmatprep.subr.bf16.mxu1 %v12150_v0 }
0x201f   :  { %v1804_v42 = vpop.f32.mrb[16].mxu1 }
0x2020   :  { %v1805_v52 = vadd.f32 %v12679_v50, %v1804_v42  ;;  %v9012_v43 = vpop.f32.mrb[17].mxu1 }
0x2022   :  { %9046 = vmatmul.mubr.f32.vlgmr.msra.gmra.mrb[16].mxu0 %v1805_v52 }
0x2023   :  { %10800 = vmatpush3.bf16.msra.mxu0 %v12734_v19  ;;  %9091 = vmatprep.mubr.msk.f32.mxu0 %vm12151_vm0, %v12152_v1 }
0x2024   :  { %10801 = vmatprep.subr.bf16.mxu0 %v12150_v0 }
0x2027   :  { %10803 = vmatpush3.bf16.msra.mxu0 %v12740_v26 }
0x2028   :  { %10804 = vmatprep.subr.bf16.mxu0 %v12150_v0 }
0x20f5   :  { %v1874_v44 = vpop.f32.mrb[16].mxu0 }
0x20f6   :  { %v1878_v62 = vsub.f32 %v1805_v52, %v1874_v44  ;;  %v9047_v63 = vpop.f32.mrb[17].mxu0 }
0x20f8   :  { %v1879_v60 = vmul.f32 %v1878_v62, %v1878_v62 }
0x20fa   :  { %9081 = vmatmul.mubr.f32.vlgmr.msra.gmra.mrb[18].mxu1 %v1879_v60 }
0x20fb   :  { %10815 = vmatpush3.bf16.msra.mxu1 %v12330_v10  ;;  %9141 = vmatprep.mubr.msk.f32.mxu1 %vm12151_vm0, %v12152_v1 }
0x20fc   :  { %10816 = vmatprep.subr.bf16.mxu1 %v12150_v0 }
0x20ff   :  { %10818 = vmatpush3.bf16.msra.mxu1 %v12346_v15 }
0x2100   :  { %10819 = vmatprep.subr.bf16.mxu1 %v12150_v0 }
0x2103   :  { %10821 = vmatpush3.bf16.msra.mxu1 %v12363_v20 }
0x2104   :  { %10822 = vmatprep.subr.bf16.mxu1 %v12150_v0 }
0x2107   :  { %10824 = vmatpush3.bf16.msra.mxu1 %v12376_v24 }
0x2108   :  { %10825 = vmatprep.subr.bf16.mxu1 %v12150_v0 }
0x210b   :  { %10827 = vmatpush3.bf16.msra.mxu1 %v12391_v27 }
0x210c   :  { %10828 = vmatprep.subr.bf16.mxu1 %v12150_v0 }
0x210f   :  { %10830 = vmatpush3.bf16.msra.mxu1 %v12403_v30 }
0x2110   :  { %10831 = vmatprep.subr.bf16.mxu1 %v12150_v0 }
0x2113   :  { %10833 = vmatpush3.bf16.msra.mxu1 %v12415_v33 }
0x2114   :  { %10834 = vmatprep.subr.bf16.mxu1 %v12150_v0 }
0x2117   :  { %10836 = vmatpush3.bf16.msra.mxu1 %v12434_v36 }
0x2118   :  { %10861 = vmatprep.subr.bf16.mxu1 %v12150_v0 }
0x21cd   :  { %v1946_v50 = vpop.f32.mrb[18].mxu1 }
0x21ce   :  { %v1947_v2 = vadd.f32 0.001, %v1946_v50  ;;  %v9082_v59 = vpop.f32.mrb[19].mxu1 }
0x21d0   :  { %11794 = vrsqrt.f32 %v1947_v2 }
0x21da   :  { %v11795_v56 = vpop.eup %11794 }
0x21db   :  { %v1951_v4 = vmul.f32 %v11795_v56, %v1878_v62 }
0x21dd   :  { %v1952_v7 = vmul.f32 %v12702_v11, %v1951_v4  ;;  %v1442_v11 = vmul.f32 0.5, %v12824_v41 }
0x21df   :  { %v1953_v16 = vadd.f32 %v12704_v14, %v1952_v7  ;;  %v12962_v22 = vadd.f32 %v1442_v11, %v1441_v17 }
0x21e1   :  { %11796 = vtanh.f32 %v1953_v16  ;;  %v7661_v31 = vmul.f32 -1.442695, %v1953_v16 }
0x21e3   :  { %11798 = vpow2.f32 %v7661_v31 }
0x21eb   :  { %v11797_v25 = vpop.eup %11796 }
0x21ec   :  { %1963 = vrot.lane.b32.xlu1 %v11797_v25, %s12153_s8 }
0x21ed   :  { %v11799_v34 = vpop.eup %11798 }
0x21ee   :  { %v1957_v35 = vadd.f32 1.0, %v11799_v34 }
0x21f0   :  { %11800 = vrcp.f32 %v1957_v35 }
0x21fa   :  { %v11801_v40 = vpop.eup %11800 }
0x21fb   :  { %v1961_v14 = vmul.f32 %v11801_v40, %v12962_v22 }
0x225e   :  { %v1964_v49 = vpop.permute.xlu1 %1963 }
0x225f   :  { %v1966_v51 = vmul.f32 %v11801_v40, %v1964_v49 }
0x2261   :  { %1968 = vrot.lane.b32.xlu0 %v1966_v51, %s12154_s2 }
0x22d3   :  { %v1969_v58 = vpop.permute.xlu0 %1968 }
0x22d4   :  { %v12965_v42 = vadd.f32 %v1969_v58, %v1961_v14 }
0x22d6   :  { %1973 = vrot.lane.b32.xlu1 %v12965_v42, %s12154_s2 }
0x2348   :  { %v1974_v52 = vpop.permute.xlu1 %1973 }
0x2349   :  { %v1976_v43 = vsel %vm472_vm3, %v1974_v52, 0.0 }
0x234a   :  { %1977 = vadd.xlane.f32.xlu0 %v1976_v43 }
0x2360   :  { %1997 = vrot.lane.b32.xlu0 %v11801_v40, %s12153_s8  ;;  %v2002_v40 = vmul.f32 0.1, %v12839_v53  ;;  %v7664_v53 = vld [vmem:[%s14421_s20 + $0x10] sm:$0xff] }
0x23d7   :  { %v1978_v44 = vpop.xlane.xlu0 %1977 }
0x23d8   :  { %v1979_v37 = vmul.f32 0.03125, %v1978_v44  ;;  %v13022_v44 = vld [vmem:[%s14422_s23] ss:$0 sm:$0xff] }
0x23da   :  { %v1980_v41 = vsub.f32 %v12965_v42, %v1979_v37 }
0x23db   :  { %v1998_v31 = vpop.permute.xlu0 %1997 }
0x23dc   :  { %v1981_v62 = vmul.f32 %v1980_v41, %v1980_v41 }
0x23de   :  { %1983 = vrot.lane.b32.xlu1 %v1981_v62, %s12154_s2 }
0x2450   :  { %v1984_v63 = vpop.permute.xlu1 %1983 }
0x2451   :  { %v1986_v60 = vsel %vm472_vm3, %v1984_v63, 0.0 }
0x2452   :  { %1987 = vadd.xlane.f32.xlu1 %v1986_v60 }
0x24df   :  { %v1988_v50 = vpop.xlane.xlu1 %1987 }
0x24e0   :  { %v1989_v2 = vmul.f32 0.03125, %v1988_v50 }
0x24e2   :  { %v1990_v59 = vadd.f32 0.001, %v1989_v2 }
0x24e4   :  { %11802 = vrsqrt.f32 %v1990_v59 }
0x24ee   :  { %v11803_v56 = vpop.eup %11802 }
0x24ef   :  { %v1992_v4 = vmul.f32 %v11803_v56, %v1980_v41 }
0x24f1   :  { %v1993_v7 = vmul.f32 %v1992_v4, %v12745_v46 }
0x24f3   :  { %v1994_v16 = vadd.f32 %v1993_v7, %v12747_v48  ;;  %v13046_v7 = vld [vmem:[%s14422_s23 + $0x1] ss:$0 sm:$0xff] }
0x24f5   :  { %11804 = vtanh.f32 %v1994_v16 }
0x24ff   :  { %v11805_v25 = vpop.eup %11804 }
0x2500   :  { %v2000_v34 = vmul.f32 %v11805_v25, %v1998_v31  ;;  %v13052_v25 = vld [vmem:[%s14422_s23 + $0x2] ss:$0 sm:$0xff] }
0x2502   :  { %v2001_v35 = vmul.f32 0.9, %v2000_v34 }
0x2504   :  { %v12977_v49 = vadd.f32 %v2002_v40, %v2001_v35 }
0x2506   :  { %2086 = vrot.lane.b32.xlu0 %v12977_v49, %s12157_s27  ;;  %2008 = vrot.lane.b32.xlu1 %v12977_v49, %s12154_s2 }
0x2578   :  { %v2009_v51 = vpop.permute.xlu1 %2008  ;;  %v2087_v17 = vpop.permute.xlu0 %2086 }
0x2579   :  { %9092 = vmatmul.mubr.msk.f32.vlgmr.msra.gmra.mrb[18].mxu0 %vm472_vm3, %v2009_v51  ;;  %v2089_v11 = vsel %vm228_vm1, %v7664_v53, %v2087_v17 }
0x257a   :  { %10806 = vmatpush3.bf16.msra.mxu0 %v12316_v5  ;;  %9106 = vmatprep.mubr.msk.f32.mxu0 %vm12151_vm0, %v12152_v1 }
0x257b   :  { %10807 = vmatprep.subr.bf16.mxu0 %v12150_v0 }
0x257e   :  { %10809 = vmatpush3.bf16.msra.mxu0 %v12328_v9 }
0x257f   :  { %10810 = vmatprep.subr.bf16.mxu0 %v12150_v0 }
0x2582   :  { %10812 = vmatpush3.bf16.msra.mxu0 %v12356_v18 }
0x2583   :  { %10837 = vmatprep.subr.bf16.mxu0 %v12150_v0 }
0x2585   :  { %9107 = vmatmul.mubr.msk.f32.vlgmr.msra.gmra.mrb[20].mxu0 %vm230_vm2, %v2089_v11 }
0x2586   :  { %10839 = vmatpush3.bf16.msra.mxu0 %v12330_v10  ;;  %9176 = vmatprep.mubr.msk.f32.mxu0 %vm12151_vm0, %v12152_v1 }
0x2587   :  { %10840 = vmatprep.subr.bf16.mxu0 %v12150_v0 }
0x258a   :  { %10842 = vmatpush3.bf16.msra.mxu0 %v12346_v15 }
0x258b   :  { %10843 = vmatprep.subr.bf16.mxu0 %v12150_v0 }
0x258e   :  { %10845 = vmatpush3.bf16.msra.mxu0 %v12363_v20 }
0x258f   :  { %10846 = vmatprep.subr.bf16.mxu0 %v12150_v0 }
0x2592   :  { %10848 = vmatpush3.bf16.msra.mxu0 %v12376_v24 }
0x2593   :  { %10849 = vmatprep.subr.bf16.mxu0 %v12150_v0 }
0x2596   :  { %10851 = vmatpush3.bf16.msra.mxu0 %v12391_v27 }
0x2597   :  { %10852 = vmatprep.subr.bf16.mxu0 %v12150_v0 }
0x259a   :  { %10854 = vmatpush3.bf16.msra.mxu0 %v12403_v30 }
0x259b   :  { %10855 = vmatprep.subr.bf16.mxu0 %v12150_v0 }
0x259e   :  { %10857 = vmatpush3.bf16.msra.mxu0 %v12415_v33 }
0x259f   :  { %10858 = vmatprep.subr.bf16.mxu0 %v12150_v0 }
0x25a2   :  { %10860 = vmatpush3.bf16.msra.mxu0 %v12434_v36 }
0x25a3   :  { %10870 = vmatprep.subr.bf16.mxu0 %v12150_v0 }
0x264c   :  { %v2078_v14 = vpop.f32.mrb[18].mxu0 }
0x264d   :  { %v2079_v58 = vadd.f32 %v12793_v12, %v2078_v14  ;;  %v9093_v52 = vpop.f32.mrb[19].mxu0  ;;  %v2004_v14 = vmul.f32 0.5, %v12965_v42 }
0x264f   :  { %7663 = vst [vmem:[%s14409_s14 + $0x8] sm:$0xff] %v2079_v58  ;;  %v2005_v58 = vmul.f32 0.5, %v12962_v22 }
0x2651   :  { %v13059_v52 = vadd.f32 %v2005_v58, %v2004_v14 }
0x2658   :  { %v2159_v43 = vpop.f32.mrb[20].mxu0 }
0x2659   :  { %v2160_v37 = vadd.f32 %v13022_v44, %v2159_v43  ;;  %v9108_v41 = vpop.f32.mrb[21].mxu0 }
0x265b   :  { %9142 = vmatmul.mubr.f32.vlgmr.msra.gmra.mrb[20].mxu1 %v2160_v37 }
0x265c   :  { %10863 = vmatpush3.bf16.msra.mxu1 %v12484_v21  ;;  %9191 = vmatprep.mubr.msk.f32.mxu1 %vm12151_vm0, %v12152_v1 }
0x265d   :  { %10864 = vmatprep.subr.bf16.mxu1 %v12150_v0 }
0x2660   :  { %10866 = vmatpush3.bf16.msra.mxu1 %v12490_v23 }
0x2661   :  { %10867 = vmatprep.subr.bf16.mxu1 %v12150_v0 }
0x2664   :  { %10869 = vmatpush3.bf16.msra.mxu1 %v12500_v28 }
0x2665   :  { %10882 = vmatprep.subr.bf16.mxu1 %v12150_v0 }
0x272e   :  { %v2229_v12 = vpop.f32.mrb[20].mxu1 }
0x272f   :  { %v2233_v62 = vsub.f32 %v2160_v37, %v2229_v12  ;;  %v9143_v63 = vpop.f32.mrb[21].mxu1 }
0x2731   :  { %v2234_v60 = vmul.f32 %v2233_v62, %v2233_v62 }
0x2733   :  { %9177 = vmatmul.mubr.f32.vlgmr.msra.gmra.mrb[22].mxu0 %v2234_v60 }
0x2734   :  { %10872 = vmatpush3.bf16.msra.mxu0 %v12520_v45  ;;  %9210 = vmatprep.mubr.msk.f32.mxu0 %vm12151_vm0, %v12152_v1 }
0x2735   :  { %10873 = vmatprep.subr.bf16.mxu0 %v12150_v0 }
0x2738   :  { %10875 = vmatpush3.bf16.msra.mxu0 %v12526_v47 }
0x2739   :  { %10876 = vmatprep.subr.bf16.mxu0 %v12150_v0 }
0x273c   :  { %10878 = vmatpush3.bf16.msra.mxu0 %v12536_v54 }
0x273d   :  { %10879 = vmatprep.subr.bf16.mxu0 %v12150_v0 }
0x2740   :  { %10881 = vmatpush3.bf16.msra.mxu0 %v12561_v61 }
0x2741   :  { %10894 = vmatprep.subr.bf16.mxu0 %v12150_v0 }
0x2806   :  { %v2301_v50 = vpop.f32.mrb[22].mxu0 }
0x2807   :  { %v2302_v2 = vadd.f32 0.001, %v2301_v50  ;;  %v9178_v59 = vpop.f32.mrb[23].mxu0 }
0x2809   :  { %11806 = vrsqrt.f32 %v2302_v2 }
0x2813   :  { %v11807_v56 = vpop.eup %11806 }
0x2814   :  { %v2306_v4 = vmul.f32 %v11807_v56, %v2233_v62 }
0x2816   :  { %v2307_v16 = vmul.f32 %v13046_v7, %v2306_v4 }
0x2818   :  { %v2308_v31 = vadd.f32 %v13052_v25, %v2307_v16 }
0x281a   :  { %11808 = vtanh.f32 %v2308_v31  ;;  %v7666_v35 = vmul.f32 -1.442695, %v2308_v31 }
0x281c   :  { %11810 = vpow2.f32 %v7666_v35 }
0x2824   :  { %v11809_v34 = vpop.eup %11808 }
0x2825   :  { %2318 = vrot.lane.b32.xlu0 %v11809_v34, %s12153_s8 }
0x2826   :  { %v11811_v40 = vpop.eup %11810 }
0x2827   :  { %v2312_v51 = vadd.f32 1.0, %v11811_v40 }
0x2829   :  { %11812 = vrcp.f32 %v2312_v51 }
0x2833   :  { %v11813_v53 = vpop.eup %11812 }
0x2834   :  { %v2316_v43 = vmul.f32 %v11813_v53, %v13059_v52 }
0x2897   :  { %v2319_v17 = vpop.permute.xlu0 %2318 }
0x2898   :  { %v2321_v11 = vmul.f32 %v11813_v53, %v2319_v17 }
0x289a   :  { %2323 = vrot.lane.b32.xlu1 %v2321_v11, %s12154_s2  ;;  %v2357_v11 = vmul.f32 0.1, %v12977_v49 }
0x290c   :  { %v2324_v37 = vpop.permute.xlu1 %2323 }
0x290d   :  { %v13062_v41 = vadd.f32 %v2324_v37, %v2316_v43  ;;  %v13091_v37 = vld [vmem:[#allocation4] ss:$0 sm:$0xff] }
0x290f   :  { %2328 = vrot.lane.b32.xlu0 %v13062_v41, %s12154_s2 }
0x2981   :  { %v2329_v12 = vpop.permute.xlu0 %2328 }
0x2982   :  { %v2331_v62 = vsel %vm472_vm3, %v2329_v12, 0.0 }
0x2983   :  { %2332 = vadd.xlane.f32.xlu1 %v2331_v62 }
0x2994   :  { %2352 = vrot.lane.b32.xlu1 %v11813_v53, %s12153_s8 }
0x2a10   :  { %v2333_v63 = vpop.xlane.xlu1 %2332 }
0x2a11   :  { %v2334_v42 = vmul.f32 0.03125, %v2333_v63 }
0x2a13   :  { %v2335_v22 = vsub.f32 %v13062_v41, %v2334_v42 }
0x2a14   :  { %v2353_v51 = vpop.permute.xlu1 %2352 }
0x2a15   :  { %v2336_v60 = vmul.f32 %v2335_v22, %v2335_v22 }
0x2a17   :  { %2338 = vrot.lane.b32.xlu0 %v2336_v60, %s12154_s2 }
0x2a89   :  { %v2339_v50 = vpop.permute.xlu0 %2338 }
0x2a8a   :  { %v2341_v2 = vsel %vm472_vm3, %v2339_v50, 0.0 }
0x2a8b   :  { %2342 = vadd.xlane.f32.xlu0 %v2341_v2 }
0x2b18   :  { %v2343_v59 = vpop.xlane.xlu0 %2342 }
0x2b19   :  { %v2344_v56 = vmul.f32 0.03125, %v2343_v59 }
0x2b1b   :  { %v2345_v4 = vadd.f32 0.001, %v2344_v56 }
0x2b1d   :  { %11814 = vrsqrt.f32 %v2345_v4 }
0x2b27   :  { %v11815_v16 = vpop.eup %11814 }
0x2b28   :  { %v2347_v31 = vmul.f32 %v11815_v16, %v2335_v22  ;;  %v13122_v16 = vld [vmem:[#allocation4 + $0x1] ss:$0 sm:$0xff] }
0x2b2a   :  { %v2348_v34 = vmul.f32 %v2347_v31, %v12505_v38 }
0x2b2c   :  { %v2349_v35 = vadd.f32 %v2348_v34, %v12507_v39  ;;  %v13125_v34 = vld [vmem:[#allocation4 + $0x2] ss:$0 sm:$0xff] }
0x2b2e   :  { %11816 = vtanh.f32 %v2349_v35 }
0x2b38   :  { %v11817_v40 = vpop.eup %11816 }
0x2b39   :  { %v2355_v53 = vmul.f32 %v11817_v40, %v2353_v51 }
0x2b3b   :  { %v2356_v17 = vmul.f32 0.9, %v2355_v53 }
0x2b3d   :  { %v13074_v14 = vadd.f32 %v2357_v11, %v2356_v17 }
0x2b3f   :  { %2363 = vrot.lane.b32.xlu0 %v13074_v14, %s12154_s2 }
0x2bb1   :  { %v2364_v58 = vpop.permute.xlu0 %2363 }
0x2bb2   :  { %v2366_v43 = vsel %vm472_vm3, %v2364_v58, %v12907_v55 }
0x2bb3   :  { %9192 = vmatmul.mubr.msk.f32.vlgmr.msra.gmra.mrb[22].mxu1 %vm230_vm2, %v2366_v43 }
0x2bb4   :  { %10884 = vmatpush3.bf16.msra.mxu1 %v12520_v45  ;;  %9229 = vmatprep.mubr.msk.f32.mxu1 %vm12151_vm0, %v12152_v1 }
0x2bb5   :  { %10885 = vmatprep.subr.bf16.mxu1 %v12150_v0 }
0x2bb8   :  { %10887 = vmatpush3.bf16.msra.mxu1 %v12526_v47 }
0x2bb9   :  { %10888 = vmatprep.subr.bf16.mxu1 %v12150_v0 }
0x2bbc   :  { %10890 = vmatpush3.bf16.msra.mxu1 %v12536_v54 }
0x2bbd   :  { %10891 = vmatprep.subr.bf16.mxu1 %v12150_v0 }
0x2bc0   :  { %10893 = vmatpush3.bf16.msra.mxu1 %v12561_v61 }
0x2bc1   :  { %10903 = vmatprep.subr.bf16.mxu1 %v12150_v0 }
0x2c86   :  { %v2436_v49 = vpop.f32.mrb[22].mxu1 }
0x2c87   :  { %v2437_v12 = vadd.f32 %v13091_v37, %v2436_v49  ;;  %v9193_v62 = vpop.f32.mrb[23].mxu1  ;;  %v1724_v49 = vmul.f32 0.5, %v12893_v3 }
0x2c89   :  { %9211 = vmatmul.mubr.msk.f32.vlgmr.msra.gmra.mrb[24].mxu0 %vm589_vm4, %v2437_v12 }
0x2c8a   :  { %10896 = vmatpush3.bf16.msra.mxu0 %v12628_v6  ;;  %9244 = vmatprep.mubr.msk.f32.mxu0 %vm12151_vm0, %v12152_v1 }
0x2c8b   :  { %10897 = vmatprep.subr.bf16.mxu0 %v12150_v0 }
0x2c8e   :  { %10899 = vmatpush3.bf16.msra.mxu0 %v12634_v8 }
0x2c8f   :  { %10900 = vmatprep.subr.bf16.mxu0 %v12150_v0 }
0x2c92   :  { %10902 = vmatpush3.bf16.msra.mxu0 %v12644_v13 }
0x2c93   :  { %10927 = vmatprep.subr.bf16.mxu0 %v12150_v0 }
0x2d5c   :  { %v2509_v63 = vpop.f32.mrb[24].mxu0 }
0x2d5d   :  { %v2513_v42 = vsub.f32 %v2437_v12, %v2509_v63  ;;  %v9212_v22 = vpop.f32.mrb[25].mxu0  ;;  %v1725_v12 = vmul.f32 0.5, %v12890_v57 }
0x2d5f   :  { %v2514_v60 = vmul.f32 %v2513_v42, %v2513_v42  ;;  %v13132_v62 = vadd.f32 %v1725_v12, %v1724_v49 }
0x2d61   :  { %9230 = vmatmul.mubr.msk.f32.vlgmr.msra.gmra.mrb[24].mxu1 %vm589_vm4, %v2514_v60 }
0x2d62   :  { %10905 = vmatpush3.bf16.msra.mxu1 %v12330_v10  ;;  %9279 = vmatprep.mubr.msk.f32.mxu1 %vm12151_vm0, %v12152_v1 }
0x2d63   :  { %10906 = vmatprep.subr.bf16.mxu1 %v12150_v0 }
0x2d66   :  { %10908 = vmatpush3.bf16.msra.mxu1 %v12346_v15 }
0x2d67   :  { %10909 = vmatprep.subr.bf16.mxu1 %v12150_v0 }
0x2d6a   :  { %10911 = vmatpush3.bf16.msra.mxu1 %v12363_v20 }
0x2d6b   :  { %10912 = vmatprep.subr.bf16.mxu1 %v12150_v0 }
0x2d6e   :  { %10914 = vmatpush3.bf16.msra.mxu1 %v12376_v24 }
0x2d6f   :  { %10915 = vmatprep.subr.bf16.mxu1 %v12150_v0 }
0x2d72   :  { %10917 = vmatpush3.bf16.msra.mxu1 %v12391_v27 }
0x2d73   :  { %10918 = vmatprep.subr.bf16.mxu1 %v12150_v0 }
0x2d76   :  { %10920 = vmatpush3.bf16.msra.mxu1 %v12403_v30 }
0x2d77   :  { %10921 = vmatprep.subr.bf16.mxu1 %v12150_v0 }
0x2d7a   :  { %10923 = vmatpush3.bf16.msra.mxu1 %v12415_v33 }
0x2d7b   :  { %10924 = vmatprep.subr.bf16.mxu1 %v12150_v0 }
0x2d7e   :  { %10926 = vmatpush3.bf16.msra.mxu1 %v12434_v36 }
0x2d7f   :  { %10951 = vmatprep.subr.bf16.mxu1 %v12150_v0 }
0x2e34   :  { %v2584_v50 = vpop.f32.mrb[24].mxu1 }
0x2e35   :  { %v2585_v2 = vadd.f32 0.001, %v2584_v50  ;;  %v9231_v59 = vpop.f32.mrb[25].mxu1 }
0x2e37   :  { %11818 = vrsqrt.f32 %v2585_v2 }
0x2e41   :  { %v11819_v56 = vpop.eup %11818 }
0x2e42   :  { %v2589_v4 = vmul.f32 %v11819_v56, %v2513_v42 }
0x2e44   :  { %v2590_v31 = vmul.f32 %v13122_v16, %v2589_v4 }
0x2e46   :  { %v2591_v35 = vadd.f32 %v13125_v34, %v2590_v31 }
0x2e48   :  { %11820 = vtanh.f32 %v2591_v35  ;;  %v7670_v51 = vmul.f32 -1.442695, %v2591_v35 }
0x2e4a   :  { %11822 = vpow2.f32 %v7670_v51 }
0x2e52   :  { %v11821_v40 = vpop.eup %11820 }
0x2e53   :  { %2601 = vrot.lane.b32.xlu1 %v11821_v40, %s12155_s11 }
0x2e54   :  { %v11823_v53 = vpop.eup %11822 }
0x2e55   :  { %v2595_v17 = vadd.f32 1.0, %v11823_v53 }
0x2e57   :  { %11824 = vrcp.f32 %v2595_v17 }
0x2e61   :  { %v11825_v11 = vpop.eup %11824 }
0x2e62   :  { %v2599_v63 = vmul.f32 %v11825_v11, %v13132_v62 }
0x2ec5   :  { %v2602_v58 = vpop.permute.xlu1 %2601 }
0x2ec6   :  { %v2604_v43 = vmul.f32 %v11825_v11, %v2602_v58 }
0x2ec8   :  { %2606 = vrot.lane.b32.xlu1 %v2604_v43, %s12156_s22 }
0x2f3a   :  { %v2607_v42 = vpop.permute.xlu1 %2606 }
0x2f3b   :  { %v13135_v22 = vadd.f32 %v2607_v42, %v2599_v63  ;;  %v2640_v63 = vmul.f32 0.1, %v12907_v55 }
0x2f3d   :  { %2611 = vrot.lane.b32.xlu0 %v13135_v22, %s12153_s8 }
0x2faf   :  { %v2612_v60 = vpop.permute.xlu0 %2611 }
0x2fb0   :  { %v2614_v50 = vsel %vm228_vm1, %v2612_v60, 0.0 }
0x2fb1   :  { %2615 = vadd.xlane.f32.xlu1 %v2614_v50 }
0x2fc2   :  { %2635 = vrot.lane.b32.xlu1 %v11825_v11, %s12155_s11 }
0x2fc6   :  { %2649 = vrot.lane.b32.xlu1 %v13074_v14, %s12157_s27 }
0x303e   :  { %v2616_v57 = vpop.xlane.xlu1 %2615 }
0x303f   :  { %v2617_v3 = vmul.f32 0.0625, %v2616_v57 }
0x3041   :  { %v2618_v2 = vsub.f32 %v13135_v22, %v2617_v3  ;;  %v13173_v3 = vld [vmem:[#allocation6] ss:$0 sm:$0xff] }
0x3042   :  { %v2636_v43 = vpop.permute.xlu1 %2635 }
0x3043   :  { %v2619_v59 = vmul.f32 %v2618_v2, %v2618_v2 }
0x3045   :  { %2621 = vrot.lane.b32.xlu0 %v2619_v59, %s12153_s8 }
0x3046   :  { %v2650_v60 = vpop.permute.xlu1 %2649 }
0x30b7   :  { %v2622_v56 = vpop.permute.xlu0 %2621 }
0x30b8   :  { %v2624_v4 = vsel %vm228_vm1, %v2622_v56, 0.0 }
0x30b9   :  { %2625 = vadd.xlane.f32.xlu0 %v2624_v4 }
0x3146   :  { %v2626_v31 = vpop.xlane.xlu0 %2625 }
0x3147   :  { %v2627_v35 = vmul.f32 0.0625, %v2626_v31 }
0x3149   :  { %v2628_v40 = vadd.f32 0.001, %v2627_v35 }
0x314b   :  { %11826 = vrsqrt.f32 %v2628_v40 }
0x3155   :  { %v11827_v51 = vpop.eup %11826 }
0x3156   :  { %v2630_v53 = vmul.f32 %v11827_v51, %v2618_v2 }
0x3158   :  { %v2631_v17 = vmul.f32 %v2630_v53, %v12649_v29 }
0x315a   :  { %v2632_v11 = vadd.f32 %v2631_v17, %v12652_v32 }
0x315c   :  { %11828 = vtanh.f32 %v2632_v11 }
0x3166   :  { %v11829_v58 = vpop.eup %11828 }
0x3167   :  { %v2638_v49 = vmul.f32 %v11829_v58, %v2636_v43  ;;  %v13200_v58 = vld [vmem:[#allocation6 + $0x1] ss:$0 sm:$0xff] }
0x3169   :  { %v2639_v12 = vmul.f32 0.9, %v2638_v49  ;;  %v13203_v49 = vld [vmem:[#allocation6 + $0x2] ss:$0 sm:$0xff] }
0x316b   :  { %v13149_v42 = vadd.f32 %v2640_v63, %v2639_v12 }
0x316d   :  { %2646 = vrot.lane.b32.xlu0 %v13149_v42, %s12153_s8 }
0x31df   :  { %v2647_v50 = vpop.permute.xlu0 %2646 }
0x31e0   :  { %v2652_v57 = vsel %vm228_vm1, %v2647_v50, %v2650_v60 }
0x31e1   :  { %9245 = vmatmul.mubr.msk.f32.vlgmr.msra.gmra.mrb[26].mxu0 %vm230_vm2, %v2652_v57 }
0x31e2   :  { %10929 = vmatpush3.bf16.msra.mxu0 %v12330_v10  ;;  %9314 = vmatprep.mubr.msk.f32.mxu0 %vm12151_vm0, %v12152_v1 }
0x31e3   :  { %10930 = vmatprep.subr.bf16.mxu0 %v12150_v0 }
0x31e6   :  { %10932 = vmatpush3.bf16.msra.mxu0 %v12346_v15 }
0x31e7   :  { %10933 = vmatprep.subr.bf16.mxu0 %v12150_v0 }
0x31ea   :  { %10935 = vmatpush3.bf16.msra.mxu0 %v12363_v20 }
0x31eb   :  { %10936 = vmatprep.subr.bf16.mxu0 %v12150_v0 }
0x31ee   :  { %10938 = vmatpush3.bf16.msra.mxu0 %v12376_v24 }
0x31ef   :  { %10939 = vmatprep.subr.bf16.mxu0 %v12150_v0 }
0x31f2   :  { %10941 = vmatpush3.bf16.msra.mxu0 %v12391_v27 }
0x31f3   :  { %10942 = vmatprep.subr.bf16.mxu0 %v12150_v0 }
0x31f6   :  { %10944 = vmatpush3.bf16.msra.mxu0 %v12403_v30 }
0x31f7   :  { %10945 = vmatprep.subr.bf16.mxu0 %v12150_v0 }
0x31fa   :  { %10947 = vmatpush3.bf16.msra.mxu0 %v12415_v33 }
0x31fb   :  { %10948 = vmatprep.subr.bf16.mxu0 %v12150_v0 }
0x31fe   :  { %10950 = vmatpush3.bf16.msra.mxu0 %v12434_v36 }
0x31ff   :  { %10966 = vmatprep.subr.bf16.mxu0 %v12150_v0 }
0x32b4   :  { %v2722_v55 = vpop.f32.mrb[26].mxu0 }
0x32b5   :  { %v2723_v2 = vadd.f32 %v13173_v3, %v2722_v55  ;;  %v9246_v59 = vpop.f32.mrb[27].mxu0 }
0x32b7   :  { %9280 = vmatmul.mubr.f32.vlgmr.msra.gmra.mrb[26].mxu1 %v2723_v2 }
0x32b8   :  { %10953 = vmatpush3.bf16.msra.mxu1 %v12734_v19  ;;  %9325 = vmatprep.mubr.msk.f32.mxu1 %vm12151_vm0, %v12152_v1 }
0x32b9   :  { %10954 = vmatprep.subr.bf16.mxu1 %v12150_v0 }
0x32bc   :  { %10956 = vmatpush3.bf16.msra.mxu1 %v12740_v26 }
0x32bd   :  { %10957 = vmatprep.subr.bf16.mxu1 %v12150_v0 }
0x338a   :  { %v2792_v56 = vpop.f32.mrb[26].mxu1 }
0x338b   :  { %v2796_v4 = vsub.f32 %v2723_v2, %v2792_v56  ;;  %v9281_v31 = vpop.f32.mrb[27].mxu1  ;;  %v2359_v56 = vmul.f32 0.5, %v13062_v41 }
0x338d   :  { %v2797_v35 = vmul.f32 %v2796_v4, %v2796_v4 }
0x338f   :  { %9315 = vmatmul.mubr.f32.vlgmr.msra.gmra.mrb[28].mxu0 %v2797_v35 }
0x3390   :  { %10968 = vmatpush3.bf16.msra.mxu0 %v12330_v10  ;;  %9375 = vmatprep.mubr.msk.f32.mxu0 %vm12151_vm0, %v12152_v1 }
0x3391   :  { %10969 = vmatprep.subr.bf16.mxu0 %v12150_v0 }
0x3394   :  { %10971 = vmatpush3.bf16.msra.mxu0 %v12346_v15 }
0x3395   :  { %10972 = vmatprep.subr.bf16.mxu0 %v12150_v0 }
0x3398   :  { %10974 = vmatpush3.bf16.msra.mxu0 %v12363_v20 }
0x3399   :  { %10975 = vmatprep.subr.bf16.mxu0 %v12150_v0 }
0x339c   :  { %10977 = vmatpush3.bf16.msra.mxu0 %v12376_v24 }
0x339d   :  { %10978 = vmatprep.subr.bf16.mxu0 %v12150_v0 }
0x33a0   :  { %10980 = vmatpush3.bf16.msra.mxu0 %v12391_v27 }
0x33a1   :  { %10981 = vmatprep.subr.bf16.mxu0 %v12150_v0 }
0x33a4   :  { %10983 = vmatpush3.bf16.msra.mxu0 %v12403_v30 }
0x33a5   :  { %10984 = vmatprep.subr.bf16.mxu0 %v12150_v0 }
0x33a8   :  { %10986 = vmatpush3.bf16.msra.mxu0 %v12415_v33 }
0x33a9   :  { %10987 = vmatprep.subr.bf16.mxu0 %v12150_v0 }
0x33ac   :  { %10989 = vmatpush3.bf16.msra.mxu0 %v12434_v36 }
0x33ad   :  { %11014 = vmatprep.subr.bf16.mxu0 %v12150_v0 }
0x3462   :  { %v2864_v40 = vpop.f32.mrb[28].mxu0 }
0x3463   :  { %v2865_v51 = vadd.f32 0.001, %v2864_v40  ;;  %v9316_v53 = vpop.f32.mrb[29].mxu0 }
0x3465   :  { %11830 = vrsqrt.f32 %v2865_v51 }
0x346f   :  { %v11831_v17 = vpop.eup %11830 }
0x3470   :  { %v2869_v11 = vmul.f32 %v11831_v17, %v2796_v4  ;;  %v2360_v4 = vmul.f32 0.5, %v13059_v52 }
0x3472   :  { %v2870_v43 = vmul.f32 %v13200_v58, %v2869_v11  ;;  %v13210_v31 = vadd.f32 %v2360_v4, %v2359_v56 }
0x3474   :  { %v2871_v12 = vadd.f32 %v13203_v49, %v2870_v43 }
0x3476   :  { %11832 = vtanh.f32 %v2871_v12  ;;  %v7672_v60 = vmul.f32 -1.442695, %v2871_v12 }
0x3478   :  { %11834 = vpow2.f32 %v7672_v60 }
0x3480   :  { %v11833_v63 = vpop.eup %11832 }
0x3481   :  { %2881 = vrot.lane.b32.xlu1 %v11833_v63, %s12153_s8 }
0x3482   :  { %v11835_v50 = vpop.eup %11834 }
0x3483   :  { %v2875_v57 = vadd.f32 1.0, %v11835_v50 }
0x3485   :  { %11836 = vrcp.f32 %v2875_v57 }
0x348f   :  { %v11837_v55 = vpop.eup %11836 }
0x3490   :  { %v2879_v35 = vmul.f32 %v11837_v55, %v13210_v31 }
0x34f3   :  { %v2882_v2 = vpop.permute.xlu1 %2881 }
0x34f4   :  { %v2884_v59 = vmul.f32 %v11837_v55, %v2882_v2 }
0x34f6   :  { %2886 = vrot.lane.b32.xlu0 %v2884_v59, %s12154_s2 }
0x3568   :  { %v2887_v40 = vpop.permute.xlu0 %2886 }
0x3569   :  { %v13213_v51 = vadd.f32 %v2887_v40, %v2879_v35 }
0x356b   :  { %2891 = vrot.lane.b32.xlu1 %v13213_v51, %s12154_s2 }
0x35dd   :  { %v2892_v53 = vpop.permute.xlu1 %2891 }
0x35de   :  { %v2894_v17 = vsel %vm472_vm3, %v2892_v53, 0.0 }
0x35df   :  { %2895 = vadd.xlane.f32.xlu0 %v2894_v17  ;;  %v2920_v17 = vmul.f32 0.1, %v13074_v14  ;;  %v7675_v14 = vld [vmem:[%s14421_s20 + $0x18] sm:$0xff] }
0x35f5   :  { %2915 = vrot.lane.b32.xlu0 %v11837_v55, %s12153_s8 }
0x366c   :  { %v2896_v11 = vpop.xlane.xlu0 %2895 }
0x366d   :  { %v2897_v41 = vmul.f32 0.03125, %v2896_v11 }
0x366f   :  { %v2898_v52 = vsub.f32 %v13213_v51, %v2897_v41 }
0x3670   :  { %v2916_v35 = vpop.permute.xlu0 %2915 }
0x3671   :  { %v2899_v43 = vmul.f32 %v2898_v52, %v2898_v52 }
0x3673   :  { %2901 = vrot.lane.b32.xlu1 %v2899_v43, %s12154_s2 }
0x36e5   :  { %v2902_v12 = vpop.permute.xlu1 %2901 }
0x36e6   :  { %v2904_v63 = vsel %vm472_vm3, %v2902_v12, 0.0 }
0x36e7   :  { %2905 = vadd.xlane.f32.xlu1 %v2904_v63  ;;  %v13266_v63 = vld [vmem:[%s14408_s13] ss:$0 sm:$0xff] }
0x3774   :  { %v2906_v60 = vpop.xlane.xlu1 %2905 }
0x3775   :  { %v2907_v50 = vmul.f32 0.03125, %v2906_v60 }
0x3777   :  { %v2908_v57 = vadd.f32 0.001, %v2907_v50 }
0x3779   :  { %11838 = vrsqrt.f32 %v2908_v57 }
0x3783   :  { %v11839_v2 = vpop.eup %11838 }
0x3784   :  { %v2910_v59 = vmul.f32 %v11839_v2, %v2898_v52 }
0x3786   :  { %v2911_v56 = vmul.f32 %v2910_v59, %v12745_v46 }
0x3788   :  { %v2912_v55 = vadd.f32 %v2911_v56, %v12747_v48 }
0x378a   :  { %11840 = vtanh.f32 %v2912_v55 }
0x3794   :  { %v11841_v4 = vpop.eup %11840 }
0x3795   :  { %v2918_v40 = vmul.f32 %v11841_v4, %v2916_v35 }
0x3797   :  { %v2919_v53 = vmul.f32 0.9, %v2918_v40 }
0x3799   :  { %v13225_v11 = vadd.f32 %v2920_v17, %v2919_v53 }
0x379b   :  { %3004 = vrot.lane.b32.xlu0 %v13225_v11, %s12157_s27  ;;  %2926 = vrot.lane.b32.xlu1 %v13225_v11, %s12154_s2 }
0x380d   :  { %v2927_v41 = vpop.permute.xlu1 %2926  ;;  %v3005_v52 = vpop.permute.xlu0 %3004 }
0x380e   :  { %9326 = vmatmul.mubr.msk.f32.vlgmr.msra.gmra.mrb[28].mxu1 %vm472_vm3, %v2927_v41  ;;  %v3007_v43 = vsel %vm228_vm1, %v7675_v14, %v3005_v52 }
0x380f   :  { %10959 = vmatpush3.bf16.msra.mxu1 %v12316_v5  ;;  %9340 = vmatprep.mubr.msk.f32.mxu1 %vm12151_vm0, %v12152_v1 }
0x3810   :  { %10960 = vmatprep.subr.bf16.mxu1 %v12150_v0 }
0x3813   :  { %10962 = vmatpush3.bf16.msra.mxu1 %v12328_v9 }
0x3814   :  { %10963 = vmatprep.subr.bf16.mxu1 %v12150_v0 }
0x3817   :  { %10965 = vmatpush3.bf16.msra.mxu1 %v12356_v18 }
0x3818   :  { %10990 = vmatprep.subr.bf16.mxu1 %v12150_v0 }
0x381a   :  { %9341 = vmatmul.mubr.msk.f32.vlgmr.msra.gmra.mrb[30].mxu1 %vm230_vm2, %v3007_v43 }
0x381b   :  { %10992 = vmatpush3.bf16.msra.mxu1 %v12330_v10  ;;  %9410 = vmatprep.mubr.msk.f32.mxu1 %vm12151_vm0, %v12152_v1 }
0x381c   :  { %10993 = vmatprep.subr.bf16.mxu1 %v12150_v0 }
0x381f   :  { %10995 = vmatpush3.bf16.msra.mxu1 %v12346_v15 }
0x3820   :  { %10996 = vmatprep.subr.bf16.mxu1 %v12150_v0 }
0x3823   :  { %10998 = vmatpush3.bf16.msra.mxu1 %v12363_v20 }
0x3824   :  { %10999 = vmatprep.subr.bf16.mxu1 %v12150_v0 }
0x3827   :  { %11001 = vmatpush3.bf16.msra.mxu1 %v12376_v24 }
0x3828   :  { %11002 = vmatprep.subr.bf16.mxu1 %v12150_v0 }
0x382b   :  { %11004 = vmatpush3.bf16.msra.mxu1 %v12391_v27 }
0x382c   :  { %11005 = vmatprep.subr.bf16.mxu1 %v12150_v0 }
0x382f   :  { %11007 = vmatpush3.bf16.msra.mxu1 %v12403_v30 }
0x3830   :  { %11008 = vmatprep.subr.bf16.mxu1 %v12150_v0 }
0x3833   :  { %11010 = vmatpush3.bf16.msra.mxu1 %v12415_v33 }
0x3834   :  { %11011 = vmatprep.subr.bf16.mxu1 %v12150_v0 }
0x3837   :  { %11013 = vmatpush3.bf16.msra.mxu1 %v12434_v36 }
0x3838   :  { %11023 = vmatprep.subr.bf16.mxu1 %v12150_v0 }
0x38e1   :  { %v2996_v12 = vpop.f32.mrb[28].mxu1 }
0x38e2   :  { %v2997_v60 = vadd.f32 %v13266_v63, %v2996_v12  ;;  %v9327_v50 = vpop.f32.mrb[29].mxu1 }
0x38e4   :  { %7674 = vst [vmem:[%s14409_s14 + $0x10] sm:$0xff] %v2997_v60 }
0x38ed   :  { %v3077_v57 = vpop.f32.mrb[30].mxu1 }
0x38ee   :  { %v3078_v2 = vadd.f32 %v13022_v44, %v3077_v57  ;;  %v9342_v59 = vpop.f32.mrb[31].mxu1 }
0x38f0   :  { %9376 = vmatmul.mubr.f32.vlgmr.msra.gmra.mrb[30].mxu0 %v3078_v2 }
0x38f1   :  { %11016 = vmatpush3.bf16.msra.mxu0 %v12484_v21  ;;  %9425 = vmatprep.mubr.msk.f32.mxu0 %vm12151_vm0, %v12152_v1 }
0x38f2   :  { %11017 = vmatprep.subr.bf16.mxu0 %v12150_v0 }
0x38f5   :  { %11019 = vmatpush3.bf16.msra.mxu0 %v12490_v23 }
0x38f6   :  { %11020 = vmatprep.subr.bf16.mxu0 %v12150_v0 }
0x38f9   :  { %11022 = vmatpush3.bf16.msra.mxu0 %v12500_v28 }
0x38fa   :  { %11035 = vmatprep.subr.bf16.mxu0 %v12150_v0 }
0x39c3   :  { %v3147_v56 = vpop.f32.mrb[30].mxu0 }
0x39c4   :  { %v3151_v55 = vsub.f32 %v3078_v2, %v3147_v56  ;;  %v9377_v44 = vpop.f32.mrb[31].mxu0  ;;  %v2922_v56 = vmul.f32 0.5, %v13213_v51 }
0x39c6   :  { %v3152_v4 = vmul.f32 %v3151_v55, %v3151_v55 }
0x39c8   :  { %9411 = vmatmul.mubr.f32.vlgmr.msra.gmra.mrb[32].mxu1 %v3152_v4 }
0x39c9   :  { %11025 = vmatpush3.bf16.msra.mxu1 %v12520_v45  ;;  %9444 = vmatprep.mubr.msk.f32.mxu1 %vm12151_vm0, %v12152_v1 }
0x39ca   :  { %11026 = vmatprep.subr.bf16.mxu1 %v12150_v0 }
0x39cd   :  { %11028 = vmatpush3.bf16.msra.mxu1 %v12526_v47 }
0x39ce   :  { %11029 = vmatprep.subr.bf16.mxu1 %v12150_v0 }
0x39d1   :  { %11031 = vmatpush3.bf16.msra.mxu1 %v12536_v54 }
0x39d2   :  { %11032 = vmatprep.subr.bf16.mxu1 %v12150_v0 }
0x39d5   :  { %11034 = vmatpush3.bf16.msra.mxu1 %v12561_v61 }
0x39d6   :  { %11047 = vmatprep.subr.bf16.mxu1 %v12150_v0 }
0x3a9b   :  { %v3219_v35 = vpop.f32.mrb[32].mxu1 }
0x3a9c   :  { %v3220_v40 = vadd.f32 0.001, %v3219_v35  ;;  %v9412_v53 = vpop.f32.mrb[33].mxu1 }
0x3a9e   :  { %11842 = vrsqrt.f32 %v3220_v40 }
0x3aa8   :  { %v11843_v17 = vpop.eup %11842 }
0x3aa9   :  { %v3224_v41 = vmul.f32 %v11843_v17, %v3151_v55 }
0x3aab   :  { %v3225_v14 = vmul.f32 %v13046_v7, %v3224_v41  ;;  %v2923_v7 = vmul.f32 0.5, %v13210_v31 }
0x3aad   :  { %v3226_v52 = vadd.f32 %v13052_v25, %v3225_v14  ;;  %v13297_v55 = vadd.f32 %v2923_v7, %v2922_v56 }
0x3aaf   :  { %11844 = vtanh.f32 %v3226_v52  ;;  %v7677_v12 = vmul.f32 -1.442695, %v3226_v52 }
0x3ab1   :  { %11846 = vpow2.f32 %v7677_v12 }
0x3ab9   :  { %v11845_v43 = vpop.eup %11844 }
0x3aba   :  { %3236 = vrot.lane.b32.xlu0 %v11845_v43, %s12153_s8 }
0x3abb   :  { %v11847_v60 = vpop.eup %11846 }
0x3abc   :  { %v3230_v50 = vadd.f32 1.0, %v11847_v60 }
0x3abe   :  { %11848 = vrcp.f32 %v3230_v50 }
0x3ac8   :  { %v11849_v57 = vpop.eup %11848 }
0x3ac9   :  { %v3234_v25 = vmul.f32 %v11849_v57, %v13297_v55 }
0x3b2c   :  { %v3237_v2 = vpop.permute.xlu0 %3236 }
0x3b2d   :  { %v3239_v59 = vmul.f32 %v11849_v57, %v3237_v2 }
0x3b2f   :  { %3241 = vrot.lane.b32.xlu1 %v3239_v59, %s12154_s2 }
0x3ba1   :  { %v3242_v44 = vpop.permute.xlu1 %3241 }
0x3ba2   :  { %v13300_v4 = vadd.f32 %v3242_v44, %v3234_v25  ;;  %v3275_v44 = vmul.f32 0.1, %v13225_v11 }
0x3ba4   :  { %3246 = vrot.lane.b32.xlu0 %v13300_v4, %s12154_s2 }
0x3c16   :  { %v3247_v35 = vpop.permute.xlu0 %3246 }
0x3c17   :  { %v3249_v40 = vsel %vm472_vm3, %v3247_v35, 0.0 }
0x3c18   :  { %3250 = vadd.xlane.f32.xlu1 %v3249_v40 }
0x3c29   :  { %3270 = vrot.lane.b32.xlu1 %v11849_v57, %s12153_s8 }
0x3ca5   :  { %v3251_v53 = vpop.xlane.xlu1 %3250 }
0x3ca6   :  { %v3252_v51 = vmul.f32 0.03125, %v3251_v53 }
0x3ca8   :  { %v3253_v31 = vsub.f32 %v13300_v4, %v3252_v51 }
0x3ca9   :  { %v3271_v56 = vpop.permute.xlu1 %3270 }
0x3caa   :  { %v3254_v17 = vmul.f32 %v3253_v31, %v3253_v31 }
0x3cac   :  { %3256 = vrot.lane.b32.xlu0 %v3254_v17, %s12154_s2 }
0x3d1e   :  { %v3257_v41 = vpop.permute.xlu0 %3256 }
0x3d1f   :  { %v3259_v14 = vsel %vm472_vm3, %v3257_v41, 0.0 }
0x3d20   :  { %3260 = vadd.xlane.f32.xlu0 %v3259_v14 }
0x3dad   :  { %v3261_v52 = vpop.xlane.xlu0 %3260 }
0x3dae   :  { %v3262_v43 = vmul.f32 0.03125, %v3261_v52 }
0x3db0   :  { %v3263_v12 = vadd.f32 0.001, %v3262_v43 }
0x3db2   :  { %11850 = vrsqrt.f32 %v3263_v12 }
0x3dbc   :  { %v11851_v60 = vpop.eup %11850 }
0x3dbd   :  { %v3265_v50 = vmul.f32 %v11851_v60, %v3253_v31 }
0x3dbf   :  { %v3266_v2 = vmul.f32 %v3265_v50, %v12505_v38 }
0x3dc1   :  { %v3267_v57 = vadd.f32 %v3266_v2, %v12507_v39 }
0x3dc3   :  { %11852 = vtanh.f32 %v3267_v57 }
0x3dcd   :  { %v11853_v59 = vpop.eup %11852 }
0x3dce   :  { %v3273_v7 = vmul.f32 %v11853_v59, %v3271_v56 }
0x3dd0   :  { %v3274_v25 = vmul.f32 0.9, %v3273_v7 }
0x3dd2   :  { %v13312_v35 = vadd.f32 %v3275_v44, %v3274_v25 }
0x3dd4   :  { %3281 = vrot.lane.b32.xlu0 %v13312_v35, %s12154_s2 }
0x3e46   :  { %v3282_v40 = vpop.permute.xlu0 %3281 }
0x3e47   :  { %v3284_v53 = vsel %vm472_vm3, %v3282_v40, %v13149_v42 }
0x3e48   :  { %9426 = vmatmul.mubr.msk.f32.vlgmr.msra.gmra.mrb[32].mxu0 %vm230_vm2, %v3284_v53 }
0x3e49   :  { %11037 = vmatpush3.bf16.msra.mxu0 %v12520_v45  ;;  %9463 = vmatprep.mubr.msk.f32.mxu0 %vm12151_vm0, %v12152_v1 }
0x3e4a   :  { %11038 = vmatprep.subr.bf16.mxu0 %v12150_v0 }
0x3e4d   :  { %11040 = vmatpush3.bf16.msra.mxu0 %v12526_v47 }
0x3e4e   :  { %11041 = vmatprep.subr.bf16.mxu0 %v12150_v0 }
0x3e51   :  { %11043 = vmatpush3.bf16.msra.mxu0 %v12536_v54 }
0x3e52   :  { %11044 = vmatprep.subr.bf16.mxu0 %v12150_v0 }
0x3e55   :  { %11046 = vmatpush3.bf16.msra.mxu0 %v12561_v61 }
0x3e56   :  { %11056 = vmatprep.subr.bf16.mxu0 %v12150_v0 }
0x3f1b   :  { %v3354_v11 = vpop.f32.mrb[32].mxu0 }
0x3f1c   :  { %v3355_v51 = vadd.f32 %v13091_v37, %v3354_v11  ;;  %v9427_v31 = vpop.f32.mrb[33].mxu0  ;;  %v2642_v11 = vmul.f32 0.5, %v13135_v22 }
0x3f1e   :  { %9445 = vmatmul.mubr.msk.f32.vlgmr.msra.gmra.mrb[34].mxu1 %vm589_vm4, %v3355_v51 }
0x3f1f   :  { %11049 = vmatpush3.bf16.msra.mxu1 %v12628_v6  ;;  %9478 = vmatprep.mubr.msk.f32.mxu1 %vm12151_vm0, %v12152_v1 }
0x3f20   :  { %11050 = vmatprep.subr.bf16.mxu1 %v12150_v0 }
0x3f23   :  { %11052 = vmatpush3.bf16.msra.mxu1 %v12634_v8 }
0x3f24   :  { %11053 = vmatprep.subr.bf16.mxu1 %v12150_v0 }
0x3f27   :  { %11055 = vmatpush3.bf16.msra.mxu1 %v12644_v13 }
0x3f28   :  { %11080 = vmatprep.subr.bf16.mxu1 %v12150_v0 }
0x3ff1   :  { %v3427_v17 = vpop.f32.mrb[34].mxu1 }
0x3ff2   :  { %v3431_v37 = vsub.f32 %v3355_v51, %v3427_v17  ;;  %v9446_v41 = vpop.f32.mrb[35].mxu1 }
0x3ff4   :  { %v3432_v14 = vmul.f32 %v3431_v37, %v3431_v37 }
0x3ff6   :  { %9464 = vmatmul.mubr.msk.f32.vlgmr.msra.gmra.mrb[34].mxu0 %vm589_vm4, %v3432_v14 }
0x3ff7   :  { %11058 = vmatpush3.bf16.msra.mxu0 %v12330_v10  ;;  %9513 = vmatprep.mubr.msk.f32.mxu0 %vm12151_vm0, %v12152_v1 }
0x3ff8   :  { %11059 = vmatprep.subr.bf16.mxu0 %v12150_v0 }
0x3ffb   :  { %11061 = vmatpush3.bf16.msra.mxu0 %v12346_v15 }
0x3ffc   :  { %11062 = vmatprep.subr.bf16.mxu0 %v12150_v0 }
0x3fff   :  { %11064 = vmatpush3.bf16.msra.mxu0 %v12363_v20 }
0x4000   :  { %11065 = vmatprep.subr.bf16.mxu0 %v12150_v0 }
0x4003   :  { %11067 = vmatpush3.bf16.msra.mxu0 %v12376_v24 }
0x4004   :  { %11068 = vmatprep.subr.bf16.mxu0 %v12150_v0 }
0x4007   :  { %11070 = vmatpush3.bf16.msra.mxu0 %v12391_v27 }
0x4008   :  { %11071 = vmatprep.subr.bf16.mxu0 %v12150_v0 }
0x400b   :  { %11073 = vmatpush3.bf16.msra.mxu0 %v12403_v30 }
0x400c   :  { %11074 = vmatprep.subr.bf16.mxu0 %v12150_v0 }
0x400f   :  { %11076 = vmatpush3.bf16.msra.mxu0 %v12415_v33 }
0x4010   :  { %11077 = vmatprep.subr.bf16.mxu0 %v12150_v0 }
0x4013   :  { %11079 = vmatpush3.bf16.msra.mxu0 %v12434_v36 }
0x4014   :  { %11104 = vmatprep.subr.bf16.mxu0 %v12150_v0 }
0x40c9   :  { %v3502_v52 = vpop.f32.mrb[34].mxu0 }
0x40ca   :  { %v3503_v43 = vadd.f32 0.001, %v3502_v52  ;;  %v9465_v12 = vpop.f32.mrb[35].mxu0 }
0x40cc   :  { %11854 = vrsqrt.f32 %v3503_v43 }
0x40d6   :  { %v11855_v60 = vpop.eup %11854 }
0x40d7   :  { %v3507_v50 = vmul.f32 %v11855_v60, %v3431_v37 }
0x40d9   :  { %v3508_v2 = vmul.f32 %v13122_v16, %v3507_v50  ;;  %v2643_v16 = vmul.f32 0.5, %v13132_v62 }
0x40db   :  { %v3509_v57 = vadd.f32 %v13125_v34, %v3508_v2  ;;  %v13364_v51 = vadd.f32 %v2643_v16, %v2642_v11 }
0x40dd   :  { %11856 = vtanh.f32 %v3509_v57  ;;  %v7681_v56 = vmul.f32 -1.442695, %v3509_v57 }
0x40df   :  { %11858 = vpow2.f32 %v7681_v56 }
0x40e7   :  { %v11857_v59 = vpop.eup %11856 }
0x40e8   :  { %3519 = vrot.lane.b32.xlu1 %v11857_v59, %s12155_s11 }
0x40e9   :  { %v11859_v7 = vpop.eup %11858 }
0x40ea   :  { %v3513_v25 = vadd.f32 1.0, %v11859_v7 }
0x40ec   :  { %11860 = vrcp.f32 %v3513_v25 }
0x40f6   :  { %v11861_v44 = vpop.eup %11860 }
0x40f7   :  { %v3517_v34 = vmul.f32 %v11861_v44, %v13364_v51 }
0x415a   :  { %v3520_v40 = vpop.permute.xlu1 %3519 }
0x415b   :  { %v3522_v53 = vmul.f32 %v11861_v44, %v3520_v40 }
0x415d   :  { %3524 = vrot.lane.b32.xlu1 %v3522_v53, %s12156_s22  ;;  %v3558_v53 = vmul.f32 0.1, %v13149_v42 }
0x41cf   :  { %v3525_v31 = vpop.permute.xlu1 %3524 }
0x41d0   :  { %v13367_v17 = vadd.f32 %v3525_v31, %v3517_v34 }
0x41d2   :  { %3529 = vrot.lane.b32.xlu0 %v13367_v17, %s12153_s8 }
0x4244   :  { %v3530_v37 = vpop.permute.xlu0 %3529 }
0x4245   :  { %v3532_v41 = vsel %vm228_vm1, %v3530_v37, 0.0 }
0x4246   :  { %3533 = vadd.xlane.f32.xlu1 %v3532_v41 }
0x4257   :  { %3553 = vrot.lane.b32.xlu1 %v11861_v44, %s12155_s11 }
0x425b   :  { %3567 = vrot.lane.b32.xlu1 %v13312_v35, %s12157_s27 }
0x42d3   :  { %v3534_v62 = vpop.xlane.xlu1 %3533 }
0x42d4   :  { %v3535_v22 = vmul.f32 0.0625, %v3534_v62 }
0x42d6   :  { %v3536_v14 = vsub.f32 %v13367_v17, %v3535_v22 }
0x42d7   :  { %v3554_v44 = vpop.permute.xlu1 %3553 }
0x42d8   :  { %v3537_v52 = vmul.f32 %v3536_v14, %v3536_v14 }
0x42da   :  { %3539 = vrot.lane.b32.xlu0 %v3537_v52, %s12153_s8 }
0x42db   :  { %v3568_v34 = vpop.permute.xlu1 %3567 }
0x434c   :  { %v3540_v43 = vpop.permute.xlu0 %3539 }
0x434d   :  { %v3542_v12 = vsel %vm228_vm1, %v3540_v43, 0.0 }
0x434e   :  { %3543 = vadd.xlane.f32.xlu0 %v3542_v12 }
0x43db   :  { %v3544_v60 = vpop.xlane.xlu0 %3543 }
0x43dc   :  { %v3545_v50 = vmul.f32 0.0625, %v3544_v60 }
0x43de   :  { %v3546_v2 = vadd.f32 0.001, %v3545_v50 }
0x43e0   :  { %11862 = vrsqrt.f32 %v3546_v2 }
0x43ea   :  { %v11863_v57 = vpop.eup %11862 }
0x43eb   :  { %v3548_v59 = vmul.f32 %v11863_v57, %v3536_v14 }
0x43ed   :  { %v3549_v56 = vmul.f32 %v3548_v59, %v12649_v29 }
0x43ef   :  { %v3550_v7 = vadd.f32 %v3549_v56, %v12652_v32 }
0x43f1   :  { %11864 = vtanh.f32 %v3550_v7 }
0x43fb   :  { %v11865_v25 = vpop.eup %11864 }
0x43fc   :  { %v3556_v40 = vmul.f32 %v11865_v25, %v3554_v44 }
0x43fe   :  { %v3557_v11 = vmul.f32 0.9, %v3556_v40 }
0x4400   :  { %v13381_v16 = vadd.f32 %v3558_v53, %v3557_v11 }
0x4402   :  { %3564 = vrot.lane.b32.xlu0 %v13381_v16, %s12153_s8 }
0x4474   :  { %v3565_v31 = vpop.permute.xlu0 %3564 }
0x4475   :  { %v3570_v37 = vsel %vm228_vm1, %v3565_v31, %v3568_v34  ;;  %v3277_v34 = vmul.f32 0.5, %v13300_v4 }
0x4476   :  { %9479 = vmatmul.mubr.msk.f32.vlgmr.msra.gmra.mrb[36].mxu1 %vm230_vm2, %v3570_v37 }
0x4477   :  { %11082 = vmatpush3.bf16.msra.mxu1 %v12330_v10  ;;  %9548 = vmatprep.mubr.msk.f32.mxu1 %vm12151_vm0, %v12152_v1 }
0x4478   :  { %11083 = vmatprep.subr.bf16.mxu1 %v12150_v0 }
0x447b   :  { %11085 = vmatpush3.bf16.msra.mxu1 %v12346_v15 }
0x447c   :  { %11086 = vmatprep.subr.bf16.mxu1 %v12150_v0 }
0x447f   :  { %11088 = vmatpush3.bf16.msra.mxu1 %v12363_v20 }
0x4480   :  { %11089 = vmatprep.subr.bf16.mxu1 %v12150_v0 }
0x4483   :  { %11091 = vmatpush3.bf16.msra.mxu1 %v12376_v24 }
0x4484   :  { %11092 = vmatprep.subr.bf16.mxu1 %v12150_v0 }
0x4487   :  { %11094 = vmatpush3.bf16.msra.mxu1 %v12391_v27 }
0x4488   :  { %11095 = vmatprep.subr.bf16.mxu1 %v12150_v0 }
0x448b   :  { %11097 = vmatpush3.bf16.msra.mxu1 %v12403_v30 }
0x448c   :  { %11098 = vmatprep.subr.bf16.mxu1 %v12150_v0 }
0x448f   :  { %11100 = vmatpush3.bf16.msra.mxu1 %v12415_v33 }
0x4490   :  { %11101 = vmatprep.subr.bf16.mxu1 %v12150_v0 }
0x4493   :  { %11103 = vmatpush3.bf16.msra.mxu1 %v12434_v36 }
0x4494   :  { %11119 = vmatprep.subr.bf16.mxu1 %v12150_v0 }
0x4549   :  { %v3640_v42 = vpop.f32.mrb[36].mxu1 }
0x454a   :  { %v3641_v41 = vadd.f32 %v13173_v3, %v3640_v42  ;;  %v9480_v62 = vpop.f32.mrb[37].mxu1 }
0x454c   :  { %9514 = vmatmul.mubr.f32.vlgmr.msra.gmra.mrb[36].mxu0 %v3641_v41 }
0x454d   :  { %11106 = vmatpush3.bf16.msra.mxu0 %v12734_v19  ;;  %9559 = vmatprep.mubr.msk.f32.mxu0 %vm12151_vm0, %v12152_v1 }
0x454e   :  { %11107 = vmatprep.subr.bf16.mxu0 %v12150_v0 }
0x4551   :  { %11109 = vmatpush3.bf16.msra.mxu0 %v12740_v26 }
0x4552   :  { %11110 = vmatprep.subr.bf16.mxu0 %v12150_v0 }
0x461f   :  { %v3710_v22 = vpop.f32.mrb[36].mxu0 }
0x4620   :  { %v3714_v14 = vsub.f32 %v3641_v41, %v3710_v22  ;;  %v9515_v52 = vpop.f32.mrb[37].mxu0 }
0x4622   :  { %v3715_v43 = vmul.f32 %v3714_v14, %v3714_v14 }
0x4624   :  { %9549 = vmatmul.mubr.f32.vlgmr.msra.gmra.mrb[38].mxu1 %v3715_v43 }
0x4625   :  { %11121 = vmatpush3.bf16.msra.mxu1 %v12330_v10  ;;  %9609 = vmatprep.mubr.msk.f32.mxu1 %vm12151_vm0, %v12152_v1 }
0x4626   :  { %11122 = vmatprep.subr.bf16.mxu1 %v12150_v0 }
0x4629   :  { %11124 = vmatpush3.bf16.msra.mxu1 %v12346_v15 }
0x462a   :  { %11125 = vmatprep.subr.bf16.mxu1 %v12150_v0 }
0x462d   :  { %11127 = vmatpush3.bf16.msra.mxu1 %v12363_v20 }
0x462e   :  { %11128 = vmatprep.subr.bf16.mxu1 %v12150_v0 }
0x4631   :  { %11130 = vmatpush3.bf16.msra.mxu1 %v12376_v24 }
0x4632   :  { %11131 = vmatprep.subr.bf16.mxu1 %v12150_v0 }
0x4635   :  { %11133 = vmatpush3.bf16.msra.mxu1 %v12391_v27 }
0x4636   :  { %11134 = vmatprep.subr.bf16.mxu1 %v12150_v0 }
0x4639   :  { %11136 = vmatpush3.bf16.msra.mxu1 %v12403_v30 }
0x463a   :  { %11137 = vmatprep.subr.bf16.mxu1 %v12150_v0 }
0x463d   :  { %11139 = vmatpush3.bf16.msra.mxu1 %v12415_v33 }
0x463e   :  { %11140 = vmatprep.subr.bf16.mxu1 %v12150_v0 }
0x4641   :  { %11142 = vmatpush3.bf16.msra.mxu1 %v12434_v36 }
0x4642   :  { %11167 = vmatprep.subr.bf16.mxu1 %v12150_v0 }
0x46f7   :  { %v3782_v3 = vpop.f32.mrb[38].mxu1 }
0x46f8   :  { %v3783_v12 = vadd.f32 0.001, %v3782_v3  ;;  %v9550_v60 = vpop.f32.mrb[39].mxu1 }
0x46fa   :  { %11866 = vrsqrt.f32 %v3783_v12 }
0x4704   :  { %v11867_v50 = vpop.eup %11866 }
0x4705   :  { %v3787_v2 = vmul.f32 %v11867_v50, %v3714_v14 }
0x4707   :  { %v3788_v57 = vmul.f32 %v13200_v58, %v3787_v2  ;;  %v3278_v58 = vmul.f32 0.5, %v13297_v55 }
0x4709   :  { %v3789_v59 = vadd.f32 %v13203_v49, %v3788_v57  ;;  %v13436_v31 = vadd.f32 %v3278_v58, %v3277_v34 }
0x470b   :  { %11868 = vtanh.f32 %v3789_v59  ;;  %v7683_v7 = vmul.f32 -1.442695, %v3789_v59 }
0x470d   :  { %11870 = vpow2.f32 %v7683_v7 }
0x4715   :  { %v11869_v56 = vpop.eup %11868 }
0x4716   :  { %3799 = vrot.lane.b32.xlu1 %v11869_v56, %s12153_s8 }
0x4717   :  { %v11871_v25 = vpop.eup %11870 }
0x4718   :  { %v3793_v44 = vadd.f32 1.0, %v11871_v25 }
0x471a   :  { %11872 = vrcp.f32 %v3793_v44  ;;  %v3838_v44 = vmul.f32 0.1, %v13312_v35  ;;  %v7686_v35 = vld [vmem:[%s14421_s20 + $0x20] sm:$0xff] }
0x4724   :  { %v11873_v40 = vpop.eup %11872 }
0x4725   :  { %v3797_v49 = vmul.f32 %v11873_v40, %v13436_v31 }
0x4788   :  { %v3800_v53 = vpop.permute.xlu1 %3799 }
0x4789   :  { %v3802_v11 = vmul.f32 %v11873_v40, %v3800_v53 }
0x478b   :  { %3804 = vrot.lane.b32.xlu0 %v3802_v11, %s12154_s2 }
0x47fd   :  { %v3805_v37 = vpop.permute.xlu0 %3804 }
0x47fe   :  { %v13439_v42 = vadd.f32 %v3805_v37, %v3797_v49 }
0x4800   :  { %3809 = vrot.lane.b32.xlu1 %v13439_v42, %s12154_s2 }
0x4872   :  { %v3810_v41 = vpop.permute.xlu1 %3809 }
0x4873   :  { %v3812_v62 = vsel %vm472_vm3, %v3810_v41, 0.0 }
0x4874   :  { %3813 = vadd.xlane.f32.xlu0 %v3812_v62 }
0x488a   :  { %3833 = vrot.lane.b32.xlu0 %v11873_v40, %s12153_s8 }
0x4901   :  { %v3814_v22 = vpop.xlane.xlu0 %3813 }
0x4902   :  { %v3815_v4 = vmul.f32 0.03125, %v3814_v22  ;;  %v13496_v22 = vld [vmem:[%s14422_s23] ss:$0 sm:$0xff] }
0x4904   :  { %v3816_v55 = vsub.f32 %v13439_v42, %v3815_v4 }
0x4905   :  { %v3834_v7 = vpop.permute.xlu0 %3833 }
0x4906   :  { %v3817_v14 = vmul.f32 %v3816_v55, %v3816_v55 }
0x4908   :  { %3819 = vrot.lane.b32.xlu1 %v3817_v14, %s12154_s2 }
0x497a   :  { %v3820_v52 = vpop.permute.xlu1 %3819 }
0x497b   :  { %v3822_v43 = vsel %vm472_vm3, %v3820_v52, 0.0 }
0x497c   :  { %3823 = vadd.xlane.f32.xlu1 %v3822_v43 }
0x4a09   :  { %v3824_v3 = vpop.xlane.xlu1 %3823 }
0x4a0a   :  { %v3825_v12 = vmul.f32 0.03125, %v3824_v3 }
0x4a0c   :  { %v3826_v60 = vadd.f32 0.001, %v3825_v12 }
0x4a0e   :  { %11874 = vrsqrt.f32 %v3826_v60 }
0x4a18   :  { %v11875_v50 = vpop.eup %11874 }
0x4a19   :  { %v3828_v2 = vmul.f32 %v11875_v50, %v3816_v55 }
0x4a1b   :  { %v3829_v57 = vmul.f32 %v3828_v2, %v12745_v46 }
0x4a1d   :  { %v3830_v59 = vadd.f32 %v3829_v57, %v12747_v48  ;;  %v13520_v57 = vld [vmem:[%s14422_s23 + $0x1] ss:$0 sm:$0xff] }
0x4a1f   :  { %11876 = vtanh.f32 %v3830_v59 }
0x4a29   :  { %v11877_v56 = vpop.eup %11876 }
0x4a2a   :  { %v3836_v25 = vmul.f32 %v11877_v56, %v3834_v7  ;;  %v13526_v56 = vld [vmem:[%s14422_s23 + $0x2] ss:$0 sm:$0xff] }
0x4a2c   :  { %v3837_v40 = vmul.f32 0.9, %v3836_v25 }
0x4a2e   :  { %v13451_v53 = vadd.f32 %v3838_v44, %v3837_v40 }
0x4a30   :  { %3922 = vrot.lane.b32.xlu0 %v13451_v53, %s12157_s27  ;;  %3844 = vrot.lane.b32.xlu1 %v13451_v53, %s12154_s2 }
0x4aa2   :  { %v3845_v11 = vpop.permute.xlu1 %3844  ;;  %v3923_v34 = vpop.permute.xlu0 %3922 }
0x4aa3   :  { %9560 = vmatmul.mubr.msk.f32.vlgmr.msra.gmra.mrb[38].mxu0 %vm472_vm3, %v3845_v11  ;;  %v3925_v58 = vsel %vm228_vm1, %v7686_v35, %v3923_v34 }
0x4aa4   :  { %11112 = vmatpush3.bf16.msra.mxu0 %v12316_v5  ;;  %9574 = vmatprep.mubr.msk.f32.mxu0 %vm12151_vm0, %v12152_v1 }
0x4aa5   :  { %11113 = vmatprep.subr.bf16.mxu0 %v12150_v0 }
0x4aa8   :  { %11115 = vmatpush3.bf16.msra.mxu0 %v12328_v9 }
0x4aa9   :  { %11116 = vmatprep.subr.bf16.mxu0 %v12150_v0 }
0x4aac   :  { %11118 = vmatpush3.bf16.msra.mxu0 %v12356_v18 }
0x4aad   :  { %11143 = vmatprep.subr.bf16.mxu0 %v12150_v0 }
0x4aaf   :  { %9575 = vmatmul.mubr.msk.f32.vlgmr.msra.gmra.mrb[40].mxu0 %vm230_vm2, %v3925_v58 }
0x4ab0   :  { %11145 = vmatpush3.bf16.msra.mxu0 %v12330_v10  ;;  %9644 = vmatprep.mubr.msk.f32.mxu0 %vm12151_vm0, %v12152_v1 }
0x4ab1   :  { %11146 = vmatprep.subr.bf16.mxu0 %v12150_v0 }
0x4ab4   :  { %11148 = vmatpush3.bf16.msra.mxu0 %v12346_v15 }
0x4ab5   :  { %11149 = vmatprep.subr.bf16.mxu0 %v12150_v0 }
0x4ab8   :  { %11151 = vmatpush3.bf16.msra.mxu0 %v12363_v20 }
0x4ab9   :  { %11152 = vmatprep.subr.bf16.mxu0 %v12150_v0 }
0x4abc   :  { %11154 = vmatpush3.bf16.msra.mxu0 %v12376_v24 }
0x4abd   :  { %11155 = vmatprep.subr.bf16.mxu0 %v12150_v0 }
0x4ac0   :  { %11157 = vmatpush3.bf16.msra.mxu0 %v12391_v27 }
0x4ac1   :  { %11158 = vmatprep.subr.bf16.mxu0 %v12150_v0 }
0x4ac4   :  { %11160 = vmatpush3.bf16.msra.mxu0 %v12403_v30 }
0x4ac5   :  { %11161 = vmatprep.subr.bf16.mxu0 %v12150_v0 }
0x4ac8   :  { %11163 = vmatpush3.bf16.msra.mxu0 %v12415_v33 }
0x4ac9   :  { %11164 = vmatprep.subr.bf16.mxu0 %v12150_v0 }
0x4acc   :  { %11166 = vmatpush3.bf16.msra.mxu0 %v12434_v36 }
0x4acd   :  { %11176 = vmatprep.subr.bf16.mxu0 %v12150_v0 }
0x4b76   :  { %v3914_v49 = vpop.f32.mrb[38].mxu0 }
0x4b77   :  { %v3915_v37 = vadd.f32 %v13266_v63, %v3914_v49  ;;  %v9561_v41 = vpop.f32.mrb[39].mxu0  ;;  %v3840_v49 = vmul.f32 0.5, %v13439_v42 }
0x4b79   :  { %7685 = vst [vmem:[%s14409_s14 + $0x18] sm:$0xff] %v3915_v37  ;;  %v3841_v37 = vmul.f32 0.5, %v13436_v31 }
0x4b7b   :  { %v13533_v41 = vadd.f32 %v3841_v37, %v3840_v49 }
0x4b82   :  { %v3995_v62 = vpop.f32.mrb[40].mxu0 }
0x4b83   :  { %v3996_v4 = vadd.f32 %v13496_v22, %v3995_v62  ;;  %v9576_v55 = vpop.f32.mrb[41].mxu0 }
0x4b85   :  { %9610 = vmatmul.mubr.f32.vlgmr.msra.gmra.mrb[40].mxu1 %v3996_v4 }
0x4b86   :  { %11169 = vmatpush3.bf16.msra.mxu1 %v12484_v21  ;;  %9659 = vmatprep.mubr.msk.f32.mxu1 %vm12151_vm0, %v12152_v1 }
0x4b87   :  { %11170 = vmatprep.subr.bf16.mxu1 %v12150_v0 }
0x4b8a   :  { %11172 = vmatpush3.bf16.msra.mxu1 %v12490_v23 }
0x4b8b   :  { %11173 = vmatprep.subr.bf16.mxu1 %v12150_v0 }
0x4b8e   :  { %11175 = vmatpush3.bf16.msra.mxu1 %v12500_v28 }
0x4b8f   :  { %11188 = vmatprep.subr.bf16.mxu1 %v12150_v0 }
0x4c58   :  { %v4065_v63 = vpop.f32.mrb[40].mxu1 }
0x4c59   :  { %v4069_v14 = vsub.f32 %v3996_v4, %v4065_v63  ;;  %v9611_v52 = vpop.f32.mrb[41].mxu1 }
0x4c5b   :  { %v4070_v43 = vmul.f32 %v4069_v14, %v4069_v14 }
0x4c5d   :  { %9645 = vmatmul.mubr.f32.vlgmr.msra.gmra.mrb[42].mxu0 %v4070_v43 }
0x4c5e   :  { %11178 = vmatpush3.bf16.msra.mxu0 %v12520_v45  ;;  %9678 = vmatprep.mubr.msk.f32.mxu0 %vm12151_vm0, %v12152_v1 }
0x4c5f   :  { %11179 = vmatprep.subr.bf16.mxu0 %v12150_v0 }
0x4c62   :  { %11181 = vmatpush3.bf16.msra.mxu0 %v12526_v47 }
0x4c63   :  { %11182 = vmatprep.subr.bf16.mxu0 %v12150_v0 }
0x4c66   :  { %11184 = vmatpush3.bf16.msra.mxu0 %v12536_v54 }
0x4c67   :  { %11185 = vmatprep.subr.bf16.mxu0 %v12150_v0 }
0x4c6a   :  { %11187 = vmatpush3.bf16.msra.mxu0 %v12561_v61 }
0x4c6b   :  { %11200 = vmatprep.subr.bf16.mxu0 %v12150_v0 }
0x4d30   :  { %v4137_v3 = vpop.f32.mrb[42].mxu0 }
0x4d31   :  { %v4138_v12 = vadd.f32 0.001, %v4137_v3  ;;  %v9646_v60 = vpop.f32.mrb[43].mxu0 }
0x4d33   :  { %11878 = vrsqrt.f32 %v4138_v12 }
0x4d3d   :  { %v11879_v50 = vpop.eup %11878 }
0x4d3e   :  { %v4142_v2 = vmul.f32 %v11879_v50, %v4069_v14 }
0x4d40   :  { %v4143_v59 = vmul.f32 %v13520_v57, %v4142_v2 }
0x4d42   :  { %v4144_v7 = vadd.f32 %v13526_v56, %v4143_v59 }
0x4d44   :  { %11880 = vtanh.f32 %v4144_v7  ;;  %v7688_v44 = vmul.f32 -1.442695, %v4144_v7 }
0x4d46   :  { %11882 = vpow2.f32 %v7688_v44 }
0x4d4e   :  { %v11881_v25 = vpop.eup %11880 }
0x4d4f   :  { %4154 = vrot.lane.b32.xlu0 %v11881_v25, %s12153_s8 }
0x4d50   :  { %v11883_v40 = vpop.eup %11882 }
0x4d51   :  { %v4148_v11 = vadd.f32 1.0, %v11883_v40 }
0x4d53   :  { %11884 = vrcp.f32 %v4148_v11 }
0x4d5d   :  { %v11885_v35 = vpop.eup %11884 }
0x4d5e   :  { %v4152_v62 = vmul.f32 %v11885_v35, %v13533_v41 }
0x4dc1   :  { %v4155_v34 = vpop.permute.xlu0 %4154 }
0x4dc2   :  { %v4157_v58 = vmul.f32 %v11885_v35, %v4155_v34 }
0x4dc4   :  { %4159 = vrot.lane.b32.xlu1 %v4157_v58, %s12154_s2  ;;  %v4193_v58 = vmul.f32 0.1, %v13451_v53 }
0x4e36   :  { %v4160_v4 = vpop.permute.xlu1 %4159 }
0x4e37   :  { %v13536_v55 = vadd.f32 %v4160_v4, %v4152_v62  ;;  %v13565_v4 = vld [vmem:[#allocation4] ss:$0 sm:$0xff] }
0x4e39   :  { %4164 = vrot.lane.b32.xlu0 %v13536_v55, %s12154_s2 }
0x4eab   :  { %v4165_v63 = vpop.permute.xlu0 %4164 }
0x4eac   :  { %v4167_v14 = vsel %vm472_vm3, %v4165_v63, 0.0 }
0x4ead   :  { %4168 = vadd.xlane.f32.xlu1 %v4167_v14 }
0x4ebe   :  { %4188 = vrot.lane.b32.xlu1 %v11885_v35, %s12153_s8 }
0x4f3a   :  { %v4169_v52 = vpop.xlane.xlu1 %4168 }
0x4f3b   :  { %v4170_v42 = vmul.f32 0.03125, %v4169_v52 }
0x4f3d   :  { %v4171_v31 = vsub.f32 %v13536_v55, %v4170_v42 }
0x4f3e   :  { %v4189_v11 = vpop.permute.xlu1 %4188 }
0x4f3f   :  { %v4172_v43 = vmul.f32 %v4171_v31, %v4171_v31 }
0x4f41   :  { %4174 = vrot.lane.b32.xlu0 %v4172_v43, %s12154_s2 }
0x4fb3   :  { %v4175_v3 = vpop.permute.xlu0 %4174 }
0x4fb4   :  { %v4177_v12 = vsel %vm472_vm3, %v4175_v3, 0.0 }
0x4fb5   :  { %4178 = vadd.xlane.f32.xlu0 %v4177_v12 }
0x5042   :  { %v4179_v60 = vpop.xlane.xlu0 %4178 }
0x5043   :  { %v4180_v50 = vmul.f32 0.03125, %v4179_v60 }
0x5045   :  { %v4181_v2 = vadd.f32 0.001, %v4180_v50 }
0x5047   :  { %11886 = vrsqrt.f32 %v4181_v2 }
0x5051   :  { %v11887_v59 = vpop.eup %11886 }
0x5052   :  { %v4183_v7 = vmul.f32 %v11887_v59, %v4171_v31  ;;  %v13596_v59 = vld [vmem:[#allocation4 + $0x1] ss:$0 sm:$0xff] }
0x5054   :  { %v4184_v25 = vmul.f32 %v4183_v7, %v12505_v38 }
0x5056   :  { %v4185_v44 = vadd.f32 %v4184_v25, %v12507_v39  ;;  %v13599_v25 = vld [vmem:[#allocation4 + $0x2] ss:$0 sm:$0xff] }
0x5058   :  { %11888 = vtanh.f32 %v4185_v44 }
0x5062   :  { %v11889_v40 = vpop.eup %11888 }
0x5063   :  { %v4191_v35 = vmul.f32 %v11889_v40, %v4189_v11 }
0x5065   :  { %v4192_v34 = vmul.f32 0.9, %v4191_v35 }
0x5067   :  { %v13548_v49 = vadd.f32 %v4193_v58, %v4192_v34 }
0x5069   :  { %4199 = vrot.lane.b32.xlu0 %v13548_v49, %s12154_s2 }
0x50db   :  { %v4200_v37 = vpop.permute.xlu0 %4199 }
0x50dc   :  { %v4202_v62 = vsel %vm472_vm3, %v4200_v37, %v13381_v16 }
0x50dd   :  { %9660 = vmatmul.mubr.msk.f32.vlgmr.msra.gmra.mrb[42].mxu1 %vm230_vm2, %v4202_v62 }
0x50de   :  { %11190 = vmatpush3.bf16.msra.mxu1 %v12520_v45  ;;  %9697 = vmatprep.mubr.msk.f32.mxu1 %vm12151_vm0, %v12152_v1 }
0x50df   :  { %11191 = vmatprep.subr.bf16.mxu1 %v12150_v0 }
0x50e2   :  { %11193 = vmatpush3.bf16.msra.mxu1 %v12526_v47 }
0x50e3   :  { %11194 = vmatprep.subr.bf16.mxu1 %v12150_v0 }
0x50e6   :  { %11196 = vmatpush3.bf16.msra.mxu1 %v12536_v54 }
0x50e7   :  { %11197 = vmatprep.subr.bf16.mxu1 %v12150_v0 }
0x50ea   :  { %11199 = vmatpush3.bf16.msra.mxu1 %v12561_v61 }
0x50eb   :  { %11209 = vmatprep.subr.bf16.mxu1 %v12150_v0 }
0x51b0   :  { %v4272_v53 = vpop.f32.mrb[42].mxu1 }
0x51b1   :  { %v4273_v63 = vadd.f32 %v13565_v4, %v4272_v53  ;;  %v9661_v14 = vpop.f32.mrb[43].mxu1  ;;  %v3560_v53 = vmul.f32 0.5, %v13367_v17 }
0x51b3   :  { %9679 = vmatmul.mubr.msk.f32.vlgmr.msra.gmra.mrb[44].mxu0 %vm589_vm4, %v4273_v63 }
0x51b4   :  { %11202 = vmatpush3.bf16.msra.mxu0 %v12628_v6  ;;  %9712 = vmatprep.mubr.msk.f32.mxu0 %vm12151_vm0, %v12152_v1 }
0x51b5   :  { %11203 = vmatprep.subr.bf16.mxu0 %v12150_v0 }
0x51b8   :  { %11205 = vmatpush3.bf16.msra.mxu0 %v12634_v8 }
0x51b9   :  { %11206 = vmatprep.subr.bf16.mxu0 %v12150_v0 }
0x51bc   :  { %11208 = vmatpush3.bf16.msra.mxu0 %v12644_v13 }
0x51bd   :  { %11233 = vmatprep.subr.bf16.mxu0 %v12150_v0 }
0x5286   :  { %v4345_v52 = vpop.f32.mrb[44].mxu0 }
0x5287   :  { %v4349_v42 = vsub.f32 %v4273_v63, %v4345_v52  ;;  %v9680_v31 = vpop.f32.mrb[45].mxu0  ;;  %v3561_v63 = vmul.f32 0.5, %v13364_v51 }
0x5289   :  { %v4350_v43 = vmul.f32 %v4349_v42, %v4349_v42  ;;  %v13606_v14 = vadd.f32 %v3561_v63, %v3560_v53 }
0x528b   :  { %9698 = vmatmul.mubr.msk.f32.vlgmr.msra.gmra.mrb[44].mxu1 %vm589_vm4, %v4350_v43 }
0x528c   :  { %11211 = vmatpush3.bf16.msra.mxu1 %v12330_v10  ;;  %9747 = vmatprep.mubr.msk.f32.mxu1 %vm12151_vm0, %v12152_v1 }
0x528d   :  { %11212 = vmatprep.subr.bf16.mxu1 %v12150_v0 }
0x5290   :  { %11214 = vmatpush3.bf16.msra.mxu1 %v12346_v15 }
0x5291   :  { %11215 = vmatprep.subr.bf16.mxu1 %v12150_v0 }
0x5294   :  { %11217 = vmatpush3.bf16.msra.mxu1 %v12363_v20 }
0x5295   :  { %11218 = vmatprep.subr.bf16.mxu1 %v12150_v0 }
0x5298   :  { %11220 = vmatpush3.bf16.msra.mxu1 %v12376_v24 }
0x5299   :  { %11221 = vmatprep.subr.bf16.mxu1 %v12150_v0 }
0x529c   :  { %11223 = vmatpush3.bf16.msra.mxu1 %v12391_v27 }
0x529d   :  { %11224 = vmatprep.subr.bf16.mxu1 %v12150_v0 }
0x52a0   :  { %11226 = vmatpush3.bf16.msra.mxu1 %v12403_v30 }
0x52a1   :  { %11227 = vmatprep.subr.bf16.mxu1 %v12150_v0 }
0x52a4   :  { %11229 = vmatpush3.bf16.msra.mxu1 %v12415_v33 }
0x52a5   :  { %11230 = vmatprep.subr.bf16.mxu1 %v12150_v0 }
0x52a8   :  { %11232 = vmatpush3.bf16.msra.mxu1 %v12434_v36 }
0x52a9   :  { %11257 = vmatprep.subr.bf16.mxu1 %v12150_v0 }
0x535e   :  { %v4420_v3 = vpop.f32.mrb[44].mxu1 }
0x535f   :  { %v4421_v12 = vadd.f32 0.001, %v4420_v3  ;;  %v9699_v60 = vpop.f32.mrb[45].mxu1 }
0x5361   :  { %11890 = vrsqrt.f32 %v4421_v12 }
0x536b   :  { %v11891_v50 = vpop.eup %11890 }
0x536c   :  { %v4425_v2 = vmul.f32 %v11891_v50, %v4349_v42 }
0x536e   :  { %v4426_v7 = vmul.f32 %v13596_v59, %v4425_v2 }
0x5370   :  { %v4427_v44 = vadd.f32 %v13599_v25, %v4426_v7 }
0x5372   :  { %11892 = vtanh.f32 %v4427_v44  ;;  %v7692_v11 = vmul.f32 -1.442695, %v4427_v44 }
0x5374   :  { %11894 = vpow2.f32 %v7692_v11 }
0x537c   :  { %v11893_v40 = vpop.eup %11892 }
0x537d   :  { %4437 = vrot.lane.b32.xlu1 %v11893_v40, %s12155_s11 }
0x537e   :  { %v11895_v35 = vpop.eup %11894 }
0x537f   :  { %v4431_v34 = vadd.f32 1.0, %v11895_v35 }
0x5381   :  { %11896 = vrcp.f32 %v4431_v34 }
0x538b   :  { %v11897_v58 = vpop.eup %11896 }
0x538c   :  { %v4435_v52 = vmul.f32 %v11897_v58, %v13606_v14 }
0x53ef   :  { %v4438_v37 = vpop.permute.xlu1 %4437 }
0x53f0   :  { %v4440_v62 = vmul.f32 %v11897_v58, %v4438_v37 }
0x53f2   :  { %4442 = vrot.lane.b32.xlu1 %v4440_v62, %s12156_s22 }
0x5464   :  { %v4443_v42 = vpop.permute.xlu1 %4442 }
0x5465   :  { %v13609_v31 = vadd.f32 %v4443_v42, %v4435_v52  ;;  %v4476_v52 = vmul.f32 0.1, %v13381_v16 }
0x5467   :  { %4447 = vrot.lane.b32.xlu0 %v13609_v31, %s12153_s8 }
0x54d9   :  { %v4448_v43 = vpop.permute.xlu0 %4447 }
0x54da   :  { %v4450_v3 = vsel %vm228_vm1, %v4448_v43, 0.0 }
0x54db   :  { %4451 = vadd.xlane.f32.xlu1 %v4450_v3 }
0x54ec   :  { %4471 = vrot.lane.b32.xlu1 %v11897_v58, %s12155_s11 }
0x54f0   :  { %4485 = vrot.lane.b32.xlu1 %v13548_v49, %s12157_s27 }
0x5568   :  { %v4452_v51 = vpop.xlane.xlu1 %4451 }
0x5569   :  { %v4453_v17 = vmul.f32 0.0625, %v4452_v51 }
0x556b   :  { %v4454_v12 = vsub.f32 %v13609_v31, %v4453_v17  ;;  %v13647_v17 = vld [vmem:[#allocation6] ss:$0 sm:$0xff] }
0x556c   :  { %v4472_v62 = vpop.permute.xlu1 %4471 }
0x556d   :  { %v4455_v60 = vmul.f32 %v4454_v12, %v4454_v12 }
0x556f   :  { %4457 = vrot.lane.b32.xlu0 %v4455_v60, %s12153_s8 }
0x5570   :  { %v4486_v43 = vpop.permute.xlu1 %4485 }
0x55e1   :  { %v4458_v50 = vpop.permute.xlu0 %4457 }
0x55e2   :  { %v4460_v2 = vsel %vm228_vm1, %v4458_v50, 0.0 }
0x55e3   :  { %4461 = vadd.xlane.f32.xlu0 %v4460_v2 }
0x5670   :  { %v4462_v7 = vpop.xlane.xlu0 %4461 }
0x5671   :  { %v4463_v44 = vmul.f32 0.0625, %v4462_v7 }
0x5673   :  { %v4464_v40 = vadd.f32 0.001, %v4463_v44 }
0x5675   :  { %11898 = vrsqrt.f32 %v4464_v40 }
0x567f   :  { %v11899_v11 = vpop.eup %11898 }
0x5680   :  { %v4466_v35 = vmul.f32 %v11899_v11, %v4454_v12 }
0x5682   :  { %v4467_v34 = vmul.f32 %v4466_v35, %v12649_v29 }
0x5684   :  { %v4468_v58 = vadd.f32 %v4467_v34, %v12652_v32 }
0x5686   :  { %11900 = vtanh.f32 %v4468_v58 }
0x5690   :  { %v11901_v37 = vpop.eup %11900 }
0x5691   :  { %v4474_v53 = vmul.f32 %v11901_v37, %v4472_v62  ;;  %v13674_v37 = vld [vmem:[#allocation6 + $0x1] ss:$0 sm:$0xff] }
0x5693   :  { %v4475_v63 = vmul.f32 0.9, %v4474_v53  ;;  %v13677_v53 = vld [vmem:[#allocation6 + $0x2] ss:$0 sm:$0xff] }
0x5695   :  { %v13623_v42 = vadd.f32 %v4476_v52, %v4475_v63 }
0x5697   :  { %4482 = vrot.lane.b32.xlu0 %v13623_v42, %s12153_s8 }
0x5709   :  { %v4483_v3 = vpop.permute.xlu0 %4482 }
0x570a   :  { %v4488_v51 = vsel %vm228_vm1, %v4483_v3, %v4486_v43 }
0x570b   :  { %9713 = vmatmul.mubr.msk.f32.vlgmr.msra.gmra.mrb[46].mxu0 %vm230_vm2, %v4488_v51 }
0x570c   :  { %11235 = vmatpush3.bf16.msra.mxu0 %v12330_v10  ;;  %9782 = vmatprep.mubr.msk.f32.mxu0 %vm12151_vm0, %v12152_v1 }
0x570d   :  { %11236 = vmatprep.subr.bf16.mxu0 %v12150_v0 }
0x5710   :  { %11238 = vmatpush3.bf16.msra.mxu0 %v12346_v15 }
0x5711   :  { %11239 = vmatprep.subr.bf16.mxu0 %v12150_v0 }
0x5714   :  { %11241 = vmatpush3.bf16.msra.mxu0 %v12363_v20 }
0x5715   :  { %11242 = vmatprep.subr.bf16.mxu0 %v12150_v0 }
0x5718   :  { %11244 = vmatpush3.bf16.msra.mxu0 %v12376_v24 }
0x5719   :  { %11245 = vmatprep.subr.bf16.mxu0 %v12150_v0 }
0x571c   :  { %11247 = vmatpush3.bf16.msra.mxu0 %v12391_v27 }
0x571d   :  { %11248 = vmatprep.subr.bf16.mxu0 %v12150_v0 }
0x5720   :  { %11250 = vmatpush3.bf16.msra.mxu0 %v12403_v30 }
0x5721   :  { %11251 = vmatprep.subr.bf16.mxu0 %v12150_v0 }
0x5724   :  { %11253 = vmatpush3.bf16.msra.mxu0 %v12415_v33 }
0x5725   :  { %11254 = vmatprep.subr.bf16.mxu0 %v12150_v0 }
0x5728   :  { %11256 = vmatpush3.bf16.msra.mxu0 %v12434_v36 }
0x5729   :  { %11272 = vmatprep.subr.bf16.mxu0 %v12150_v0 }
0x57de   :  { %v4558_v16 = vpop.f32.mrb[46].mxu0 }
0x57df   :  { %v4559_v12 = vadd.f32 %v13647_v17, %v4558_v16  ;;  %v9714_v60 = vpop.f32.mrb[47].mxu0 }
0x57e1   :  { %9748 = vmatmul.mubr.f32.vlgmr.msra.gmra.mrb[46].mxu1 %v4559_v12 }
0x57e2   :  { %11259 = vmatpush3.bf16.msra.mxu1 %v12734_v19  ;;  %9793 = vmatprep.mubr.msk.f32.mxu1 %vm12151_vm0, %v12152_v1 }
0x57e3   :  { %11260 = vmatprep.subr.bf16.mxu1 %v12150_v0 }
0x57e6   :  { %11262 = vmatpush3.bf16.msra.mxu1 %v12740_v26 }
0x57e7   :  { %11263 = vmatprep.subr.bf16.mxu1 %v12150_v0 }
0x58b4   :  { %v4628_v50 = vpop.f32.mrb[46].mxu1 }
0x58b5   :  { %v4632_v2 = vsub.f32 %v4559_v12, %v4628_v50  ;;  %v9749_v7 = vpop.f32.mrb[47].mxu1  ;;  %v4195_v50 = vmul.f32 0.5, %v13536_v55 }
0x58b7   :  { %v4633_v44 = vmul.f32 %v4632_v2, %v4632_v2 }
0x58b9   :  { %9783 = vmatmul.mubr.f32.vlgmr.msra.gmra.mrb[48].mxu0 %v4633_v44 }
0x58ba   :  { %11274 = vmatpush3.bf16.msra.mxu0 %v12330_v10  ;;  %9843 = vmatprep.mubr.msk.f32.mxu0 %vm12151_vm0, %v12152_v1 }
0x58bb   :  { %11275 = vmatprep.subr.bf16.mxu0 %v12150_v0 }
0x58be   :  { %11277 = vmatpush3.bf16.msra.mxu0 %v12346_v15 }
0x58bf   :  { %11278 = vmatprep.subr.bf16.mxu0 %v12150_v0 }
0x58c2   :  { %11280 = vmatpush3.bf16.msra.mxu0 %v12363_v20 }
0x58c3   :  { %11281 = vmatprep.subr.bf16.mxu0 %v12150_v0 }
0x58c6   :  { %11283 = vmatpush3.bf16.msra.mxu0 %v12376_v24 }
0x58c7   :  { %11284 = vmatprep.subr.bf16.mxu0 %v12150_v0 }
0x58ca   :  { %11286 = vmatpush3.bf16.msra.mxu0 %v12391_v27 }
0x58cb   :  { %11287 = vmatprep.subr.bf16.mxu0 %v12150_v0 }
0x58ce   :  { %11289 = vmatpush3.bf16.msra.mxu0 %v12403_v30 }
0x58cf   :  { %11290 = vmatprep.subr.bf16.mxu0 %v12150_v0 }
0x58d2   :  { %11292 = vmatpush3.bf16.msra.mxu0 %v12415_v33 }
0x58d3   :  { %11293 = vmatprep.subr.bf16.mxu0 %v12150_v0 }
0x58d6   :  { %11295 = vmatpush3.bf16.msra.mxu0 %v12434_v36 }
0x58d7   :  { %11320 = vmatprep.subr.bf16.mxu0 %v12150_v0 }
0x598c   :  { %v4700_v40 = vpop.f32.mrb[48].mxu0 }
0x598d   :  { %v4701_v11 = vadd.f32 0.001, %v4700_v40  ;;  %v9784_v35 = vpop.f32.mrb[49].mxu0 }
0x598f   :  { %11902 = vrsqrt.f32 %v4701_v11 }
0x5999   :  { %v11903_v34 = vpop.eup %11902 }
0x599a   :  { %v4705_v58 = vmul.f32 %v11903_v34, %v4632_v2  ;;  %v4196_v2 = vmul.f32 0.5, %v13533_v41 }
0x599c   :  { %v4706_v62 = vmul.f32 %v13674_v37, %v4705_v58  ;;  %v13684_v7 = vadd.f32 %v4196_v2, %v4195_v50 }
0x599e   :  { %v4707_v63 = vadd.f32 %v13677_v53, %v4706_v62 }
0x59a0   :  { %11904 = vtanh.f32 %v4707_v63  ;;  %v7694_v43 = vmul.f32 -1.442695, %v4707_v63 }
0x59a2   :  { %11906 = vpow2.f32 %v7694_v43 }
0x59aa   :  { %v11905_v52 = vpop.eup %11904 }
0x59ab   :  { %4717 = vrot.lane.b32.xlu1 %v11905_v52, %s12153_s8 }
0x59ac   :  { %v11907_v3 = vpop.eup %11906 }
0x59ad   :  { %v4711_v51 = vadd.f32 1.0, %v11907_v3 }
0x59af   :  { %11908 = vrcp.f32 %v4711_v51 }
0x59b9   :  { %v11909_v16 = vpop.eup %11908 }
0x59ba   :  { %v4715_v44 = vmul.f32 %v11909_v16, %v13684_v7 }
0x5a1d   :  { %v4718_v12 = vpop.permute.xlu1 %4717 }
0x5a1e   :  { %v4720_v60 = vmul.f32 %v11909_v16, %v4718_v12 }
0x5a20   :  { %4722 = vrot.lane.b32.xlu0 %v4720_v60, %s12154_s2 }
0x5a92   :  { %v4723_v40 = vpop.permute.xlu0 %4722 }
0x5a93   :  { %v13687_v11 = vadd.f32 %v4723_v40, %v4715_v44 }
0x5a95   :  { %4727 = vrot.lane.b32.xlu1 %v13687_v11, %s12154_s2 }
0x5b07   :  { %v4728_v35 = vpop.permute.xlu1 %4727 }
0x5b08   :  { %v4730_v34 = vsel %vm472_vm3, %v4728_v35, 0.0 }
0x5b09   :  { %4731 = vadd.xlane.f32.xlu0 %v4730_v34  ;;  %v4756_v34 = vmul.f32 0.1, %v13548_v49  ;;  %v7697_v49 = vld [vmem:[%s14421_s20 + $0x28] sm:$0xff] }
0x5b1f   :  { %4751 = vrot.lane.b32.xlu0 %v11909_v16, %s12153_s8 }
0x5b96   :  { %v4732_v58 = vpop.xlane.xlu0 %4731 }
0x5b97   :  { %v4733_v55 = vmul.f32 0.03125, %v4732_v58 }
0x5b99   :  { %v4734_v41 = vsub.f32 %v13687_v11, %v4733_v55 }
0x5b9a   :  { %v4752_v44 = vpop.permute.xlu0 %4751 }
0x5b9b   :  { %v4735_v62 = vmul.f32 %v4734_v41, %v4734_v41 }
0x5b9d   :  { %4737 = vrot.lane.b32.xlu1 %v4735_v62, %s12154_s2 }
0x5c0f   :  { %v4738_v63 = vpop.permute.xlu1 %4737 }
0x5c10   :  { %v4740_v52 = vsel %vm472_vm3, %v4738_v63, 0.0 }
0x5c11   :  { %4741 = vadd.xlane.f32.xlu1 %v4740_v52  ;;  %v13740_v52 = vld [vmem:[%s14408_s13] ss:$0 sm:$0xff] }
0x5c9e   :  { %v4742_v43 = vpop.xlane.xlu1 %4741 }
0x5c9f   :  { %v4743_v3 = vmul.f32 0.03125, %v4742_v43 }
0x5ca1   :  { %v4744_v51 = vadd.f32 0.001, %v4743_v3 }
0x5ca3   :  { %11910 = vrsqrt.f32 %v4744_v51 }
0x5cad   :  { %v11911_v12 = vpop.eup %11910 }
0x5cae   :  { %v4746_v60 = vmul.f32 %v11911_v12, %v4734_v41 }
0x5cb0   :  { %v4747_v50 = vmul.f32 %v4746_v60, %v12745_v46 }
0x5cb2   :  { %v4748_v16 = vadd.f32 %v4747_v50, %v12747_v48 }
0x5cb4   :  { %11912 = vtanh.f32 %v4748_v16 }
0x5cbe   :  { %v11913_v2 = vpop.eup %11912 }
0x5cbf   :  { %v4754_v40 = vmul.f32 %v11913_v2, %v4752_v44 }
0x5cc1   :  { %v4755_v35 = vmul.f32 0.9, %v4754_v40 }
0x5cc3   :  { %v13699_v58 = vadd.f32 %v4756_v34, %v4755_v35 }
0x5cc5   :  { %4840 = vrot.lane.b32.xlu0 %v13699_v58, %s12157_s27  ;;  %4762 = vrot.lane.b32.xlu1 %v13699_v58, %s12154_s2 }
0x5d37   :  { %v4763_v55 = vpop.permute.xlu1 %4762  ;;  %v4841_v41 = vpop.permute.xlu0 %4840 }
0x5d38   :  { %9794 = vmatmul.mubr.msk.f32.vlgmr.msra.gmra.mrb[48].mxu1 %vm472_vm3, %v4763_v55  ;;  %v4843_v62 = vsel %vm228_vm1, %v7697_v49, %v4841_v41 }
0x5d39   :  { %11265 = vmatpush3.bf16.msra.mxu1 %v12316_v5  ;;  %9808 = vmatprep.mubr.msk.f32.mxu1 %vm12151_vm0, %v12152_v1 }
0x5d3a   :  { %11266 = vmatprep.subr.bf16.mxu1 %v12150_v0 }
0x5d3d   :  { %11268 = vmatpush3.bf16.msra.mxu1 %v12328_v9 }
0x5d3e   :  { %11269 = vmatprep.subr.bf16.mxu1 %v12150_v0 }
0x5d41   :  { %11271 = vmatpush3.bf16.msra.mxu1 %v12356_v18 }
0x5d42   :  { %11296 = vmatprep.subr.bf16.mxu1 %v12150_v0 }
0x5d44   :  { %9809 = vmatmul.mubr.msk.f32.vlgmr.msra.gmra.mrb[50].mxu1 %vm230_vm2, %v4843_v62 }
0x5d45   :  { %11298 = vmatpush3.bf16.msra.mxu1 %v12330_v10  ;;  %9878 = vmatprep.mubr.msk.f32.mxu1 %vm12151_vm0, %v12152_v1 }
0x5d46   :  { %11299 = vmatprep.subr.bf16.mxu1 %v12150_v0 }
0x5d49   :  { %11301 = vmatpush3.bf16.msra.mxu1 %v12346_v15 }
0x5d4a   :  { %11302 = vmatprep.subr.bf16.mxu1 %v12150_v0 }
0x5d4d   :  { %11304 = vmatpush3.bf16.msra.mxu1 %v12363_v20 }
0x5d4e   :  { %11305 = vmatprep.subr.bf16.mxu1 %v12150_v0 }
0x5d51   :  { %11307 = vmatpush3.bf16.msra.mxu1 %v12376_v24 }
0x5d52   :  { %11308 = vmatprep.subr.bf16.mxu1 %v12150_v0 }
0x5d55   :  { %11310 = vmatpush3.bf16.msra.mxu1 %v12391_v27 }
0x5d56   :  { %11311 = vmatprep.subr.bf16.mxu1 %v12150_v0 }
0x5d59   :  { %11313 = vmatpush3.bf16.msra.mxu1 %v12403_v30 }
0x5d5a   :  { %11314 = vmatprep.subr.bf16.mxu1 %v12150_v0 }
0x5d5d   :  { %11316 = vmatpush3.bf16.msra.mxu1 %v12415_v33 }
0x5d5e   :  { %11317 = vmatprep.subr.bf16.mxu1 %v12150_v0 }
0x5d61   :  { %11319 = vmatpush3.bf16.msra.mxu1 %v12434_v36 }
0x5d62   :  { %11329 = vmatprep.subr.bf16.mxu1 %v12150_v0 }
0x5e0b   :  { %v4832_v63 = vpop.f32.mrb[48].mxu1 }
0x5e0c   :  { %v4833_v43 = vadd.f32 %v13740_v52, %v4832_v63  ;;  %v9795_v3 = vpop.f32.mrb[49].mxu1 }
0x5e0e   :  { %7696 = vst [vmem:[%s14409_s14 + $0x20] sm:$0xff] %v4833_v43 }
0x5e17   :  { %v4913_v51 = vpop.f32.mrb[50].mxu1 }
0x5e18   :  { %v4914_v12 = vadd.f32 %v13496_v22, %v4913_v51  ;;  %v9810_v60 = vpop.f32.mrb[51].mxu1 }
0x5e1a   :  { %9844 = vmatmul.mubr.f32.vlgmr.msra.gmra.mrb[50].mxu0 %v4914_v12 }
0x5e1b   :  { %11322 = vmatpush3.bf16.msra.mxu0 %v12484_v21  ;;  %9893 = vmatprep.mubr.msk.f32.mxu0 %vm12151_vm0, %v12152_v1 }
0x5e1c   :  { %11323 = vmatprep.subr.bf16.mxu0 %v12150_v0 }
0x5e1f   :  { %11325 = vmatpush3.bf16.msra.mxu0 %v12490_v23 }
0x5e20   :  { %11326 = vmatprep.subr.bf16.mxu0 %v12150_v0 }
0x5e23   :  { %11328 = vmatpush3.bf16.msra.mxu0 %v12500_v28 }
0x5e24   :  { %11341 = vmatprep.subr.bf16.mxu0 %v12150_v0 }
0x5eed   :  { %v4983_v50 = vpop.f32.mrb[50].mxu0 }
0x5eee   :  { %v4987_v16 = vsub.f32 %v4914_v12, %v4983_v50  ;;  %v9845_v22 = vpop.f32.mrb[51].mxu0  ;;  %v4758_v50 = vmul.f32 0.5, %v13687_v11 }
0x5ef0   :  { %v4988_v2 = vmul.f32 %v4987_v16, %v4987_v16 }
0x5ef2   :  { %9879 = vmatmul.mubr.f32.vlgmr.msra.gmra.mrb[52].mxu1 %v4988_v2 }
0x5ef3   :  { %11331 = vmatpush3.bf16.msra.mxu1 %v12520_v45  ;;  %9912 = vmatprep.mubr.msk.f32.mxu1 %vm12151_vm0, %v12152_v1 }
0x5ef4   :  { %11332 = vmatprep.subr.bf16.mxu1 %v12150_v0 }
0x5ef7   :  { %11334 = vmatpush3.bf16.msra.mxu1 %v12526_v47 }
0x5ef8   :  { %11335 = vmatprep.subr.bf16.mxu1 %v12150_v0 }
0x5efb   :  { %11337 = vmatpush3.bf16.msra.mxu1 %v12536_v54 }
0x5efc   :  { %11338 = vmatprep.subr.bf16.mxu1 %v12150_v0 }
0x5eff   :  { %11340 = vmatpush3.bf16.msra.mxu1 %v12561_v61 }
0x5f00   :  { %11353 = vmatprep.subr.bf16.mxu1 %v12150_v0 }
0x5fc5   :  { %v5055_v44 = vpop.f32.mrb[52].mxu1 }
0x5fc6   :  { %v5056_v40 = vadd.f32 0.001, %v5055_v44  ;;  %v9880_v35 = vpop.f32.mrb[53].mxu1 }
0x5fc8   :  { %11914 = vrsqrt.f32 %v5056_v40 }
0x5fd2   :  { %v11915_v34 = vpop.eup %11914 }
0x5fd3   :  { %v5060_v55 = vmul.f32 %v11915_v34, %v4987_v16 }
0x5fd5   :  { %v5061_v49 = vmul.f32 %v13520_v57, %v5060_v55  ;;  %v4759_v57 = vmul.f32 0.5, %v13684_v7 }
0x5fd7   :  { %v5062_v41 = vadd.f32 %v13526_v56, %v5061_v49  ;;  %v13771_v16 = vadd.f32 %v4759_v57, %v4758_v50 }
0x5fd9   :  { %11916 = vtanh.f32 %v5062_v41  ;;  %v7699_v63 = vmul.f32 -1.442695, %v5062_v41 }
0x5fdb   :  { %11918 = vpow2.f32 %v7699_v63 }
0x5fe3   :  { %v11917_v62 = vpop.eup %11916 }
0x5fe4   :  { %5072 = vrot.lane.b32.xlu0 %v11917_v62, %s12153_s8 }
0x5fe5   :  { %v11919_v43 = vpop.eup %11918 }
0x5fe6   :  { %v5066_v3 = vadd.f32 1.0, %v11919_v43 }
0x5fe8   :  { %11920 = vrcp.f32 %v5066_v3 }
0x5ff2   :  { %v11921_v51 = vpop.eup %11920 }
0x5ff3   :  { %v5070_v56 = vmul.f32 %v11921_v51, %v13771_v16 }
0x6056   :  { %v5073_v12 = vpop.permute.xlu0 %5072 }
0x6057   :  { %v5075_v60 = vmul.f32 %v11921_v51, %v5073_v12 }
0x6059   :  { %5077 = vrot.lane.b32.xlu1 %v5075_v60, %s12154_s2 }
0x60cb   :  { %v5078_v22 = vpop.permute.xlu1 %5077 }
0x60cc   :  { %v13774_v2 = vadd.f32 %v5078_v22, %v5070_v56  ;;  %v5111_v22 = vmul.f32 0.1, %v13699_v58 }
0x60ce   :  { %5082 = vrot.lane.b32.xlu0 %v13774_v2, %s12154_s2 }
0x6140   :  { %v5083_v44 = vpop.permute.xlu0 %5082 }
0x6141   :  { %v5085_v40 = vsel %vm472_vm3, %v5083_v44, 0.0 }
0x6142   :  { %5086 = vadd.xlane.f32.xlu1 %v5085_v40 }
0x6153   :  { %5106 = vrot.lane.b32.xlu1 %v11921_v51, %s12153_s8 }
0x61cf   :  { %v5087_v35 = vpop.xlane.xlu1 %5086 }
0x61d0   :  { %v5088_v11 = vmul.f32 0.03125, %v5087_v35 }
0x61d2   :  { %v5089_v7 = vsub.f32 %v13774_v2, %v5088_v11 }
0x61d3   :  { %v5107_v50 = vpop.permute.xlu1 %5106 }
0x61d4   :  { %v5090_v34 = vmul.f32 %v5089_v7, %v5089_v7 }
0x61d6   :  { %5092 = vrot.lane.b32.xlu0 %v5090_v34, %s12154_s2 }
0x6248   :  { %v5093_v55 = vpop.permute.xlu0 %5092 }
0x6249   :  { %v5095_v49 = vsel %vm472_vm3, %v5093_v55, 0.0 }
0x624a   :  { %5096 = vadd.xlane.f32.xlu0 %v5095_v49 }
0x62d7   :  { %v5097_v41 = vpop.xlane.xlu0 %5096 }
0x62d8   :  { %v5098_v62 = vmul.f32 0.03125, %v5097_v41 }
0x62da   :  { %v5099_v63 = vadd.f32 0.001, %v5098_v62 }
0x62dc   :  { %11922 = vrsqrt.f32 %v5099_v63 }
0x62e6   :  { %v11923_v43 = vpop.eup %11922 }
0x62e7   :  { %v5101_v3 = vmul.f32 %v11923_v43, %v5089_v7 }
0x62e9   :  { %v5102_v12 = vmul.f32 %v5101_v3, %v12505_v38 }
0x62eb   :  { %v5103_v51 = vadd.f32 %v5102_v12, %v12507_v39 }
0x62ed   :  { %11924 = vtanh.f32 %v5103_v51 }
0x62f7   :  { %v11925_v60 = vpop.eup %11924 }
0x62f8   :  { %v5109_v57 = vmul.f32 %v11925_v60, %v5107_v50 }
0x62fa   :  { %v5110_v56 = vmul.f32 0.9, %v5109_v57 }
0x62fc   :  { %v13786_v44 = vadd.f32 %v5111_v22, %v5110_v56 }
0x62fe   :  { %5117 = vrot.lane.b32.xlu0 %v13786_v44, %s12154_s2 }
0x6370   :  { %v5118_v40 = vpop.permute.xlu0 %5117 }
0x6371   :  { %v5120_v35 = vsel %vm472_vm3, %v5118_v40, %v13623_v42 }
0x6372   :  { %9894 = vmatmul.mubr.msk.f32.vlgmr.msra.gmra.mrb[52].mxu0 %vm230_vm2, %v5120_v35 }
0x6373   :  { %11343 = vmatpush3.bf16.msra.mxu0 %v12520_v45  ;;  %9931 = vmatprep.mubr.msk.f32.mxu0 %vm12151_vm0, %v12152_v1 }
0x6374   :  { %11344 = vmatprep.subr.bf16.mxu0 %v12150_v0 }
0x6377   :  { %11346 = vmatpush3.bf16.msra.mxu0 %v12526_v47 }
0x6378   :  { %11347 = vmatprep.subr.bf16.mxu0 %v12150_v0 }
0x637b   :  { %11349 = vmatpush3.bf16.msra.mxu0 %v12536_v54 }
0x637c   :  { %11350 = vmatprep.subr.bf16.mxu0 %v12150_v0 }
0x637f   :  { %11352 = vmatpush3.bf16.msra.mxu0 %v12561_v61 }
0x6380   :  { %11362 = vmatprep.subr.bf16.mxu0 %v12150_v0 }
0x6445   :  { %v5190_v58 = vpop.f32.mrb[52].mxu0 }
0x6446   :  { %v5191_v11 = vadd.f32 %v13565_v4, %v5190_v58  ;;  %v9895_v7 = vpop.f32.mrb[53].mxu0  ;;  %v4478_v58 = vmul.f32 0.5, %v13609_v31 }
0x6448   :  { %9913 = vmatmul.mubr.msk.f32.vlgmr.msra.gmra.mrb[54].mxu1 %vm589_vm4, %v5191_v11 }
0x6449   :  { %11355 = vmatpush3.bf16.msra.mxu1 %v12628_v6  ;;  %9946 = vmatprep.mubr.msk.f32.mxu1 %vm12151_vm0, %v12152_v1 }
0x644a   :  { %11356 = vmatprep.subr.bf16.mxu1 %v12150_v0 }
0x644d   :  { %11358 = vmatpush3.bf16.msra.mxu1 %v12634_v8 }
0x644e   :  { %11359 = vmatprep.subr.bf16.mxu1 %v12150_v0 }
0x6451   :  { %11361 = vmatpush3.bf16.msra.mxu1 %v12644_v13 }
0x6452   :  { %11386 = vmatprep.subr.bf16.mxu1 %v12150_v0 }
0x651b   :  { %v5263_v34 = vpop.f32.mrb[54].mxu1 }
0x651c   :  { %v5267_v4 = vsub.f32 %v5191_v11, %v5263_v34  ;;  %v9914_v55 = vpop.f32.mrb[55].mxu1 }
0x651e   :  { %v5268_v49 = vmul.f32 %v5267_v4, %v5267_v4 }
0x6520   :  { %9932 = vmatmul.mubr.msk.f32.vlgmr.msra.gmra.mrb[54].mxu0 %vm589_vm4, %v5268_v49 }
0x6521   :  { %11364 = vmatpush3.bf16.msra.mxu0 %v12330_v10  ;;  %9981 = vmatprep.mubr.msk.f32.mxu0 %vm12151_vm0, %v12152_v1 }
0x6522   :  { %11365 = vmatprep.subr.bf16.mxu0 %v12150_v0 }
0x6525   :  { %11367 = vmatpush3.bf16.msra.mxu0 %v12346_v15 }
0x6526   :  { %11368 = vmatprep.subr.bf16.mxu0 %v12150_v0 }
0x6529   :  { %11370 = vmatpush3.bf16.msra.mxu0 %v12363_v20 }
0x652a   :  { %11371 = vmatprep.subr.bf16.mxu0 %v12150_v0 }
0x652d   :  { %11373 = vmatpush3.bf16.msra.mxu0 %v12376_v24 }
0x652e   :  { %11374 = vmatprep.subr.bf16.mxu0 %v12150_v0 }
0x6531   :  { %11376 = vmatpush3.bf16.msra.mxu0 %v12391_v27 }
0x6532   :  { %11377 = vmatprep.subr.bf16.mxu0 %v12150_v0 }
0x6535   :  { %11379 = vmatpush3.bf16.msra.mxu0 %v12403_v30 }
0x6536   :  { %11380 = vmatprep.subr.bf16.mxu0 %v12150_v0 }
0x6539   :  { %11382 = vmatpush3.bf16.msra.mxu0 %v12415_v33 }
0x653a   :  { %11383 = vmatprep.subr.bf16.mxu0 %v12150_v0 }
0x653d   :  { %11385 = vmatpush3.bf16.msra.mxu0 %v12434_v36 }
0x653e   :  { %11410 = vmatprep.subr.bf16.mxu0 %v12150_v0 }
0x65f3   :  { %v5338_v41 = vpop.f32.mrb[54].mxu0 }
0x65f4   :  { %v5339_v62 = vadd.f32 0.001, %v5338_v41  ;;  %v9933_v63 = vpop.f32.mrb[55].mxu0 }
0x65f6   :  { %11926 = vrsqrt.f32 %v5339_v62 }
0x6600   :  { %v11927_v43 = vpop.eup %11926 }
0x6601   :  { %v5343_v3 = vmul.f32 %v11927_v43, %v5267_v4 }
0x6603   :  { %v5344_v12 = vmul.f32 %v13596_v59, %v5343_v3  ;;  %v4479_v59 = vmul.f32 0.5, %v13606_v14 }
0x6605   :  { %v5345_v51 = vadd.f32 %v13599_v25, %v5344_v12  ;;  %v13838_v11 = vadd.f32 %v4479_v59, %v4478_v58  ;;  %v5394_v58 = vmul.f32 0.1, %v13623_v42 }
0x6607   :  { %11928 = vtanh.f32 %v5345_v51  ;;  %v7703_v50 = vmul.f32 -1.442695, %v5345_v51 }
0x6609   :  { %11930 = vpow2.f32 %v7703_v50 }
0x6611   :  { %v11929_v60 = vpop.eup %11928 }
0x6612   :  { %5355 = vrot.lane.b32.xlu1 %v11929_v60, %s12155_s11 }
0x6613   :  { %v11931_v57 = vpop.eup %11930 }
0x6614   :  { %v5349_v56 = vadd.f32 1.0, %v11931_v57 }
0x6616   :  { %11932 = vrcp.f32 %v5349_v56 }
0x6620   :  { %v11933_v22 = vpop.eup %11932 }
0x6621   :  { %v5353_v25 = vmul.f32 %v11933_v22, %v13838_v11 }
0x6684   :  { %v5356_v40 = vpop.permute.xlu1 %5355 }
0x6685   :  { %v5358_v35 = vmul.f32 %v11933_v22, %v5356_v40 }
0x6687   :  { %5360 = vrot.lane.b32.xlu1 %v5358_v35, %s12156_s22 }
0x66f9   :  { %v5361_v7 = vpop.permute.xlu1 %5360 }
0x66fa   :  { %v13841_v34 = vadd.f32 %v5361_v7, %v5353_v25 }
0x66fc   :  { %5365 = vrot.lane.b32.xlu0 %v13841_v34, %s12153_s8 }
0x676e   :  { %v5366_v4 = vpop.permute.xlu0 %5365 }
0x676f   :  { %v5368_v55 = vsel %vm228_vm1, %v5366_v4, 0.0 }
0x6770   :  { %5369 = vadd.xlane.f32.xlu1 %v5368_v55 }
0x6781   :  { %5389 = vrot.lane.b32.xlu1 %v11933_v22, %s12155_s11 }
0x6785   :  { %5403 = vrot.lane.b32.xlu1 %v13786_v44, %s12157_s27 }
0x67fd   :  { %v5370_v14 = vpop.xlane.xlu1 %5369 }
0x67fe   :  { %v5371_v31 = vmul.f32 0.0625, %v5370_v14 }
0x6800   :  { %v5372_v49 = vsub.f32 %v13841_v34, %v5371_v31 }
0x6801   :  { %v5390_v22 = vpop.permute.xlu1 %5389 }
0x6802   :  { %v5373_v41 = vmul.f32 %v5372_v49, %v5372_v49 }
0x6804   :  { %5375 = vrot.lane.b32.xlu0 %v5373_v41, %s12153_s8 }
0x6805   :  { %v5404_v25 = vpop.permute.xlu1 %5403 }
0x6876   :  { %v5376_v62 = vpop.permute.xlu0 %5375 }
0x6877   :  { %v5378_v63 = vsel %vm228_vm1, %v5376_v62, 0.0 }
0x6878   :  { %5379 = vadd.xlane.f32.xlu0 %v5378_v63 }
0x6905   :  { %v5380_v43 = vpop.xlane.xlu0 %5379 }
0x6906   :  { %v5381_v3 = vmul.f32 0.0625, %v5380_v43 }
0x6908   :  { %v5382_v12 = vadd.f32 0.001, %v5381_v3 }
0x690a   :  { %11934 = vrsqrt.f32 %v5382_v12 }
0x6914   :  { %v11935_v51 = vpop.eup %11934 }
0x6915   :  { %v5384_v60 = vmul.f32 %v11935_v51, %v5372_v49 }
0x6917   :  { %v5385_v50 = vmul.f32 %v5384_v60, %v12649_v29 }
0x6919   :  { %v5386_v57 = vadd.f32 %v5385_v50, %v12652_v32 }
0x691b   :  { %11936 = vtanh.f32 %v5386_v57 }
0x6925   :  { %v11937_v56 = vpop.eup %11936 }
0x6926   :  { %v5392_v40 = vmul.f32 %v11937_v56, %v5390_v22 }
0x6928   :  { %v5393_v35 = vmul.f32 0.9, %v5392_v40 }
0x692a   :  { %v13855_v59 = vadd.f32 %v5394_v58, %v5393_v35 }
0x692c   :  { %5400 = vrot.lane.b32.xlu0 %v13855_v59, %s12153_s8 }
0x699e   :  { %v5401_v7 = vpop.permute.xlu0 %5400 }
0x699f   :  { %v5406_v4 = vsel %vm228_vm1, %v5401_v7, %v5404_v25  ;;  %v5113_v25 = vmul.f32 0.5, %v13774_v2 }
0x69a0   :  { %9947 = vmatmul.mubr.msk.f32.vlgmr.msra.gmra.mrb[56].mxu1 %vm230_vm2, %v5406_v4 }
0x69a1   :  { %11388 = vmatpush3.bf16.msra.mxu1 %v12330_v10  ;;  %10016 = vmatprep.mubr.msk.f32.mxu1 %vm12151_vm0, %v12152_v1 }
0x69a2   :  { %11389 = vmatprep.subr.bf16.mxu1 %v12150_v0 }
0x69a5   :  { %11391 = vmatpush3.bf16.msra.mxu1 %v12346_v15 }
0x69a6   :  { %11392 = vmatprep.subr.bf16.mxu1 %v12150_v0 }
0x69a9   :  { %11394 = vmatpush3.bf16.msra.mxu1 %v12363_v20 }
0x69aa   :  { %11395 = vmatprep.subr.bf16.mxu1 %v12150_v0 }
0x69ad   :  { %11397 = vmatpush3.bf16.msra.mxu1 %v12376_v24 }
0x69ae   :  { %11398 = vmatprep.subr.bf16.mxu1 %v12150_v0 }
0x69b1   :  { %11400 = vmatpush3.bf16.msra.mxu1 %v12391_v27 }
0x69b2   :  { %11401 = vmatprep.subr.bf16.mxu1 %v12150_v0 }
0x69b5   :  { %11403 = vmatpush3.bf16.msra.mxu1 %v12403_v30 }
0x69b6   :  { %11404 = vmatprep.subr.bf16.mxu1 %v12150_v0 }
0x69b9   :  { %11406 = vmatpush3.bf16.msra.mxu1 %v12415_v33 }
0x69ba   :  { %11407 = vmatprep.subr.bf16.mxu1 %v12150_v0 }
0x69bd   :  { %11409 = vmatpush3.bf16.msra.mxu1 %v12434_v36 }
0x69be   :  { %11425 = vmatprep.subr.bf16.mxu1 %v12150_v0 }
0x6a73   :  { %v5476_v42 = vpop.f32.mrb[56].mxu1 }
0x6a74   :  { %v5477_v55 = vadd.f32 %v13647_v17, %v5476_v42  ;;  %v9948_v14 = vpop.f32.mrb[57].mxu1 }
0x6a76   :  { %9982 = vmatmul.mubr.f32.vlgmr.msra.gmra.mrb[56].mxu0 %v5477_v55 }
0x6a77   :  { %11412 = vmatpush3.bf16.msra.mxu0 %v12734_v19  ;;  %10027 = vmatprep.mubr.msk.f32.mxu0 %vm12151_vm0, %v12152_v1 }
0x6a78   :  { %11413 = vmatprep.subr.bf16.mxu0 %v12150_v0 }
0x6a7b   :  { %11415 = vmatpush3.bf16.msra.mxu0 %v12740_v26 }
0x6a7c   :  { %11416 = vmatprep.subr.bf16.mxu0 %v12150_v0 }
0x6b49   :  { %v5546_v31 = vpop.f32.mrb[56].mxu0 }
0x6b4a   :  { %v5550_v49 = vsub.f32 %v5477_v55, %v5546_v31  ;;  %v9983_v41 = vpop.f32.mrb[57].mxu0 }
0x6b4c   :  { %v5551_v62 = vmul.f32 %v5550_v49, %v5550_v49 }
0x6b4e   :  { %10017 = vmatmul.mubr.f32.vlgmr.msra.gmra.mrb[58].mxu1 %v5551_v62 }
0x6b4f   :  { %11427 = vmatpush3.bf16.msra.mxu1 %v12330_v10  ;;  %10077 = vmatprep.mubr.msk.f32.mxu1 %vm12151_vm0, %v12152_v1 }
0x6b50   :  { %11428 = vmatprep.subr.bf16.mxu1 %v12150_v0 }
0x6b53   :  { %11430 = vmatpush3.bf16.msra.mxu1 %v12346_v15 }
0x6b54   :  { %11431 = vmatprep.subr.bf16.mxu1 %v12150_v0 }
0x6b57   :  { %11433 = vmatpush3.bf16.msra.mxu1 %v12363_v20 }
0x6b58   :  { %11434 = vmatprep.subr.bf16.mxu1 %v12150_v0 }
0x6b5b   :  { %11436 = vmatpush3.bf16.msra.mxu1 %v12376_v24 }
0x6b5c   :  { %11437 = vmatprep.subr.bf16.mxu1 %v12150_v0 }
0x6b5f   :  { %11439 = vmatpush3.bf16.msra.mxu1 %v12391_v27 }
0x6b60   :  { %11440 = vmatprep.subr.bf16.mxu1 %v12150_v0 }
0x6b63   :  { %11442 = vmatpush3.bf16.msra.mxu1 %v12403_v30 }
0x6b64   :  { %11443 = vmatprep.subr.bf16.mxu1 %v12150_v0 }
0x6b67   :  { %11445 = vmatpush3.bf16.msra.mxu1 %v12415_v33 }
0x6b68   :  { %11446 = vmatprep.subr.bf16.mxu1 %v12150_v0 }
0x6b6b   :  { %11448 = vmatpush3.bf16.msra.mxu1 %v12434_v36 }
0x6b6c   :  { %11473 = vmatprep.subr.bf16.mxu1 %v12150_v0 }
0x6c21   :  { %v5618_v17 = vpop.f32.mrb[58].mxu1 }
0x6c22   :  { %v5619_v63 = vadd.f32 0.001, %v5618_v17  ;;  %v10018_v43 = vpop.f32.mrb[59].mxu1 }
0x6c24   :  { %11938 = vrsqrt.f32 %v5619_v63 }
0x6c2e   :  { %v11939_v3 = vpop.eup %11938 }
0x6c2f   :  { %v5623_v12 = vmul.f32 %v11939_v3, %v5550_v49 }
0x6c31   :  { %v5624_v51 = vmul.f32 %v13674_v37, %v5623_v12  ;;  %v5114_v37 = vmul.f32 0.5, %v13771_v16 }
0x6c33   :  { %v5625_v60 = vadd.f32 %v13677_v53, %v5624_v51  ;;  %v13910_v7 = vadd.f32 %v5114_v37, %v5113_v25 }
0x6c35   :  { %11940 = vtanh.f32 %v5625_v60  ;;  %v7705_v57 = vmul.f32 -1.442695, %v5625_v60 }
0x6c37   :  { %11942 = vpow2.f32 %v7705_v57 }
0x6c3f   :  { %v11941_v50 = vpop.eup %11940 }
0x6c40   :  { %5635 = vrot.lane.b32.xlu1 %v11941_v50, %s12153_s8 }
0x6c41   :  { %v11943_v56 = vpop.eup %11942 }
0x6c42   :  { %v5629_v22 = vadd.f32 1.0, %v11943_v56 }
0x6c44   :  { %11944 = vrcp.f32 %v5629_v22 }
0x6c4e   :  { %v11945_v40 = vpop.eup %11944 }
0x6c4f   :  { %v5633_v53 = vmul.f32 %v11945_v40, %v13910_v7 }
0x6cb2   :  { %v5636_v35 = vpop.permute.xlu1 %5635 }
0x6cb3   :  { %v5638_v58 = vmul.f32 %v11945_v40, %v5636_v35 }
0x6cb5   :  { %5640 = vrot.lane.b32.xlu0 %v5638_v58, %s12154_s2 }
0x6d27   :  { %v5641_v4 = vpop.permute.xlu0 %5640 }
0x6d28   :  { %v13913_v42 = vadd.f32 %v5641_v4, %v5633_v53 }
0x6d2a   :  { %5645 = vrot.lane.b32.xlu1 %v13913_v42, %s12154_s2 }
0x6d9c   :  { %v5646_v55 = vpop.permute.xlu1 %5645 }
0x6d9d   :  { %v5648_v14 = vsel %vm472_vm3, %v5646_v55, 0.0 }
0x6d9e   :  { %5649 = vadd.xlane.f32.xlu0 %v5648_v14 }
0x6db4   :  { %5669 = vrot.lane.b32.xlu0 %v11945_v40, %s12153_s8  ;;  %v5674_v40 = vmul.f32 0.1, %v13786_v44  ;;  %v7708_v44 = vld [vmem:[%s14421_s20 + $0x30] sm:$0xff] }
0x6e2b   :  { %v5650_v31 = vpop.xlane.xlu0 %5649 }
0x6e2c   :  { %v5651_v2 = vmul.f32 0.03125, %v5650_v31  ;;  %v13970_v31 = vld [vmem:[%s14422_s23] ss:$0 sm:$0xff] }
0x6e2e   :  { %v5652_v16 = vsub.f32 %v13913_v42, %v5651_v2 }
0x6e2f   :  { %v5670_v57 = vpop.permute.xlu0 %5669 }
0x6e30   :  { %v5653_v49 = vmul.f32 %v5652_v16, %v5652_v16 }
0x6e32   :  { %5655 = vrot.lane.b32.xlu1 %v5653_v49, %s12154_s2 }
0x6ea4   :  { %v5656_v41 = vpop.permute.xlu1 %5655 }
0x6ea5   :  { %v5658_v62 = vsel %vm472_vm3, %v5656_v41, 0.0 }
0x6ea6   :  { %5659 = vadd.xlane.f32.xlu1 %v5658_v62 }
0x6f33   :  { %v5660_v17 = vpop.xlane.xlu1 %5659 }
0x6f34   :  { %v5661_v63 = vmul.f32 0.03125, %v5660_v17 }
0x6f36   :  { %v5662_v43 = vadd.f32 0.001, %v5661_v63 }
0x6f38   :  { %11946 = vrsqrt.f32 %v5662_v43 }
0x6f42   :  { %v11947_v3 = vpop.eup %11946 }
0x6f43   :  { %v5664_v12 = vmul.f32 %v11947_v3, %v5652_v16 }
0x6f45   :  { %v5665_v51 = vmul.f32 %v5664_v12, %v12745_v46 }
0x6f47   :  { %v5666_v60 = vadd.f32 %v5665_v51, %v12747_v48  ;;  %v13994_v51 = vld [vmem:[%s14422_s23 + $0x1] ss:$0 sm:$0xff] }
0x6f49   :  { %11948 = vtanh.f32 %v5666_v60 }
0x6f53   :  { %v11949_v50 = vpop.eup %11948 }
0x6f54   :  { %v5672_v56 = vmul.f32 %v11949_v50, %v5670_v57  ;;  %v14000_v50 = vld [vmem:[%s14422_s23 + $0x2] ss:$0 sm:$0xff] }
0x6f56   :  { %v5673_v22 = vmul.f32 0.9, %v5672_v56 }
0x6f58   :  { %v13925_v35 = vadd.f32 %v5674_v40, %v5673_v22 }
0x6f5a   :  { %5758 = vrot.lane.b32.xlu0 %v13925_v35, %s12157_s27  ;;  %5680 = vrot.lane.b32.xlu1 %v13925_v35, %s12154_s2 }
0x6fcc   :  { %v5681_v58 = vpop.permute.xlu1 %5680  ;;  %v5759_v25 = vpop.permute.xlu0 %5758 }
0x6fcd   :  { %10028 = vmatmul.mubr.msk.f32.vlgmr.msra.gmra.mrb[58].mxu0 %vm472_vm3, %v5681_v58  ;;  %v5761_v37 = vsel %vm228_vm1, %v7708_v44, %v5759_v25 }
0x6fce   :  { %11418 = vmatpush3.bf16.msra.mxu0 %v12316_v5  ;;  %10042 = vmatprep.mubr.msk.f32.mxu0 %vm12151_vm0, %v12152_v1 }
0x6fcf   :  { %11419 = vmatprep.subr.bf16.mxu0 %v12150_v0 }
0x6fd2   :  { %11421 = vmatpush3.bf16.msra.mxu0 %v12328_v9 }
0x6fd3   :  { %11422 = vmatprep.subr.bf16.mxu0 %v12150_v0 }
0x6fd6   :  { %11424 = vmatpush3.bf16.msra.mxu0 %v12356_v18 }
0x6fd7   :  { %11449 = vmatprep.subr.bf16.mxu0 %v12150_v0 }
0x6fd9   :  { %10043 = vmatmul.mubr.msk.f32.vlgmr.msra.gmra.mrb[60].mxu0 %vm230_vm2, %v5761_v37 }
0x6fda   :  { %11451 = vmatpush3.bf16.msra.mxu0 %v12330_v10  ;;  %10112 = vmatprep.mubr.msk.f32.mxu0 %vm12151_vm0, %v12152_v1 }
0x6fdb   :  { %11452 = vmatprep.subr.bf16.mxu0 %v12150_v0 }
0x6fde   :  { %11454 = vmatpush3.bf16.msra.mxu0 %v12346_v15 }
0x6fdf   :  { %11455 = vmatprep.subr.bf16.mxu0 %v12150_v0 }
0x6fe2   :  { %11457 = vmatpush3.bf16.msra.mxu0 %v12363_v20 }
0x6fe3   :  { %11458 = vmatprep.subr.bf16.mxu0 %v12150_v0 }
0x6fe6   :  { %11460 = vmatpush3.bf16.msra.mxu0 %v12376_v24 }
0x6fe7   :  { %11461 = vmatprep.subr.bf16.mxu0 %v12150_v0 }
0x6fea   :  { %11463 = vmatpush3.bf16.msra.mxu0 %v12391_v27 }
0x6feb   :  { %11464 = vmatprep.subr.bf16.mxu0 %v12150_v0 }
0x6fee   :  { %11466 = vmatpush3.bf16.msra.mxu0 %v12403_v30 }
0x6fef   :  { %11467 = vmatprep.subr.bf16.mxu0 %v12150_v0 }
0x6ff2   :  { %11469 = vmatpush3.bf16.msra.mxu0 %v12415_v33 }
0x6ff3   :  { %11470 = vmatprep.subr.bf16.mxu0 %v12150_v0 }
0x6ff6   :  { %11472 = vmatpush3.bf16.msra.mxu0 %v12434_v36 }
0x6ff7   :  { %11482 = vmatprep.subr.bf16.mxu0 %v12150_v0 }
0x70a0   :  { %v5750_v53 = vpop.f32.mrb[58].mxu0 }
0x70a1   :  { %v5751_v4 = vadd.f32 %v13740_v52, %v5750_v53  ;;  %v10029_v55 = vpop.f32.mrb[59].mxu0  ;;  %v5676_v53 = vmul.f32 0.5, %v13913_v42 }
0x70a3   :  { %7707 = vst [vmem:[%s14409_s14 + $0x28] sm:$0xff] %v5751_v4  ;;  %v5677_v4 = vmul.f32 0.5, %v13910_v7 }
0x70a5   :  { %v14007_v55 = vadd.f32 %v5677_v4, %v5676_v53 }
0x70ac   :  { %v5831_v14 = vpop.f32.mrb[60].mxu0 }
0x70ad   :  { %v5832_v2 = vadd.f32 %v13970_v31, %v5831_v14  ;;  %v10044_v16 = vpop.f32.mrb[61].mxu0 }
0x70af   :  { %10078 = vmatmul.mubr.f32.vlgmr.msra.gmra.mrb[60].mxu1 %v5832_v2 }
0x70b0   :  { %11475 = vmatpush3.bf16.msra.mxu1 %v12484_v21  ;;  %10127 = vmatprep.mubr.msk.f32.mxu1 %vm12151_vm0, %v12152_v1 }
0x70b1   :  { %11476 = vmatprep.subr.bf16.mxu1 %v12150_v0 }
0x70b4   :  { %11478 = vmatpush3.bf16.msra.mxu1 %v12490_v23 }
0x70b5   :  { %11479 = vmatprep.subr.bf16.mxu1 %v12150_v0 }
0x70b8   :  { %11481 = vmatpush3.bf16.msra.mxu1 %v12500_v28 }
0x70b9   :  { %11494 = vmatprep.subr.bf16.mxu1 %v12150_v0 }
0x7182   :  { %v5901_v52 = vpop.f32.mrb[60].mxu1 }
0x7183   :  { %v5905_v49 = vsub.f32 %v5832_v2, %v5901_v52  ;;  %v10079_v41 = vpop.f32.mrb[61].mxu1 }
0x7185   :  { %v5906_v62 = vmul.f32 %v5905_v49, %v5905_v49 }
0x7187   :  { %10113 = vmatmul.mubr.f32.vlgmr.msra.gmra.mrb[62].mxu0 %v5906_v62 }
0x7188   :  { %11484 = vmatpush3.bf16.msra.mxu0 %v12520_v45  ;;  %10146 = vmatprep.mubr.msk.f32.mxu0 %vm12151_vm0, %v12152_v1 }
0x7189   :  { %11485 = vmatprep.subr.bf16.mxu0 %v12150_v0 }
0x718c   :  { %11487 = vmatpush3.bf16.msra.mxu0 %v12526_v47 }
0x718d   :  { %11488 = vmatprep.subr.bf16.mxu0 %v12150_v0 }
0x7190   :  { %11490 = vmatpush3.bf16.msra.mxu0 %v12536_v54 }
0x7191   :  { %11491 = vmatprep.subr.bf16.mxu0 %v12150_v0 }
0x7194   :  { %11493 = vmatpush3.bf16.msra.mxu0 %v12561_v61 }
0x7195   :  { %11506 = vmatprep.subr.bf16.mxu0 %v12150_v0 }
0x725a   :  { %v5973_v17 = vpop.f32.mrb[62].mxu0 }
0x725b   :  { %v5974_v63 = vadd.f32 0.001, %v5973_v17  ;;  %v10114_v43 = vpop.f32.mrb[63].mxu0 }
0x725d   :  { %11950 = vrsqrt.f32 %v5974_v63 }
0x7267   :  { %v11951_v3 = vpop.eup %11950 }
0x7268   :  { %v5978_v12 = vmul.f32 %v11951_v3, %v5905_v49 }
0x726a   :  { %v5979_v60 = vmul.f32 %v13994_v51, %v5978_v12 }
0x726c   :  { %v5980_v57 = vadd.f32 %v14000_v50, %v5979_v60 }
0x726e   :  { %11952 = vtanh.f32 %v5980_v57  ;;  %v7710_v22 = vmul.f32 -1.442695, %v5980_v57 }
0x7270   :  { %11954 = vpow2.f32 %v7710_v22 }
0x7278   :  { %v11953_v56 = vpop.eup %11952 }
0x7279   :  { %5990 = vrot.lane.b32.xlu0 %v11953_v56, %s12153_s8 }
0x727a   :  { %v11955_v40 = vpop.eup %11954 }
0x727b   :  { %v5984_v58 = vadd.f32 1.0, %v11955_v40 }
0x727d   :  { %11956 = vrcp.f32 %v5984_v58 }
0x7287   :  { %v11957_v44 = vpop.eup %11956 }
0x7288   :  { %v5988_v14 = vmul.f32 %v11957_v44, %v14007_v55 }
0x72eb   :  { %v5991_v25 = vpop.permute.xlu0 %5990 }
0x72ec   :  { %v5993_v37 = vmul.f32 %v11957_v44, %v5991_v25 }
0x72ee   :  { %5995 = vrot.lane.b32.xlu1 %v5993_v37, %s12154_s2  ;;  %v6029_v37 = vmul.f32 0.1, %v13925_v35 }
0x7360   :  { %v5996_v2 = vpop.permute.xlu1 %5995 }
0x7361   :  { %v14010_v16 = vadd.f32 %v5996_v2, %v5988_v14  ;;  %v14039_v2 = vld [vmem:[#allocation4] ss:$0 sm:$0xff] }
0x7363   :  { %6000 = vrot.lane.b32.xlu0 %v14010_v16, %s12154_s2 }
0x73d5   :  { %v6001_v52 = vpop.permute.xlu0 %6000 }
0x73d6   :  { %v6003_v49 = vsel %vm472_vm3, %v6001_v52, 0.0 }
0x73d7   :  { %6004 = vadd.xlane.f32.xlu1 %v6003_v49 }
0x73e8   :  { %6024 = vrot.lane.b32.xlu1 %v11957_v44, %s12153_s8 }
0x7464   :  { %v6005_v41 = vpop.xlane.xlu1 %6004 }
0x7465   :  { %v6006_v42 = vmul.f32 0.03125, %v6005_v41 }
0x7467   :  { %v6007_v7 = vsub.f32 %v14010_v16, %v6006_v42 }
0x7468   :  { %v6025_v58 = vpop.permute.xlu1 %6024 }
0x7469   :  { %v6008_v62 = vmul.f32 %v6007_v7, %v6007_v7 }
0x746b   :  { %6010 = vrot.lane.b32.xlu0 %v6008_v62, %s12154_s2 }
0x74dd   :  { %v6011_v17 = vpop.permute.xlu0 %6010 }
0x74de   :  { %v6013_v63 = vsel %vm472_vm3, %v6011_v17, 0.0 }
0x74df   :  { %6014 = vadd.xlane.f32.xlu0 %v6013_v63 }
0x756c   :  { %v6015_v43 = vpop.xlane.xlu0 %6014 }
0x756d   :  { %v6016_v3 = vmul.f32 0.03125, %v6015_v43 }
0x756f   :  { %v6017_v12 = vadd.f32 0.001, %v6016_v3 }
0x7571   :  { %11958 = vrsqrt.f32 %v6017_v12 }
0x757b   :  { %v11959_v60 = vpop.eup %11958 }
0x757c   :  { %v6019_v57 = vmul.f32 %v11959_v60, %v6007_v7  ;;  %v14070_v60 = vld [vmem:[#allocation4 + $0x1] ss:$0 sm:$0xff] }
0x757e   :  { %v6020_v56 = vmul.f32 %v6019_v57, %v12505_v38 }
0x7580   :  { %v6021_v22 = vadd.f32 %v6020_v56, %v12507_v39  ;;  %v14073_v56 = vld [vmem:[#allocation4 + $0x2] ss:$0 sm:$0xff] }
0x7582   :  { %11960 = vtanh.f32 %v6021_v22 }
0x758c   :  { %v11961_v40 = vpop.eup %11960 }
0x758d   :  { %v6027_v44 = vmul.f32 %v11961_v40, %v6025_v58 }
0x758f   :  { %v6028_v25 = vmul.f32 0.9, %v6027_v44 }
0x7591   :  { %v14022_v53 = vadd.f32 %v6029_v37, %v6028_v25 }
0x7593   :  { %6035 = vrot.lane.b32.xlu0 %v14022_v53, %s12154_s2 }
0x7605   :  { %v6036_v4 = vpop.permute.xlu0 %6035 }
0x7606   :  { %v6038_v14 = vsel %vm472_vm3, %v6036_v4, %v13855_v59 }
0x7607   :  { %10128 = vmatmul.mubr.msk.f32.vlgmr.msra.gmra.mrb[62].mxu1 %vm230_vm2, %v6038_v14 }
0x7608   :  { %11496 = vmatpush3.bf16.msra.mxu1 %v12520_v45  ;;  %10165 = vmatprep.mubr.msk.f32.mxu1 %vm12151_vm0, %v12152_v1 }
0x7609   :  { %11497 = vmatprep.subr.bf16.mxu1 %v12150_v0 }
0x760c   :  { %11499 = vmatpush3.bf16.msra.mxu1 %v12526_v47 }
0x760d   :  { %11500 = vmatprep.subr.bf16.mxu1 %v12150_v0 }
0x7610   :  { %11502 = vmatpush3.bf16.msra.mxu1 %v12536_v54 }
0x7611   :  { %11503 = vmatprep.subr.bf16.mxu1 %v12150_v0 }
0x7614   :  { %11505 = vmatpush3.bf16.msra.mxu1 %v12561_v61 }
0x7615   :  { %11515 = vmatprep.subr.bf16.mxu1 %v12150_v0 }
0x76da   :  { %v6108_v35 = vpop.f32.mrb[62].mxu1 }
0x76db   :  { %v6109_v52 = vadd.f32 %v14039_v2, %v6108_v35  ;;  %v10129_v49 = vpop.f32.mrb[63].mxu1  ;;  %v5396_v35 = vmul.f32 0.5, %v13841_v34 }
0x76dd   :  { %10147 = vmatmul.mubr.msk.f32.vlgmr.msra.gmra.mrb[64].mxu0 %vm589_vm4, %v6109_v52 }
0x76de   :  { %11508 = vmatpush3.bf16.msra.mxu0 %v12628_v6  ;;  %10180 = vmatprep.mubr.msk.f32.mxu0 %vm12151_vm0, %v12152_v1 }
0x76df   :  { %11509 = vmatprep.subr.bf16.mxu0 %v12150_v0 }
0x76e2   :  { %11511 = vmatpush3.bf16.msra.mxu0 %v12634_v8 }
0x76e3   :  { %11512 = vmatprep.subr.bf16.mxu0 %v12150_v0 }
0x76e6   :  { %11514 = vmatpush3.bf16.msra.mxu0 %v12644_v13 }
0x76e7   :  { %11539 = vmatprep.subr.bf16.mxu0 %v12150_v0 }
0x77b0   :  { %v6181_v41 = vpop.f32.mrb[64].mxu0 }
0x77b1   :  { %v6185_v42 = vsub.f32 %v6109_v52, %v6181_v41  ;;  %v10148_v7 = vpop.f32.mrb[65].mxu0  ;;  %v5397_v52 = vmul.f32 0.5, %v13838_v11 }
0x77b3   :  { %v6186_v62 = vmul.f32 %v6185_v42, %v6185_v42  ;;  %v14080_v49 = vadd.f32 %v5397_v52, %v5396_v35 }
0x77b5   :  { %10166 = vmatmul.mubr.msk.f32.vlgmr.msra.gmra.mrb[64].mxu1 %vm589_vm4, %v6186_v62 }
0x77b6   :  { %11517 = vmatpush3.bf16.msra.mxu1 %v12330_v10  ;;  %10215 = vmatprep.mubr.msk.f32.mxu1 %vm12151_vm0, %v12152_v1 }
0x77b7   :  { %11518 = vmatprep.subr.bf16.mxu1 %v12150_v0 }
0x77ba   :  { %11520 = vmatpush3.bf16.msra.mxu1 %v12346_v15 }
0x77bb   :  { %11521 = vmatprep.subr.bf16.mxu1 %v12150_v0 }
0x77be   :  { %11523 = vmatpush3.bf16.msra.mxu1 %v12363_v20 }
0x77bf   :  { %11524 = vmatprep.subr.bf16.mxu1 %v12150_v0 }
0x77c2   :  { %11526 = vmatpush3.bf16.msra.mxu1 %v12376_v24 }
0x77c3   :  { %11527 = vmatprep.subr.bf16.mxu1 %v12150_v0 }
0x77c6   :  { %11529 = vmatpush3.bf16.msra.mxu1 %v12391_v27 }
0x77c7   :  { %11530 = vmatprep.subr.bf16.mxu1 %v12150_v0 }
0x77ca   :  { %11532 = vmatpush3.bf16.msra.mxu1 %v12403_v30 }
0x77cb   :  { %11533 = vmatprep.subr.bf16.mxu1 %v12150_v0 }
0x77ce   :  { %11535 = vmatpush3.bf16.msra.mxu1 %v12415_v33 }
0x77cf   :  { %11536 = vmatprep.subr.bf16.mxu1 %v12150_v0 }
0x77d2   :  { %11538 = vmatpush3.bf16.msra.mxu1 %v12434_v36 }
0x77d3   :  { %11563 = vmatprep.subr.bf16.mxu1 %v12150_v0 }
0x7888   :  { %v6256_v17 = vpop.f32.mrb[64].mxu1 }
0x7889   :  { %v6257_v63 = vadd.f32 0.001, %v6256_v17  ;;  %v10167_v43 = vpop.f32.mrb[65].mxu1 }
0x788b   :  { %11962 = vrsqrt.f32 %v6257_v63 }
0x7895   :  { %v11963_v3 = vpop.eup %11962 }
0x7896   :  { %v6261_v12 = vmul.f32 %v11963_v3, %v6185_v42 }
0x7898   :  { %v6262_v57 = vmul.f32 %v14070_v60, %v6261_v12 }
0x789a   :  { %v6263_v22 = vadd.f32 %v14073_v56, %v6262_v57 }
0x789c   :  { %11964 = vtanh.f32 %v6263_v22  ;;  %v7714_v58 = vmul.f32 -1.442695, %v6263_v22 }
0x789e   :  { %11966 = vpow2.f32 %v7714_v58 }
0x78a6   :  { %v11965_v40 = vpop.eup %11964 }
0x78a7   :  { %6273 = vrot.lane.b32.xlu1 %v11965_v40, %s12155_s11 }
0x78a8   :  { %v11967_v44 = vpop.eup %11966 }
0x78a9   :  { %v6267_v25 = vadd.f32 1.0, %v11967_v44 }
0x78ab   :  { %11968 = vrcp.f32 %v6267_v25 }
0x78b5   :  { %v11969_v37 = vpop.eup %11968 }
0x78b6   :  { %v6271_v41 = vmul.f32 %v11969_v37, %v14080_v49 }
0x7919   :  { %v6274_v4 = vpop.permute.xlu1 %6273 }
0x791a   :  { %v6276_v14 = vmul.f32 %v11969_v37, %v6274_v4 }
0x791c   :  { %6278 = vrot.lane.b32.xlu1 %v6276_v14, %s12156_s22 }
0x798e   :  { %v6279_v42 = vpop.permute.xlu1 %6278 }
0x798f   :  { %v14083_v7 = vadd.f32 %v6279_v42, %v6271_v41  ;;  %v6312_v41 = vmul.f32 0.1, %v13855_v59 }
0x7991   :  { %6283 = vrot.lane.b32.xlu0 %v14083_v7, %s12153_s8 }
0x7a03   :  { %v6284_v62 = vpop.permute.xlu0 %6283 }
0x7a04   :  { %v6286_v17 = vsel %vm228_vm1, %v6284_v62, 0.0 }
0x7a05   :  { %6287 = vadd.xlane.f32.xlu1 %v6286_v17 }
0x7a16   :  { %6307 = vrot.lane.b32.xlu1 %v11969_v37, %s12155_s11 }
0x7a1a   :  { %6321 = vrot.lane.b32.xlu1 %v14022_v53, %s12157_s27 }
0x7a92   :  { %v6288_v11 = vpop.xlane.xlu1 %6287 }
0x7a93   :  { %v6289_v34 = vmul.f32 0.0625, %v6288_v11 }
0x7a95   :  { %v6290_v63 = vsub.f32 %v14083_v7, %v6289_v34  ;;  %v14121_v34 = vld [vmem:[#allocation6] ss:$0 sm:$0xff] }
0x7a96   :  { %v6308_v14 = vpop.permute.xlu1 %6307 }
0x7a97   :  { %v6291_v43 = vmul.f32 %v6290_v63, %v6290_v63 }
0x7a99   :  { %6293 = vrot.lane.b32.xlu0 %v6291_v43, %s12153_s8 }
0x7a9a   :  { %v6322_v62 = vpop.permute.xlu1 %6321 }
0x7b0b   :  { %v6294_v3 = vpop.permute.xlu0 %6293 }
0x7b0c   :  { %v6296_v12 = vsel %vm228_vm1, %v6294_v3, 0.0 }
0x7b0d   :  { %6297 = vadd.xlane.f32.xlu0 %v6296_v12 }
0x7b9a   :  { %v6298_v57 = vpop.xlane.xlu0 %6297 }
0x7b9b   :  { %v6299_v22 = vmul.f32 0.0625, %v6298_v57 }
0x7b9d   :  { %v6300_v40 = vadd.f32 0.001, %v6299_v22 }
0x7b9f   :  { %11970 = vrsqrt.f32 %v6300_v40 }
0x7ba9   :  { %v11971_v58 = vpop.eup %11970 }
0x7baa   :  { %v6302_v44 = vmul.f32 %v11971_v58, %v6290_v63 }
0x7bac   :  { %v6303_v25 = vmul.f32 %v6302_v44, %v12649_v29 }
0x7bae   :  { %v6304_v37 = vadd.f32 %v6303_v25, %v12652_v32 }
0x7bb0   :  { %11972 = vtanh.f32 %v6304_v37 }
0x7bba   :  { %v11973_v4 = vpop.eup %11972 }
0x7bbb   :  { %v6310_v35 = vmul.f32 %v11973_v4, %v6308_v14  ;;  %v14148_v4 = vld [vmem:[#allocation6 + $0x1] ss:$0 sm:$0xff] }
0x7bbd   :  { %v6311_v52 = vmul.f32 0.9, %v6310_v35  ;;  %v14151_v35 = vld [vmem:[#allocation6 + $0x2] ss:$0 sm:$0xff] }
0x7bbf   :  { %v14097_v42 = vadd.f32 %v6312_v41, %v6311_v52 }
0x7bc1   :  { %6318 = vrot.lane.b32.xlu0 %v14097_v42, %s12153_s8 }
0x7c33   :  { %v6319_v17 = vpop.permute.xlu0 %6318 }
0x7c34   :  { %v6324_v11 = vsel %vm228_vm1, %v6319_v17, %v6322_v62 }
0x7c35   :  { %10181 = vmatmul.mubr.msk.f32.vlgmr.msra.gmra.mrb[66].mxu0 %vm230_vm2, %v6324_v11 }
0x7c36   :  { %11541 = vmatpush3.bf16.msra.mxu0 %v12330_v10  ;;  %10250 = vmatprep.mubr.msk.f32.mxu0 %vm12151_vm0, %v12152_v1 }
0x7c37   :  { %11542 = vmatprep.subr.bf16.mxu0 %v12150_v0 }
0x7c3a   :  { %11544 = vmatpush3.bf16.msra.mxu0 %v12346_v15 }
0x7c3b   :  { %11545 = vmatprep.subr.bf16.mxu0 %v12150_v0 }
0x7c3e   :  { %11547 = vmatpush3.bf16.msra.mxu0 %v12363_v20 }
0x7c3f   :  { %11548 = vmatprep.subr.bf16.mxu0 %v12150_v0 }
0x7c42   :  { %11550 = vmatpush3.bf16.msra.mxu0 %v12376_v24 }
0x7c43   :  { %11551 = vmatprep.subr.bf16.mxu0 %v12150_v0 }
0x7c46   :  { %11553 = vmatpush3.bf16.msra.mxu0 %v12391_v27 }
0x7c47   :  { %11554 = vmatprep.subr.bf16.mxu0 %v12150_v0 }
0x7c4a   :  { %11556 = vmatpush3.bf16.msra.mxu0 %v12403_v30 }
0x7c4b   :  { %11557 = vmatprep.subr.bf16.mxu0 %v12150_v0 }
0x7c4e   :  { %11559 = vmatpush3.bf16.msra.mxu0 %v12415_v33 }
0x7c4f   :  { %11560 = vmatprep.subr.bf16.mxu0 %v12150_v0 }
0x7c52   :  { %11562 = vmatpush3.bf16.msra.mxu0 %v12434_v36 }
0x7c53   :  { %11578 = vmatprep.subr.bf16.mxu0 %v12150_v0 }
0x7d08   :  { %v6394_v59 = vpop.f32.mrb[66].mxu0 }
0x7d09   :  { %v6395_v63 = vadd.f32 %v14121_v34, %v6394_v59  ;;  %v10182_v43 = vpop.f32.mrb[67].mxu0 }
0x7d0b   :  { %10216 = vmatmul.mubr.f32.vlgmr.msra.gmra.mrb[66].mxu1 %v6395_v63 }
0x7d0c   :  { %11565 = vmatpush3.bf16.msra.mxu1 %v12734_v19  ;;  %10261 = vmatprep.mubr.msk.f32.mxu1 %vm12151_vm0, %v12152_v1 }
0x7d0d   :  { %11566 = vmatprep.subr.bf16.mxu1 %v12150_v0 }
0x7d10   :  { %11568 = vmatpush3.bf16.msra.mxu1 %v12740_v26 }
0x7d11   :  { %11569 = vmatprep.subr.bf16.mxu1 %v12150_v0 }
0x7dde   :  { %v6464_v3 = vpop.f32.mrb[66].mxu1 }
0x7ddf   :  { %v6468_v12 = vsub.f32 %v6395_v63, %v6464_v3  ;;  %v10217_v57 = vpop.f32.mrb[67].mxu1  ;;  %v6031_v3 = vmul.f32 0.5, %v14010_v16 }
0x7de1   :  { %v6469_v22 = vmul.f32 %v6468_v12, %v6468_v12 }
0x7de3   :  { %10251 = vmatmul.mubr.f32.vlgmr.msra.gmra.mrb[68].mxu0 %v6469_v22 }
0x7de4   :  { %11580 = vmatpush3.bf16.msra.mxu0 %v12330_v10  ;;  %10311 = vmatprep.mubr.msk.f32.mxu0 %vm12151_vm0, %v12152_v1 }
0x7de5   :  { %11581 = vmatprep.subr.bf16.mxu0 %v12150_v0 }
0x7de8   :  { %11583 = vmatpush3.bf16.msra.mxu0 %v12346_v15 }
0x7de9   :  { %11584 = vmatprep.subr.bf16.mxu0 %v12150_v0 }
0x7dec   :  { %11586 = vmatpush3.bf16.msra.mxu0 %v12363_v20 }
0x7ded   :  { %11587 = vmatprep.subr.bf16.mxu0 %v12150_v0 }
0x7df0   :  { %11589 = vmatpush3.bf16.msra.mxu0 %v12376_v24 }
0x7df1   :  { %11590 = vmatprep.subr.bf16.mxu0 %v12150_v0 }
0x7df4   :  { %11592 = vmatpush3.bf16.msra.mxu0 %v12391_v27 }
0x7df5   :  { %11593 = vmatprep.subr.bf16.mxu0 %v12150_v0 }
0x7df8   :  { %11595 = vmatpush3.bf16.msra.mxu0 %v12403_v30 }
0x7df9   :  { %11596 = vmatprep.subr.bf16.mxu0 %v12150_v0 }
0x7dfc   :  { %11598 = vmatpush3.bf16.msra.mxu0 %v12415_v33 }
0x7dfd   :  { %11599 = vmatprep.subr.bf16.mxu0 %v12150_v0 }
0x7e00   :  { %11601 = vmatpush3.bf16.msra.mxu0 %v12434_v36 }
0x7e01   :  { %11626 = vmatprep.subr.bf16.mxu0 %v12150_v0 }
0x7eb6   :  { %v6536_v40 = vpop.f32.mrb[68].mxu0 }
0x7eb7   :  { %v6537_v58 = vadd.f32 0.001, %v6536_v40  ;;  %v10252_v44 = vpop.f32.mrb[69].mxu0 }
0x7eb9   :  { %11974 = vrsqrt.f32 %v6537_v58 }
0x7ec3   :  { %v11975_v25 = vpop.eup %11974 }
0x7ec4   :  { %v6541_v37 = vmul.f32 %v11975_v25, %v6468_v12  ;;  %v6032_v12 = vmul.f32 0.5, %v14007_v55 }
0x7ec6   :  { %v6542_v14 = vmul.f32 %v14148_v4, %v6541_v37  ;;  %v14158_v57 = vadd.f32 %v6032_v12, %v6031_v3 }
0x7ec8   :  { %v6543_v52 = vadd.f32 %v14151_v35, %v6542_v14 }
0x7eca   :  { %11976 = vtanh.f32 %v6543_v52  ;;  %v7716_v62 = vmul.f32 -1.442695, %v6543_v52 }
0x7ecc   :  { %11978 = vpow2.f32 %v7716_v62 }
0x7ed4   :  { %v11977_v41 = vpop.eup %11976 }
0x7ed5   :  { %6553 = vrot.lane.b32.xlu1 %v11977_v41, %s12153_s8 }
0x7ed6   :  { %v11979_v17 = vpop.eup %11978 }
0x7ed7   :  { %v6547_v11 = vadd.f32 1.0, %v11979_v17 }
0x7ed9   :  { %11980 = vrcp.f32 %v6547_v11 }
0x7ee3   :  { %v11981_v59 = vpop.eup %11980 }
0x7ee4   :  { %v6551_v22 = vmul.f32 %v11981_v59, %v14158_v57 }
0x7f47   :  { %v6554_v63 = vpop.permute.xlu1 %6553 }
0x7f48   :  { %v6556_v43 = vmul.f32 %v11981_v59, %v6554_v63 }
0x7f4a   :  { %6558 = vrot.lane.b32.xlu0 %v6556_v43, %s12154_s2 }
0x7fbc   :  { %v6559_v40 = vpop.permute.xlu0 %6558 }
0x7fbd   :  { %v14161_v58 = vadd.f32 %v6559_v40, %v6551_v22 }
0x7fbf   :  { %6563 = vrot.lane.b32.xlu1 %v14161_v58, %s12154_s2 }
0x8031   :  { %v6564_v44 = vpop.permute.xlu1 %6563 }
0x8032   :  { %v6566_v25 = vsel %vm472_vm3, %v6564_v44, 0.0 }
0x8033   :  { %6567 = vadd.xlane.f32.xlu0 %v6566_v25  ;;  %v6592_v25 = vmul.f32 0.1, %v14022_v53  ;;  %v7719_v53 = vld [vmem:[%s14421_s20 + $0x38] sm:$0xff] }
0x8049   :  { %6587 = vrot.lane.b32.xlu0 %v11981_v59, %s12153_s8 }
0x80c0   :  { %v6568_v37 = vpop.xlane.xlu0 %6567 }
0x80c1   :  { %v6569_v16 = vmul.f32 0.03125, %v6568_v37 }
0x80c3   :  { %v6570_v55 = vsub.f32 %v14161_v58, %v6569_v16 }
0x80c4   :  { %v6588_v22 = vpop.permute.xlu0 %6587 }
0x80c5   :  { %v6571_v14 = vmul.f32 %v6570_v55, %v6570_v55 }
0x80c7   :  { %6573 = vrot.lane.b32.xlu1 %v6571_v14, %s12154_s2 }
0x8139   :  { %v6574_v52 = vpop.permute.xlu1 %6573 }
0x813a   :  { %v6576_v41 = vsel %vm472_vm3, %v6574_v52, 0.0 }
0x813b   :  { %6577 = vadd.xlane.f32.xlu1 %v6576_v41 }
0x81c8   :  { %v6578_v62 = vpop.xlane.xlu1 %6577 }
0x81c9   :  { %v6579_v17 = vmul.f32 0.03125, %v6578_v62 }
0x81cb   :  { %v6580_v11 = vadd.f32 0.001, %v6579_v17 }
0x81cd   :  { %11982 = vrsqrt.f32 %v6580_v11 }
0x81d7   :  { %v11983_v63 = vpop.eup %11982 }
0x81d8   :  { %v6582_v43 = vmul.f32 %v11983_v63, %v6570_v55 }
0x81da   :  { %v6583_v3 = vmul.f32 %v6582_v43, %v12745_v46 }
0x81dc   :  { %v6584_v59 = vadd.f32 %v6583_v3, %v12747_v48 }
0x81de   :  { %11984 = vtanh.f32 %v6584_v59 }
0x81e8   :  { %v11985_v12 = vpop.eup %11984 }
0x81e9   :  { %v6590_v40 = vmul.f32 %v11985_v12, %v6588_v22 }
0x81eb   :  { %v6591_v44 = vmul.f32 0.9, %v6590_v40 }
0x81ed   :  { %v14173_v37 = vadd.f32 %v6592_v25, %v6591_v44 }
0x81ef   :  { %6676 = vrot.lane.b32.xlu0 %v14173_v37, %s12157_s27  ;;  %6598 = vrot.lane.b32.xlu1 %v14173_v37, %s12154_s2 }
0x8261   :  { %v6599_v16 = vpop.permute.xlu1 %6598  ;;  %v6677_v55 = vpop.permute.xlu0 %6676 }
0x8262   :  { %10262 = vmatmul.mubr.msk.f32.vlgmr.msra.gmra.mrb[68].mxu1 %vm472_vm3, %v6599_v16 }
0x8263   :  { %11571 = vmatpush3.bf16.msra.mxu1 %v12316_v5  ;;  %10276 = vmatprep.mubr.msk.f32.mxu1 %vm12151_vm0, %v12152_v1  ;;  %v6679_v5 = vsel %vm228_vm1, %v7719_v53, %v6677_v55 }
0x8264   :  { %11572 = vmatprep.subr.bf16.mxu1 %v12150_v0 }
0x8267   :  { %11574 = vmatpush3.bf16.msra.mxu1 %v12328_v9 }
0x8268   :  { %11575 = vmatprep.subr.bf16.mxu1 %v12150_v0 }
0x826b   :  { %11577 = vmatpush3.bf16.msra.mxu1 %v12356_v18  ;;  %v14214_v18 = vld [vmem:[%s14408_s13] ss:$0 sm:$0xff] }
0x826c   :  { %11602 = vmatprep.subr.bf16.mxu1 %v12150_v0 }
0x826e   :  { %10277 = vmatmul.mubr.msk.f32.vlgmr.msra.gmra.mrb[70].mxu1 %vm230_vm2, %v6679_v5 }
0x826f   :  { %11604 = vmatpush3.bf16.msra.mxu1 %v12330_v10  ;;  %10346 = vmatprep.mubr.msk.f32.mxu1 %vm12151_vm0, %v12152_v1 }
0x8270   :  { %11605 = vmatprep.subr.bf16.mxu1 %v12150_v0 }
0x8273   :  { %11607 = vmatpush3.bf16.msra.mxu1 %v12346_v15 }
0x8274   :  { %11608 = vmatprep.subr.bf16.mxu1 %v12150_v0 }
0x8277   :  { %11610 = vmatpush3.bf16.msra.mxu1 %v12363_v20 }
0x8278   :  { %11611 = vmatprep.subr.bf16.mxu1 %v12150_v0 }
0x827b   :  { %11613 = vmatpush3.bf16.msra.mxu1 %v12376_v24 }
0x827c   :  { %11614 = vmatprep.subr.bf16.mxu1 %v12150_v0 }
0x827f   :  { %11616 = vmatpush3.bf16.msra.mxu1 %v12391_v27 }
0x8280   :  { %11617 = vmatprep.subr.bf16.mxu1 %v12150_v0 }
0x8283   :  { %11619 = vmatpush3.bf16.msra.mxu1 %v12403_v30 }
0x8284   :  { %11620 = vmatprep.subr.bf16.mxu1 %v12150_v0 }
0x8287   :  { %11622 = vmatpush3.bf16.msra.mxu1 %v12415_v33 }
0x8288   :  { %11623 = vmatprep.subr.bf16.mxu1 %v12150_v0 }
0x828b   :  { %11625 = vmatpush3.bf16.msra.mxu1 %v12434_v36 }
0x828c   :  { %11635 = vmatprep.subr.bf16.mxu1 %v12150_v0 }
0x8335   :  { %v6668_v9 = vpop.f32.mrb[68].mxu1 }
0x8336   :  { %v6669_v14 = vadd.f32 %v14214_v18, %v6668_v9  ;;  %v10263_v52 = vpop.f32.mrb[69].mxu1  ;;  %v6594_v9 = vmul.f32 0.5, %v14161_v58 }
0x8338   :  { %7718 = vst [vmem:[%s14409_s14 + $0x30] sm:$0xff] %v6669_v14 }
0x8341   :  { %v6749_v41 = vpop.f32.mrb[70].mxu1 }
0x8342   :  { %v6750_v62 = vadd.f32 %v13970_v31, %v6749_v41  ;;  %v10278_v17 = vpop.f32.mrb[71].mxu1 }
0x8344   :  { %10312 = vmatmul.mubr.f32.vlgmr.msra.gmra.mrb[70].mxu0 %v6750_v62 }
0x8345   :  { %11628 = vmatpush3.bf16.msra.mxu0 %v12484_v21  ;;  %10361 = vmatprep.mubr.msk.f32.mxu0 %vm12151_vm0, %v12152_v1 }
0x8346   :  { %11629 = vmatprep.subr.bf16.mxu0 %v12150_v0 }
0x8349   :  { %11631 = vmatpush3.bf16.msra.mxu0 %v12490_v23 }
0x834a   :  { %11632 = vmatprep.subr.bf16.mxu0 %v12150_v0 }
0x834d   :  { %11634 = vmatpush3.bf16.msra.mxu0 %v12500_v28 }
0x834e   :  { %11647 = vmatprep.subr.bf16.mxu0 %v12150_v0 }
0x8417   :  { %v6819_v11 = vpop.f32.mrb[70].mxu0 }
0x8418   :  { %v6823_v63 = vsub.f32 %v6750_v62, %v6819_v11  ;;  %v10313_v31 = vpop.f32.mrb[71].mxu0 }
0x841a   :  { %v6824_v43 = vmul.f32 %v6823_v63, %v6823_v63 }
0x841c   :  { %10347 = vmatmul.mubr.f32.vlgmr.msra.gmra.mrb[72].mxu1 %v6824_v43 }
0x841d   :  { %11637 = vmatpush3.bf16.msra.mxu1 %v12520_v45  ;;  %10380 = vmatprep.mubr.msk.f32.mxu1 %vm12151_vm0, %v12152_v1 }
0x841e   :  { %11638 = vmatprep.subr.bf16.mxu1 %v12150_v0 }
0x8421   :  { %11640 = vmatpush3.bf16.msra.mxu1 %v12526_v47 }
0x8422   :  { %11641 = vmatprep.subr.bf16.mxu1 %v12150_v0 }
0x8425   :  { %11643 = vmatpush3.bf16.msra.mxu1 %v12536_v54 }
0x8426   :  { %11644 = vmatprep.subr.bf16.mxu1 %v12150_v0 }
0x8429   :  { %11646 = vmatpush3.bf16.msra.mxu1 %v12561_v61 }
0x842a   :  { %11659 = vmatprep.subr.bf16.mxu1 %v12150_v0 }
0x84ef   :  { %v6891_v21 = vpop.f32.mrb[72].mxu1 }
0x84f0   :  { %v6892_v23 = vadd.f32 0.001, %v6891_v21  ;;  %v10348_v28 = vpop.f32.mrb[73].mxu1 }
0x84f2   :  { %11986 = vrsqrt.f32 %v6892_v23 }
0x84fc   :  { %v11987_v3 = vpop.eup %11986 }
0x84fd   :  { %v6896_v59 = vmul.f32 %v11987_v3, %v6823_v63 }
0x84ff   :  { %v6897_v12 = vmul.f32 %v13994_v51, %v6896_v59  ;;  %v6595_v51 = vmul.f32 0.5, %v14158_v57 }
0x8501   :  { %v6898_v22 = vadd.f32 %v14000_v50, %v6897_v12  ;;  %v14245_v14 = vadd.f32 %v6595_v51, %v6594_v9 }
0x8503   :  { %11988 = vtanh.f32 %v6898_v22  ;;  %v7721_v44 = vmul.f32 -1.442695, %v6898_v22 }
0x8505   :  { %11990 = vpow2.f32 %v7721_v44 }
0x850d   :  { %v11989_v40 = vpop.eup %11988 }
0x850e   :  { %6908 = vrot.lane.b32.xlu0 %v11989_v40, %s12153_s8 }
0x850f   :  { %v11991_v25 = vpop.eup %11990 }
0x8510   :  { %v6902_v16 = vadd.f32 1.0, %v11991_v25 }
0x8512   :  { %11992 = vrcp.f32 %v6902_v16 }
0x851c   :  { %v11993_v53 = vpop.eup %11992 }
0x851d   :  { %v6906_v50 = vmul.f32 %v11993_v53, %v14245_v14 }
0x8580   :  { %v6909_v55 = vpop.permute.xlu0 %6908 }
0x8581   :  { %v6911_v5 = vmul.f32 %v11993_v53, %v6909_v55 }
0x8583   :  { %6913 = vrot.lane.b32.xlu1 %v6911_v5, %s12154_s2 }
0x85f5   :  { %v6914_v52 = vpop.permute.xlu1 %6913 }
0x85f6   :  { %v14248_v41 = vadd.f32 %v6914_v52, %v6906_v50 }
0x85f8   :  { %6918 = vrot.lane.b32.xlu0 %v14248_v41, %s12154_s2 }
0x866a   :  { %v6919_v62 = vpop.permute.xlu0 %6918 }
0x866b   :  { %v6921_v17 = vsel %vm472_vm3, %v6919_v62, 0.0 }
0x866c   :  { %6922 = vadd.xlane.f32.xlu1 %v6921_v17 }
0x867d   :  { %6942 = vrot.lane.b32.xlu1 %v11993_v53, %s12153_s8  ;;  %v6947_v53 = vmul.f32 0.1, %v14173_v37 }
0x86f9   :  { %v6923_v11 = vpop.xlane.xlu1 %6922 }
0x86fa   :  { %v6924_v58 = vmul.f32 0.03125, %v6923_v11 }
0x86fc   :  { %v6925_v57 = vsub.f32 %v14248_v41, %v6924_v58 }
0x86fd   :  { %v6943_v44 = vpop.permute.xlu1 %6942 }
0x86fe   :  { %v6926_v63 = vmul.f32 %v6925_v57, %v6925_v57 }
0x8700   :  { %6928 = vrot.lane.b32.xlu0 %v6926_v63, %s12154_s2 }
0x8772   :  { %v6929_v31 = vpop.permute.xlu0 %6928 }
0x8773   :  { %v6931_v43 = vsel %vm472_vm3, %v6929_v31, 0.0 }
0x8774   :  { %6932 = vadd.xlane.f32.xlu0 %v6931_v43  ;;  %v6314_v43 = vmul.f32 0.5, %v14083_v7 }
0x8801   :  { %v6933_v21 = vpop.xlane.xlu0 %6932 }
0x8802   :  { %v6934_v23 = vmul.f32 0.03125, %v6933_v21 }
0x8804   :  { %v6935_v28 = vadd.f32 0.001, %v6934_v23 }
0x8806   :  { %11994 = vrsqrt.f32 %v6935_v28 }
0x8810   :  { %v11995_v3 = vpop.eup %11994 }
0x8811   :  { %v6937_v59 = vmul.f32 %v11995_v3, %v6925_v57 }
0x8813   :  { %v6938_v12 = vmul.f32 %v6937_v59, %v12505_v38 }
0x8815   :  { %v6939_v22 = vadd.f32 %v6938_v12, %v12507_v39 }
0x8817   :  { %11996 = vtanh.f32 %v6939_v22 }
0x8821   :  { %v11997_v40 = vpop.eup %11996 }
0x8822   :  { %v6945_v25 = vmul.f32 %v11997_v40, %v6943_v44 }
0x8824   :  { %v6946_v16 = vmul.f32 0.9, %v6945_v25 }
0x8826   :  { %v14260_v55 = vadd.f32 %v6947_v53, %v6946_v16 }
0x8828   :  { %6953 = vrot.lane.b32.xlu0 %v14260_v55, %s12154_s2 }
0x889a   :  { %v6954_v5 = vpop.permute.xlu0 %6953 }
0x889b   :  { %v6956_v9 = vsel %vm472_vm3, %v6954_v5, %v14097_v42 }
0x889c   :  { %10362 = vmatmul.mubr.msk.f32.vlgmr.msra.gmra.mrb[72].mxu0 %vm230_vm2, %v6956_v9 }
0x889d   :  { %11649 = vmatpush3.bf16.msra.mxu0 %v12520_v45  ;;  %10399 = vmatprep.mubr.msk.f32.mxu0 %vm12151_vm0, %v12152_v1 }
0x889e   :  { %11650 = vmatprep.subr.bf16.mxu0 %v12150_v0 }
0x88a1   :  { %11652 = vmatpush3.bf16.msra.mxu0 %v12526_v47 }
0x88a2   :  { %11653 = vmatprep.subr.bf16.mxu0 %v12150_v0 }
0x88a5   :  { %11655 = vmatpush3.bf16.msra.mxu0 %v12536_v54 }
0x88a6   :  { %11656 = vmatprep.subr.bf16.mxu0 %v12150_v0 }
0x88a9   :  { %11658 = vmatpush3.bf16.msra.mxu0 %v12561_v61 }
0x88aa   :  { %11668 = vmatprep.subr.bf16.mxu0 %v12150_v0 }
0x896f   :  { %v7026_v38 = vpop.f32.mrb[72].mxu0 }
0x8970   :  { %v7027_v39 = vadd.f32 %v14039_v2, %v7026_v38  ;;  %v10363_v45 = vpop.f32.mrb[73].mxu0 }
0x8972   :  { %10381 = vmatmul.mubr.msk.f32.vlgmr.msra.gmra.mrb[74].mxu1 %vm589_vm4, %v7027_v39 }
0x8973   :  { %11661 = vmatpush3.bf16.msra.mxu1 %v12628_v6  ;;  %10414 = vmatprep.mubr.msk.f32.mxu1 %vm12151_vm0, %v12152_v1 }
0x8974   :  { %11662 = vmatprep.subr.bf16.mxu1 %v12150_v0 }
0x8977   :  { %11664 = vmatpush3.bf16.msra.mxu1 %v12634_v8 }
0x8978   :  { %11665 = vmatprep.subr.bf16.mxu1 %v12150_v0 }
0x897b   :  { %11667 = vmatpush3.bf16.msra.mxu1 %v12644_v13 }
0x897c   :  { %11692 = vmatprep.subr.bf16.mxu1 %v12150_v0 }
0x8a45   :  { %v7099_v47 = vpop.f32.mrb[74].mxu1 }
0x8a46   :  { %v7103_v54 = vsub.f32 %v7027_v39, %v7099_v47  ;;  %v10382_v61 = vpop.f32.mrb[75].mxu1 }
0x8a48   :  { %v7104_v2 = vmul.f32 %v7103_v54, %v7103_v54 }
0x8a4a   :  { %10400 = vmatmul.mubr.msk.f32.vlgmr.msra.gmra.mrb[74].mxu0 %vm589_vm4, %v7104_v2  ;;  %v7230_v2 = vmul.f32 0.1, %v14097_v42 }
0x8a4b   :  { %11670 = vmatpush3.bf16.msra.mxu0 %v12330_v10  ;;  %10449 = vmatprep.mubr.msk.f32.mxu0 %vm12151_vm0, %v12152_v1 }
0x8a4c   :  { %11671 = vmatprep.subr.bf16.mxu0 %v12150_v0 }
0x8a4f   :  { %11673 = vmatpush3.bf16.msra.mxu0 %v12346_v15 }
0x8a50   :  { %11674 = vmatprep.subr.bf16.mxu0 %v12150_v0 }
0x8a53   :  { %11676 = vmatpush3.bf16.msra.mxu0 %v12363_v20 }
0x8a54   :  { %11677 = vmatprep.subr.bf16.mxu0 %v12150_v0 }
0x8a57   :  { %11679 = vmatpush3.bf16.msra.mxu0 %v12376_v24 }
0x8a58   :  { %11680 = vmatprep.subr.bf16.mxu0 %v12150_v0 }
0x8a5b   :  { %11682 = vmatpush3.bf16.msra.mxu0 %v12391_v27 }
0x8a5c   :  { %11683 = vmatprep.subr.bf16.mxu0 %v12150_v0 }
0x8a5f   :  { %11685 = vmatpush3.bf16.msra.mxu0 %v12403_v30 }
0x8a60   :  { %11686 = vmatprep.subr.bf16.mxu0 %v12150_v0 }
0x8a63   :  { %11688 = vmatpush3.bf16.msra.mxu0 %v12415_v33 }
0x8a64   :  { %11689 = vmatprep.subr.bf16.mxu0 %v12150_v0 }
0x8a67   :  { %11691 = vmatpush3.bf16.msra.mxu0 %v12434_v36 }
0x8a68   :  { %11716 = vmatprep.subr.bf16.mxu0 %v12150_v0 }
0x8b1d   :  { %v7174_v6 = vpop.f32.mrb[74].mxu0 }
0x8b1e   :  { %v7175_v8 = vadd.f32 0.001, %v7174_v6  ;;  %v10401_v13 = vpop.f32.mrb[75].mxu0 }
0x8b20   :  { %11998 = vrsqrt.f32 %v7175_v8 }
0x8b2a   :  { %v11999_v37 = vpop.eup %11998 }
0x8b2b   :  { %v7179_v51 = vmul.f32 %v11999_v37, %v7103_v54 }
0x8b2d   :  { %v7180_v50 = vmul.f32 %v14070_v60, %v7179_v51  ;;  %v6315_v60 = vmul.f32 0.5, %v14080_v49 }
0x8b2f   :  { %v7181_v52 = vadd.f32 %v14073_v56, %v7180_v50  ;;  %v14312_v21 = vadd.f32 %v6315_v60, %v6314_v43 }
0x8b31   :  { %12000 = vtanh.f32 %v7181_v52  ;;  %v7725_v17 = vmul.f32 -1.442695, %v7181_v52 }
0x8b33   :  { %12002 = vpow2.f32 %v7725_v17 }
0x8b3b   :  { %v12001_v62 = vpop.eup %12000 }
0x8b3c   :  { %7191 = vrot.lane.b32.xlu1 %v12001_v62, %s12155_s11 }
0x8b3d   :  { %v12003_v11 = vpop.eup %12002 }
0x8b3e   :  { %v7185_v58 = vadd.f32 1.0, %v12003_v11  ;;  %v6949_v11 = vmul.f32 0.5, %v14248_v41  ;;  %v7233_v41 = vmul.f32 0.5, %v14312_v21 }
0x8b40   :  { %12004 = vrcp.f32 %v7185_v58 }
0x8b4a   :  { %v12005_v57 = vpop.eup %12004 }
0x8b4b   :  { %v7189_v56 = vmul.f32 %v12005_v57, %v14312_v21 }
0x8bae   :  { %v7192_v63 = vpop.permute.xlu1 %7191 }
0x8baf   :  { %v7194_v31 = vmul.f32 %v12005_v57, %v7192_v63 }
0x8bb1   :  { %7196 = vrot.lane.b32.xlu1 %v7194_v31, %s12156_s22 }
0x8c23   :  { %v7197_v23 = vpop.permute.xlu1 %7196 }
0x8c24   :  { %v14315_v28 = vadd.f32 %v7197_v23, %v7189_v56 }
0x8c26   :  { %7201 = vrot.lane.b32.xlu0 %v14315_v28, %s12153_s8  ;;  %v7232_v23 = vmul.f32 0.5, %v14315_v28 }
0x8c98   :  { %v7202_v3 = vpop.permute.xlu0 %7201 }
0x8c99   :  { %v7204_v59 = vsel %vm228_vm1, %v7202_v3, 0.0 }
0x8c9a   :  { %7205 = vadd.xlane.f32.xlu1 %v7204_v59 }
0x8cab   :  { %7225 = vrot.lane.b32.xlu1 %v12005_v57, %s12155_s11 }
0x8caf   :  { %7239 = vrot.lane.b32.xlu1 %v14260_v55, %s12157_s27 }
0x8d27   :  { %v7206_v49 = vpop.xlane.xlu1 %7205 }
0x8d28   :  { %v7207_v7 = vmul.f32 0.0625, %v7206_v49 }
0x8d2a   :  { %v7208_v12 = vsub.f32 %v14315_v28, %v7207_v7 }
0x8d2b   :  { %v7226_v47 = vpop.permute.xlu1 %7225 }
0x8d2c   :  { %v7209_v22 = vmul.f32 %v7208_v12, %v7208_v12 }
0x8d2e   :  { %7211 = vrot.lane.b32.xlu0 %v7209_v22, %s12153_s8 }
0x8d2f   :  { %v7240_v8 = vpop.permute.xlu1 %7239 }
0x8da0   :  { %v7212_v40 = vpop.permute.xlu0 %7211 }
0x8da1   :  { %v7214_v44 = vsel %vm228_vm1, %v7212_v40, 0.0 }
0x8da2   :  { %7215 = vadd.xlane.f32.xlu0 %v7214_v44 }
0x8e2f   :  { %v7216_v25 = vpop.xlane.xlu0 %7215 }
0x8e30   :  { %v7217_v16 = vmul.f32 0.0625, %v7216_v25 }
0x8e32   :  { %v7218_v53 = vadd.f32 0.001, %v7217_v16 }
0x8e34   :  { %12006 = vrsqrt.f32 %v7218_v53 }
0x8e3e   :  { %v12007_v5 = vpop.eup %12006 }
0x8e3f   :  { %v7220_v9 = vmul.f32 %v12007_v5, %v7208_v12 }
0x8e41   :  { %v7221_v38 = vmul.f32 %v7220_v9, %v12649_v29 }
0x8e43   :  { %v7222_v39 = vadd.f32 %v7221_v38, %v12652_v32 }
0x8e45   :  { %12008 = vtanh.f32 %v7222_v39 }
0x8e4f   :  { %v12009_v45 = vpop.eup %12008 }
0x8e50   :  { %v7228_v54 = vmul.f32 %v12009_v45, %v7226_v47 }
0x8e52   :  { %v7229_v61 = vmul.f32 0.9, %v7228_v54 }
0x8e54   :  { %v7231_v6 = vadd.f32 %v7230_v2, %v7229_v61  ;;  %v7510_v61 = vmul.f32 0.1, %v14260_v55 }
0x8e56   :  { %7236 = vrot.lane.b32.xlu0 %v7231_v6, %s12153_s8 }
0x8ec8   :  { %v7237_v13 = vpop.permute.xlu0 %7236 }
0x8ec9   :  { %v7242_v37 = vsel %vm228_vm1, %v7237_v13, %v7240_v8  ;;  %7599 = vst.msk [vmem:[%s14412_s17] sm:$0xff] %vm228_vm1, %v7237_v13 }
0x8eca   :  { %10415 = vmatmul.mubr.msk.f32.vlgmr.msra.gmra.mrb[76].mxu1 %vm230_vm2, %v7242_v37 }
0x8ecb   :  { %11694 = vmatpush3.bf16.msra.mxu1 %v12330_v10  ;;  %10484 = vmatprep.mubr.msk.f32.mxu1 %vm12151_vm0, %v12152_v1 }
0x8ecc   :  { %11695 = vmatprep.subr.bf16.mxu1 %v12150_v0 }
0x8ecf   :  { %11697 = vmatpush3.bf16.msra.mxu1 %v12346_v15 }
0x8ed0   :  { %11698 = vmatprep.subr.bf16.mxu1 %v12150_v0 }
0x8ed3   :  { %11700 = vmatpush3.bf16.msra.mxu1 %v12363_v20 }
0x8ed4   :  { %11701 = vmatprep.subr.bf16.mxu1 %v12150_v0 }
0x8ed7   :  { %11703 = vmatpush3.bf16.msra.mxu1 %v12376_v24 }
0x8ed8   :  { %11704 = vmatprep.subr.bf16.mxu1 %v12150_v0 }
0x8edb   :  { %11706 = vmatpush3.bf16.msra.mxu1 %v12391_v27 }
0x8edc   :  { %11707 = vmatprep.subr.bf16.mxu1 %v12150_v0 }
0x8edf   :  { %11709 = vmatpush3.bf16.msra.mxu1 %v12403_v30 }
0x8ee0   :  { %11710 = vmatprep.subr.bf16.mxu1 %v12150_v0 }
0x8ee3   :  { %11712 = vmatpush3.bf16.msra.mxu1 %v12415_v33 }
0x8ee4   :  { %11713 = vmatprep.subr.bf16.mxu1 %v12150_v0 }
0x8ee7   :  { %11715 = vmatpush3.bf16.msra.mxu1 %v12434_v36 }
0x8f9d   :  { %v7312_v10 = vpop.f32.mrb[76].mxu1 }
0x8f9e   :  { %v7313_v15 = vadd.f32 %v14121_v34, %v7312_v10  ;;  %v10416_v20 = vpop.f32.mrb[77].mxu1 }
0x8fa0   :  { %10450 = vmatmul.mubr.f32.vlgmr.msra.gmra.mrb[76].mxu0 %v7313_v15 }
0x8fa1   :  { %11718 = vmatpush3.bf16.msra.mxu0 %v12734_v19  ;;  %10495 = vmatprep.mubr.msk.f32.mxu0 %vm12151_vm0, %v12152_v1 }
0x8fa2   :  { %11719 = vmatprep.subr.bf16.mxu0 %v12150_v0 }
0x8fa5   :  { %11721 = vmatpush3.bf16.msra.mxu0 %v12740_v26 }
0x9073   :  { %v7382_v24 = vpop.f32.mrb[76].mxu0 }
0x9074   :  { %v7386_v27 = vsub.f32 %v7313_v15, %v7382_v24  ;;  %v10451_v30 = vpop.f32.mrb[77].mxu0 }
0x9076   :  { %v7387_v33 = vmul.f32 %v7386_v27, %v7386_v27 }
0x9078   :  { %10485 = vmatmul.mubr.f32.vlgmr.msra.gmra.mrb[78].mxu1 %v7387_v33 }
0x914b   :  { %v7454_v36 = vpop.f32.mrb[78].mxu1 }
0x914c   :  { %v7455_v29 = vadd.f32 0.001, %v7454_v36  ;;  %v10486_v32 = vpop.f32.mrb[79].mxu1 }
0x914e   :  { %12010 = vrsqrt.f32 %v7455_v29 }
0x9158   :  { %v12011_v42 = vpop.eup %12010 }
0x9159   :  { %v7459_v34 = vmul.f32 %v12011_v42, %v7386_v27 }
0x915b   :  { %v7460_v19 = vmul.f32 %v14148_v4, %v7459_v34  ;;  %v6950_v4 = vmul.f32 0.5, %v14245_v14  ;;  %v7234_v14 = vadd.f32 %v7233_v41, %v7232_v23 }
0x915d   :  { %v7461_v51 = vadd.f32 %v14151_v35, %v7460_v19  ;;  %v6951_v58 = vadd.f32 %v6950_v4, %v6949_v11 }
0x915f   :  { %12012 = vtanh.f32 %v7461_v51  ;;  %v7727_v0 = vmul.f32 -1.442695, %v7461_v51  ;;  %v7513_v56 = vmul.f32 0.5, %v6951_v58 }
0x9161   :  { %12014 = vpow2.f32 %v7727_v0 }
0x9169   :  { %v12013_v1 = vpop.eup %12012 }
0x916a   :  { %7471 = vrot.lane.b32.xlu1 %v12013_v1, %s12153_s8 }
0x916b   :  { %v12015_v26 = vpop.eup %12014 }
0x916c   :  { %v7465_v50 = vadd.f32 1.0, %v12015_v26 }
0x916e   :  { %12016 = vrcp.f32 %v7465_v50 }
0x9178   :  { %v12017_v52 = vpop.eup %12016 }
0x9179   :  { %v7469_v35 = vmul.f32 %v12017_v52, %v6951_v58 }
0x91dc   :  { %v7472_v62 = vpop.permute.xlu1 %7471 }
0x91dd   :  { %v7474_v17 = vmul.f32 %v12017_v52, %v7472_v62 }
0x91df   :  { %7476 = vrot.lane.b32.xlu0 %v7474_v17, %s12154_s2 }
0x9251   :  { %v7477_v57 = vpop.permute.xlu0 %7476 }
0x9252   :  { %v7479_v63 = vadd.f32 %v7477_v57, %v7469_v35 }
0x9254   :  { %7481 = vrot.lane.b32.xlu1 %v7479_v63, %s12154_s2  ;;  %v7512_v60 = vmul.f32 0.5, %v7479_v63 }
0x9256   :  { %v7514_v3 = vadd.f32 %v7513_v56, %v7512_v60 }
0x92c6   :  { %v7482_v31 = vpop.permute.xlu1 %7481 }
0x92c7   :  { %v7484_v43 = vsel %vm472_vm3, %v7482_v31, 0.0 }
0x92c8   :  { %7485 = vadd.xlane.f32.xlu0 %v7484_v43 }
0x92de   :  { %7505 = vrot.lane.b32.xlu0 %v12017_v52, %s12153_s8 }
0x92e2   :  { %7595 = vrot.lane.b32.xlu0 %v7514_v3, %s12154_s2 }
0x92e6   :  { %7601 = vrot.lane.b32.xlu0 %v7234_v14, %s12153_s8 }
0x9355   :  { %v7486_v59 = vpop.xlane.xlu0 %7485 }
0x9356   :  { %v7487_v49 = vmul.f32 0.03125, %v7486_v59 }
0x9358   :  { %v7488_v7 = vsub.f32 %v7479_v63, %v7487_v49 }
0x9359   :  { %v7506_v12 = vpop.permute.xlu0 %7505 }
0x935a   :  { %v7489_v22 = vmul.f32 %v7488_v7, %v7488_v7 }
0x935c   :  { %7491 = vrot.lane.b32.xlu1 %v7489_v22, %s12154_s2 }
0x935d   :  { %v7596_v40 = vpop.permute.xlu0 %7595 }
0x935e   :  { %7598 = vst.msk [vmem:[%s14411_s16] sm:$0xff] %vm472_vm3, %v7596_v40 }
0x9361   :  { %v7602_v28 = vpop.permute.xlu0 %7601 }
0x9362   :  { %7604 = vst.msk [vmem:[%s14413_s18] sm:$0xff] %vm228_vm1, %v7602_v28 }
0x93ce   :  { %v7492_v21 = vpop.permute.xlu1 %7491 }
0x93cf   :  { %v7494_v44 = vsel %vm472_vm3, %v7492_v21, 0.0 }
0x93d0   :  { %7495 = vadd.xlane.f32.xlu1 %v7494_v44 }
0x945d   :  { %v7496_v25 = vpop.xlane.xlu1 %7495 }
0x945e   :  { %v7497_v16 = vmul.f32 0.03125, %v7496_v25 }
0x9460   :  { %v7498_v53 = vadd.f32 0.001, %v7497_v16 }
0x9462   :  { %12018 = vrsqrt.f32 %v7498_v53 }
0x946c   :  { %v12019_v5 = vpop.eup %12018 }
0x946d   :  { %v7500_v9 = vmul.f32 %v12019_v5, %v7488_v7 }
0x946f   :  { %v7501_v38 = vmul.f32 %v7500_v9, %v12745_v46 }
0x9471   :  { %v7502_v39 = vadd.f32 %v7501_v38, %v12747_v48 }
0x9473   :  { %12020 = vtanh.f32 %v7502_v39 }
0x947d   :  { %v12021_v45 = vpop.eup %12020 }
0x947e   :  { %v7508_v47 = vmul.f32 %v12021_v45, %v7506_v12 }
0x9480   :  { %v7509_v54 = vmul.f32 0.9, %v7508_v47 }
0x9482   :  { %v7511_v2 = vadd.f32 %v7510_v61, %v7509_v54 }
0x9484   :  { %7516 = vrot.lane.b32.xlu1 %v7511_v2, %s12154_s2 }
0x94f6   :  { %v7517_v6 = vpop.permute.xlu1 %7516 }
0x94f7   :  { %7593 = vst.msk [vmem:[%s14410_s15] sm:$0xff] %vm472_vm3, %v7517_v6  ;;  %10496 = vmatmul.mubr.msk.f32.vlgmr.msra.gmra.mrb[78].mxu0 %vm472_vm3, %v7517_v6 }
0x95ca   :  { %v7586_v46 = vpop.f32.mrb[78].mxu0 }
0x95cb   :  { %v7587_v48 = vadd.f32 %v14214_v18, %v7586_v46  ;;  %v10497_v8 = vpop.f32.mrb[79].mxu0 }
0x95cd   :  { %7729 = vst [vmem:[%s14409_s14 + $0x38] sm:$0xff] %v7587_v48 }
0x95ce   :  { %7625 = vsyncpa [#allocation3], 1 }
0x95cf   :  { %7626 = vsyncpa [#allocation5], 1 }
0x95d0   :  { %7627 = vsyncpa [#allocation8], 1 }

</bundles_post_ra>
